<compile_context>
chip_gen: v7x
topology: tpu7x:2x2x1
jax: 0.10.0
libtpu: 0.0.40
codegen_flags: <defaults>
</compile_context>

<pallas_src>
import math
from functools import partial

import jax
import jax.numpy as jnp
from jax.experimental import pallas as pl
from jax.experimental.pallas import tpu as pltpu

ACT_DTYPE = jnp.bfloat16                 # activation dtype at kernel boundary
VMEM_LIMIT = 64 * 1024 * 1024            # explicit scoped-VMEM budget


# ----------------------------------------------------------------- helpers --

def _round_up(x, m):
    return ((x + m - 1) // m) * m


def _choose_tile(dim, target, align):
    """Tile (multiple of `align`) used to cover `dim` after zero padding."""
    if dim >= target:
        return target
    return _round_up(dim, align)


def _pad_axis(x, axis, new_size):
    pad = new_size - x.shape[axis]
    if pad == 0:
        return x
    widths = [(0, 0)] * x.ndim
    widths[axis] = (0, pad)
    return jnp.pad(x, widths)


# ---------------------------------------------------- generic tiled matmul --

def _matmul_kernel(x_ref, w_ref, b_ref, *rest, activation, has_residual):
    if has_residual:
        r_ref, o_ref, acc_ref = rest
    else:
        o_ref, acc_ref = rest

    @pl.when(pl.program_id(2) == 0)
    def _():
        acc_ref[...] = jnp.zeros_like(acc_ref)

    acc_ref[...] += jnp.dot(x_ref[...], w_ref[...],
                            preferred_element_type=jnp.float32)

    @pl.when(pl.program_id(2) == pl.num_programs(2) - 1)
    def _():
        y = acc_ref[...] + b_ref[...].astype(jnp.float32)
        if activation == "silu":
            y = y * jax.nn.sigmoid(y)
        elif activation == "gelu":
            # TODO(synk): PyTorch nn.GELU default is exact erf; tanh approx used.
            y = jax.nn.gelu(y)
        if has_residual:
            y = y + r_ref[...].astype(jnp.float32)
        o_ref[...] = y.astype(o_ref.dtype)


def pallas_matmul(x, w, b, *, activation=None, residual=None, out_dtype=None,
                  tm=512, tn=512, tk=512):
    """y = act(x @ w + b) [+ residual]; bf16 operands, f32 accumulation."""
    M, K = x.shape
    K2, N = w.shape
    assert K == K2
    out_dtype = out_dtype or ACT_DTYPE

    tm = _choose_tile(M, tm, 16)
    tn = _choose_tile(N, tn, 128)
    tk = _choose_tile(K, tk, 128)
    Mp, Np, Kp = _round_up(M, tm), _round_up(N, tn), _round_up(K, tk)

    xp = _pad_axis(_pad_axis(x.astype(ACT_DTYPE), 0, Mp), 1, Kp)
    wp = _pad_axis(_pad_axis(w.astype(ACT_DTYPE), 0, Kp), 1, Np)
    bp = _pad_axis(jnp.asarray(b, jnp.float32).reshape(1, N), 1, Np)

    in_specs = [pl.BlockSpec((tm, tk), lambda i, j, k: (i, k)),
                pl.BlockSpec((tk, tn), lambda i, j, k: (k, j)),
                pl.BlockSpec((1, tn), lambda i, j, k: (0, j))]
    operands = [xp, wp, bp]
    if residual is not None:
        rp = _pad_axis(_pad_axis(residual.astype(ACT_DTYPE), 0, Mp), 1, Np)
        in_specs.append(pl.BlockSpec((tm, tn), lambda i, j, k: (i, j)))
        operands.append(rp)

    out = pl.pallas_call(
        partial(_matmul_kernel, activation=activation,
                has_residual=residual is not None),
        out_shape=jax.ShapeDtypeStruct((Mp, Np), out_dtype),
        grid=(Mp // tm, Np // tn, Kp // tk),
        in_specs=in_specs,
        out_specs=pl.BlockSpec((tm, tn), lambda i, j, k: (i, j)),
        scratch_shapes=[pltpu.VMEM((tm, tn), jnp.float32)],
        compiler_params=pltpu.CompilerParams(
            dimension_semantics=("parallel", "parallel", "arbitrary"),
            vmem_limit_bytes=VMEM_LIMIT),
    )(*operands)
    if (Mp, Np) != (M, N):
        out = out[:M, :N]
    return out


# ----------------------- fused (LayerNorm [+FiLM/affine]) -> matmul kernel --

def _ln_matmul_kernel(x_ref, mul_ref, add_ref, w_ref, b_ref, o_ref,
                      *, eps, activation):
    x = x_ref[0].astype(jnp.float32)                       # (tl, D)
    mu = jnp.mean(x, axis=-1, keepdims=True)
    xc = x - mu
    var = jnp.mean(xc * xc, axis=-1, keepdims=True)
    y = xc * jax.lax.rsqrt(var + eps)
    y = y * mul_ref[0].astype(jnp.float32) + add_ref[0].astype(jnp.float32)
    out = jnp.dot(y.astype(w_ref.dtype), w_ref[...],
                  preferred_element_type=jnp.float32)
    out = out + b_ref[...].astype(jnp.float32)
    if activation == "silu":
        out = out * jax.nn.sigmoid(out)
    elif activation == "gelu":
        # TODO(synk): tanh-approx GELU vs PyTorch's exact erf.
        out = jax.nn.gelu(out)
    o_ref[0] = out.astype(o_ref.dtype)


def pallas_ln_matmul(x, mult, add, w, b, *, activation=None, out_dtype=None,
                     tl=512, tn=512, eps=1e-5):
    """out[b,l,:] = act( (LN(x[b,l,:]) * mult[b] + add[b]) @ w + b ).

    Covers both FiLM conditioning (mult = 1+scale, add = shift, per-batch)
    and an ordinary affine LayerNorm (mult = gamma, add = beta).
    """
    B, L, D = x.shape
    N = w.shape[1]
    out_dtype = out_dtype or ACT_DTYPE
    tl = _choose_tile(L, tl, 16)
    tn = _choose_tile(N, tn, 128)
    Lp, Np = _round_up(L, tl), _round_up(N, tn)

    xp = _pad_axis(x.astype(ACT_DTYPE), 1, Lp)
    wp = _pad_axis(w.astype(ACT_DTYPE), 1, Np)
    bp = _pad_axis(jnp.asarray(b, jnp.float32).reshape(1, N), 1, Np)
    mul3 = jnp.broadcast_to(
        jnp.asarray(mult, jnp.float32).reshape(-1, 1, D), (B, 1, D))
    add3 = jnp.broadcast_to(
        jnp.asarray(add, jnp.float32).reshape(-1, 1, D), (B, 1, D))

    out = pl.pallas_call(
        partial(_ln_matmul_kernel, eps=eps, activation=activation),
        out_shape=jax.ShapeDtypeStruct((B, Lp, Np), out_dtype),
        grid=(B, Lp // tl, Np // tn),
        in_specs=[pl.BlockSpec((1, tl, D), lambda b, i, j: (b, i, 0)),
                  pl.BlockSpec((1, 1, D), lambda b, i, j: (b, 0, 0)),
                  pl.BlockSpec((1, 1, D), lambda b, i, j: (b, 0, 0)),
                  pl.BlockSpec((D, tn), lambda b, i, j: (0, j)),
                  pl.BlockSpec((1, tn), lambda b, i, j: (0, j))],
        out_specs=pl.BlockSpec((1, tl, tn), lambda b, i, j: (b, i, j)),
        compiler_params=pltpu.CompilerParams(
            dimension_semantics=("parallel", "parallel", "parallel"),
            vmem_limit_bytes=VMEM_LIMIT),
    )(xp, mul3, add3, wp, bp)
    if (Lp, Np) != (L, N):
        out = out[:, :L, :N]
    return out


# ----------------------------- flash attention on packed (head-merged) QKV --

def _attention_kernel(q_ref, kv_ref, bias_ref, o_ref, m_sc, l_sc, acc_sc,
                      *, heads, dh, k_start, v_start, scale):
    kv_step = pl.program_id(2)

    @pl.when(kv_step == 0)
    def _():
        m_sc[...] = jnp.full_like(m_sc, -1e30)
        l_sc[...] = jnp.zeros_like(l_sc)
        acc_sc[...] = jnp.zeros_like(acc_sc)

    bias = bias_ref[0]                                     # (1, tkv) additive

    for h in range(heads):
        q_h = q_ref[0, :, pl.ds(h * dh, dh)] * scale       # (tq, dh) bf16
        k_h = kv_ref[0, :, pl.ds(k_start + h * dh, dh)]    # (tkv, dh)
        v_h = kv_ref[0, :, pl.ds(v_start + h * dh, dh)]    # (tkv, dh)

        # q @ k^T, contracting the head dim directly (no transpose op).
        s = jax.lax.dot_general(q_h, k_h, (((1,), (1,)), ((), ())),
                                preferred_element_type=jnp.float32)
        s = s + bias                                       # masked keys -> -1e30
        # NOTE: fully-masked query rows reduce to a uniform average over the
        # (masked/padded) key positions, as in the previous implementation.

        m_prev = m_sc[h]                                   # (tq, 1)
        m_new = jnp.maximum(m_prev, jnp.max(s, axis=-1, keepdims=True))
        alpha = jnp.exp(m_prev - m_new)
        p = jnp.exp(s - m_new)
        l_sc[h] = alpha * l_sc[h] + jnp.sum(p, axis=-1, keepdims=True)
        pv = jnp.dot(p.astype(kv_ref.dtype), v_h,
                     preferred_element_type=jnp.float32)   # (tq, dh)
        acc_sc[h] = alpha * acc_sc[h] + pv
        m_sc[h] = m_new

    @pl.when(kv_step == pl.num_programs(2) - 1)
    def _():
        for h in range(heads):
            inv_l = pl.reciprocal(l_sc[h], approx=True)
            o_ref[0, :, pl.ds(h * dh, dh)] = (acc_sc[h] * inv_l
                                              ).astype(o_ref.dtype)


def pallas_attention(q_packed, kv_packed, key_mask, *, heads, dim,
                     k_start, v_start, tq=512, tkv=512):
    """q_packed: (B, Lq, Wq) with Q in channels [0, dim);
    kv_packed: (B, Lk, Wkv) with K at k_start and V at v_start.
    Output is head-merged (B, Lq, dim)."""
    assert dim % heads == 0
    B, Lq, _ = q_packed.shape
    _, Lk, _ = kv_packed.shape
    dh = dim // heads
    if key_mask is None:
        key_mask = jnp.ones((B, Lk), dtype=bool)

    tq = _choose_tile(Lq, tq, 16)
    tkv = _choose_tile(Lk, tkv, 128)
    Lqp, Lkp = _round_up(Lq, tq), _round_up(Lk, tkv)

    qp = _pad_axis(q_packed.astype(ACT_DTYPE), 1, Lqp)
    kvp = _pad_axis(kv_packed.astype(ACT_DTYPE), 1, Lkp)
    maskp = _pad_axis(key_mask, 1, Lkp)                    # pads with False
    bias = ((maskp.astype(jnp.float32) - 1.0) * 1e30).reshape(B, 1, Lkp)

    out = pl.pallas_call(
        partial(_attention_kernel, heads=heads, dh=dh, k_start=k_start,
                v_start=v_start, scale=1.0 / math.sqrt(dh)),
        out_shape=jax.ShapeDtypeStruct((B, Lqp, dim), ACT_DTYPE),
        grid=(Lqp // tq, B, Lkp // tkv),
        in_specs=[pl.BlockSpec((1, tq, qp.shape[2]), lambda i, b, j: (b, i, 0)),
                  pl.BlockSpec((1, tkv, kvp.shape[2]), lambda i, b, j: (b, j, 0)),
                  pl.BlockSpec((1, 1, tkv), lambda i, b, j: (b, 0, j))],
        out_specs=pl.BlockSpec((1, tq, dim), lambda i, b, j: (b, i, 0)),
        scratch_shapes=[pltpu.VMEM((heads, tq, 1), jnp.float32),
                        pltpu.VMEM((heads, tq, 1), jnp.float32),
                        pltpu.VMEM((heads, tq, dh), jnp.float32)],
        compiler_params=pltpu.CompilerParams(
            dimension_semantics=("parallel", "parallel", "arbitrary"),
            vmem_limit_bytes=VMEM_LIMIT),
    )(qp, kvp, bias)
    if Lqp != Lq:
        out = out[:, :Lq]
    return out


# ------------------- fused final LayerNorm + ConvRMSNorm + SiLU + 1x1 conv --

def _final_conv_kernel(x_ref, lg_ref, lb_ref, rg_ref, w_ref, b_ref, o_ref,
                       *, eps_ln, rms_scale, eps_rms):
    x = x_ref[...].astype(jnp.float32)                     # (tm, D)
    mu = jnp.mean(x, axis=-1, keepdims=True)
    xc = x - mu
    var = jnp.mean(xc * xc, axis=-1, keepdims=True)
    y = xc * jax.lax.rsqrt(var + eps_ln)
    y = y * lg_ref[...].astype(jnp.float32) + lb_ref[...].astype(jnp.float32)
    # TODO(synk): ConvRMSNorm source not provided; F.normalize * sqrt(D) * g assumed.
    nrm = jnp.sqrt(jnp.sum(y * y, axis=-1, keepdims=True))
    z = y / jnp.maximum(nrm, eps_rms) * rg_ref[...].astype(jnp.float32) * rms_scale
    z = z * jax.nn.sigmoid(z)                              # SiLU
    out = jnp.dot(z.astype(w_ref.dtype), w_ref[...],
                  preferred_element_type=jnp.float32)
    out = out + b_ref[...].astype(jnp.float32)
    o_ref[...] = out.astype(o_ref.dtype)


def pallas_final_conv(x, ln_g, ln_b, rms_g, w, b, *, tm=512):
    M, D = x.shape
    N = w.shape[1]
    tm = _choose_tile(M, tm, 16)
    Mp = _round_up(M, tm)
    Np = _round_up(N, 128)            # lane-dense output stores, sliced after
    xp = _pad_axis(x.astype(ACT_DTYPE), 0, Mp)
    wp = _pad_axis(w.astype(ACT_DTYPE), 1, Np)
    bp = _pad_axis(jnp.asarray(b, jnp.float32).reshape(1, N), 1, Np)
    lg = jnp.asarray(ln_g, jnp.float32).reshape(1, D)
    lb = jnp.asarray(ln_b, jnp.float32).reshape(1, D)
    rg = jnp.asarray(rms_g, jnp.float32).reshape(1, D)

    out = pl.pallas_call(
        partial(_final_conv_kernel, eps_ln=1e-5, rms_scale=math.sqrt(D),
                eps_rms=1e-12),
        out_shape=jax.ShapeDtypeStruct((Mp, Np), jnp.float32),
        grid=(Mp // tm,),
        in_specs=[pl.BlockSpec((tm, D), lambda i: (i, 0)),
                  pl.BlockSpec((1, D), lambda i: (0, 0)),
                  pl.BlockSpec((1, D), lambda i: (0, 0)),
                  pl.BlockSpec((1, D), lambda i: (0, 0)),
                  pl.BlockSpec((D, Np), lambda i: (0, 0)),
                  pl.BlockSpec((1, Np), lambda i: (0, 0))],
        out_specs=pl.BlockSpec((tm, Np), lambda i: (i, 0)),
        compiler_params=pltpu.CompilerParams(
            dimension_semantics=("parallel",),
            vmem_limit_bytes=VMEM_LIMIT),
    )(xp, lg, lb, rg, wp, bp)
    return out[:M, :N]


# --------------------------------------------------------------- plain glue --

def sinusoidal_pos_emb(x, dim):
    half = dim // 2
    emb = math.log(10000) / (half - 1)
    emb = jnp.exp(jnp.arange(half, dtype=jnp.float32) * -emb)
    emb = x[:, None] * emb[None, :]
    return jnp.concatenate([jnp.sin(emb), jnp.cos(emb)], axis=-1)


def masked_mean(t, mask):
    if mask is None:
        return jnp.mean(t, axis=1)
    denom = jnp.sum(mask.astype(t.dtype), axis=1, keepdims=True)
    masked_t = jnp.where(mask[:, :, None], t, 0.0)
    return jnp.sum(masked_t, axis=1) / jnp.maximum(denom, 1e-5)


def _layernorm_jnp(x, g, b, eps=1e-5):
    mu = jnp.mean(x, axis=-1, keepdims=True)
    var = jnp.mean((x - mu) ** 2, axis=-1, keepdims=True)
    return (x - mu) * jax.lax.rsqrt(var + eps) * g + b


# ------------------------------------------------------------- transformer --

# TODO(synk): ConditionableTransformer source was not provided; implemented as a
# standard pre-LN transformer with FiLM time conditioning, masked self-attention,
# masked cross-attention to the text context and a GELU feed-forward
# (dropout=0.0, position_aware_cross_attention=False, inpainting off).
def conditionable_transformer(x, context, context_mask, t, audio_mask, p, heads):
    B, L, D = x.shape
    N = context.shape[1]
    tc = jax.nn.silu(t)                                    # (B, 2D) f32

    # FiLM projections for every layer hoisted into one tiny XLA matmul (M=B).
    film_all = (jnp.dot(tc, p["w_time_all"].astype(jnp.float32))
                + p["b_time_all"])

    ctx2d = context.astype(ACT_DTYPE).reshape(B * N, -1)

    for li, lp in enumerate(p["layers"]):
        film = film_all[:, li * 4 * D:(li + 1) * 4 * D]
        s1, sh1, s2, sh2 = jnp.split(film, 4, axis=-1)

        # --- self attention: fused LN+FiLM+QKV matmul, packed heads ---
        qkv = pallas_ln_matmul(x, 1.0 + s1, sh1, lp["wqkv"], lp["bqkv"])
        attn = pallas_attention(qkv, qkv, audio_mask, heads=heads, dim=D,
                                k_start=D, v_start=2 * D)          # (B, L, D)
        x2d = x.reshape(B * L, D)
        x = pallas_matmul(attn.reshape(B * L, D), lp["wo"], lp["bo"],
                          residual=x2d).reshape(B, L, D)

        # --- cross attention to the text context ---
        qc = pallas_ln_matmul(x, lp["x_ln_g"], lp["x_ln_b"],
                              lp["wq_c"], lp["bq_c"])              # (B, L, D)
        kvc = pallas_matmul(ctx2d, lp["wkv_c"], lp["bkv_c"]
                            ).reshape(B, N, 2 * D)                 # packed K|V
        attn = pallas_attention(qc, kvc, context_mask, heads=heads, dim=D,
                                k_start=0, v_start=D)
        x2d = x.reshape(B * L, D)
        x = pallas_matmul(attn.reshape(B * L, D), lp["wo_c"], lp["bo_c"],
                          residual=x2d).reshape(B, L, D)

        # --- feed forward: fused LN+FiLM+matmul+GELU, fused residual ---
        ff = pallas_ln_matmul(x, 1.0 + s2, sh2, lp["ff_w1"], lp["ff_b1"],
                              activation="gelu")                   # (B, L, 4D)
        x2d = x.reshape(B * L, D)
        x = pallas_matmul(ff.reshape(B * L, 4 * D), lp["ff_w2"], lp["ff_b2"],
                          residual=x2d).reshape(B, L, D)

    return x        # final LayerNorm is fused into the output conv kernel


# ------------------------------------------------------------------ wrapper --

def transformer_wrapper_forward(params, x, time_cond, text_cond,
                                text_cond_mask=None, audio_mask=None,
                                *, dim, heads):
    B, C, L = x.shape
    if audio_mask is None:
        audio_mask = jnp.ones((B, L), dtype=bool)

    # init_conv: 1x1 Conv1d == channel matmul.  (b c l) -> (b l c)
    x_blc = jnp.transpose(x, (0, 2, 1)).reshape(B * L, C)
    h = pallas_matmul(x_blc, params["init_conv_w"],
                      params["init_conv_b"]).reshape(B, L, dim)
    # TODO(synk): inpainting_embedding branch skipped (inpainting_embedding=False).

    # Tiny conditioning paths (M = batch): plain XLA per review feedback.
    mean_pooled = masked_mean(text_cond.astype(jnp.float32), text_cond_mask)
    txt = _layernorm_jnp(mean_pooled, params["txt_ln_g"], params["txt_ln_b"])
    txt = jax.nn.silu(jnp.dot(txt, params["txt_w1"].astype(jnp.float32))
                      + params["txt_b1"])
    text_mean_cond = (jnp.dot(txt, params["txt_w2"].astype(jnp.float32))
                      + params["txt_b2"])

    fourier = sinusoidal_pos_emb(time_cond.astype(jnp.float32) * 1000.0, dim)
    t = jax.nn.silu(jnp.dot(fourier, params["time_w1"].astype(jnp.float32))
                    + params["time_b1"])
    t = jnp.dot(t, params["time_w2"].astype(jnp.float32)) + params["time_b2"]
    t = t + text_mean_cond

    # transformer over (b l c)
    h = conditionable_transformer(h, text_cond, text_cond_mask, t, audio_mask,
                                  params, heads)

    # final: LN -> ConvRMSNorm -> SiLU -> zero-init 1x1 Conv1d (one fused kernel)
    out = pallas_final_conv(h.reshape(B * L, dim), params["final_ln_g"],
                            params["final_ln_b"], params["rms_g"],
                            params["out_conv_w"], params["out_conv_b"])
    out = out.reshape(B, L, C)
    return jnp.transpose(out, (0, 2, 1))                  # back to (B, C, L)


# -------------------------------------------------------------------- params --

def init_params(key, *, dim, text_dim, channels, num_layers):
    time_dim = dim * 2
    keys = iter(jax.random.split(key, 256))
    wdt = jnp.bfloat16

    def lin(k, din, dout, std=0.02):
        w = (jax.random.normal(k, (din, dout), jnp.float32) * std).astype(wdt)
        return w, jnp.zeros((dout,), jnp.float32)

    p = {}
    p["init_conv_w"], p["init_conv_b"] = lin(next(keys), channels, dim)
    p["time_w1"], p["time_b1"] = lin(next(keys), dim, time_dim)
    p["time_w2"], p["time_b2"] = lin(next(keys), time_dim, time_dim)
    p["txt_ln_g"] = jnp.ones((text_dim,), jnp.float32)
    p["txt_ln_b"] = jnp.zeros((text_dim,), jnp.float32)
    p["txt_w1"], p["txt_b1"] = lin(next(keys), text_dim, time_dim)
    p["txt_w2"], p["txt_b2"] = lin(next(keys), time_dim, time_dim)

    layers, w_times, b_times = [], [], []
    for _ in range(num_layers):
        lp = {}
        wt, bt = lin(next(keys), time_dim, 4 * dim)
        w_times.append(wt); b_times.append(bt)
        lp["wqkv"], lp["bqkv"] = lin(next(keys), dim, 3 * dim)        # Q|K|V
        lp["wo"], lp["bo"] = lin(next(keys), dim, dim)
        lp["x_ln_g"] = jnp.ones((dim,), jnp.float32)
        lp["x_ln_b"] = jnp.zeros((dim,), jnp.float32)
        lp["wq_c"], lp["bq_c"] = lin(next(keys), dim, dim)
        lp["wkv_c"], lp["bkv_c"] = lin(next(keys), text_dim, 2 * dim)  # K|V
        lp["wo_c"], lp["bo_c"] = lin(next(keys), dim, dim)
        lp["ff_w1"], lp["ff_b1"] = lin(next(keys), dim, 4 * dim)
        lp["ff_w2"], lp["ff_b2"] = lin(next(keys), 4 * dim, dim)
        layers.append(lp)
    p["layers"] = layers
    # hoisted FiLM projection: one (time_dim, num_layers*4*dim) weight
    p["w_time_all"] = jnp.concatenate(w_times, axis=1)
    p["b_time_all"] = jnp.concatenate(b_times, axis=0)

    p["final_ln_g"] = jnp.ones((dim,), jnp.float32)
    p["final_ln_b"] = jnp.zeros((dim,), jnp.float32)
    p["rms_g"] = jnp.ones((dim,), jnp.float32)
    # zero_init_ on the final conv
    p["out_conv_w"] = jnp.zeros((dim, channels), wdt)
    p["out_conv_b"] = jnp.zeros((channels,), jnp.float32)
    return p


# ---------------------------------------------------------------------- main --

if __name__ == "__main__":
    B, channels, L = 2, 8, 16          # audio: (batch, channels, length)
    dim, text_dim, N = 32, 16, 8       # model dim, text dim, text length
    num_layers, heads = 2, 4

    key = jax.random.PRNGKey(0)
    kx, kt, kc, kp = jax.random.split(key, 4)
    x = jax.random.normal(kx, (B, channels, L), jnp.float32)
    time_cond = jax.random.uniform(kt, (B,), jnp.float32)
    text_cond = jax.random.normal(kc, (B, N, text_dim), jnp.float32)
    text_cond_mask = jnp.array([[True] * 6 + [False] * 2,
                                [True] * 4 + [False] * 4])

    params = init_params(kp, dim=dim, text_dim=text_dim,
                         channels=channels, num_layers=num_layers)

    fwd = jax.jit(partial(transformer_wrapper_forward, dim=dim, heads=heads))
    out = fwd(params, x, time_cond, text_cond, text_cond_mask, None)
    out = jax.block_until_ready(out)
    assert out.shape == (B, channels, L), out.shape
    assert jnp.all(jnp.isfinite(out))
    print("KERNEL_OK")
</pallas_src>

<mosaic_0001>
module attributes {stable_mosaic.version = 11 : i64} {
  func.func @_matmul_kernel(%arg0: i32, %arg1: i32, %arg2: i32, %arg3: memref<32x128xbf16, #tpu.memory_space<vmem>>, %arg4: memref<128x128xbf16, #tpu.memory_space<vmem>>, %arg5: memref<1x128xf32, #tpu.memory_space<vmem>>, %arg6: memref<32x128xbf16, #tpu.memory_space<vmem>>, %arg7: memref<32x128xf32, #tpu.memory_space<vmem>>) attributes {dimension_semantics = [#tpu.dimension_semantics<parallel>, #tpu.dimension_semantics<parallel>, #tpu.dimension_semantics<arbitrary>], iteration_bounds = array<i64: 1, 1, 1>, scalar_prefetch = 0 : i64, scratch_operands = 1 : i64, tpu.core_type = #tpu.core_type<tc>, window_params = [{transform_indices = @transform_0, window_bounds = array<i64: 32, 128>}, {transform_indices = @transform_1, window_bounds = array<i64: 128, 128>}, {transform_indices = @transform_2, window_bounds = array<i64: 1, 128>}, {transform_indices = @transform_3, window_bounds = array<i64: 32, 128>}]} {
    %c0_i32 = arith.constant 0 : i32
    %0 = arith.cmpi eq, %arg2, %c0_i32 : i32
    %1 = arith.extui %0 : i1 to i32
    %c0_i32_0 = arith.constant 0 : i32
    %2 = arith.cmpi ne, %1, %c0_i32_0 : i32
    scf.if %2 {
      %cst_10 = arith.constant 0.000000e+00 : f32
      %12 = vector.broadcast %cst_10 : f32 to vector<32x128xf32>
      %c0_11 = arith.constant 0 : index
      %c0_12 = arith.constant 0 : index
      %13 = vector.load %arg7[%c0_11, %c0_12] : memref<32x128xf32, #tpu.memory_space<vmem>>, vector<32x128xf32>
      tpu.vector_store %arg7[%c0_11, %c0_12], %12 {strides = array<i32>} : memref<32x128xf32, #tpu.memory_space<vmem>>, vector<32x128xf32>,
    } else {
    }
    %c0 = arith.constant 0 : index
    %c0_1 = arith.constant 0 : index
    %3 = vector.load %arg7[%c0, %c0_1] : memref<32x128xf32, #tpu.memory_space<vmem>>, vector<32x128xf32>
    %c0_2 = arith.constant 0 : index
    %c0_3 = arith.constant 0 : index
    %4 = vector.load %arg3[%c0_2, %c0_3] : memref<32x128xbf16, #tpu.memory_space<vmem>>, vector<32x128xbf16>
    %c0_4 = arith.constant 0 : index
    %c0_5 = arith.constant 0 : index
    %5 = vector.load %arg4[%c0_4, %c0_5] : memref<128x128xbf16, #tpu.memory_space<vmem>>, vector<128x128xbf16>
    %cst = arith.constant dense<0.000000e+00> : vector<32x128xf32>
    %6 = tpu.matmul %4, %5, %cst {dimension_numbers = #tpu.dot_dimension_numbers<[1], [0], [0], [1], [0, 0, 1, 1], [], []>} : vector<32x128xbf16>, vector<128x128xbf16>, vector<32x128xf32> -> vector<32x128xf32>
    %7 = arith.addf %3, %6 : vector<32x128xf32>
    %c0_6 = arith.constant 0 : index
    %c0_7 = arith.constant 0 : index
    %8 = vector.load %arg7[%c0_6, %c0_7] : memref<32x128xf32, #tpu.memory_space<vmem>>, vector<32x128xf32>
    tpu.vector_store %arg7[%c0_6, %c0_7], %7 {strides = array<i32>} : memref<32x128xf32, #tpu.memory_space<vmem>>, vector<32x128xf32>,
    %c0_i32_8 = arith.constant 0 : i32
    %9 = arith.cmpi eq, %arg2, %c0_i32_8 : i32
    %10 = arith.extui %9 : i1 to i32
    %c0_i32_9 = arith.constant 0 : i32
    %11 = arith.cmpi ne, %10, %c0_i32_9 : i32
    scf.if %11 {
      %c0_10 = arith.constant 0 : index
      %c0_11 = arith.constant 0 : index
      %12 = vector.load %arg7[%c0_10, %c0_11] : memref<32x128xf32, #tpu.memory_space<vmem>>, vector<32x128xf32>
      %c0_12 = arith.constant 0 : index
      %c0_13 = arith.constant 0 : index
      %13 = vector.load %arg5[%c0_12, %c0_13] : memref<1x128xf32, #tpu.memory_space<vmem>>, vector<1x128xf32>
      %14 = vector.broadcast %13 : vector<1x128xf32> to vector<32x128xf32>
      %15 = arith.addf %12, %14 : vector<32x128xf32>
      %16 = arith.truncf %15 : vector<32x128xf32> to vector<32x128xbf16>
      %c0_14 = arith.constant 0 : index
      %c0_15 = arith.constant 0 : index
      %17 = vector.load %arg6[%c0_14, %c0_15] : memref<32x128xbf16, #tpu.memory_space<vmem>>, vector<32x128xbf16>
      tpu.vector_store %arg6[%c0_14, %c0_15], %16 {strides = array<i32>} : memref<32x128xbf16, #tpu.memory_space<vmem>>, vector<32x128xbf16>,
    } else {
    }
    return
  }
  func.func @transform_0(%arg0: i32, %arg1: i32, %arg2: i32) -> (i32, i32) {
    %c0_i32 = arith.constant 0 : i32
    return %arg0, %arg2 : i32, i32
  }
  func.func @transform_1(%arg0: i32, %arg1: i32, %arg2: i32) -> (i32, i32) {
    %c0_i32 = arith.constant 0 : i32
    return %arg2, %arg1 : i32, i32
  }
  func.func @transform_2(%arg0: i32, %arg1: i32, %arg2: i32) -> (i32, i32) {
    %c0_i32 = arith.constant 0 : i32
    %c0_i32_0 = arith.constant 0 : i32
    return %c0_i32, %arg1 : i32, i32
  }
  func.func @transform_3(%arg0: i32, %arg1: i32, %arg2: i32) -> (i32, i32) {
    %c0_i32 = arith.constant 0 : i32
    return %arg0, %arg1 : i32, i32
  }
}

module attributes {stable_mosaic.version = 11 : i64} {
  func.func @_ln_matmul_kernel(%arg0: i32, %arg1: i32, %arg2: i32, %arg3: memref<1x16x32xbf16, #tpu.memory_space<vmem>>, %arg4: memref<1x1x32xf32, #tpu.memory_space<vmem>>, %arg5: memref<1x1x32xf32, #tpu.memory_space<vmem>>, %arg6: memref<32x128xbf16, #tpu.memory_space<vmem>>, %arg7: memref<1x128xf32, #tpu.memory_space<vmem>>, %arg8: memref<1x16x128xbf16, #tpu.memory_space<vmem>>) attributes {dimension_semantics = [#tpu.dimension_semantics<parallel>, #tpu.dimension_semantics<parallel>, #tpu.dimension_semantics<parallel>], iteration_bounds = array<i64: 2, 1, 1>, scalar_prefetch = 0 : i64, scratch_operands = 0 : i64, tpu.core_type = #tpu.core_type<tc>, window_params = [{transform_indices = @transform_0, window_bounds = array<i64: 1, 16, 32>}, {transform_indices = @transform_1, window_bounds = array<i64: 1, 1, 32>}, {transform_indices = @transform_2, window_bounds = array<i64: 1, 1, 32>}, {transform_indices = @transform_3, window_bounds = array<i64: 32, 128>}, {transform_indices = @transform_4, window_bounds = array<i64: 1, 128>}, {transform_indices = @transform_5, window_bounds = array<i64: 1, 16, 128>}]} {
    %c0 = arith.constant 0 : index
    %c0_0 = arith.constant 0 : index
    %c0_1 = arith.constant 0 : index
    %0 = vector.load %arg3[%c0, %c0_0, %c0_1] : memref<1x16x32xbf16, #tpu.memory_space<vmem>>, vector<1x16x32xbf16>
    %1 = vector.shape_cast %0 : vector<1x16x32xbf16> to vector<16x32xbf16>
    %2 = arith.extf %1 : vector<16x32xbf16> to vector<16x32xf32>
    %cst = arith.constant dense<0.000000e+00> : vector<16xf32>
    %3 = vector.multi_reduction <add>, %2, %cst [1] : vector<16x32xf32> to vector<16xf32>
    %4 = vector.shape_cast %3 : vector<16xf32> to vector<16x1xf32>
    %cst_2 = arith.constant 3.200000e+01 : f32
    %5 = vector.broadcast %cst_2 : f32 to vector<16x1xf32>
    %6 = arith.divf %4, %5 : vector<16x1xf32>
    %7 = vector.broadcast %6 : vector<16x1xf32> to vector<16x32xf32>
    %8 = arith.subf %2, %7 : vector<16x32xf32>
    %9 = arith.mulf %8, %8 : vector<16x32xf32>
    %cst_3 = arith.constant dense<0.000000e+00> : vector<16xf32>
    %10 = vector.multi_reduction <add>, %9, %cst_3 [1] : vector<16x32xf32> to vector<16xf32>
    %11 = vector.shape_cast %10 : vector<16xf32> to vector<16x1xf32>
    %cst_4 = arith.constant 3.200000e+01 : f32
    %12 = vector.broadcast %cst_4 : f32 to vector<16x1xf32>
    %13 = arith.divf %11, %12 : vector<16x1xf32>
    %cst_5 = arith.constant 9.99999974E-6 : f32
    %14 = vector.broadcast %cst_5 : f32 to vector<16x1xf32>
    %15 = arith.addf %13, %14 : vector<16x1xf32>
    %16 = math.rsqrt %15 : vector<16x1xf32>
    %17 = vector.broadcast %16 : vector<16x1xf32> to vector<16x32xf32>
    %18 = arith.mulf %8, %17 : vector<16x32xf32>
    %c0_6 = arith.constant 0 : index
    %c0_7 = arith.constant 0 : index
    %c0_8 = arith.constant 0 : index
    %19 = vector.load %arg4[%c0_6, %c0_7, %c0_8] : memref<1x1x32xf32, #tpu.memory_space<vmem>>, vector<1x1x32xf32>
    %20 = vector.shape_cast %19 : vector<1x1x32xf32> to vector<1x32xf32>
    %21 = vector.broadcast %20 : vector<1x32xf32> to vector<16x32xf32>
    %22 = arith.mulf %18, %21 : vector<16x32xf32>
    %c0_9 = arith.constant 0 : index
    %c0_10 = arith.constant 0 : index
    %c0_11 = arith.constant 0 : index
    %23 = vector.load %arg5[%c0_9, %c0_10, %c0_11] : memref<1x1x32xf32, #tpu.memory_space<vmem>>, vector<1x1x32xf32>
    %24 = vector.shape_cast %23 : vector<1x1x32xf32> to vector<1x32xf32>
    %25 = vector.broadcast %24 : vector<1x32xf32> to vector<16x32xf32>
    %26 = arith.addf %22, %25 : vector<16x32xf32>
    %27 = arith.truncf %26 : vector<16x32xf32> to vector<16x32xbf16>
    %c0_12 = arith.constant 0 : index
    %c0_13 = arith.constant 0 : index
    %28 = vector.load %arg6[%c0_12, %c0_13] : memref<32x128xbf16, #tpu.memory_space<vmem>>, vector<32x128xbf16>
    %cst_14 = arith.constant dense<0.000000e+00> : vector<16x128xf32>
    %29 = tpu.matmul %27, %28, %cst_14 {dimension_numbers = #tpu.dot_dimension_numbers<[1], [0], [0], [1], [0, 0, 1, 1], [], []>} : vector<16x32xbf16>, vector<32x128xbf16>, vector<16x128xf32> -> vector<16x128xf32>
    %c0_15 = arith.constant 0 : index
    %c0_16 = arith.constant 0 : index
    %30 = vector.load %arg7[%c0_15, %c0_16] : memref<1x128xf32, #tpu.memory_space<vmem>>, vector<1x128xf32>
    %31 = vector.broadcast %30 : vector<1x128xf32> to vector<16x128xf32>
    %32 = arith.addf %29, %31 : vector<16x128xf32>
    %33 = arith.truncf %32 : vector<16x128xf32> to vector<16x128xbf16>
    %c0_17 = arith.constant 0 : index
    %c0_18 = arith.constant 0 : index
    %c0_19 = arith.constant 0 : index
    %34 = vector.load %arg8[%c0_17, %c0_18, %c0_19] : memref<1x16x128xbf16, #tpu.memory_space<vmem>>, vector<1x16x128xbf16>
    %35 = vector.shape_cast %34 : vector<1x16x128xbf16> to vector<16x128xbf16>
    %36 = vector.shape_cast %33 : vector<16x128xbf16> to vector<1x16x128xbf16>
    tpu.vector_store %arg8[%c0_17, %c0_18, %c0_19], %36 {strides = array<i32>} : memref<1x16x128xbf16, #tpu.memory_space<vmem>>, vector<1x16x128xbf16>,
    return
  }
  func.func @transform_0(%arg0: i32, %arg1: i32, %arg2: i32) -> (i32, i32, i32) {
    %c0_i32 = arith.constant 0 : i32
    %c0_i32_0 = arith.constant 0 : i32
    return %arg0, %arg1, %c0_i32 : i32, i32, i32
  }
  func.func @transform_1(%arg0: i32, %arg1: i32, %arg2: i32) -> (i32, i32, i32) {
    %c0_i32 = arith.constant 0 : i32
    %c0_i32_0 = arith.constant 0 : i32
    %c0_i32_1 = arith.constant 0 : i32
    return %arg0, %c0_i32, %c0_i32_0 : i32, i32, i32
  }
  func.func @transform_2(%arg0: i32, %arg1: i32, %arg2: i32) -> (i32, i32, i32) {
    %c0_i32 = arith.constant 0 : i32
    %c0_i32_0 = arith.constant 0 : i32
    %c0_i32_1 = arith.constant 0 : i32
    return %arg0, %c0_i32, %c0_i32_0 : i32, i32, i32
  }
  func.func @transform_3(%arg0: i32, %arg1: i32, %arg2: i32) -> (i32, i32) {
    %c0_i32 = arith.constant 0 : i32
    %c0_i32_0 = arith.constant 0 : i32
    return %c0_i32, %arg2 : i32, i32
  }
  func.func @transform_4(%arg0: i32, %arg1: i32, %arg2: i32) -> (i32, i32) {
    %c0_i32 = arith.constant 0 : i32
    %c0_i32_0 = arith.constant 0 : i32
    return %c0_i32, %arg2 : i32, i32
  }
  func.func @transform_5(%arg0: i32, %arg1: i32, %arg2: i32) -> (i32, i32, i32) {
    %c0_i32 = arith.constant 0 : i32
    return %arg0, %arg1, %arg2 : i32, i32, i32
  }
}

module attributes {stable_mosaic.version = 11 : i64} {
  func.func @_attention_kernel(%arg0: i32, %arg1: i32, %arg2: i32, %arg3: memref<1x16x96xbf16, #tpu.memory_space<vmem>>, %arg4: memref<1x128x96xbf16, #tpu.memory_space<vmem>>, %arg5: memref<1x1x128xf32, #tpu.memory_space<vmem>>, %arg6: memref<1x16x32xbf16, #tpu.memory_space<vmem>>, %arg7: memref<4x16x1xf32, #tpu.memory_space<vmem>>, %arg8: memref<4x16x1xf32, #tpu.memory_space<vmem>>, %arg9: memref<4x16x8xf32, #tpu.memory_space<vmem>>) attributes {dimension_semantics = [#tpu.dimension_semantics<parallel>, #tpu.dimension_semantics<parallel>, #tpu.dimension_semantics<arbitrary>], iteration_bounds = array<i64: 1, 2, 1>, scalar_prefetch = 0 : i64, scratch_operands = 3 : i64, tpu.core_type = #tpu.core_type<tc>, window_params = [{transform_indices = @transform_0, window_bounds = array<i64: 1, 16, 96>}, {transform_indices = @transform_1, window_bounds = array<i64: 1, 128, 96>}, {transform_indices = @transform_2, window_bounds = array<i64: 1, 1, 128>}, {transform_indices = @transform_3, window_bounds = array<i64: 1, 16, 32>}]} {
    %c0_i32 = arith.constant 0 : i32
    %0 = arith.cmpi eq, %arg2, %c0_i32 : i32
    %1 = arith.extui %0 : i1 to i32
    %c0_i32_0 = arith.constant 0 : i32
    %2 = arith.cmpi ne, %1, %c0_i32_0 : i32
    scf.if %2 {
      %cst_118 = arith.constant -1.000000e+30 : f32
      %180 = vector.broadcast %cst_118 : f32 to vector<4x16x1xf32>
      %c0_119 = arith.constant 0 : index
      %c0_120 = arith.constant 0 : index
      %c0_121 = arith.constant 0 : index
      %181 = vector.load %arg7[%c0_119, %c0_120, %c0_121] : memref<4x16x1xf32, #tpu.memory_space<vmem>>, vector<4x16x1xf32>
      tpu.vector_store %arg7[%c0_119, %c0_120, %c0_121], %180 {strides = array<i32>} : memref<4x16x1xf32, #tpu.memory_space<vmem>>, vector<4x16x1xf32>,
      %cst_122 = arith.constant 0.000000e+00 : f32
      %182 = vector.broadcast %cst_122 : f32 to vector<4x16x1xf32>
      %c0_123 = arith.constant 0 : index
      %c0_124 = arith.constant 0 : index
      %c0_125 = arith.constant 0 : index
      %183 = vector.load %arg8[%c0_123, %c0_124, %c0_125] : memref<4x16x1xf32, #tpu.memory_space<vmem>>, vector<4x16x1xf32>
      tpu.vector_store %arg8[%c0_123, %c0_124, %c0_125], %182 {strides = array<i32>} : memref<4x16x1xf32, #tpu.memory_space<vmem>>, vector<4x16x1xf32>,
      %cst_126 = arith.constant 0.000000e+00 : f32
      %184 = vector.broadcast %cst_126 : f32 to vector<4x16x8xf32>
      %c0_127 = arith.constant 0 : index
      %c0_128 = arith.constant 0 : index
      %c0_129 = arith.constant 0 : index
      %185 = vector.load %arg9[%c0_127, %c0_128, %c0_129] : memref<4x16x8xf32, #tpu.memory_space<vmem>>, vector<4x16x8xf32>
      tpu.vector_store %arg9[%c0_127, %c0_128, %c0_129], %184 {strides = array<i32>} : memref<4x16x8xf32, #tpu.memory_space<vmem>>, vector<4x16x8xf32>,
    } else {
    }
    %c0 = arith.constant 0 : index
    %c0_1 = arith.constant 0 : index
    %c0_2 = arith.constant 0 : index
    %3 = vector.load %arg5[%c0, %c0_1, %c0_2] : memref<1x1x128xf32, #tpu.memory_space<vmem>>, vector<1x1x128xf32>
    %4 = vector.shape_cast %3 : vector<1x1x128xf32> to vector<1x128xf32>
    %c0_3 = arith.constant 0 : index
    %c0_4 = arith.constant 0 : index
    %c0_5 = arith.constant 0 : index
    %5 = vector.load %arg3[%c0_3, %c0_4, %c0_5] : memref<1x16x96xbf16, #tpu.memory_space<vmem>>, vector<1x16x8xbf16>
    %6 = vector.shape_cast %5 : vector<1x16x8xbf16> to vector<16x8xbf16>
    %cst = arith.constant 3.535160e-01 : bf16
    %7 = vector.broadcast %cst : bf16 to vector<16x8xbf16>
    %8 = arith.mulf %6, %7 : vector<16x8xbf16>
    %c0_6 = arith.constant 0 : index
    %c0_7 = arith.constant 0 : index
    %c32 = arith.constant 32 : index
    %9 = vector.load %arg4[%c0_6, %c0_7, %c32] : memref<1x128x96xbf16, #tpu.memory_space<vmem>>, vector<1x128x8xbf16>
    %10 = vector.shape_cast %9 : vector<1x128x8xbf16> to vector<128x8xbf16>
    %c0_8 = arith.constant 0 : index
    %c0_9 = arith.constant 0 : index
    %c64 = arith.constant 64 : index
    %11 = vector.load %arg4[%c0_8, %c0_9, %c64] : memref<1x128x96xbf16, #tpu.memory_space<vmem>>, vector<1x128x8xbf16>
    %12 = vector.shape_cast %11 : vector<1x128x8xbf16> to vector<128x8xbf16>
    %cst_10 = arith.constant dense<0.000000e+00> : vector<16x128xf32>
    %13 = tpu.matmul %8, %10, %cst_10 {dimension_numbers = #tpu.dot_dimension_numbers<[1], [1], [0], [0], [0, 0, 1, 0], [], []>} : vector<16x8xbf16>, vector<128x8xbf16>, vector<16x128xf32> -> vector<16x128xf32>
    %14 = vector.broadcast %4 : vector<1x128xf32> to vector<16x128xf32>
    %15 = arith.addf %13, %14 : vector<16x128xf32>
    %c0_11 = arith.constant 0 : index
    %c0_12 = arith.constant 0 : index
    %c0_13 = arith.constant 0 : index
    %16 = vector.load %arg7[%c0_11, %c0_12, %c0_13] : memref<4x16x1xf32, #tpu.memory_space<vmem>>, vector<1x16x1xf32>
    %17 = vector.shape_cast %16 : vector<1x16x1xf32> to vector<16x1xf32>
    %cst_14 = arith.constant dense<0xFF800000> : vector<16xf32>
    %18 = vector.multi_reduction <maximumf>, %15, %cst_14 [1] : vector<16x128xf32> to vector<16xf32>
    %19 = vector.shape_cast %18 : vector<16xf32> to vector<16x1xf32>
    %20 = arith.maximumf %17, %19 : vector<16x1xf32>
    %21 = arith.subf %17, %20 : vector<16x1xf32>
    %22 = math.exp %21 : vector<16x1xf32>
    %23 = vector.broadcast %20 : vector<16x1xf32> to vector<16x128xf32>
    %24 = arith.subf %15, %23 : vector<16x128xf32>
    %25 = math.exp %24 : vector<16x128xf32>
    %c0_15 = arith.constant 0 : index
    %c0_16 = arith.constant 0 : index
    %c0_17 = arith.constant 0 : index
    %26 = vector.load %arg8[%c0_15, %c0_16, %c0_17] : memref<4x16x1xf32, #tpu.memory_space<vmem>>, vector<1x16x1xf32>
    %27 = vector.shape_cast %26 : vector<1x16x1xf32> to vector<16x1xf32>
    %28 = arith.mulf %22, %27 : vector<16x1xf32>
    %cst_18 = arith.constant dense<0.000000e+00> : vector<16xf32>
    %29 = vector.multi_reduction <add>, %25, %cst_18 [1] : vector<16x128xf32> to vector<16xf32>
    %30 = vector.shape_cast %29 : vector<16xf32> to vector<16x1xf32>
    %31 = arith.addf %28, %30 : vector<16x1xf32>
    %c0_19 = arith.constant 0 : index
    %c0_20 = arith.constant 0 : index
    %c0_21 = arith.constant 0 : index
    %32 = vector.load %arg8[%c0_19, %c0_20, %c0_21] : memref<4x16x1xf32, #tpu.memory_space<vmem>>, vector<1x16x1xf32>
    %33 = vector.shape_cast %32 : vector<1x16x1xf32> to vector<16x1xf32>
    %34 = vector.shape_cast %31 : vector<16x1xf32> to vector<1x16x1xf32>
    tpu.vector_store %arg8[%c0_19, %c0_20, %c0_21], %34 {strides = array<i32>} : memref<4x16x1xf32, #tpu.memory_space<vmem>>, vector<1x16x1xf32>,
    %35 = arith.truncf %25 : vector<16x128xf32> to vector<16x128xbf16>
    %cst_22 = arith.constant dense<0.000000e+00> : vector<16x8xf32>
    %36 = tpu.matmul %35, %12, %cst_22 {dimension_numbers = #tpu.dot_dimension_numbers<[1], [0], [0], [1], [0, 0, 1, 1], [], []>} : vector<16x128xbf16>, vector<128x8xbf16>, vector<16x8xf32> -> vector<16x8xf32>
    %c0_23 = arith.constant 0 : index
    %c0_24 = arith.constant 0 : index
    %c0_25 = arith.constant 0 : index
    %37 = vector.load %arg9[%c0_23, %c0_24, %c0_25] : memref<4x16x8xf32, #tpu.memory_space<vmem>>, vector<1x16x8xf32>
    %38 = vector.shape_cast %37 : vector<1x16x8xf32> to vector<16x8xf32>
    %39 = vector.broadcast %22 : vector<16x1xf32> to vector<16x8xf32>
    %40 = arith.mulf %39, %38 : vector<16x8xf32>
    %41 = arith.addf %40, %36 : vector<16x8xf32>
    %c0_26 = arith.constant 0 : index
    %c0_27 = arith.constant 0 : index
    %c0_28 = arith.constant 0 : index
    %42 = vector.load %arg9[%c0_26, %c0_27, %c0_28] : memref<4x16x8xf32, #tpu.memory_space<vmem>>, vector<1x16x8xf32>
    %43 = vector.shape_cast %42 : vector<1x16x8xf32> to vector<16x8xf32>
    %44 = vector.shape_cast %41 : vector<16x8xf32> to vector<1x16x8xf32>
    tpu.vector_store %arg9[%c0_26, %c0_27, %c0_28], %44 {strides = array<i32>} : memref<4x16x8xf32, #tpu.memory_space<vmem>>, vector<1x16x8xf32>,
    %c0_29 = arith.constant 0 : index
    %c0_30 = arith.constant 0 : index
    %c0_31 = arith.constant 0 : index
    %45 = vector.load %arg7[%c0_29, %c0_30, %c0_31] : memref<4x16x1xf32, #tpu.memory_space<vmem>>, vector<1x16x1xf32>
    %46 = vector.shape_cast %45 : vector<1x16x1xf32> to vector<16x1xf32>
    %47 = vector.shape_cast %20 : vector<16x1xf32> to vector<1x16x1xf32>
    tpu.vector_store %arg7[%c0_29, %c0_30, %c0_31], %47 {strides = array<i32>} : memref<4x16x1xf32, #tpu.memory_space<vmem>>, vector<1x16x1xf32>,
    %c0_32 = arith.constant 0 : index
    %c0_33 = arith.constant 0 : index
    %c8 = arith.constant 8 : index
    %48 = vector.load %arg3[%c0_32, %c0_33, %c8] : memref<1x16x96xbf16, #tpu.memory_space<vmem>>, vector<1x16x8xbf16>
    %49 = vector.shape_cast %48 : vector<1x16x8xbf16> to vector<16x8xbf16>
    %cst_34 = arith.constant 3.535160e-01 : bf16
    %50 = vector.broadcast %cst_34 : bf16 to vector<16x8xbf16>
    %51 = arith.mulf %49, %50 : vector<16x8xbf16>
    %c0_35 = arith.constant 0 : index
    %c0_36 = arith.constant 0 : index
    %c40 = arith.constant 40 : index
    %52 = vector.load %arg4[%c0_35, %c0_36, %c40] : memref<1x128x96xbf16, #tpu.memory_space<vmem>>, vector<1x128x8xbf16>
    %53 = vector.shape_cast %52 : vector<1x128x8xbf16> to vector<128x8xbf16>
    %c0_37 = arith.constant 0 : index
    %c0_38 = arith.constant 0 : index
    %c72 = arith.constant 72 : index
    %54 = vector.load %arg4[%c0_37, %c0_38, %c72] : memref<1x128x96xbf16, #tpu.memory_space<vmem>>, vector<1x128x8xbf16>
    %55 = vector.shape_cast %54 : vector<1x128x8xbf16> to vector<128x8xbf16>
    %cst_39 = arith.constant dense<0.000000e+00> : vector<16x128xf32>
    %56 = tpu.matmul %51, %53, %cst_39 {dimension_numbers = #tpu.dot_dimension_numbers<[1], [1], [0], [0], [0, 0, 1, 0], [], []>} : vector<16x8xbf16>, vector<128x8xbf16>, vector<16x128xf32> -> vector<16x128xf32>
    %57 = vector.broadcast %4 : vector<1x128xf32> to vector<16x128xf32>
    %58 = arith.addf %56, %57 : vector<16x128xf32>
    %c1 = arith.constant 1 : index
    %c0_40 = arith.constant 0 : index
    %c0_41 = arith.constant 0 : index
    %59 = vector.load %arg7[%c1, %c0_40, %c0_41] : memref<4x16x1xf32, #tpu.memory_space<vmem>>, vector<1x16x1xf32>
    %60 = vector.shape_cast %59 : vector<1x16x1xf32> to vector<16x1xf32>
    %cst_42 = arith.constant dense<0xFF800000> : vector<16xf32>
    %61 = vector.multi_reduction <maximumf>, %58, %cst_42 [1] : vector<16x128xf32> to vector<16xf32>
    %62 = vector.shape_cast %61 : vector<16xf32> to vector<16x1xf32>
    %63 = arith.maximumf %60, %62 : vector<16x1xf32>
    %64 = arith.subf %60, %63 : vector<16x1xf32>
    %65 = math.exp %64 : vector<16x1xf32>
    %66 = vector.broadcast %63 : vector<16x1xf32> to vector<16x128xf32>
    %67 = arith.subf %58, %66 : vector<16x128xf32>
    %68 = math.exp %67 : vector<16x128xf32>
    %c1_43 = arith.constant 1 : index
    %c0_44 = arith.constant 0 : index
    %c0_45 = arith.constant 0 : index
    %69 = vector.load %arg8[%c1_43, %c0_44, %c0_45] : memref<4x16x1xf32, #tpu.memory_space<vmem>>, vector<1x16x1xf32>
    %70 = vector.shape_cast %69 : vector<1x16x1xf32> to vector<16x1xf32>
    %71 = arith.mulf %65, %70 : vector<16x1xf32>
    %cst_46 = arith.constant dense<0.000000e+00> : vector<16xf32>
    %72 = vector.multi_reduction <add>, %68, %cst_46 [1] : vector<16x128xf32> to vector<16xf32>
    %73 = vector.shape_cast %72 : vector<16xf32> to vector<16x1xf32>
    %74 = arith.addf %71, %73 : vector<16x1xf32>
    %c1_47 = arith.constant 1 : index
    %c0_48 = arith.constant 0 : index
    %c0_49 = arith.constant 0 : index
    %75 = vector.load %arg8[%c1_47, %c0_48, %c0_49] : memref<4x16x1xf32, #tpu.memory_space<vmem>>, vector<1x16x1xf32>
    %76 = vector.shape_cast %75 : vector<1x16x1xf32> to vector<16x1xf32>
    %77 = vector.shape_cast %74 : vector<16x1xf32> to vector<1x16x1xf32>
    tpu.vector_store %arg8[%c1_47, %c0_48, %c0_49], %77 {strides = array<i32>} : memref<4x16x1xf32, #tpu.memory_space<vmem>>, vector<1x16x1xf32>,
    %78 = arith.truncf %68 : vector<16x128xf32> to vector<16x128xbf16>
    %cst_50 = arith.constant dense<0.000000e+00> : vector<16x8xf32>
    %79 = tpu.matmul %78, %55, %cst_50 {dimension_numbers = #tpu.dot_dimension_numbers<[1], [0], [0], [1], [0, 0, 1, 1], [], []>} : vector<16x128xbf16>, vector<128x8xbf16>, vector<16x8xf32> -> vector<16x8xf32>
    %c1_51 = arith.constant 1 : index
    %c0_52 = arith.constant 0 : index
    %c0_53 = arith.constant 0 : index
    %80 = vector.load %arg9[%c1_51, %c0_52, %c0_53] : memref<4x16x8xf32, #tpu.memory_space<vmem>>, vector<1x16x8xf32>
    %81 = vector.shape_cast %80 : vector<1x16x8xf32> to vector<16x8xf32>
    %82 = vector.broadcast %65 : vector<16x1xf32> to vector<16x8xf32>
    %83 = arith.mulf %82, %81 : vector<16x8xf32>
    %84 = arith.addf %83, %79 : vector<16x8xf32>
    %c1_54 = arith.constant 1 : index
    %c0_55 = arith.constant 0 : index
    %c0_56 = arith.constant 0 : index
    %85 = vector.load %arg9[%c1_54, %c0_55, %c0_56] : memref<4x16x8xf32, #tpu.memory_space<vmem>>, vector<1x16x8xf32>
    %86 = vector.shape_cast %85 : vector<1x16x8xf32> to vector<16x8xf32>
    %87 = vector.shape_cast %84 : vector<16x8xf32> to vector<1x16x8xf32>
    tpu.vector_store %arg9[%c1_54, %c0_55, %c0_56], %87 {strides = array<i32>} : memref<4x16x8xf32, #tpu.memory_space<vmem>>, vector<1x16x8xf32>,
    %c1_57 = arith.constant 1 : index
    %c0_58 = arith.constant 0 : index
    %c0_59 = arith.constant 0 : index
    %88 = vector.load %arg7[%c1_57, %c0_58, %c0_59] : memref<4x16x1xf32, #tpu.memory_space<vmem>>, vector<1x16x1xf32>
    %89 = vector.shape_cast %88 : vector<1x16x1xf32> to vector<16x1xf32>
    %90 = vector.shape_cast %63 : vector<16x1xf32> to vector<1x16x1xf32>
    tpu.vector_store %arg7[%c1_57, %c0_58, %c0_59], %90 {strides = array<i32>} : memref<4x16x1xf32, #tpu.memory_space<vmem>>, vector<1x16x1xf32>,
    %c0_60 = arith.constant 0 : index
    %c0_61 = arith.constant 0 : index
    %c16 = arith.constant 16 : index
    %91 = vector.load %arg3[%c0_60, %c0_61, %c16] : memref<1x16x96xbf16, #tpu.memory_space<vmem>>, vector<1x16x8xbf16>
    %92 = vector.shape_cast %91 : vector<1x16x8xbf16> to vector<16x8xbf16>
    %cst_62 = arith.constant 3.535160e-01 : bf16
    %93 = vector.broadcast %cst_62 : bf16 to vector<16x8xbf16>
    %94 = arith.mulf %92, %93 : vector<16x8xbf16>
    %c0_63 = arith.constant 0 : index
    %c0_64 = arith.constant 0 : index
    %c48 = arith.constant 48 : index
    %95 = vector.load %arg4[%c0_63, %c0_64, %c48] : memref<1x128x96xbf16, #tpu.memory_space<vmem>>, vector<1x128x8xbf16>
    %96 = vector.shape_cast %95 : vector<1x128x8xbf16> to vector<128x8xbf16>
    %c0_65 = arith.constant 0 : index
    %c0_66 = arith.constant 0 : index
    %c80 = arith.constant 80 : index
    %97 = vector.load %arg4[%c0_65, %c0_66, %c80] : memref<1x128x96xbf16, #tpu.memory_space<vmem>>, vector<1x128x8xbf16>
    %98 = vector.shape_cast %97 : vector<1x128x8xbf16> to vector<128x8xbf16>
    %cst_67 = arith.constant dense<0.000000e+00> : vector<16x128xf32>
    %99 = tpu.matmul %94, %96, %cst_67 {dimension_numbers = #tpu.dot_dimension_numbers<[1], [1], [0], [0], [0, 0, 1, 0], [], []>} : vector<16x8xbf16>, vector<128x8xbf16>, vector<16x128xf32> -> vector<16x128xf32>
    %100 = vector.broadcast %4 : vector<1x128xf32> to vector<16x128xf32>
    %101 = arith.addf %99, %100 : vector<16x128xf32>
    %c2 = arith.constant 2 : index
    %c0_68 = arith.constant 0 : index
    %c0_69 = arith.constant 0 : index
    %102 = vector.load %arg7[%c2, %c0_68, %c0_69] : memref<4x16x1xf32, #tpu.memory_space<vmem>>, vector<1x16x1xf32>
    %103 = vector.shape_cast %102 : vector<1x16x1xf32> to vector<16x1xf32>
    %cst_70 = arith.constant dense<0xFF800000> : vector<16xf32>
    %104 = vector.multi_reduction <maximumf>, %101, %cst_70 [1] : vector<16x128xf32> to vector<16xf32>
    %105 = vector.shape_cast %104 : vector<16xf32> to vector<16x1xf32>
    %106 = arith.maximumf %103, %105 : vector<16x1xf32>
    %107 = arith.subf %103, %106 : vector<16x1xf32>
    %108 = math.exp %107 : vector<16x1xf32>
    %109 = vector.broadcast %106 : vector<16x1xf32> to vector<16x128xf32>
    %110 = arith.subf %101, %109 : vector<16x128xf32>
    %111 = math.exp %110 : vector<16x128xf32>
    %c2_71 = arith.constant 2 : index
    %c0_72 = arith.constant 0 : index
    %c0_73 = arith.constant 0 : index
    %112 = vector.load %arg8[%c2_71, %c0_72, %c0_73] : memref<4x16x1xf32, #tpu.memory_space<vmem>>, vector<1x16x1xf32>
    %113 = vector.shape_cast %112 : vector<1x16x1xf32> to vector<16x1xf32>
    %114 = arith.mulf %108, %113 : vector<16x1xf32>
    %cst_74 = arith.constant dense<0.000000e+00> : vector<16xf32>
    %115 = vector.multi_reduction <add>, %111, %cst_74 [1] : vector<16x128xf32> to vector<16xf32>
    %116 = vector.shape_cast %115 : vector<16xf32> to vector<16x1xf32>
    %117 = arith.addf %114, %116 : vector<16x1xf32>
    %c2_75 = arith.constant 2 : index
    %c0_76 = arith.constant 0 : index
    %c0_77 = arith.constant 0 : index
    %118 = vector.load %arg8[%c2_75, %c0_76, %c0_77] : memref<4x16x1xf32, #tpu.memory_space<vmem>>, vector<1x16x1xf32>
    %119 = vector.shape_cast %118 : vector<1x16x1xf32> to vector<16x1xf32>
    %120 = vector.shape_cast %117 : vector<16x1xf32> to vector<1x16x1xf32>
    tpu.vector_store %arg8[%c2_75, %c0_76, %c0_77], %120 {strides = array<i32>} : memref<4x16x1xf32, #tpu.memory_space<vmem>>, vector<1x16x1xf32>,
    %121 = arith.truncf %111 : vector<16x128xf32> to vector<16x128xbf16>
    %cst_78 = arith.constant dense<0.000000e+00> : vector<16x8xf32>
    %122 = tpu.matmul %121, %98, %cst_78 {dimension_numbers = #tpu.dot_dimension_numbers<[1], [0], [0], [1], [0, 0, 1, 1], [], []>} : vector<16x128xbf16>, vector<128x8xbf16>, vector<16x8xf32> -> vector<16x8xf32>
    %c2_79 = arith.constant 2 : index
    %c0_80 = arith.constant 0 : index
    %c0_81 = arith.constant 0 : index
    %123 = vector.load %arg9[%c2_79, %c0_80, %c0_81] : memref<4x16x8xf32, #tpu.memory_space<vmem>>, vector<1x16x8xf32>
    %124 = vector.shape_cast %123 : vector<1x16x8xf32> to vector<16x8xf32>
    %125 = vector.broadcast %108 : vector<16x1xf32> to vector<16x8xf32>
    %126 = arith.mulf %125, %124 : vector<16x8xf32>
    %127 = arith.addf %126, %122 : vector<16x8xf32>
    %c2_82 = arith.constant 2 : index
    %c0_83 = arith.constant 0 : index
    %c0_84 = arith.constant 0 : index
    %128 = vector.load %arg9[%c2_82, %c0_83, %c0_84] : memref<4x16x8xf32, #tpu.memory_space<vmem>>, vector<1x16x8xf32>
    %129 = vector.shape_cast %128 : vector<1x16x8xf32> to vector<16x8xf32>
    %130 = vector.shape_cast %127 : vector<16x8xf32> to vector<1x16x8xf32>
    tpu.vector_store %arg9[%c2_82, %c0_83, %c0_84], %130 {strides = array<i32>} : memref<4x16x8xf32, #tpu.memory_space<vmem>>, vector<1x16x8xf32>,
    %c2_85 = arith.constant 2 : index
    %c0_86 = arith.constant 0 : index
    %c0_87 = arith.constant 0 : index
    %131 = vector.load %arg7[%c2_85, %c0_86, %c0_87] : memref<4x16x1xf32, #tpu.memory_space<vmem>>, vector<1x16x1xf32>
    %132 = vector.shape_cast %131 : vector<1x16x1xf32> to vector<16x1xf32>
    %133 = vector.shape_cast %106 : vector<16x1xf32> to vector<1x16x1xf32>
    tpu.vector_store %arg7[%c2_85, %c0_86, %c0_87], %133 {strides = array<i32>} : memref<4x16x1xf32, #tpu.memory_space<vmem>>, vector<1x16x1xf32>,
    %c0_88 = arith.constant 0 : index
    %c0_89 = arith.constant 0 : index
    %c24 = arith.constant 24 : index
    %134 = vector.load %arg3[%c0_88, %c0_89, %c24] : memref<1x16x96xbf16, #tpu.memory_space<vmem>>, vector<1x16x8xbf16>
    %135 = vector.shape_cast %134 : vector<1x16x8xbf16> to vector<16x8xbf16>
    %cst_90 = arith.constant 3.535160e-01 : bf16
    %136 = vector.broadcast %cst_90 : bf16 to vector<16x8xbf16>
    %137 = arith.mulf %135, %136 : vector<16x8xbf16>
    %c0_91 = arith.constant 0 : index
    %c0_92 = arith.constant 0 : index
    %c56 = arith.constant 56 : index
    %138 = vector.load %arg4[%c0_91, %c0_92, %c56] : memref<1x128x96xbf16, #tpu.memory_space<vmem>>, vector<1x128x8xbf16>
    %139 = vector.shape_cast %138 : vector<1x128x8xbf16> to vector<128x8xbf16>
    %c0_93 = arith.constant 0 : index
    %c0_94 = arith.constant 0 : index
    %c88 = arith.constant 88 : index
    %140 = vector.load %arg4[%c0_93, %c0_94, %c88] : memref<1x128x96xbf16, #tpu.memory_space<vmem>>, vector<1x128x8xbf16>
    %141 = vector.shape_cast %140 : vector<1x128x8xbf16> to vector<128x8xbf16>
    %cst_95 = arith.constant dense<0.000000e+00> : vector<16x128xf32>
    %142 = tpu.matmul %137, %139, %cst_95 {dimension_numbers = #tpu.dot_dimension_numbers<[1], [1], [0], [0], [0, 0, 1, 0], [], []>} : vector<16x8xbf16>, vector<128x8xbf16>, vector<16x128xf32> -> vector<16x128xf32>
    %143 = vector.broadcast %4 : vector<1x128xf32> to vector<16x128xf32>
    %144 = arith.addf %142, %143 : vector<16x128xf32>
    %c3 = arith.constant 3 : index
    %c0_96 = arith.constant 0 : index
    %c0_97 = arith.constant 0 : index
    %145 = vector.load %arg7[%c3, %c0_96, %c0_97] : memref<4x16x1xf32, #tpu.memory_space<vmem>>, vector<1x16x1xf32>
    %146 = vector.shape_cast %145 : vector<1x16x1xf32> to vector<16x1xf32>
    %cst_98 = arith.constant dense<0xFF800000> : vector<16xf32>
    %147 = vector.multi_reduction <maximumf>, %144, %cst_98 [1] : vector<16x128xf32> to vector<16xf32>
    %148 = vector.shape_cast %147 : vector<16xf32> to vector<16x1xf32>
    %149 = arith.maximumf %146, %148 : vector<16x1xf32>
    %150 = arith.subf %146, %149 : vector<16x1xf32>
    %151 = math.exp %150 : vector<16x1xf32>
    %152 = vector.broadcast %149 : vector<16x1xf32> to vector<16x128xf32>
    %153 = arith.subf %144, %152 : vector<16x128xf32>
    %154 = math.exp %153 : vector<16x128xf32>
    %c3_99 = arith.constant 3 : index
    %c0_100 = arith.constant 0 : index
    %c0_101 = arith.constant 0 : index
    %155 = vector.load %arg8[%c3_99, %c0_100, %c0_101] : memref<4x16x1xf32, #tpu.memory_space<vmem>>, vector<1x16x1xf32>
    %156 = vector.shape_cast %155 : vector<1x16x1xf32> to vector<16x1xf32>
    %157 = arith.mulf %151, %156 : vector<16x1xf32>
    %cst_102 = arith.constant dense<0.000000e+00> : vector<16xf32>
    %158 = vector.multi_reduction <add>, %154, %cst_102 [1] : vector<16x128xf32> to vector<16xf32>
    %159 = vector.shape_cast %158 : vector<16xf32> to vector<16x1xf32>
    %160 = arith.addf %157, %159 : vector<16x1xf32>
    %c3_103 = arith.constant 3 : index
    %c0_104 = arith.constant 0 : index
    %c0_105 = arith.constant 0 : index
    %161 = vector.load %arg8[%c3_103, %c0_104, %c0_105] : memref<4x16x1xf32, #tpu.memory_space<vmem>>, vector<1x16x1xf32>
    %162 = vector.shape_cast %161 : vector<1x16x1xf32> to vector<16x1xf32>
    %163 = vector.shape_cast %160 : vector<16x1xf32> to vector<1x16x1xf32>
    tpu.vector_store %arg8[%c3_103, %c0_104, %c0_105], %163 {strides = array<i32>} : memref<4x16x1xf32, #tpu.memory_space<vmem>>, vector<1x16x1xf32>,
    %164 = arith.truncf %154 : vector<16x128xf32> to vector<16x128xbf16>
    %cst_106 = arith.constant dense<0.000000e+00> : vector<16x8xf32>
    %165 = tpu.matmul %164, %141, %cst_106 {dimension_numbers = #tpu.dot_dimension_numbers<[1], [0], [0], [1], [0, 0, 1, 1], [], []>} : vector<16x128xbf16>, vector<128x8xbf16>, vector<16x8xf32> -> vector<16x8xf32>
    %c3_107 = arith.constant 3 : index
    %c0_108 = arith.constant 0 : index
    %c0_109 = arith.constant 0 : index
    %166 = vector.load %arg9[%c3_107, %c0_108, %c0_109] : memref<4x16x8xf32, #tpu.memory_space<vmem>>, vector<1x16x8xf32>
    %167 = vector.shape_cast %166 : vector<1x16x8xf32> to vector<16x8xf32>
    %168 = vector.broadcast %151 : vector<16x1xf32> to vector<16x8xf32>
    %169 = arith.mulf %168, %167 : vector<16x8xf32>
    %170 = arith.addf %169, %165 : vector<16x8xf32>
    %c3_110 = arith.constant 3 : index
    %c0_111 = arith.constant 0 : index
    %c0_112 = arith.constant 0 : index
    %171 = vector.load %arg9[%c3_110, %c0_111, %c0_112] : memref<4x16x8xf32, #tpu.memory_space<vmem>>, vector<1x16x8xf32>
    %172 = vector.shape_cast %171 : vector<1x16x8xf32> to vector<16x8xf32>
    %173 = vector.shape_cast %170 : vector<16x8xf32> to vector<1x16x8xf32>
    tpu.vector_store %arg9[%c3_110, %c0_111, %c0_112], %173 {strides = array<i32>} : memref<4x16x8xf32, #tpu.memory_space<vmem>>, vector<1x16x8xf32>,
    %c3_113 = arith.constant 3 : index
    %c0_114 = arith.constant 0 : index
    %c0_115 = arith.constant 0 : index
    %174 = vector.load %arg7[%c3_113, %c0_114, %c0_115] : memref<4x16x1xf32, #tpu.memory_space<vmem>>, vector<1x16x1xf32>
    %175 = vector.shape_cast %174 : vector<1x16x1xf32> to vector<16x1xf32>
    %176 = vector.shape_cast %149 : vector<16x1xf32> to vector<1x16x1xf32>
    tpu.vector_store %arg7[%c3_113, %c0_114, %c0_115], %176 {strides = array<i32>} : memref<4x16x1xf32, #tpu.memory_space<vmem>>, vector<1x16x1xf32>,
    %c0_i32_116 = arith.constant 0 : i32
    %177 = arith.cmpi eq, %arg2, %c0_i32_116 : i32
    %178 = arith.extui %177 : i1 to i32
    %c0_i32_117 = arith.constant 0 : i32
    %179 = arith.cmpi ne, %178, %c0_i32_117 : i32
    scf.if %179 {
      %c0_118 = arith.constant 0 : index
      %c0_119 = arith.constant 0 : index
      %c0_120 = arith.constant 0 : index
      %180 = vector.load %arg8[%c0_118, %c0_119, %c0_120] : memref<4x16x1xf32, #tpu.memory_space<vmem>>, vector<1x16x1xf32>
      %181 = vector.shape_cast %180 : vector<1x16x1xf32> to vector<16x1xf32>
      %182 = tpu.reciprocal %181 {approx = true} : vector<16x1xf32> -> vector<16x1xf32>
      %c0_121 = arith.constant 0 : index
      %c0_122 = arith.constant 0 : index
      %c0_123 = arith.constant 0 : index
      %183 = vector.load %arg9[%c0_121, %c0_122, %c0_123] : memref<4x16x8xf32, #tpu.memory_space<vmem>>, vector<1x16x8xf32>
      %184 = vector.shape_cast %183 : vector<1x16x8xf32> to vector<16x8xf32>
      %185 = vector.broadcast %182 : vector<16x1xf32> to vector<16x8xf32>
      %186 = arith.mulf %184, %185 : vector<16x8xf32>
      %187 = arith.truncf %186 : vector<16x8xf32> to vector<16x8xbf16>
      %c0_124 = arith.constant 0 : index
      %c0_125 = arith.constant 0 : index
      %c0_126 = arith.constant 0 : index
      %188 = vector.load %arg6[%c0_124, %c0_125, %c0_126] : memref<1x16x32xbf16, #tpu.memory_space<vmem>>, vector<1x16x8xbf16>
      %189 = vector.shape_cast %188 : vector<1x16x8xbf16> to vector<16x8xbf16>
      %190 = vector.shape_cast %187 : vector<16x8xbf16> to vector<1x16x8xbf16>
      tpu.vector_store %arg6[%c0_124, %c0_125, %c0_126], %190 {strides = array<i32>} : memref<1x16x32xbf16, #tpu.memory_space<vmem>>, vector<1x16x8xbf16>,
      %c1_127 = arith.constant 1 : index
      %c0_128 = arith.constant 0 : index
      %c0_129 = arith.constant 0 : index
      %191 = vector.load %arg8[%c1_127, %c0_128, %c0_129] : memref<4x16x1xf32, #tpu.memory_space<vmem>>, vector<1x16x1xf32>
      %192 = vector.shape_cast %191 : vector<1x16x1xf32> to vector<16x1xf32>
      %193 = tpu.reciprocal %192 {approx = true} : vector<16x1xf32> -> vector<16x1xf32>
      %c1_130 = arith.constant 1 : index
      %c0_131 = arith.constant 0 : index
      %c0_132 = arith.constant 0 : index
      %194 = vector.load %arg9[%c1_130, %c0_131, %c0_132] : memref<4x16x8xf32, #tpu.memory_space<vmem>>, vector<1x16x8xf32>
      %195 = vector.shape_cast %194 : vector<1x16x8xf32> to vector<16x8xf32>
      %196 = vector.broadcast %193 : vector<16x1xf32> to vector<16x8xf32>
      %197 = arith.mulf %195, %196 : vector<16x8xf32>
      %198 = arith.truncf %197 : vector<16x8xf32> to vector<16x8xbf16>
      %c0_133 = arith.constant 0 : index
      %c0_134 = arith.constant 0 : index
      %c8_135 = arith.constant 8 : index
      %199 = vector.load %arg6[%c0_133, %c0_134, %c8_135] : memref<1x16x32xbf16, #tpu.memory_space<vmem>>, vector<1x16x8xbf16>
      %200 = vector.shape_cast %199 : vector<1x16x8xbf16> to vector<16x8xbf16>
      %201 = vector.shape_cast %198 : vector<16x8xbf16> to vector<1x16x8xbf16>
      tpu.vector_store %arg6[%c0_133, %c0_134, %c8_135], %201 {strides = array<i32>} : memref<1x16x32xbf16, #tpu.memory_space<vmem>>, vector<1x16x8xbf16>,
      %c2_136 = arith.constant 2 : index
      %c0_137 = arith.constant 0 : index
      %c0_138 = arith.constant 0 : index
      %202 = vector.load %arg8[%c2_136, %c0_137, %c0_138] : memref<4x16x1xf32, #tpu.memory_space<vmem>>, vector<1x16x1xf32>
      %203 = vector.shape_cast %202 : vector<1x16x1xf32> to vector<16x1xf32>
      %204 = tpu.reciprocal %203 {approx = true} : vector<16x1xf32> -> vector<16x1xf32>
      %c2_139 = arith.constant 2 : index
      %c0_140 = arith.constant 0 : index
      %c0_141 = arith.constant 0 : index
      %205 = vector.load %arg9[%c2_139, %c0_140, %c0_141] : memref<4x16x8xf32, #tpu.memory_space<vmem>>, vector<1x16x8xf32>
      %206 = vector.shape_cast %205 : vector<1x16x8xf32> to vector<16x8xf32>
      %207 = vector.broadcast %204 : vector<16x1xf32> to vector<16x8xf32>
      %208 = arith.mulf %206, %207 : vector<16x8xf32>
      %209 = arith.truncf %208 : vector<16x8xf32> to vector<16x8xbf16>
      %c0_142 = arith.constant 0 : index
      %c0_143 = arith.constant 0 : index
      %c16_144 = arith.constant 16 : index
      %210 = vector.load %arg6[%c0_142, %c0_143, %c16_144] : memref<1x16x32xbf16, #tpu.memory_space<vmem>>, vector<1x16x8xbf16>
      %211 = vector.shape_cast %210 : vector<1x16x8xbf16> to vector<16x8xbf16>
      %212 = vector.shape_cast %209 : vector<16x8xbf16> to vector<1x16x8xbf16>
      tpu.vector_store %arg6[%c0_142, %c0_143, %c16_144], %212 {strides = array<i32>} : memref<1x16x32xbf16, #tpu.memory_space<vmem>>, vector<1x16x8xbf16>,
      %c3_145 = arith.constant 3 : index
      %c0_146 = arith.constant 0 : index
      %c0_147 = arith.constant 0 : index
      %213 = vector.load %arg8[%c3_145, %c0_146, %c0_147] : memref<4x16x1xf32, #tpu.memory_space<vmem>>, vector<1x16x1xf32>
      %214 = vector.shape_cast %213 : vector<1x16x1xf32> to vector<16x1xf32>
      %215 = tpu.reciprocal %214 {approx = true} : vector<16x1xf32> -> vector<16x1xf32>
      %c3_148 = arith.constant 3 : index
      %c0_149 = arith.constant 0 : index
      %c0_150 = arith.constant 0 : index
      %216 = vector.load %arg9[%c3_148, %c0_149, %c0_150] : memref<4x16x8xf32, #tpu.memory_space<vmem>>, vector<1x16x8xf32>
      %217 = vector.shape_cast %216 : vector<1x16x8xf32> to vector<16x8xf32>
      %218 = vector.broadcast %215 : vector<16x1xf32> to vector<16x8xf32>
      %219 = arith.mulf %217, %218 : vector<16x8xf32>
      %220 = arith.truncf %219 : vector<16x8xf32> to vector<16x8xbf16>
      %c0_151 = arith.constant 0 : index
      %c0_152 = arith.constant 0 : index
      %c24_153 = arith.constant 24 : index
      %221 = vector.load %arg6[%c0_151, %c0_152, %c24_153] : memref<1x16x32xbf16, #tpu.memory_space<vmem>>, vector<1x16x8xbf16>
      %222 = vector.shape_cast %221 : vector<1x16x8xbf16> to vector<16x8xbf16>
      %223 = vector.shape_cast %220 : vector<16x8xbf16> to vector<1x16x8xbf16>
      tpu.vector_store %arg6[%c0_151, %c0_152, %c24_153], %223 {strides = array<i32>} : memref<1x16x32xbf16, #tpu.memory_space<vmem>>, vector<1x16x8xbf16>,
    } else {
    }
    return
  }
  func.func @transform_0(%arg0: i32, %arg1: i32, %arg2: i32) -> (i32, i32, i32) {
    %c0_i32 = arith.constant 0 : i32
    %c0_i32_0 = arith.constant 0 : i32
    return %arg1, %arg0, %c0_i32 : i32, i32, i32
  }
  func.func @transform_1(%arg0: i32, %arg1: i32, %arg2: i32) -> (i32, i32, i32) {
    %c0_i32 = arith.constant 0 : i32
    %c0_i32_0 = arith.constant 0 : i32
    return %arg1, %arg2, %c0_i32 : i32, i32, i32
  }
  func.func @transform_2(%arg0: i32, %arg1: i32, %arg2: i32) -> (i32, i32, i32) {
    %c0_i32 = arith.constant 0 : i32
    %c0_i32_0 = arith.constant 0 : i32
    return %arg1, %c0_i32, %arg2 : i32, i32, i32
  }
  func.func @transform_3(%arg0: i32, %arg1: i32, %arg2: i32) -> (i32, i32, i32) {
    %c0_i32 = arith.constant 0 : i32
    %c0_i32_0 = arith.constant 0 : i32
    return %arg1, %arg0, %c0_i32 : i32, i32, i32
  }
}

module attributes {stable_mosaic.version = 11 : i64} {
  func.func @_matmul_kernel(%arg0: i32, %arg1: i32, %arg2: i32, %arg3: memref<32x128xbf16, #tpu.memory_space<vmem>>, %arg4: memref<128x128xbf16, #tpu.memory_space<vmem>>, %arg5: memref<1x128xf32, #tpu.memory_space<vmem>>, %arg6: memref<32x128xbf16, #tpu.memory_space<vmem>>, %arg7: memref<32x128xbf16, #tpu.memory_space<vmem>>, %arg8: memref<32x128xf32, #tpu.memory_space<vmem>>) attributes {dimension_semantics = [#tpu.dimension_semantics<parallel>, #tpu.dimension_semantics<parallel>, #tpu.dimension_semantics<arbitrary>], iteration_bounds = array<i64: 1, 1, 1>, scalar_prefetch = 0 : i64, scratch_operands = 1 : i64, tpu.core_type = #tpu.core_type<tc>, window_params = [{transform_indices = @transform_0, window_bounds = array<i64: 32, 128>}, {transform_indices = @transform_1, window_bounds = array<i64: 128, 128>}, {transform_indices = @transform_2, window_bounds = array<i64: 1, 128>}, {transform_indices = @transform_3, window_bounds = array<i64: 32, 128>}, {transform_indices = @transform_4, window_bounds = array<i64: 32, 128>}]} {
    %c0_i32 = arith.constant 0 : i32
    %0 = arith.cmpi eq, %arg2, %c0_i32 : i32
    %1 = arith.extui %0 : i1 to i32
    %c0_i32_0 = arith.constant 0 : i32
    %2 = arith.cmpi ne, %1, %c0_i32_0 : i32
    scf.if %2 {
      %cst_10 = arith.constant 0.000000e+00 : f32
      %12 = vector.broadcast %cst_10 : f32 to vector<32x128xf32>
      %c0_11 = arith.constant 0 : index
      %c0_12 = arith.constant 0 : index
      %13 = vector.load %arg8[%c0_11, %c0_12] : memref<32x128xf32, #tpu.memory_space<vmem>>, vector<32x128xf32>
      tpu.vector_store %arg8[%c0_11, %c0_12], %12 {strides = array<i32>} : memref<32x128xf32, #tpu.memory_space<vmem>>, vector<32x128xf32>,
    } else {
    }
    %c0 = arith.constant 0 : index
    %c0_1 = arith.constant 0 : index
    %3 = vector.load %arg8[%c0, %c0_1] : memref<32x128xf32, #tpu.memory_space<vmem>>, vector<32x128xf32>
    %c0_2 = arith.constant 0 : index
    %c0_3 = arith.constant 0 : index
    %4 = vector.load %arg3[%c0_2, %c0_3] : memref<32x128xbf16, #tpu.memory_space<vmem>>, vector<32x128xbf16>
    %c0_4 = arith.constant 0 : index
    %c0_5 = arith.constant 0 : index
    %5 = vector.load %arg4[%c0_4, %c0_5] : memref<128x128xbf16, #tpu.memory_space<vmem>>, vector<128x128xbf16>
    %cst = arith.constant dense<0.000000e+00> : vector<32x128xf32>
    %6 = tpu.matmul %4, %5, %cst {dimension_numbers = #tpu.dot_dimension_numbers<[1], [0], [0], [1], [0, 0, 1, 1], [], []>} : vector<32x128xbf16>, vector<128x128xbf16>, vector<32x128xf32> -> vector<32x128xf32>
    %7 = arith.addf %3, %6 : vector<32x128xf32>
    %c0_6 = arith.constant 0 : index
    %c0_7 = arith.constant 0 : index
    %8 = vector.load %arg8[%c0_6, %c0_7] : memref<32x128xf32, #tpu.memory_space<vmem>>, vector<32x128xf32>
    tpu.vector_store %arg8[%c0_6, %c0_7], %7 {strides = array<i32>} : memref<32x128xf32, #tpu.memory_space<vmem>>, vector<32x128xf32>,
    %c0_i32_8 = arith.constant 0 : i32
    %9 = arith.cmpi eq, %arg2, %c0_i32_8 : i32
    %10 = arith.extui %9 : i1 to i32
    %c0_i32_9 = arith.constant 0 : i32
    %11 = arith.cmpi ne, %10, %c0_i32_9 : i32
    scf.if %11 {
      %c0_10 = arith.constant 0 : index
      %c0_11 = arith.constant 0 : index
      %12 = vector.load %arg8[%c0_10, %c0_11] : memref<32x128xf32, #tpu.memory_space<vmem>>, vector<32x128xf32>
      %c0_12 = arith.constant 0 : index
      %c0_13 = arith.constant 0 : index
      %13 = vector.load %arg5[%c0_12, %c0_13] : memref<1x128xf32, #tpu.memory_space<vmem>>, vector<1x128xf32>
      %14 = vector.broadcast %13 : vector<1x128xf32> to vector<32x128xf32>
      %15 = arith.addf %12, %14 : vector<32x128xf32>
      %c0_14 = arith.constant 0 : index
      %c0_15 = arith.constant 0 : index
      %16 = vector.load %arg6[%c0_14, %c0_15] : memref<32x128xbf16, #tpu.memory_space<vmem>>, vector<32x128xbf16>
      %17 = arith.extf %16 : vector<32x128xbf16> to vector<32x128xf32>
      %18 = arith.addf %15, %17 : vector<32x128xf32>
      %19 = arith.truncf %18 : vector<32x128xf32> to vector<32x128xbf16>
      %c0_16 = arith.constant 0 : index
      %c0_17 = arith.constant 0 : index
      %20 = vector.load %arg7[%c0_16, %c0_17] : memref<32x128xbf16, #tpu.memory_space<vmem>>, vector<32x128xbf16>
      tpu.vector_store %arg7[%c0_16, %c0_17], %19 {strides = array<i32>} : memref<32x128xbf16, #tpu.memory_space<vmem>>, vector<32x128xbf16>,
    } else {
    }
    return
  }
  func.func @transform_0(%arg0: i32, %arg1: i32, %arg2: i32) -> (i32, i32) {
    %c0_i32 = arith.constant 0 : i32
    return %arg0, %arg2 : i32, i32
  }
  func.func @transform_1(%arg0: i32, %arg1: i32, %arg2: i32) -> (i32, i32) {
    %c0_i32 = arith.constant 0 : i32
    return %arg2, %arg1 : i32, i32
  }
  func.func @transform_2(%arg0: i32, %arg1: i32, %arg2: i32) -> (i32, i32) {
    %c0_i32 = arith.constant 0 : i32
    %c0_i32_0 = arith.constant 0 : i32
    return %c0_i32, %arg1 : i32, i32
  }
  func.func @transform_3(%arg0: i32, %arg1: i32, %arg2: i32) -> (i32, i32) {
    %c0_i32 = arith.constant 0 : i32
    return %arg0, %arg1 : i32, i32
  }
  func.func @transform_4(%arg0: i32, %arg1: i32, %arg2: i32) -> (i32, i32) {
    %c0_i32 = arith.constant 0 : i32
    return %arg0, %arg1 : i32, i32
  }
}

module attributes {stable_mosaic.version = 11 : i64} {
  func.func @_matmul_kernel(%arg0: i32, %arg1: i32, %arg2: i32, %arg3: memref<16x128xbf16, #tpu.memory_space<vmem>>, %arg4: memref<128x128xbf16, #tpu.memory_space<vmem>>, %arg5: memref<1x128xf32, #tpu.memory_space<vmem>>, %arg6: memref<16x128xbf16, #tpu.memory_space<vmem>>, %arg7: memref<16x128xf32, #tpu.memory_space<vmem>>) attributes {dimension_semantics = [#tpu.dimension_semantics<parallel>, #tpu.dimension_semantics<parallel>, #tpu.dimension_semantics<arbitrary>], iteration_bounds = array<i64: 1, 1, 1>, scalar_prefetch = 0 : i64, scratch_operands = 1 : i64, tpu.core_type = #tpu.core_type<tc>, window_params = [{transform_indices = @transform_0, window_bounds = array<i64: 16, 128>}, {transform_indices = @transform_1, window_bounds = array<i64: 128, 128>}, {transform_indices = @transform_2, window_bounds = array<i64: 1, 128>}, {transform_indices = @transform_3, window_bounds = array<i64: 16, 128>}]} {
    %c0_i32 = arith.constant 0 : i32
    %0 = arith.cmpi eq, %arg2, %c0_i32 : i32
    %1 = arith.extui %0 : i1 to i32
    %c0_i32_0 = arith.constant 0 : i32
    %2 = arith.cmpi ne, %1, %c0_i32_0 : i32
    scf.if %2 {
      %cst_10 = arith.constant 0.000000e+00 : f32
      %12 = vector.broadcast %cst_10 : f32 to vector<16x128xf32>
      %c0_11 = arith.constant 0 : index
      %c0_12 = arith.constant 0 : index
      %13 = vector.load %arg7[%c0_11, %c0_12] : memref<16x128xf32, #tpu.memory_space<vmem>>, vector<16x128xf32>
      tpu.vector_store %arg7[%c0_11, %c0_12], %12 {strides = array<i32>} : memref<16x128xf32, #tpu.memory_space<vmem>>, vector<16x128xf32>,
    } else {
    }
    %c0 = arith.constant 0 : index
    %c0_1 = arith.constant 0 : index
    %3 = vector.load %arg7[%c0, %c0_1] : memref<16x128xf32, #tpu.memory_space<vmem>>, vector<16x128xf32>
    %c0_2 = arith.constant 0 : index
    %c0_3 = arith.constant 0 : index
    %4 = vector.load %arg3[%c0_2, %c0_3] : memref<16x128xbf16, #tpu.memory_space<vmem>>, vector<16x128xbf16>
    %c0_4 = arith.constant 0 : index
    %c0_5 = arith.constant 0 : index
    %5 = vector.load %arg4[%c0_4, %c0_5] : memref<128x128xbf16, #tpu.memory_space<vmem>>, vector<128x128xbf16>
    %cst = arith.constant dense<0.000000e+00> : vector<16x128xf32>
    %6 = tpu.matmul %4, %5, %cst {dimension_numbers = #tpu.dot_dimension_numbers<[1], [0], [0], [1], [0, 0, 1, 1], [], []>} : vector<16x128xbf16>, vector<128x128xbf16>, vector<16x128xf32> -> vector<16x128xf32>
    %7 = arith.addf %3, %6 : vector<16x128xf32>
    %c0_6 = arith.constant 0 : index
    %c0_7 = arith.constant 0 : index
    %8 = vector.load %arg7[%c0_6, %c0_7] : memref<16x128xf32, #tpu.memory_space<vmem>>, vector<16x128xf32>
    tpu.vector_store %arg7[%c0_6, %c0_7], %7 {strides = array<i32>} : memref<16x128xf32, #tpu.memory_space<vmem>>, vector<16x128xf32>,
    %c0_i32_8 = arith.constant 0 : i32
    %9 = arith.cmpi eq, %arg2, %c0_i32_8 : i32
    %10 = arith.extui %9 : i1 to i32
    %c0_i32_9 = arith.constant 0 : i32
    %11 = arith.cmpi ne, %10, %c0_i32_9 : i32
    scf.if %11 {
      %c0_10 = arith.constant 0 : index
      %c0_11 = arith.constant 0 : index
      %12 = vector.load %arg7[%c0_10, %c0_11] : memref<16x128xf32, #tpu.memory_space<vmem>>, vector<16x128xf32>
      %c0_12 = arith.constant 0 : index
      %c0_13 = arith.constant 0 : index
      %13 = vector.load %arg5[%c0_12, %c0_13] : memref<1x128xf32, #tpu.memory_space<vmem>>, vector<1x128xf32>
      %14 = vector.broadcast %13 : vector<1x128xf32> to vector<16x128xf32>
      %15 = arith.addf %12, %14 : vector<16x128xf32>
      %16 = arith.truncf %15 : vector<16x128xf32> to vector<16x128xbf16>
      %c0_14 = arith.constant 0 : index
      %c0_15 = arith.constant 0 : index
      %17 = vector.load %arg6[%c0_14, %c0_15] : memref<16x128xbf16, #tpu.memory_space<vmem>>, vector<16x128xbf16>
      tpu.vector_store %arg6[%c0_14, %c0_15], %16 {strides = array<i32>} : memref<16x128xbf16, #tpu.memory_space<vmem>>, vector<16x128xbf16>,
    } else {
    }
    return
  }
  func.func @transform_0(%arg0: i32, %arg1: i32, %arg2: i32) -> (i32, i32) {
    %c0_i32 = arith.constant 0 : i32
    return %arg0, %arg2 : i32, i32
  }
  func.func @transform_1(%arg0: i32, %arg1: i32, %arg2: i32) -> (i32, i32) {
    %c0_i32 = arith.constant 0 : i32
    return %arg2, %arg1 : i32, i32
  }
  func.func @transform_2(%arg0: i32, %arg1: i32, %arg2: i32) -> (i32, i32) {
    %c0_i32 = arith.constant 0 : i32
    %c0_i32_0 = arith.constant 0 : i32
    return %c0_i32, %arg1 : i32, i32
  }
  func.func @transform_3(%arg0: i32, %arg1: i32, %arg2: i32) -> (i32, i32) {
    %c0_i32 = arith.constant 0 : i32
    return %arg0, %arg1 : i32, i32
  }
}

module attributes {stable_mosaic.version = 11 : i64} {
  func.func @_attention_kernel(%arg0: i32, %arg1: i32, %arg2: i32, %arg3: memref<1x16x32xbf16, #tpu.memory_space<vmem>>, %arg4: memref<1x128x64xbf16, #tpu.memory_space<vmem>>, %arg5: memref<1x1x128xf32, #tpu.memory_space<vmem>>, %arg6: memref<1x16x32xbf16, #tpu.memory_space<vmem>>, %arg7: memref<4x16x1xf32, #tpu.memory_space<vmem>>, %arg8: memref<4x16x1xf32, #tpu.memory_space<vmem>>, %arg9: memref<4x16x8xf32, #tpu.memory_space<vmem>>) attributes {dimension_semantics = [#tpu.dimension_semantics<parallel>, #tpu.dimension_semantics<parallel>, #tpu.dimension_semantics<arbitrary>], iteration_bounds = array<i64: 1, 2, 1>, scalar_prefetch = 0 : i64, scratch_operands = 3 : i64, tpu.core_type = #tpu.core_type<tc>, window_params = [{transform_indices = @transform_0, window_bounds = array<i64: 1, 16, 32>}, {transform_indices = @transform_1, window_bounds = array<i64: 1, 128, 64>}, {transform_indices = @transform_2, window_bounds = array<i64: 1, 1, 128>}, {transform_indices = @transform_3, window_bounds = array<i64: 1, 16, 32>}]} {
    %c0_i32 = arith.constant 0 : i32
    %0 = arith.cmpi eq, %arg2, %c0_i32 : i32
    %1 = arith.extui %0 : i1 to i32
    %c0_i32_0 = arith.constant 0 : i32
    %2 = arith.cmpi ne, %1, %c0_i32_0 : i32
    scf.if %2 {
      %cst_122 = arith.constant -1.000000e+30 : f32
      %180 = vector.broadcast %cst_122 : f32 to vector<4x16x1xf32>
      %c0_123 = arith.constant 0 : index
      %c0_124 = arith.constant 0 : index
      %c0_125 = arith.constant 0 : index
      %181 = vector.load %arg7[%c0_123, %c0_124, %c0_125] : memref<4x16x1xf32, #tpu.memory_space<vmem>>, vector<4x16x1xf32>
      tpu.vector_store %arg7[%c0_123, %c0_124, %c0_125], %180 {strides = array<i32>} : memref<4x16x1xf32, #tpu.memory_space<vmem>>, vector<4x16x1xf32>,
      %cst_126 = arith.constant 0.000000e+00 : f32
      %182 = vector.broadcast %cst_126 : f32 to vector<4x16x1xf32>
      %c0_127 = arith.constant 0 : index
      %c0_128 = arith.constant 0 : index
      %c0_129 = arith.constant 0 : index
      %183 = vector.load %arg8[%c0_127, %c0_128, %c0_129] : memref<4x16x1xf32, #tpu.memory_space<vmem>>, vector<4x16x1xf32>
      tpu.vector_store %arg8[%c0_127, %c0_128, %c0_129], %182 {strides = array<i32>} : memref<4x16x1xf32, #tpu.memory_space<vmem>>, vector<4x16x1xf32>,
      %cst_130 = arith.constant 0.000000e+00 : f32
      %184 = vector.broadcast %cst_130 : f32 to vector<4x16x8xf32>
      %c0_131 = arith.constant 0 : index
      %c0_132 = arith.constant 0 : index
      %c0_133 = arith.constant 0 : index
      %185 = vector.load %arg9[%c0_131, %c0_132, %c0_133] : memref<4x16x8xf32, #tpu.memory_space<vmem>>, vector<4x16x8xf32>
      tpu.vector_store %arg9[%c0_131, %c0_132, %c0_133], %184 {strides = array<i32>} : memref<4x16x8xf32, #tpu.memory_space<vmem>>, vector<4x16x8xf32>,
    } else {
    }
    %c0 = arith.constant 0 : index
    %c0_1 = arith.constant 0 : index
    %c0_2 = arith.constant 0 : index
    %3 = vector.load %arg5[%c0, %c0_1, %c0_2] : memref<1x1x128xf32, #tpu.memory_space<vmem>>, vector<1x1x128xf32>
    %4 = vector.shape_cast %3 : vector<1x1x128xf32> to vector<1x128xf32>
    %c0_3 = arith.constant 0 : index
    %c0_4 = arith.constant 0 : index
    %c0_5 = arith.constant 0 : index
    %5 = vector.load %arg3[%c0_3, %c0_4, %c0_5] : memref<1x16x32xbf16, #tpu.memory_space<vmem>>, vector<1x16x8xbf16>
    %6 = vector.shape_cast %5 : vector<1x16x8xbf16> to vector<16x8xbf16>
    %cst = arith.constant 3.535160e-01 : bf16
    %7 = vector.broadcast %cst : bf16 to vector<16x8xbf16>
    %8 = arith.mulf %6, %7 : vector<16x8xbf16>
    %c0_6 = arith.constant 0 : index
    %c0_7 = arith.constant 0 : index
    %c0_8 = arith.constant 0 : index
    %9 = vector.load %arg4[%c0_6, %c0_7, %c0_8] : memref<1x128x64xbf16, #tpu.memory_space<vmem>>, vector<1x128x8xbf16>
    %10 = vector.shape_cast %9 : vector<1x128x8xbf16> to vector<128x8xbf16>
    %c0_9 = arith.constant 0 : index
    %c0_10 = arith.constant 0 : index
    %c32 = arith.constant 32 : index
    %11 = vector.load %arg4[%c0_9, %c0_10, %c32] : memref<1x128x64xbf16, #tpu.memory_space<vmem>>, vector<1x128x8xbf16>
    %12 = vector.shape_cast %11 : vector<1x128x8xbf16> to vector<128x8xbf16>
    %cst_11 = arith.constant dense<0.000000e+00> : vector<16x128xf32>
    %13 = tpu.matmul %8, %10, %cst_11 {dimension_numbers = #tpu.dot_dimension_numbers<[1], [1], [0], [0], [0, 0, 1, 0], [], []>} : vector<16x8xbf16>, vector<128x8xbf16>, vector<16x128xf32> -> vector<16x128xf32>
    %14 = vector.broadcast %4 : vector<1x128xf32> to vector<16x128xf32>
    %15 = arith.addf %13, %14 : vector<16x128xf32>
    %c0_12 = arith.constant 0 : index
    %c0_13 = arith.constant 0 : index
    %c0_14 = arith.constant 0 : index
    %16 = vector.load %arg7[%c0_12, %c0_13, %c0_14] : memref<4x16x1xf32, #tpu.memory_space<vmem>>, vector<1x16x1xf32>
    %17 = vector.shape_cast %16 : vector<1x16x1xf32> to vector<16x1xf32>
    %cst_15 = arith.constant dense<0xFF800000> : vector<16xf32>
    %18 = vector.multi_reduction <maximumf>, %15, %cst_15 [1] : vector<16x128xf32> to vector<16xf32>
    %19 = vector.shape_cast %18 : vector<16xf32> to vector<16x1xf32>
    %20 = arith.maximumf %17, %19 : vector<16x1xf32>
    %21 = arith.subf %17, %20 : vector<16x1xf32>
    %22 = math.exp %21 : vector<16x1xf32>
    %23 = vector.broadcast %20 : vector<16x1xf32> to vector<16x128xf32>
    %24 = arith.subf %15, %23 : vector<16x128xf32>
    %25 = math.exp %24 : vector<16x128xf32>
    %c0_16 = arith.constant 0 : index
    %c0_17 = arith.constant 0 : index
    %c0_18 = arith.constant 0 : index
    %26 = vector.load %arg8[%c0_16, %c0_17, %c0_18] : memref<4x16x1xf32, #tpu.memory_space<vmem>>, vector<1x16x1xf32>
    %27 = vector.shape_cast %26 : vector<1x16x1xf32> to vector<16x1xf32>
    %28 = arith.mulf %22, %27 : vector<16x1xf32>
    %cst_19 = arith.constant dense<0.000000e+00> : vector<16xf32>
    %29 = vector.multi_reduction <add>, %25, %cst_19 [1] : vector<16x128xf32> to vector<16xf32>
    %30 = vector.shape_cast %29 : vector<16xf32> to vector<16x1xf32>
    %31 = arith.addf %28, %30 : vector<16x1xf32>
    %c0_20 = arith.constant 0 : index
    %c0_21 = arith.constant 0 : index
    %c0_22 = arith.constant 0 : index
    %32 = vector.load %arg8[%c0_20, %c0_21, %c0_22] : memref<4x16x1xf32, #tpu.memory_space<vmem>>, vector<1x16x1xf32>
    %33 = vector.shape_cast %32 : vector<1x16x1xf32> to vector<16x1xf32>
    %34 = vector.shape_cast %31 : vector<16x1xf32> to vector<1x16x1xf32>
    tpu.vector_store %arg8[%c0_20, %c0_21, %c0_22], %34 {strides = array<i32>} : memref<4x16x1xf32, #tpu.memory_space<vmem>>, vector<1x16x1xf32>,
    %35 = arith.truncf %25 : vector<16x128xf32> to vector<16x128xbf16>
    %cst_23 = arith.constant dense<0.000000e+00> : vector<16x8xf32>
    %36 = tpu.matmul %35, %12, %cst_23 {dimension_numbers = #tpu.dot_dimension_numbers<[1], [0], [0], [1], [0, 0, 1, 1], [], []>} : vector<16x128xbf16>, vector<128x8xbf16>, vector<16x8xf32> -> vector<16x8xf32>
    %c0_24 = arith.constant 0 : index
    %c0_25 = arith.constant 0 : index
    %c0_26 = arith.constant 0 : index
    %37 = vector.load %arg9[%c0_24, %c0_25, %c0_26] : memref<4x16x8xf32, #tpu.memory_space<vmem>>, vector<1x16x8xf32>
    %38 = vector.shape_cast %37 : vector<1x16x8xf32> to vector<16x8xf32>
    %39 = vector.broadcast %22 : vector<16x1xf32> to vector<16x8xf32>
    %40 = arith.mulf %39, %38 : vector<16x8xf32>
    %41 = arith.addf %40, %36 : vector<16x8xf32>
    %c0_27 = arith.constant 0 : index
    %c0_28 = arith.constant 0 : index
    %c0_29 = arith.constant 0 : index
    %42 = vector.load %arg9[%c0_27, %c0_28, %c0_29] : memref<4x16x8xf32, #tpu.memory_space<vmem>>, vector<1x16x8xf32>
    %43 = vector.shape_cast %42 : vector<1x16x8xf32> to vector<16x8xf32>
    %44 = vector.shape_cast %41 : vector<16x8xf32> to vector<1x16x8xf32>
    tpu.vector_store %arg9[%c0_27, %c0_28, %c0_29], %44 {strides = array<i32>} : memref<4x16x8xf32, #tpu.memory_space<vmem>>, vector<1x16x8xf32>,
    %c0_30 = arith.constant 0 : index
    %c0_31 = arith.constant 0 : index
    %c0_32 = arith.constant 0 : index
    %45 = vector.load %arg7[%c0_30, %c0_31, %c0_32] : memref<4x16x1xf32, #tpu.memory_space<vmem>>, vector<1x16x1xf32>
    %46 = vector.shape_cast %45 : vector<1x16x1xf32> to vector<16x1xf32>
    %47 = vector.shape_cast %20 : vector<16x1xf32> to vector<1x16x1xf32>
    tpu.vector_store %arg7[%c0_30, %c0_31, %c0_32], %47 {strides = array<i32>} : memref<4x16x1xf32, #tpu.memory_space<vmem>>, vector<1x16x1xf32>,
    %c0_33 = arith.constant 0 : index
    %c0_34 = arith.constant 0 : index
    %c8 = arith.constant 8 : index
    %48 = vector.load %arg3[%c0_33, %c0_34, %c8] : memref<1x16x32xbf16, #tpu.memory_space<vmem>>, vector<1x16x8xbf16>
    %49 = vector.shape_cast %48 : vector<1x16x8xbf16> to vector<16x8xbf16>
    %cst_35 = arith.constant 3.535160e-01 : bf16
    %50 = vector.broadcast %cst_35 : bf16 to vector<16x8xbf16>
    %51 = arith.mulf %49, %50 : vector<16x8xbf16>
    %c0_36 = arith.constant 0 : index
    %c0_37 = arith.constant 0 : index
    %c8_38 = arith.constant 8 : index
    %52 = vector.load %arg4[%c0_36, %c0_37, %c8_38] : memref<1x128x64xbf16, #tpu.memory_space<vmem>>, vector<1x128x8xbf16>
    %53 = vector.shape_cast %52 : vector<1x128x8xbf16> to vector<128x8xbf16>
    %c0_39 = arith.constant 0 : index
    %c0_40 = arith.constant 0 : index
    %c40 = arith.constant 40 : index
    %54 = vector.load %arg4[%c0_39, %c0_40, %c40] : memref<1x128x64xbf16, #tpu.memory_space<vmem>>, vector<1x128x8xbf16>
    %55 = vector.shape_cast %54 : vector<1x128x8xbf16> to vector<128x8xbf16>
    %cst_41 = arith.constant dense<0.000000e+00> : vector<16x128xf32>
    %56 = tpu.matmul %51, %53, %cst_41 {dimension_numbers = #tpu.dot_dimension_numbers<[1], [1], [0], [0], [0, 0, 1, 0], [], []>} : vector<16x8xbf16>, vector<128x8xbf16>, vector<16x128xf32> -> vector<16x128xf32>
    %57 = vector.broadcast %4 : vector<1x128xf32> to vector<16x128xf32>
    %58 = arith.addf %56, %57 : vector<16x128xf32>
    %c1 = arith.constant 1 : index
    %c0_42 = arith.constant 0 : index
    %c0_43 = arith.constant 0 : index
    %59 = vector.load %arg7[%c1, %c0_42, %c0_43] : memref<4x16x1xf32, #tpu.memory_space<vmem>>, vector<1x16x1xf32>
    %60 = vector.shape_cast %59 : vector<1x16x1xf32> to vector<16x1xf32>
    %cst_44 = arith.constant dense<0xFF800000> : vector<16xf32>
    %61 = vector.multi_reduction <maximumf>, %58, %cst_44 [1] : vector<16x128xf32> to vector<16xf32>
    %62 = vector.shape_cast %61 : vector<16xf32> to vector<16x1xf32>
    %63 = arith.maximumf %60, %62 : vector<16x1xf32>
    %64 = arith.subf %60, %63 : vector<16x1xf32>
    %65 = math.exp %64 : vector<16x1xf32>
    %66 = vector.broadcast %63 : vector<16x1xf32> to vector<16x128xf32>
    %67 = arith.subf %58, %66 : vector<16x128xf32>
    %68 = math.exp %67 : vector<16x128xf32>
    %c1_45 = arith.constant 1 : index
    %c0_46 = arith.constant 0 : index
    %c0_47 = arith.constant 0 : index
    %69 = vector.load %arg8[%c1_45, %c0_46, %c0_47] : memref<4x16x1xf32, #tpu.memory_space<vmem>>, vector<1x16x1xf32>
    %70 = vector.shape_cast %69 : vector<1x16x1xf32> to vector<16x1xf32>
    %71 = arith.mulf %65, %70 : vector<16x1xf32>
    %cst_48 = arith.constant dense<0.000000e+00> : vector<16xf32>
    %72 = vector.multi_reduction <add>, %68, %cst_48 [1] : vector<16x128xf32> to vector<16xf32>
    %73 = vector.shape_cast %72 : vector<16xf32> to vector<16x1xf32>
    %74 = arith.addf %71, %73 : vector<16x1xf32>
    %c1_49 = arith.constant 1 : index
    %c0_50 = arith.constant 0 : index
    %c0_51 = arith.constant 0 : index
    %75 = vector.load %arg8[%c1_49, %c0_50, %c0_51] : memref<4x16x1xf32, #tpu.memory_space<vmem>>, vector<1x16x1xf32>
    %76 = vector.shape_cast %75 : vector<1x16x1xf32> to vector<16x1xf32>
    %77 = vector.shape_cast %74 : vector<16x1xf32> to vector<1x16x1xf32>
    tpu.vector_store %arg8[%c1_49, %c0_50, %c0_51], %77 {strides = array<i32>} : memref<4x16x1xf32, #tpu.memory_space<vmem>>, vector<1x16x1xf32>,
    %78 = arith.truncf %68 : vector<16x128xf32> to vector<16x128xbf16>
    %cst_52 = arith.constant dense<0.000000e+00> : vector<16x8xf32>
    %79 = tpu.matmul %78, %55, %cst_52 {dimension_numbers = #tpu.dot_dimension_numbers<[1], [0], [0], [1], [0, 0, 1, 1], [], []>} : vector<16x128xbf16>, vector<128x8xbf16>, vector<16x8xf32> -> vector<16x8xf32>
    %c1_53 = arith.constant 1 : index
    %c0_54 = arith.constant 0 : index
    %c0_55 = arith.constant 0 : index
    %80 = vector.load %arg9[%c1_53, %c0_54, %c0_55] : memref<4x16x8xf32, #tpu.memory_space<vmem>>, vector<1x16x8xf32>
    %81 = vector.shape_cast %80 : vector<1x16x8xf32> to vector<16x8xf32>
    %82 = vector.broadcast %65 : vector<16x1xf32> to vector<16x8xf32>
    %83 = arith.mulf %82, %81 : vector<16x8xf32>
    %84 = arith.addf %83, %79 : vector<16x8xf32>
    %c1_56 = arith.constant 1 : index
    %c0_57 = arith.constant 0 : index
    %c0_58 = arith.constant 0 : index
    %85 = vector.load %arg9[%c1_56, %c0_57, %c0_58] : memref<4x16x8xf32, #tpu.memory_space<vmem>>, vector<1x16x8xf32>
    %86 = vector.shape_cast %85 : vector<1x16x8xf32> to vector<16x8xf32>
    %87 = vector.shape_cast %84 : vector<16x8xf32> to vector<1x16x8xf32>
    tpu.vector_store %arg9[%c1_56, %c0_57, %c0_58], %87 {strides = array<i32>} : memref<4x16x8xf32, #tpu.memory_space<vmem>>, vector<1x16x8xf32>,
    %c1_59 = arith.constant 1 : index
    %c0_60 = arith.constant 0 : index
    %c0_61 = arith.constant 0 : index
    %88 = vector.load %arg7[%c1_59, %c0_60, %c0_61] : memref<4x16x1xf32, #tpu.memory_space<vmem>>, vector<1x16x1xf32>
    %89 = vector.shape_cast %88 : vector<1x16x1xf32> to vector<16x1xf32>
    %90 = vector.shape_cast %63 : vector<16x1xf32> to vector<1x16x1xf32>
    tpu.vector_store %arg7[%c1_59, %c0_60, %c0_61], %90 {strides = array<i32>} : memref<4x16x1xf32, #tpu.memory_space<vmem>>, vector<1x16x1xf32>,
    %c0_62 = arith.constant 0 : index
    %c0_63 = arith.constant 0 : index
    %c16 = arith.constant 16 : index
    %91 = vector.load %arg3[%c0_62, %c0_63, %c16] : memref<1x16x32xbf16, #tpu.memory_space<vmem>>, vector<1x16x8xbf16>
    %92 = vector.shape_cast %91 : vector<1x16x8xbf16> to vector<16x8xbf16>
    %cst_64 = arith.constant 3.535160e-01 : bf16
    %93 = vector.broadcast %cst_64 : bf16 to vector<16x8xbf16>
    %94 = arith.mulf %92, %93 : vector<16x8xbf16>
    %c0_65 = arith.constant 0 : index
    %c0_66 = arith.constant 0 : index
    %c16_67 = arith.constant 16 : index
    %95 = vector.load %arg4[%c0_65, %c0_66, %c16_67] : memref<1x128x64xbf16, #tpu.memory_space<vmem>>, vector<1x128x8xbf16>
    %96 = vector.shape_cast %95 : vector<1x128x8xbf16> to vector<128x8xbf16>
    %c0_68 = arith.constant 0 : index
    %c0_69 = arith.constant 0 : index
    %c48 = arith.constant 48 : index
    %97 = vector.load %arg4[%c0_68, %c0_69, %c48] : memref<1x128x64xbf16, #tpu.memory_space<vmem>>, vector<1x128x8xbf16>
    %98 = vector.shape_cast %97 : vector<1x128x8xbf16> to vector<128x8xbf16>
    %cst_70 = arith.constant dense<0.000000e+00> : vector<16x128xf32>
    %99 = tpu.matmul %94, %96, %cst_70 {dimension_numbers = #tpu.dot_dimension_numbers<[1], [1], [0], [0], [0, 0, 1, 0], [], []>} : vector<16x8xbf16>, vector<128x8xbf16>, vector<16x128xf32> -> vector<16x128xf32>
    %100 = vector.broadcast %4 : vector<1x128xf32> to vector<16x128xf32>
    %101 = arith.addf %99, %100 : vector<16x128xf32>
    %c2 = arith.constant 2 : index
    %c0_71 = arith.constant 0 : index
    %c0_72 = arith.constant 0 : index
    %102 = vector.load %arg7[%c2, %c0_71, %c0_72] : memref<4x16x1xf32, #tpu.memory_space<vmem>>, vector<1x16x1xf32>
    %103 = vector.shape_cast %102 : vector<1x16x1xf32> to vector<16x1xf32>
    %cst_73 = arith.constant dense<0xFF800000> : vector<16xf32>
    %104 = vector.multi_reduction <maximumf>, %101, %cst_73 [1] : vector<16x128xf32> to vector<16xf32>
    %105 = vector.shape_cast %104 : vector<16xf32> to vector<16x1xf32>
    %106 = arith.maximumf %103, %105 : vector<16x1xf32>
    %107 = arith.subf %103, %106 : vector<16x1xf32>
    %108 = math.exp %107 : vector<16x1xf32>
    %109 = vector.broadcast %106 : vector<16x1xf32> to vector<16x128xf32>
    %110 = arith.subf %101, %109 : vector<16x128xf32>
    %111 = math.exp %110 : vector<16x128xf32>
    %c2_74 = arith.constant 2 : index
    %c0_75 = arith.constant 0 : index
    %c0_76 = arith.constant 0 : index
    %112 = vector.load %arg8[%c2_74, %c0_75, %c0_76] : memref<4x16x1xf32, #tpu.memory_space<vmem>>, vector<1x16x1xf32>
    %113 = vector.shape_cast %112 : vector<1x16x1xf32> to vector<16x1xf32>
    %114 = arith.mulf %108, %113 : vector<16x1xf32>
    %cst_77 = arith.constant dense<0.000000e+00> : vector<16xf32>
    %115 = vector.multi_reduction <add>, %111, %cst_77 [1] : vector<16x128xf32> to vector<16xf32>
    %116 = vector.shape_cast %115 : vector<16xf32> to vector<16x1xf32>
    %117 = arith.addf %114, %116 : vector<16x1xf32>
    %c2_78 = arith.constant 2 : index
    %c0_79 = arith.constant 0 : index
    %c0_80 = arith.constant 0 : index
    %118 = vector.load %arg8[%c2_78, %c0_79, %c0_80] : memref<4x16x1xf32, #tpu.memory_space<vmem>>, vector<1x16x1xf32>
    %119 = vector.shape_cast %118 : vector<1x16x1xf32> to vector<16x1xf32>
    %120 = vector.shape_cast %117 : vector<16x1xf32> to vector<1x16x1xf32>
    tpu.vector_store %arg8[%c2_78, %c0_79, %c0_80], %120 {strides = array<i32>} : memref<4x16x1xf32, #tpu.memory_space<vmem>>, vector<1x16x1xf32>,
    %121 = arith.truncf %111 : vector<16x128xf32> to vector<16x128xbf16>
    %cst_81 = arith.constant dense<0.000000e+00> : vector<16x8xf32>
    %122 = tpu.matmul %121, %98, %cst_81 {dimension_numbers = #tpu.dot_dimension_numbers<[1], [0], [0], [1], [0, 0, 1, 1], [], []>} : vector<16x128xbf16>, vector<128x8xbf16>, vector<16x8xf32> -> vector<16x8xf32>
    %c2_82 = arith.constant 2 : index
    %c0_83 = arith.constant 0 : index
    %c0_84 = arith.constant 0 : index
    %123 = vector.load %arg9[%c2_82, %c0_83, %c0_84] : memref<4x16x8xf32, #tpu.memory_space<vmem>>, vector<1x16x8xf32>
    %124 = vector.shape_cast %123 : vector<1x16x8xf32> to vector<16x8xf32>
    %125 = vector.broadcast %108 : vector<16x1xf32> to vector<16x8xf32>
    %126 = arith.mulf %125, %124 : vector<16x8xf32>
    %127 = arith.addf %126, %122 : vector<16x8xf32>
    %c2_85 = arith.constant 2 : index
    %c0_86 = arith.constant 0 : index
    %c0_87 = arith.constant 0 : index
    %128 = vector.load %arg9[%c2_85, %c0_86, %c0_87] : memref<4x16x8xf32, #tpu.memory_space<vmem>>, vector<1x16x8xf32>
    %129 = vector.shape_cast %128 : vector<1x16x8xf32> to vector<16x8xf32>
    %130 = vector.shape_cast %127 : vector<16x8xf32> to vector<1x16x8xf32>
    tpu.vector_store %arg9[%c2_85, %c0_86, %c0_87], %130 {strides = array<i32>} : memref<4x16x8xf32, #tpu.memory_space<vmem>>, vector<1x16x8xf32>,
    %c2_88 = arith.constant 2 : index
    %c0_89 = arith.constant 0 : index
    %c0_90 = arith.constant 0 : index
    %131 = vector.load %arg7[%c2_88, %c0_89, %c0_90] : memref<4x16x1xf32, #tpu.memory_space<vmem>>, vector<1x16x1xf32>
    %132 = vector.shape_cast %131 : vector<1x16x1xf32> to vector<16x1xf32>
    %133 = vector.shape_cast %106 : vector<16x1xf32> to vector<1x16x1xf32>
    tpu.vector_store %arg7[%c2_88, %c0_89, %c0_90], %133 {strides = array<i32>} : memref<4x16x1xf32, #tpu.memory_space<vmem>>, vector<1x16x1xf32>,
    %c0_91 = arith.constant 0 : index
    %c0_92 = arith.constant 0 : index
    %c24 = arith.constant 24 : index
    %134 = vector.load %arg3[%c0_91, %c0_92, %c24] : memref<1x16x32xbf16, #tpu.memory_space<vmem>>, vector<1x16x8xbf16>
    %135 = vector.shape_cast %134 : vector<1x16x8xbf16> to vector<16x8xbf16>
    %cst_93 = arith.constant 3.535160e-01 : bf16
    %136 = vector.broadcast %cst_93 : bf16 to vector<16x8xbf16>
    %137 = arith.mulf %135, %136 : vector<16x8xbf16>
    %c0_94 = arith.constant 0 : index
    %c0_95 = arith.constant 0 : index
    %c24_96 = arith.constant 24 : index
    %138 = vector.load %arg4[%c0_94, %c0_95, %c24_96] : memref<1x128x64xbf16, #tpu.memory_space<vmem>>, vector<1x128x8xbf16>
    %139 = vector.shape_cast %138 : vector<1x128x8xbf16> to vector<128x8xbf16>
    %c0_97 = arith.constant 0 : index
    %c0_98 = arith.constant 0 : index
    %c56 = arith.constant 56 : index
    %140 = vector.load %arg4[%c0_97, %c0_98, %c56] : memref<1x128x64xbf16, #tpu.memory_space<vmem>>, vector<1x128x8xbf16>
    %141 = vector.shape_cast %140 : vector<1x128x8xbf16> to vector<128x8xbf16>
    %cst_99 = arith.constant dense<0.000000e+00> : vector<16x128xf32>
    %142 = tpu.matmul %137, %139, %cst_99 {dimension_numbers = #tpu.dot_dimension_numbers<[1], [1], [0], [0], [0, 0, 1, 0], [], []>} : vector<16x8xbf16>, vector<128x8xbf16>, vector<16x128xf32> -> vector<16x128xf32>
    %143 = vector.broadcast %4 : vector<1x128xf32> to vector<16x128xf32>
    %144 = arith.addf %142, %143 : vector<16x128xf32>
    %c3 = arith.constant 3 : index
    %c0_100 = arith.constant 0 : index
    %c0_101 = arith.constant 0 : index
    %145 = vector.load %arg7[%c3, %c0_100, %c0_101] : memref<4x16x1xf32, #tpu.memory_space<vmem>>, vector<1x16x1xf32>
    %146 = vector.shape_cast %145 : vector<1x16x1xf32> to vector<16x1xf32>
    %cst_102 = arith.constant dense<0xFF800000> : vector<16xf32>
    %147 = vector.multi_reduction <maximumf>, %144, %cst_102 [1] : vector<16x128xf32> to vector<16xf32>
    %148 = vector.shape_cast %147 : vector<16xf32> to vector<16x1xf32>
    %149 = arith.maximumf %146, %148 : vector<16x1xf32>
    %150 = arith.subf %146, %149 : vector<16x1xf32>
    %151 = math.exp %150 : vector<16x1xf32>
    %152 = vector.broadcast %149 : vector<16x1xf32> to vector<16x128xf32>
    %153 = arith.subf %144, %152 : vector<16x128xf32>
    %154 = math.exp %153 : vector<16x128xf32>
    %c3_103 = arith.constant 3 : index
    %c0_104 = arith.constant 0 : index
    %c0_105 = arith.constant 0 : index
    %155 = vector.load %arg8[%c3_103, %c0_104, %c0_105] : memref<4x16x1xf32, #tpu.memory_space<vmem>>, vector<1x16x1xf32>
    %156 = vector.shape_cast %155 : vector<1x16x1xf32> to vector<16x1xf32>
    %157 = arith.mulf %151, %156 : vector<16x1xf32>
    %cst_106 = arith.constant dense<0.000000e+00> : vector<16xf32>
    %158 = vector.multi_reduction <add>, %154, %cst_106 [1] : vector<16x128xf32> to vector<16xf32>
    %159 = vector.shape_cast %158 : vector<16xf32> to vector<16x1xf32>
    %160 = arith.addf %157, %159 : vector<16x1xf32>
    %c3_107 = arith.constant 3 : index
    %c0_108 = arith.constant 0 : index
    %c0_109 = arith.constant 0 : index
    %161 = vector.load %arg8[%c3_107, %c0_108, %c0_109] : memref<4x16x1xf32, #tpu.memory_space<vmem>>, vector<1x16x1xf32>
    %162 = vector.shape_cast %161 : vector<1x16x1xf32> to vector<16x1xf32>
    %163 = vector.shape_cast %160 : vector<16x1xf32> to vector<1x16x1xf32>
    tpu.vector_store %arg8[%c3_107, %c0_108, %c0_109], %163 {strides = array<i32>} : memref<4x16x1xf32, #tpu.memory_space<vmem>>, vector<1x16x1xf32>,
    %164 = arith.truncf %154 : vector<16x128xf32> to vector<16x128xbf16>
    %cst_110 = arith.constant dense<0.000000e+00> : vector<16x8xf32>
    %165 = tpu.matmul %164, %141, %cst_110 {dimension_numbers = #tpu.dot_dimension_numbers<[1], [0], [0], [1], [0, 0, 1, 1], [], []>} : vector<16x128xbf16>, vector<128x8xbf16>, vector<16x8xf32> -> vector<16x8xf32>
    %c3_111 = arith.constant 3 : index
    %c0_112 = arith.constant 0 : index
    %c0_113 = arith.constant 0 : index
    %166 = vector.load %arg9[%c3_111, %c0_112, %c0_113] : memref<4x16x8xf32, #tpu.memory_space<vmem>>, vector<1x16x8xf32>
    %167 = vector.shape_cast %166 : vector<1x16x8xf32> to vector<16x8xf32>
    %168 = vector.broadcast %151 : vector<16x1xf32> to vector<16x8xf32>
    %169 = arith.mulf %168, %167 : vector<16x8xf32>
    %170 = arith.addf %169, %165 : vector<16x8xf32>
    %c3_114 = arith.constant 3 : index
    %c0_115 = arith.constant 0 : index
    %c0_116 = arith.constant 0 : index
    %171 = vector.load %arg9[%c3_114, %c0_115, %c0_116] : memref<4x16x8xf32, #tpu.memory_space<vmem>>, vector<1x16x8xf32>
    %172 = vector.shape_cast %171 : vector<1x16x8xf32> to vector<16x8xf32>
    %173 = vector.shape_cast %170 : vector<16x8xf32> to vector<1x16x8xf32>
    tpu.vector_store %arg9[%c3_114, %c0_115, %c0_116], %173 {strides = array<i32>} : memref<4x16x8xf32, #tpu.memory_space<vmem>>, vector<1x16x8xf32>,
    %c3_117 = arith.constant 3 : index
    %c0_118 = arith.constant 0 : index
    %c0_119 = arith.constant 0 : index
    %174 = vector.load %arg7[%c3_117, %c0_118, %c0_119] : memref<4x16x1xf32, #tpu.memory_space<vmem>>, vector<1x16x1xf32>
    %175 = vector.shape_cast %174 : vector<1x16x1xf32> to vector<16x1xf32>
    %176 = vector.shape_cast %149 : vector<16x1xf32> to vector<1x16x1xf32>
    tpu.vector_store %arg7[%c3_117, %c0_118, %c0_119], %176 {strides = array<i32>} : memref<4x16x1xf32, #tpu.memory_space<vmem>>, vector<1x16x1xf32>,
    %c0_i32_120 = arith.constant 0 : i32
    %177 = arith.cmpi eq, %arg2, %c0_i32_120 : i32
    %178 = arith.extui %177 : i1 to i32
    %c0_i32_121 = arith.constant 0 : i32
    %179 = arith.cmpi ne, %178, %c0_i32_121 : i32
    scf.if %179 {
      %c0_122 = arith.constant 0 : index
      %c0_123 = arith.constant 0 : index
      %c0_124 = arith.constant 0 : index
      %180 = vector.load %arg8[%c0_122, %c0_123, %c0_124] : memref<4x16x1xf32, #tpu.memory_space<vmem>>, vector<1x16x1xf32>
      %181 = vector.shape_cast %180 : vector<1x16x1xf32> to vector<16x1xf32>
      %182 = tpu.reciprocal %181 {approx = true} : vector<16x1xf32> -> vector<16x1xf32>
      %c0_125 = arith.constant 0 : index
      %c0_126 = arith.constant 0 : index
      %c0_127 = arith.constant 0 : index
      %183 = vector.load %arg9[%c0_125, %c0_126, %c0_127] : memref<4x16x8xf32, #tpu.memory_space<vmem>>, vector<1x16x8xf32>
      %184 = vector.shape_cast %183 : vector<1x16x8xf32> to vector<16x8xf32>
      %185 = vector.broadcast %182 : vector<16x1xf32> to vector<16x8xf32>
      %186 = arith.mulf %184, %185 : vector<16x8xf32>
      %187 = arith.truncf %186 : vector<16x8xf32> to vector<16x8xbf16>
      %c0_128 = arith.constant 0 : index
      %c0_129 = arith.constant 0 : index
      %c0_130 = arith.constant 0 : index
      %188 = vector.load %arg6[%c0_128, %c0_129, %c0_130] : memref<1x16x32xbf16, #tpu.memory_space<vmem>>, vector<1x16x8xbf16>
      %189 = vector.shape_cast %188 : vector<1x16x8xbf16> to vector<16x8xbf16>
      %190 = vector.shape_cast %187 : vector<16x8xbf16> to vector<1x16x8xbf16>
      tpu.vector_store %arg6[%c0_128, %c0_129, %c0_130], %190 {strides = array<i32>} : memref<1x16x32xbf16, #tpu.memory_space<vmem>>, vector<1x16x8xbf16>,
      %c1_131 = arith.constant 1 : index
      %c0_132 = arith.constant 0 : index
      %c0_133 = arith.constant 0 : index
      %191 = vector.load %arg8[%c1_131, %c0_132, %c0_133] : memref<4x16x1xf32, #tpu.memory_space<vmem>>, vector<1x16x1xf32>
      %192 = vector.shape_cast %191 : vector<1x16x1xf32> to vector<16x1xf32>
      %193 = tpu.reciprocal %192 {approx = true} : vector<16x1xf32> -> vector<16x1xf32>
      %c1_134 = arith.constant 1 : index
      %c0_135 = arith.constant 0 : index
      %c0_136 = arith.constant 0 : index
      %194 = vector.load %arg9[%c1_134, %c0_135, %c0_136] : memref<4x16x8xf32, #tpu.memory_space<vmem>>, vector<1x16x8xf32>
      %195 = vector.shape_cast %194 : vector<1x16x8xf32> to vector<16x8xf32>
      %196 = vector.broadcast %193 : vector<16x1xf32> to vector<16x8xf32>
      %197 = arith.mulf %195, %196 : vector<16x8xf32>
      %198 = arith.truncf %197 : vector<16x8xf32> to vector<16x8xbf16>
      %c0_137 = arith.constant 0 : index
      %c0_138 = arith.constant 0 : index
      %c8_139 = arith.constant 8 : index
      %199 = vector.load %arg6[%c0_137, %c0_138, %c8_139] : memref<1x16x32xbf16, #tpu.memory_space<vmem>>, vector<1x16x8xbf16>
      %200 = vector.shape_cast %199 : vector<1x16x8xbf16> to vector<16x8xbf16>
      %201 = vector.shape_cast %198 : vector<16x8xbf16> to vector<1x16x8xbf16>
      tpu.vector_store %arg6[%c0_137, %c0_138, %c8_139], %201 {strides = array<i32>} : memref<1x16x32xbf16, #tpu.memory_space<vmem>>, vector<1x16x8xbf16>,
      %c2_140 = arith.constant 2 : index
      %c0_141 = arith.constant 0 : index
      %c0_142 = arith.constant 0 : index
      %202 = vector.load %arg8[%c2_140, %c0_141, %c0_142] : memref<4x16x1xf32, #tpu.memory_space<vmem>>, vector<1x16x1xf32>
      %203 = vector.shape_cast %202 : vector<1x16x1xf32> to vector<16x1xf32>
      %204 = tpu.reciprocal %203 {approx = true} : vector<16x1xf32> -> vector<16x1xf32>
      %c2_143 = arith.constant 2 : index
      %c0_144 = arith.constant 0 : index
      %c0_145 = arith.constant 0 : index
      %205 = vector.load %arg9[%c2_143, %c0_144, %c0_145] : memref<4x16x8xf32, #tpu.memory_space<vmem>>, vector<1x16x8xf32>
      %206 = vector.shape_cast %205 : vector<1x16x8xf32> to vector<16x8xf32>
      %207 = vector.broadcast %204 : vector<16x1xf32> to vector<16x8xf32>
      %208 = arith.mulf %206, %207 : vector<16x8xf32>
      %209 = arith.truncf %208 : vector<16x8xf32> to vector<16x8xbf16>
      %c0_146 = arith.constant 0 : index
      %c0_147 = arith.constant 0 : index
      %c16_148 = arith.constant 16 : index
      %210 = vector.load %arg6[%c0_146, %c0_147, %c16_148] : memref<1x16x32xbf16, #tpu.memory_space<vmem>>, vector<1x16x8xbf16>
      %211 = vector.shape_cast %210 : vector<1x16x8xbf16> to vector<16x8xbf16>
      %212 = vector.shape_cast %209 : vector<16x8xbf16> to vector<1x16x8xbf16>
      tpu.vector_store %arg6[%c0_146, %c0_147, %c16_148], %212 {strides = array<i32>} : memref<1x16x32xbf16, #tpu.memory_space<vmem>>, vector<1x16x8xbf16>,
      %c3_149 = arith.constant 3 : index
      %c0_150 = arith.constant 0 : index
      %c0_151 = arith.constant 0 : index
      %213 = vector.load %arg8[%c3_149, %c0_150, %c0_151] : memref<4x16x1xf32, #tpu.memory_space<vmem>>, vector<1x16x1xf32>
      %214 = vector.shape_cast %213 : vector<1x16x1xf32> to vector<16x1xf32>
      %215 = tpu.reciprocal %214 {approx = true} : vector<16x1xf32> -> vector<16x1xf32>
      %c3_152 = arith.constant 3 : index
      %c0_153 = arith.constant 0 : index
      %c0_154 = arith.constant 0 : index
      %216 = vector.load %arg9[%c3_152, %c0_153, %c0_154] : memref<4x16x8xf32, #tpu.memory_space<vmem>>, vector<1x16x8xf32>
      %217 = vector.shape_cast %216 : vector<1x16x8xf32> to vector<16x8xf32>
      %218 = vector.broadcast %215 : vector<16x1xf32> to vector<16x8xf32>
      %219 = arith.mulf %217, %218 : vector<16x8xf32>
      %220 = arith.truncf %219 : vector<16x8xf32> to vector<16x8xbf16>
      %c0_155 = arith.constant 0 : index
      %c0_156 = arith.constant 0 : index
      %c24_157 = arith.constant 24 : index
      %221 = vector.load %arg6[%c0_155, %c0_156, %c24_157] : memref<1x16x32xbf16, #tpu.memory_space<vmem>>, vector<1x16x8xbf16>
      %222 = vector.shape_cast %221 : vector<1x16x8xbf16> to vector<16x8xbf16>
      %223 = vector.shape_cast %220 : vector<16x8xbf16> to vector<1x16x8xbf16>
      tpu.vector_store %arg6[%c0_155, %c0_156, %c24_157], %223 {strides = array<i32>} : memref<1x16x32xbf16, #tpu.memory_space<vmem>>, vector<1x16x8xbf16>,
    } else {
    }
    return
  }
  func.func @transform_0(%arg0: i32, %arg1: i32, %arg2: i32) -> (i32, i32, i32) {
    %c0_i32 = arith.constant 0 : i32
    %c0_i32_0 = arith.constant 0 : i32
    return %arg1, %arg0, %c0_i32 : i32, i32, i32
  }
  func.func @transform_1(%arg0: i32, %arg1: i32, %arg2: i32) -> (i32, i32, i32) {
    %c0_i32 = arith.constant 0 : i32
    %c0_i32_0 = arith.constant 0 : i32
    return %arg1, %arg2, %c0_i32 : i32, i32, i32
  }
  func.func @transform_2(%arg0: i32, %arg1: i32, %arg2: i32) -> (i32, i32, i32) {
    %c0_i32 = arith.constant 0 : i32
    %c0_i32_0 = arith.constant 0 : i32
    return %arg1, %c0_i32, %arg2 : i32, i32, i32
  }
  func.func @transform_3(%arg0: i32, %arg1: i32, %arg2: i32) -> (i32, i32, i32) {
    %c0_i32 = arith.constant 0 : i32
    %c0_i32_0 = arith.constant 0 : i32
    return %arg1, %arg0, %c0_i32 : i32, i32, i32
  }
}

module attributes {stable_mosaic.version = 11 : i64} {
  func.func @_ln_matmul_kernel(%arg0: i32, %arg1: i32, %arg2: i32, %arg3: memref<1x16x32xbf16, #tpu.memory_space<vmem>>, %arg4: memref<1x1x32xf32, #tpu.memory_space<vmem>>, %arg5: memref<1x1x32xf32, #tpu.memory_space<vmem>>, %arg6: memref<32x128xbf16, #tpu.memory_space<vmem>>, %arg7: memref<1x128xf32, #tpu.memory_space<vmem>>, %arg8: memref<1x16x128xbf16, #tpu.memory_space<vmem>>) attributes {dimension_semantics = [#tpu.dimension_semantics<parallel>, #tpu.dimension_semantics<parallel>, #tpu.dimension_semantics<parallel>], iteration_bounds = array<i64: 2, 1, 1>, scalar_prefetch = 0 : i64, scratch_operands = 0 : i64, tpu.core_type = #tpu.core_type<tc>, window_params = [{transform_indices = @transform_0, window_bounds = array<i64: 1, 16, 32>}, {transform_indices = @transform_1, window_bounds = array<i64: 1, 1, 32>}, {transform_indices = @transform_2, window_bounds = array<i64: 1, 1, 32>}, {transform_indices = @transform_3, window_bounds = array<i64: 32, 128>}, {transform_indices = @transform_4, window_bounds = array<i64: 1, 128>}, {transform_indices = @transform_5, window_bounds = array<i64: 1, 16, 128>}]} {
    %c0 = arith.constant 0 : index
    %c0_0 = arith.constant 0 : index
    %c0_1 = arith.constant 0 : index
    %0 = vector.load %arg3[%c0, %c0_0, %c0_1] : memref<1x16x32xbf16, #tpu.memory_space<vmem>>, vector<1x16x32xbf16>
    %1 = vector.shape_cast %0 : vector<1x16x32xbf16> to vector<16x32xbf16>
    %2 = arith.extf %1 : vector<16x32xbf16> to vector<16x32xf32>
    %cst = arith.constant dense<0.000000e+00> : vector<16xf32>
    %3 = vector.multi_reduction <add>, %2, %cst [1] : vector<16x32xf32> to vector<16xf32>
    %4 = vector.shape_cast %3 : vector<16xf32> to vector<16x1xf32>
    %cst_2 = arith.constant 3.200000e+01 : f32
    %5 = vector.broadcast %cst_2 : f32 to vector<16x1xf32>
    %6 = arith.divf %4, %5 : vector<16x1xf32>
    %7 = vector.broadcast %6 : vector<16x1xf32> to vector<16x32xf32>
    %8 = arith.subf %2, %7 : vector<16x32xf32>
    %9 = arith.mulf %8, %8 : vector<16x32xf32>
    %cst_3 = arith.constant dense<0.000000e+00> : vector<16xf32>
    %10 = vector.multi_reduction <add>, %9, %cst_3 [1] : vector<16x32xf32> to vector<16xf32>
    %11 = vector.shape_cast %10 : vector<16xf32> to vector<16x1xf32>
    %cst_4 = arith.constant 3.200000e+01 : f32
    %12 = vector.broadcast %cst_4 : f32 to vector<16x1xf32>
    %13 = arith.divf %11, %12 : vector<16x1xf32>
    %cst_5 = arith.constant 9.99999974E-6 : f32
    %14 = vector.broadcast %cst_5 : f32 to vector<16x1xf32>
    %15 = arith.addf %13, %14 : vector<16x1xf32>
    %16 = math.rsqrt %15 : vector<16x1xf32>
    %17 = vector.broadcast %16 : vector<16x1xf32> to vector<16x32xf32>
    %18 = arith.mulf %8, %17 : vector<16x32xf32>
    %c0_6 = arith.constant 0 : index
    %c0_7 = arith.constant 0 : index
    %c0_8 = arith.constant 0 : index
    %19 = vector.load %arg4[%c0_6, %c0_7, %c0_8] : memref<1x1x32xf32, #tpu.memory_space<vmem>>, vector<1x1x32xf32>
    %20 = vector.shape_cast %19 : vector<1x1x32xf32> to vector<1x32xf32>
    %21 = vector.broadcast %20 : vector<1x32xf32> to vector<16x32xf32>
    %22 = arith.mulf %18, %21 : vector<16x32xf32>
    %c0_9 = arith.constant 0 : index
    %c0_10 = arith.constant 0 : index
    %c0_11 = arith.constant 0 : index
    %23 = vector.load %arg5[%c0_9, %c0_10, %c0_11] : memref<1x1x32xf32, #tpu.memory_space<vmem>>, vector<1x1x32xf32>
    %24 = vector.shape_cast %23 : vector<1x1x32xf32> to vector<1x32xf32>
    %25 = vector.broadcast %24 : vector<1x32xf32> to vector<16x32xf32>
    %26 = arith.addf %22, %25 : vector<16x32xf32>
    %27 = arith.truncf %26 : vector<16x32xf32> to vector<16x32xbf16>
    %c0_12 = arith.constant 0 : index
    %c0_13 = arith.constant 0 : index
    %28 = vector.load %arg6[%c0_12, %c0_13] : memref<32x128xbf16, #tpu.memory_space<vmem>>, vector<32x128xbf16>
    %cst_14 = arith.constant dense<0.000000e+00> : vector<16x128xf32>
    %29 = tpu.matmul %27, %28, %cst_14 {dimension_numbers = #tpu.dot_dimension_numbers<[1], [0], [0], [1], [0, 0, 1, 1], [], []>} : vector<16x32xbf16>, vector<32x128xbf16>, vector<16x128xf32> -> vector<16x128xf32>
    %c0_15 = arith.constant 0 : index
    %c0_16 = arith.constant 0 : index
    %30 = vector.load %arg7[%c0_15, %c0_16] : memref<1x128xf32, #tpu.memory_space<vmem>>, vector<1x128xf32>
    %31 = vector.broadcast %30 : vector<1x128xf32> to vector<16x128xf32>
    %32 = arith.addf %29, %31 : vector<16x128xf32>
    %33 = arith.mulf %32, %32 : vector<16x128xf32>
    %34 = arith.mulf %32, %33 : vector<16x128xf32>
    %cst_17 = arith.constant 4.471500e-02 : f32
    %35 = vector.broadcast %cst_17 : f32 to vector<16x128xf32>
    %36 = arith.mulf %35, %34 : vector<16x128xf32>
    %37 = arith.addf %32, %36 : vector<16x128xf32>
    %cst_18 = arith.constant 0.797884583 : f32
    %38 = vector.broadcast %cst_18 : f32 to vector<16x128xf32>
    %39 = arith.mulf %38, %37 : vector<16x128xf32>
    %40 = math.tanh %39 : vector<16x128xf32>
    %cst_19 = arith.constant 1.000000e+00 : f32
    %41 = vector.broadcast %cst_19 : f32 to vector<16x128xf32>
    %42 = arith.addf %41, %40 : vector<16x128xf32>
    %cst_20 = arith.constant 5.000000e-01 : f32
    %43 = vector.broadcast %cst_20 : f32 to vector<16x128xf32>
    %44 = arith.mulf %43, %42 : vector<16x128xf32>
    %45 = arith.mulf %32, %44 : vector<16x128xf32>
    %46 = arith.truncf %45 : vector<16x128xf32> to vector<16x128xbf16>
    %c0_21 = arith.constant 0 : index
    %c0_22 = arith.constant 0 : index
    %c0_23 = arith.constant 0 : index
    %47 = vector.load %arg8[%c0_21, %c0_22, %c0_23] : memref<1x16x128xbf16, #tpu.memory_space<vmem>>, vector<1x16x128xbf16>
    %48 = vector.shape_cast %47 : vector<1x16x128xbf16> to vector<16x128xbf16>
    %49 = vector.shape_cast %46 : vector<16x128xbf16> to vector<1x16x128xbf16>
    tpu.vector_store %arg8[%c0_21, %c0_22, %c0_23], %49 {strides = array<i32>} : memref<1x16x128xbf16, #tpu.memory_space<vmem>>, vector<1x16x128xbf16>,
    return
  }
  func.func @transform_0(%arg0: i32, %arg1: i32, %arg2: i32) -> (i32, i32, i32) {
    %c0_i32 = arith.constant 0 : i32
    %c0_i32_0 = arith.constant 0 : i32
    return %arg0, %arg1, %c0_i32 : i32, i32, i32
  }
  func.func @transform_1(%arg0: i32, %arg1: i32, %arg2: i32) -> (i32, i32, i32) {
    %c0_i32 = arith.constant 0 : i32
    %c0_i32_0 = arith.constant 0 : i32
    %c0_i32_1 = arith.constant 0 : i32
    return %arg0, %c0_i32, %c0_i32_0 : i32, i32, i32
  }
  func.func @transform_2(%arg0: i32, %arg1: i32, %arg2: i32) -> (i32, i32, i32) {
    %c0_i32 = arith.constant 0 : i32
    %c0_i32_0 = arith.constant 0 : i32
    %c0_i32_1 = arith.constant 0 : i32
    return %arg0, %c0_i32, %c0_i32_0 : i32, i32, i32
  }
  func.func @transform_3(%arg0: i32, %arg1: i32, %arg2: i32) -> (i32, i32) {
    %c0_i32 = arith.constant 0 : i32
    %c0_i32_0 = arith.constant 0 : i32
    return %c0_i32, %arg2 : i32, i32
  }
  func.func @transform_4(%arg0: i32, %arg1: i32, %arg2: i32) -> (i32, i32) {
    %c0_i32 = arith.constant 0 : i32
    %c0_i32_0 = arith.constant 0 : i32
    return %c0_i32, %arg2 : i32, i32
  }
  func.func @transform_5(%arg0: i32, %arg1: i32, %arg2: i32) -> (i32, i32, i32) {
    %c0_i32 = arith.constant 0 : i32
    return %arg0, %arg1, %arg2 : i32, i32, i32
  }
}

module attributes {stable_mosaic.version = 11 : i64} {
  func.func @_final_conv_kernel(%arg0: i32, %arg1: memref<32x32xbf16, #tpu.memory_space<vmem>>, %arg2: memref<1x32xf32, #tpu.memory_space<vmem>>, %arg3: memref<1x32xf32, #tpu.memory_space<vmem>>, %arg4: memref<1x32xf32, #tpu.memory_space<vmem>>, %arg5: memref<32x128xbf16, #tpu.memory_space<vmem>>, %arg6: memref<1x128xf32, #tpu.memory_space<vmem>>, %arg7: memref<32x128xf32, #tpu.memory_space<vmem>>) attributes {dimension_semantics = [#tpu.dimension_semantics<parallel>], iteration_bounds = array<i64: 1>, scalar_prefetch = 0 : i64, scratch_operands = 0 : i64, tpu.core_type = #tpu.core_type<tc>, window_params = [{transform_indices = @transform_0, window_bounds = array<i64: 32, 32>}, {pipeline_mode = #tpu.pipeline_mode<synchronous>, transform_indices = @transform_1, window_bounds = array<i64: 1, 32>}, {pipeline_mode = #tpu.pipeline_mode<synchronous>, transform_indices = @transform_2, window_bounds = array<i64: 1, 32>}, {pipeline_mode = #tpu.pipeline_mode<synchronous>, transform_indices = @transform_3, window_bounds = array<i64: 1, 32>}, {pipeline_mode = #tpu.pipeline_mode<synchronous>, transform_indices = @transform_4, window_bounds = array<i64: 32, 128>}, {pipeline_mode = #tpu.pipeline_mode<synchronous>, transform_indices = @transform_5, window_bounds = array<i64: 1, 128>}, {transform_indices = @transform_6, window_bounds = array<i64: 32, 128>}]} {
    %c0 = arith.constant 0 : index
    %c0_0 = arith.constant 0 : index
    %0 = vector.load %arg1[%c0, %c0_0] : memref<32x32xbf16, #tpu.memory_space<vmem>>, vector<32x32xbf16>
    %1 = arith.extf %0 : vector<32x32xbf16> to vector<32x32xf32>
    %cst = arith.constant dense<0.000000e+00> : vector<32xf32>
    %2 = vector.multi_reduction <add>, %1, %cst [1] : vector<32x32xf32> to vector<32xf32>
    %3 = vector.shape_cast %2 : vector<32xf32> to vector<32x1xf32>
    %cst_1 = arith.constant 3.200000e+01 : f32
    %4 = vector.broadcast %cst_1 : f32 to vector<32x1xf32>
    %5 = arith.divf %3, %4 : vector<32x1xf32>
    %6 = vector.broadcast %5 : vector<32x1xf32> to vector<32x32xf32>
    %7 = arith.subf %1, %6 : vector<32x32xf32>
    %8 = arith.mulf %7, %7 : vector<32x32xf32>
    %cst_2 = arith.constant dense<0.000000e+00> : vector<32xf32>
    %9 = vector.multi_reduction <add>, %8, %cst_2 [1] : vector<32x32xf32> to vector<32xf32>
    %10 = vector.shape_cast %9 : vector<32xf32> to vector<32x1xf32>
    %cst_3 = arith.constant 3.200000e+01 : f32
    %11 = vector.broadcast %cst_3 : f32 to vector<32x1xf32>
    %12 = arith.divf %10, %11 : vector<32x1xf32>
    %cst_4 = arith.constant 9.99999974E-6 : f32
    %13 = vector.broadcast %cst_4 : f32 to vector<32x1xf32>
    %14 = arith.addf %12, %13 : vector<32x1xf32>
    %15 = math.rsqrt %14 : vector<32x1xf32>
    %16 = vector.broadcast %15 : vector<32x1xf32> to vector<32x32xf32>
    %17 = arith.mulf %7, %16 : vector<32x32xf32>
    %c0_5 = arith.constant 0 : index
    %c0_6 = arith.constant 0 : index
    %18 = vector.load %arg2[%c0_5, %c0_6] : memref<1x32xf32, #tpu.memory_space<vmem>>, vector<1x32xf32>
    %19 = vector.broadcast %18 : vector<1x32xf32> to vector<32x32xf32>
    %20 = arith.mulf %17, %19 : vector<32x32xf32>
    %c0_7 = arith.constant 0 : index
    %c0_8 = arith.constant 0 : index
    %21 = vector.load %arg3[%c0_7, %c0_8] : memref<1x32xf32, #tpu.memory_space<vmem>>, vector<1x32xf32>
    %22 = vector.broadcast %21 : vector<1x32xf32> to vector<32x32xf32>
    %23 = arith.addf %20, %22 : vector<32x32xf32>
    %24 = arith.mulf %23, %23 : vector<32x32xf32>
    %cst_9 = arith.constant dense<0.000000e+00> : vector<32xf32>
    %25 = vector.multi_reduction <add>, %24, %cst_9 [1] : vector<32x32xf32> to vector<32xf32>
    %26 = vector.shape_cast %25 : vector<32xf32> to vector<32x1xf32>
    %27 = math.sqrt %26 : vector<32x1xf32>
    %cst_10 = arith.constant 9.99999996E-13 : f32
    %28 = vector.broadcast %cst_10 : f32 to vector<32x1xf32>
    %29 = arith.maximumf %27, %28 : vector<32x1xf32>
    %30 = vector.broadcast %29 : vector<32x1xf32> to vector<32x32xf32>
    %31 = arith.divf %23, %30 : vector<32x32xf32>
    %c0_11 = arith.constant 0 : index
    %c0_12 = arith.constant 0 : index
    %32 = vector.load %arg4[%c0_11, %c0_12] : memref<1x32xf32, #tpu.memory_space<vmem>>, vector<1x32xf32>
    %33 = vector.broadcast %32 : vector<1x32xf32> to vector<32x32xf32>
    %34 = arith.mulf %31, %33 : vector<32x32xf32>
    %cst_13 = arith.constant 5.65685415 : f32
    %35 = vector.broadcast %cst_13 : f32 to vector<32x32xf32>
    %36 = arith.mulf %34, %35 : vector<32x32xf32>
    %37 = arith.negf %36 : vector<32x32xf32>
    %38 = math.exp %37 : vector<32x32xf32>
    %cst_14 = arith.constant 1.000000e+00 : f32
    %39 = vector.broadcast %cst_14 : f32 to vector<32x32xf32>
    %40 = arith.addf %39, %38 : vector<32x32xf32>
    %41 = arith.divf %39, %40 : vector<32x32xf32>
    %42 = arith.mulf %36, %41 : vector<32x32xf32>
    %43 = arith.truncf %42 : vector<32x32xf32> to vector<32x32xbf16>
    %c0_15 = arith.constant 0 : index
    %c0_16 = arith.constant 0 : index
    %44 = vector.load %arg5[%c0_15, %c0_16] : memref<32x128xbf16, #tpu.memory_space<vmem>>, vector<32x128xbf16>
    %cst_17 = arith.constant dense<0.000000e+00> : vector<32x128xf32>
    %45 = tpu.matmul %43, %44, %cst_17 {dimension_numbers = #tpu.dot_dimension_numbers<[1], [0], [0], [1], [0, 0, 1, 1], [], []>} : vector<32x32xbf16>, vector<32x128xbf16>, vector<32x128xf32> -> vector<32x128xf32>
    %c0_18 = arith.constant 0 : index
    %c0_19 = arith.constant 0 : index
    %46 = vector.load %arg6[%c0_18, %c0_19] : memref<1x128xf32, #tpu.memory_space<vmem>>, vector<1x128xf32>
    %47 = vector.broadcast %46 : vector<1x128xf32> to vector<32x128xf32>
    %48 = arith.addf %45, %47 : vector<32x128xf32>
    %c0_20 = arith.constant 0 : index
    %c0_21 = arith.constant 0 : index
    %49 = vector.load %arg7[%c0_20, %c0_21] : memref<32x128xf32, #tpu.memory_space<vmem>>, vector<32x128xf32>
    tpu.vector_store %arg7[%c0_20, %c0_21], %48 {strides = array<i32>} : memref<32x128xf32, #tpu.memory_space<vmem>>, vector<32x128xf32>,
    return
  }
  func.func @transform_0(%arg0: i32) -> (i32, i32) {
    %c0_i32 = arith.constant 0 : i32
    %c0_i32_0 = arith.constant 0 : i32
    return %arg0, %c0_i32 : i32, i32
  }
  func.func @transform_1(%arg0: i32) -> (i32, i32) {
    %c0_i32 = arith.constant 0 : i32
    %c0_i32_0 = arith.constant 0 : i32
    %c0_i32_1 = arith.constant 0 : i32
    return %c0_i32, %c0_i32_0 : i32, i32
  }
  func.func @transform_2(%arg0: i32) -> (i32, i32) {
    %c0_i32 = arith.constant 0 : i32
    %c0_i32_0 = arith.constant 0 : i32
    %c0_i32_1 = arith.constant 0 : i32
    return %c0_i32, %c0_i32_0 : i32, i32
  }
  func.func @transform_3(%arg0: i32) -> (i32, i32) {
    %c0_i32 = arith.constant 0 : i32
    %c0_i32_0 = arith.constant 0 : i32
    %c0_i32_1 = arith.constant 0 : i32
    return %c0_i32, %c0_i32_0 : i32, i32
  }
  func.func @transform_4(%arg0: i32) -> (i32, i32) {
    %c0_i32 = arith.constant 0 : i32
    %c0_i32_0 = arith.constant 0 : i32
    %c0_i32_1 = arith.constant 0 : i32
    return %c0_i32, %c0_i32_0 : i32, i32
  }
  func.func @transform_5(%arg0: i32) -> (i32, i32) {
    %c0_i32 = arith.constant 0 : i32
    %c0_i32_0 = arith.constant 0 : i32
    %c0_i32_1 = arith.constant 0 : i32
    return %c0_i32, %c0_i32_0 : i32, i32
  }
  func.func @transform_6(%arg0: i32) -> (i32, i32) {
    %c0_i32 = arith.constant 0 : i32
    %c0_i32_0 = arith.constant 0 : i32
    return %arg0, %c0_i32 : i32, i32
  }
}

</mosaic_0001>

<bundles_post_ra>
// kernel: transformer_wrapper_forward.20
= control target key start
LH: loop header
LB: loop body
LE: loop exit
PB: predicated region body
PF: predicated region fallthrough
CT: control target
= control target key end

     0   :  { %8 = vsyncpa [#allocation4], 0  ;;  %s520_s0 = inlined_call_operand.hbm [shape: bf16[32,128], index: 0, kind: input, shape index: {}]   ;;  %s521_s1 = inlined_call_operand.hbm [shape: bf16[128,128], index: 1, kind: input, shape index: {}]   ;;  %s522_s2 = inlined_call_operand.hbm [shape: f32[1,128], index: 2, kind: input, shape index: {}]   ;;  %s523_s3 = inlined_call_operand.hbm [shape: bf16[32,128], index: 3, kind: output, shape index: {}]  }
   0x1   :  { %9 = vsyncpa [#allocation7], 0 }
   0x2   :  { %10 = vsyncpa [#allocation5], 0  ;;  %s430_s12 = smov [#allocation6]   ;;  %s431_s14 = smov [#allocation3]  }
   0x3   :  { %s28_s13 = sshll.u32 %s430_s12, 4  ;;  %s16_s15 = sshll.u32 %s431_s14, 4  ;;  %s29_s13 = int_to_ptr.vmem [resolvable:$true] %s28_s13  ;;  %s456_s15 = int_to_ptr.vmem [resolvable:$true] %s16_s15 }
   0x4   :  { %s336_s18 = scalar_lea.hbm %s521_s1, 1024 }
   0x5   :  { %p337_p0 = scmp.ne.s32.totalorder %s521_s1, %s336_s18  ;;  %p340_p1 = scmp.lt.u32.totalorder %s336_s18, %s521_s1 }
   0x7   :  { %p342_p2 = pnand %p340_p1, %p337_p0 }
   0x9   :  { %345 = shalt.err (!%p342_p2)
}
   0xa   :  { %s346_s23 = scalar_lea.vmem %s29_s13, 1024  ;;  %p351_p4 = scmp.lt.s32.totalorder %s29_s13, %s29_s13 }
   0xb   :  { %p347_p3 = scmp.ne.s32.totalorder %s29_s13, %s346_s23  ;;  %p352_p5 = scmp.lt.s32.totalorder %s346_s23, %s346_s23 }
   0xd   :  { %p353_p6 = por %p352_p5, %p351_p4 }
   0xf   :  { %p354_p7 = pnand %p353_p6, %p347_p3 }
  0x11   :  { %357 = shalt.err (!%p354_p7)
}
  0x12   :  { %s432_s24 = smov 64   ;;  %s433_s25 = smov 4  }
  0x13   :  { %34 = dma.hbm_to_vmem [thread:$0]  %s521_s1, 1024, %s29_s13, [#allocation7], %s432_s24, %s432_s24, %s433_s25  }
  0x14   :  { %s358_s30 = scalar_lea.hbm %s520_s0, 256 }
  0x15   :  { %p359_p8 = scmp.ne.s32.totalorder %s520_s0, %s358_s30  ;;  %p362_p9 = scmp.lt.u32.totalorder %s358_s30, %s520_s0 }
  0x17   :  { %p364_p10 = pnand %p362_p9, %p359_p8 }
  0x19   :  { %367 = shalt.err (!%p364_p10)
}
  0x1a   :  { %s368_s8 = scalar_lea.vmem %s456_s15, 256  ;;  %p373_p12 = scmp.lt.s32.totalorder %s456_s15, %s456_s15 }
  0x1b   :  { %p369_p11 = scmp.ne.s32.totalorder %s456_s15, %s368_s8  ;;  %p374_p13 = scmp.lt.s32.totalorder %s368_s8, %s368_s8 }
  0x1d   :  { %p375_p0 = por %p374_p13, %p373_p12 }
  0x1f   :  { %p376_p1 = pnand %p375_p0, %p369_p11 }
  0x21   :  { %379 = shalt.err (!%p376_p1)
}
  0x22   :  { %22 = dma.hbm_to_vmem [thread:$0]  %s520_s0, 256, %s456_s15, [#allocation4], %s432_s24, %s432_s24, %s433_s25  }
  0x23   :  { %s434_s10 = smov [#allocation8]   ;;  %s380_s14 = scalar_lea.hbm %s522_s2, 16 }
  0x24   :  { %s41_s11 = sshll.u32 %s434_s10, 4  ;;  %p381_p2 = scmp.ne.s32.totalorder %s522_s2, %s380_s14  ;;  %s42_s11 = int_to_ptr.vmem [resolvable:$true] %s41_s11 }
  0x25   :  { %p384_p3 = scmp.lt.u32.totalorder %s380_s14, %s522_s2 }
  0x27   :  { %p386_p4 = pnand %p384_p3, %p381_p2 }
  0x29   :  { %389 = shalt.err (!%p386_p4)
}
  0x2a   :  { %s390_s20 = scalar_lea.vmem %s42_s11, 16  ;;  %s394_s0 = scalar_lea.vmem %s42_s11, 32 }
  0x2b   :  { %p391_p5 = scmp.ne.s32.totalorder %s42_s11, %s390_s20  ;;  %p395_p6 = scmp.lt.s32.totalorder %s42_s11, %s42_s11 }
  0x2c   :  { %p396_p7 = scmp.lt.s32.totalorder %s394_s0, %s390_s20 }
  0x2e   :  { %p397_p8 = por %p396_p7, %p395_p6 }
  0x30   :  { %p398_p9 = pnand %p397_p8, %p391_p5 }
  0x32   :  { %401 = shalt.err (!%p398_p9)
}
  0x33   :  { %44 = dma.hbm_to_vmem [thread:$0]  %s522_s2, 16, %s42_s11, [#allocation7]  }
  0x34   :  { %424 = dma.done.wait [#allocation4], 256  }
  0x35   :  { %425 = vsyncadd [#allocation4], 4294967040 }
  0x36   :  { %426 = dma.done.wait [#allocation7], 1040  }
  0x37   :  { %427 = vsyncadd [#allocation7], 4294966256  ;;  %v326_v0 = vld [vmem:[#allocation6] sm:$0xff]   ;;  %v327_v1 = vld [vmem:[#allocation6 + $0x8] sm:$0xff]   ;;  %s435_s2 = smov [#allocation9]  }
  0x38   :  { %300 = vmatprep.subr.bf16.mxu0 %v326_v0  ;;  %v328_v2 = vld [vmem:[#allocation6 + $0x10] sm:$0xff]   ;;  %v329_v3 = vld [vmem:[#allocation6 + $0x18] sm:$0xff]   ;;  %v330_v5 = vld [vmem:[#allocation6 + $0x20] sm:$0xff]   ;;  %s247_s22 = sshll.u32 %s435_s2, 4  ;;  %s248_s22 = int_to_ptr.vmem [resolvable:$true] %s247_s22 }
  0x39   :  { %301 = vmatpush3.bf16.msra.mxu0 %v326_v0  ;;  %v334_v4 = vld [vmem:[#allocation3] sm:$0xff]   ;;  %v331_v6 = vld [vmem:[#allocation6 + $0x28] sm:$0xff]   ;;  %v333_v8 = vld [vmem:[#allocation6 + $0x38] sm:$0xff]   ;;  %s402_s23 = scalar_lea.vmem %s248_s22, 256  ;;  %p407_p11 = scmp.lt.s32.totalorder %s248_s22, %s248_s22 }
  0x3a   :  { %302 = vmatprep.subr.bf16.mxu0 %v327_v1  ;;  %316 = vmatprep.mubr.bf16.mxu0 %v334_v4  ;;  %v332_v7 = vld [vmem:[#allocation6 + $0x30] sm:$0xff]   ;;  %v335_v9 = vld [vmem:[#allocation3 + $0x8] sm:$0xff]   ;;  %v270_v11 = vld [vmem:[#allocation8] ss:$0 sm:$0xff]  ;;  %p403_p10 = scmp.ne.s32.totalorder %s248_s22, %s402_s23  ;;  %p408_p12 = scmp.lt.s32.totalorder %s402_s23, %s402_s23 }
  0x3c   :  { %p409_p13 = por %p408_p12, %p407_p11 }
  0x3d   :  { %303 = vmatpush3.bf16.msra.mxu0 %v327_v1 }
  0x3e   :  { %304 = vmatprep.subr.bf16.mxu0 %v328_v2  ;;  %p410_p0 = pnand %p409_p13, %p403_p10 }
  0x41   :  { %305 = vmatpush3.bf16.msra.mxu0 %v328_v2 }
  0x42   :  { %306 = vmatprep.subr.bf16.mxu0 %v329_v3 }
  0x45   :  { %307 = vmatpush3.bf16.msra.mxu0 %v329_v3 }
  0x46   :  { %308 = vmatprep.subr.bf16.mxu0 %v330_v5 }
  0x49   :  { %309 = vmatpush3.bf16.msra.mxu0 %v330_v5 }
  0x4a   :  { %310 = vmatprep.subr.bf16.mxu0 %v331_v6 }
  0x4d   :  { %311 = vmatpush3.bf16.msra.mxu0 %v331_v6 }
  0x4e   :  { %312 = vmatprep.subr.bf16.mxu0 %v332_v7 }
  0x51   :  { %313 = vmatpush3.bf16.msra.mxu0 %v332_v7 }
  0x52   :  { %314 = vmatprep.subr.bf16.mxu0 %v333_v8 }
  0x55   :  { %315 = vmatpush3.bf16.msra.mxu0 %v333_v8 }
  0x58   :  { %317 = vmatmul.mubr.bf16.vlgmr.msra.gmra.mrb[0].mxu0 %v335_v9 }
 0x12b   :  { %v318_v10 = vpop.f32.mrb[0].mxu0 }
 0x12c   :  { %v181_v12 = vpop.f32.mrb[1].mxu0  ;;  %v220_v14 = vadd.f32 %v318_v10, %v270_v11 }
 0x12d   :  { %v319_v13 = vpop.f32.mrb[2].mxu0  ;;  %v218_v17 = vadd.f32 %v270_v11, %v181_v12 }
 0x12e   :  { %v221_v15 = vadd.f32 %v319_v13, %v270_v11  ;;  %v184_v16 = vpop.f32.mrb[3].mxu0 }
 0x12f   :  { %v219_v18 = vadd.f32 %v270_v11, %v184_v16 }
 0x130   :  { %v287_v19 = vpack.c.bf16 %v221_v15, %v220_v14 }
 0x131   :  { %v282_v20 = vpack.c.bf16 %v219_v18, %v218_v17 }
 0x132   :  { %289 = vst [vmem:[#allocation9 + $0x8] sm:$0xff] %v287_v19  }
 0x133   :  { %283 = vst [vmem:[#allocation9] sm:$0xff] %v282_v20  }
 0x134   :  { %413 = shalt.err (!%p410_p0)
}
 0x135   :  { %s414_s28 = scalar_lea.hbm %s523_s3, 256 }
 0x136   :  { %p415_p1 = scmp.ne.s32.totalorder %s523_s3, %s414_s28  ;;  %p418_p2 = scmp.lt.u32.totalorder %s414_s28, %s523_s3 }
 0x138   :  { %p420_p3 = pnand %p418_p2, %p415_p1 }
 0x13a   :  { %423 = shalt.err (!%p420_p3)
}
 0x13b   :  { %253 = dma.vmem_to_hbm [thread:$0]  %s248_s22, 256, %s523_s3, [#allocation5], %s432_s24, %s432_s24, %s433_s25  }
 0x13c   :  { %428 = dma.done.wait [#allocation5], 256  }
 0x13d   :  { %429 = vsyncadd [#allocation5], 4294967040 }
 0x13e   :  { %257 = vsyncpa [#allocation4], 1 }
 0x13f   :  { %258 = vsyncpa [#allocation7], 1 }
 0x140   :  { %259 = vsyncpa [#allocation5], 1 }

// kernel: transformer_wrapper_forward.21
= control target key start
LH: loop header
LB: loop body
LE: loop exit
PB: predicated region body
PF: predicated region fallthrough
CT: control target
= control target key end

     0   :  { %s1441_s0 = inlined_call_operand.hbm [shape: bf16[2,16,32], index: 0, kind: input, shape index: {}]   ;;  %s1442_s1 = inlined_call_operand.hbm [shape: f32[2,1,32], index: 1, kind: input, shape index: {}]   ;;  %s1443_s2 = inlined_call_operand.hbm [shape: f32[2,1,32], index: 2, kind: input, shape index: {}]   ;;  %s1444_s3 = inlined_call_operand.hbm [shape: bf16[32,128], index: 3, kind: input, shape index: {}]   ;;  %s1445_s4 = inlined_call_operand.hbm [shape: f32[1,128], index: 4, kind: input, shape index: {}]   ;;  %s1446_s5 = inlined_call_operand.hbm [shape: bf16[2,16,128], index: 5, kind: output, shape index: {}]  }
   0x1   :  { %1463 = sst [smem:[#allocation19_spill]] %s1442_s1 }
   0x2   :  { %1464 = sst [smem:[#allocation20_spill]] %s1444_s3 }
   0x3   :  { %10 = vsyncpa [#allocation3], 0 }
   0x4   :  { %12 = vsyncpa [#allocation3 + $0x1], 0 }
   0x5   :  { %13 = vsyncpa [#allocation6], 0 }
   0x6   :  { %15 = vsyncpa [#allocation6 + $0x1], 0 }
   0x7   :  { %16 = vsyncpa [#allocation9], 0 }
   0x8   :  { %17 = vsyncpa [#allocation4], 0 }
   0x9   :  { %19 = vsyncpa [#allocation4 + $0x1], 0  ;;  %s1113_s18 = smov 0   ;;  %s1115_s19 = smov 0  }
   0xa   :  { %s1117_s20 = smov 0   ;;  %s1119_s21 = smov 0  }
   0xb   :  { %s1121_s22 = smov 0   ;;  %s1123_s23 = smov 0  }
   0xc LB: > { %1465 = sst [smem:[#allocation16_spill]] %s1057_s20  ;;  %s1144_s24 = sadd.s32 4294967295, %s1069_s23   ;;  %s1069_s23 = sphi %s1123_s23, %s25_s23   ;;  %s1065_s22 = sphi %s1121_s22, %s1500_s22   ;;  %s1061_s21 = sphi %s1119_s21, %s1499_s21   ;;  %s1057_s20 = sphi %s1117_s20, %s1495_s20   ;;  %s1053_s19 = sphi %s1115_s19, %s1498_s19   ;;  %s1049_s18 = sphi %s1113_s18, %s1497_s18  }
   0xd   : > { %s676_s25 = sadd.s32 4294967294, %s1069_s23   ;;  %p66_p0 = scmp.ne.s32.totalorder %s1053_s19, %s1049_s18 }
   0xe   : > { %p1447_p1 = scmp.eq.s32.totalorder %s1144_s24, 0  ;;  %p204_p3 = scmp.eq.s32.totalorder %s676_s25, 1 }
   0xf   : > { %p677_p5 = scmp.ge.s32.totalorder %s1069_s23, 1  ;;  %p211_p7 = scmp.lt.s32.totalorder %s1069_s23, 3 }
  0x10   : > { %p1153_p4 = por %p1447_p1, %p66_p0  ;;  %p1158_p6 = por %p204_p3, %p66_p0 }
  0x11   : > { %p1163_p8 = pnand %p677_p5, %p211_p7  ;;  %s1071_s29 = smov [#allocation8]  }
  0x12   : > { %s1466_s26 = scalar_select %p1153_p4, 1, 0 }
  0x13   : > { %s1467_s27 = scalar_select %p1158_p6, 1, 0 }
  0x14   : > { %s1468_s28 = scalar_select %p1163_p8, 1, 0 }
  0x15   : > { %s225_s30 = sshll.u32 %s1071_s29, 4  ;;  %p744_p9 = pneg %p1163_p8  ;;  %s226_s30 = int_to_ptr.vmem [resolvable:$true] %s225_s30 }
  0x16   : > { %s44_s7 = sadd.s32 1, %s1065_s22  ;;  %s1470_s3 = sld [smem:[#allocation20_spill]] }
  0x17   : > { %p1172_p11 = pnand %p744_p9, %p1447_p1 }
  0x19   : > { %s1469_s6 = scalar_select %p1172_p11, 1, 0 }
  0x1a   : > { %p1454_p13 = pneg %p1172_p11 }
  0x1c   : > { %s833_s10 = scalar_lea.hbm %s1470_s3, 256 }
  0x1d   : > { %p834_p12 = scmp.ne.s32.totalorder %s1470_s3, %s833_s10  ;;  %p840_p5 = scmp.lt.u32.totalorder %s833_s10, %s1470_s3 }
  0x1f   : > { %p836_p0 = pnand %p1454_p13, %p834_p12 }
  0x21   : > { %p837_p3 = pneg %p836_p0 }
  0x23   : > { %p842_p7 = pnand %p840_p5, %p837_p3 }
  0x25   : > { %845 = shalt.err (!%p842_p7)
}
  0x26   : > { %s846_s15 = scalar_lea.vmem %s226_s30, 256  ;;  %p854_p2 = scmp.lt.s32.totalorder %s226_s30, %s226_s30 }
  0x27   : > { %p847_p9 = scmp.ne.s32.totalorder %s226_s30, %s846_s15  ;;  %p855_p6 = scmp.lt.s32.totalorder %s846_s15, %s846_s15 }
  0x29   : > { %p849_p10 = pnand %p847_p9, %p1454_p13  ;;  %p856_p4 = por %p855_p6, %p854_p2 }
  0x2b   : > { %p850_p1 = pneg %p849_p10 }
  0x2d   : > { %p857_p8 = pnand %p856_p4, %p850_p1 }
  0x2f   : > { %860 = shalt.err (!%p857_p8)
}
  0x30   : > { %s1450_s16 = smov 64   ;;  %s1451_s17 = smov 4  }
  0x31   : > { %747 = dma.hbm_to_vmem [thread:$0]  (!%p1172_p11), %s1470_s3, 256, %s226_s30, [#allocation9], %s1450_s16, %s1450_s16, %s1451_s17  }
  0x32   : > { %p46_p1 = scmp.ge.s32.totalorder %s44_s7, 2  ;;  %s53_s8 = sadd.s32 1, %s1057_s20 }
  0x33   : > { %p60_p2 = scmp.ne.s32.totalorder %s1057_s20, %s1053_s19  ;;  %p61_p4 = scmp.eq.s32.totalorder %s1069_s23, 0 }
  0x34   : > { %s1502_s7 = smov (%p46_p1, %s44_s7), 0  ;;  %p1472_p8 = scmp.eq.s32.totalorder %s1144_s24, 1 }
  0x35   : > { %1471 = sst [smem:[#allocation17_spill]] %s1502_s7  ;;  %p62_p6 = por %p61_p4, %p60_p2 }
  0x36   : > { %p1210_p10 = por %p1472_p8, %p60_p2  ;;  %s48_s10 = ssub.s32 %s1065_s22, %s1502_s7 }
  0x37   : > { %p767_p12 = scmp.lt.s32.totalorder %s1069_s23, 2  ;;  %p51_p0 = scmp.eq.s32.totalorder %s48_s10, 0 }
  0x38   : > { %s1473_s9 = scalar_select %p1210_p10, 1, 0 }
  0x39   : > { %s1218_s11 = sand.u32 1, %s1057_s20   ;;  %p1220_p3 = pnand %p767_p12, %p62_p6 }
  0x3a   : > { %s275_s12 = sand.u32 1, %s1069_s23   ;;  %s1452_s14 = sshll.u32 %s1065_s22, 4 }
  0x3b   : > { %s1474_s30 = scalar_select %p1220_p3, 1, 0 }
  0x3c   : > { %s1226_s13 = scalar_select %p51_p0, %s1057_s20, %s53_s8  }
  0x3d   : > { %s1476_s1 = sld [smem:[#allocation19_spill]]  ;;  %s278_s10 = scalar_lea.vmem [#allocation5], %s1218_s11 }
  0x3e   : > { %1475 = sst [smem:[#allocation18_spill]] %s1226_s13  ;;  %s285_s16 = sshll.u32 %s278_s10, 4  ;;  %s1237_s16 = int_to_ptr.vmem [resolvable:$true] %s285_s16 }
  0x3f   : > { %s1239_s17 = scalar_lea.sflag [#allocation6], %s275_s12  ;;  %p1245_p7 = pneg %p1220_p3 }
  0x41   : > { %s1477_s8 = scalar_select %p1245_p7, 1, 0 }
  0x43   : > { %s1234_s29 = scalar_lea.hbm %s1476_s1, %s1452_s14  ;;  %s866_s14 = scalar_lea.hbm %s1476_s1, 32 }
  0x44   : > { %s861_s3 = scalar_lea.hbm %s1234_s29, 16  ;;  %p867_p2 = scmp.lt.u32.totalorder %s1234_s29, %s1476_s1 }
  0x45   : > { %p862_p5 = scmp.ne.s32.totalorder %s1234_s29, %s861_s3  ;;  %p868_p4 = scmp.lt.u32.totalorder %s866_s14, %s861_s3 }
  0x46   : > { %p870_p8 = scmp.lt.u32.totalorder %s861_s3, %s1234_s29 }
  0x47   : > { %p864_p9 = pnand %p1245_p7, %p862_p5  ;;  %p869_p6 = por %p868_p4, %p867_p2 }
  0x49   : > { %p865_p1 = pneg %p864_p9  ;;  %p871_p12 = por %p870_p8, %p869_p6 }
  0x4b   : > { %p872_p0 = pnand %p871_p12, %p865_p1 }
  0x4d   : > { %875 = shalt.err (!%p872_p0)
}
  0x4e   : > { %s876_s12 = scalar_lea.vmem %s1237_s16, 16  ;;  %s1074_s15 = smov [#allocation5]  }
  0x4f   : > { %p877_p5 = scmp.ne.s32.totalorder %s1237_s16, %s876_s12  ;;  %s881_s25 = sshll.u32 %s1074_s15, 4  ;;  %s882_s25 = int_to_ptr.vmem [resolvable:$false] %s881_s25 }
  0x50   : > { %s883_s7 = scalar_lea.vmem %s882_s25, 32  ;;  %p884_p10 = scmp.lt.s32.totalorder %s1237_s16, %s882_s25 }
  0x51   : > { %p879_p9 = pnand %p877_p5, %p1245_p7  ;;  %p885_p11 = scmp.lt.s32.totalorder %s883_s7, %s876_s12 }
  0x53   : > { %p880_p13 = pneg %p879_p9  ;;  %p886_p2 = por %p885_p11, %p884_p10 }
  0x55   : > { %p887_p4 = pnand %p886_p2, %p880_p13 }
  0x57   : > { %890 = shalt.err (!%p887_p4)
}
  0x58   : > { %757 = dma.hbm_to_vmem [thread:$0]  (!%p1220_p3), %s1234_s29, 16, %s1237_s16, %s1239_s17  }
  0x59   : > { %s1075_s3 = smov [#allocation10]   ;;  %s681_s10 = sshll.u32 %s1218_s11, 3 }
  0x5a   : > { %s241_s14 = sshll.u32 %s1075_s3, 4  ;;  %s891_s25 = scalar_lea.hbm %s1445_s4, 16  ;;  %s242_s14 = int_to_ptr.vmem [resolvable:$true] %s241_s14 }
  0x5b   : > { %p892_p11 = scmp.ne.s32.totalorder %s1445_s4, %s891_s25  ;;  %p1478_p13 = scmp.ne.s32.totalorder %s1469_s6, 0 }
  0x5c   : > { %p898_p8 = scmp.lt.u32.totalorder %s891_s25, %s1445_s4 }
  0x5d   : > { %p1479_p10 = pneg %p1478_p13 }
  0x5f   : > { %p894_p1 = pnand %p892_p11, %p1479_p10 }
  0x61   : > { %p895_p6 = pneg %p894_p1 }
  0x63   : > { %p900_p12 = pnand %p898_p8, %p895_p6 }
  0x65   : > { %903 = shalt.err (!%p900_p12)
}
  0x66   : > { %s904_s16 = scalar_lea.vmem %s242_s14, 16  ;;  %p1480_p5 = pmov %p1479_p10 }
  0x67   : > { %p905_p0 = scmp.ne.s32.totalorder %s242_s14, %s904_s16  ;;  %s911_s1 = scalar_lea.vmem %s242_s14, 32 }
  0x68   : > { %p912_p4 = scmp.lt.s32.totalorder %s242_s14, %s242_s14  ;;  %p913_p3 = scmp.lt.s32.totalorder %s911_s1, %s904_s16 }
  0x69   : > { %p907_p9 = pnand %p905_p0, %p1480_p5 }
  0x6a   : > { %p914_p7 = por %p913_p3, %p912_p4 }
  0x6b   : > { %p908_p2 = pneg %p907_p9 }
  0x6d   : > { %p915_p10 = pnand %p914_p7, %p908_p2 }
  0x6f   : > { %918 = shalt.err (!%p915_p10)
}
  0x70   : > { %750 = dma.hbm_to_vmem [thread:$0]  (!%p1478_p13), %s1445_s4, 16, %s242_s14, [#allocation9]  }
  0x71   : > { %s704_s13 = sshll.u32 %s1065_s22, 7  ;;  %s256_s3 = scalar_lea.vmem [#allocation2], %s681_s10 }
  0x72   : > { %s265_s15 = sshll.u32 %s256_s3, 4  ;;  %s1294_s7 = scalar_lea.hbm %s1441_s0, %s704_s13  ;;  %s1296_s15 = int_to_ptr.vmem [resolvable:$true] %s265_s15 }
  0x73   : > { %s253_s6 = scalar_lea.sflag [#allocation3], %s1218_s11  ;;  %s919_s16 = scalar_lea.hbm %s1294_s7, 128 }
  0x74   : > { %p920_p3 = scmp.ne.s32.totalorder %s1294_s7, %s919_s16  ;;  %p1481_p7 = scmp.ne.s32.totalorder %s1477_s8, 0 }
  0x75   : > { %s924_s1 = scalar_lea.hbm %s1441_s0, 256  ;;  %p925_p1 = scmp.lt.u32.totalorder %s1294_s7, %s1441_s0 }
  0x76   : > { %p922_p11 = pnand %p920_p3, %p1481_p7  ;;  %p926_p6 = scmp.lt.u32.totalorder %s924_s1, %s919_s16 }
  0x77   : > { %p928_p12 = scmp.lt.u32.totalorder %s919_s16, %s1294_s7 }
  0x78   : > { %p923_p13 = pneg %p922_p11  ;;  %p927_p8 = por %p926_p6, %p925_p1 }
  0x7a   : > { %p929_p0 = por %p928_p12, %p927_p8 }
  0x7c   : > { %p930_p5 = pnand %p929_p0, %p923_p13 }
  0x7e   : > { %933 = shalt.err (!%p930_p5)
}
  0x7f   : > { %s934_s13 = scalar_lea.vmem %s1296_s15, 128  ;;  %s1076_s3 = smov [#allocation2]  }
  0x80   : > { %p935_p9 = scmp.ne.s32.totalorder %s1296_s15, %s934_s13  ;;  %s939_s25 = sshll.u32 %s1076_s3, 4  ;;  %s940_s25 = int_to_ptr.vmem [resolvable:$false] %s939_s25 }
  0x81   : > { %s941_s12 = scalar_lea.vmem %s940_s25, 256  ;;  %p942_p10 = scmp.lt.s32.totalorder %s1296_s15, %s940_s25 }
  0x82   : > { %p937_p2 = pnand %p935_p9, %p1481_p7  ;;  %p943_p3 = scmp.lt.s32.totalorder %s941_s12, %s934_s13 }
  0x84   : > { %p938_p4 = pneg %p937_p2  ;;  %p944_p11 = por %p943_p3, %p942_p10 }
  0x86   : > { %p945_p1 = pnand %p944_p11, %p938_p4 }
  0x88   : > { %948 = shalt.err (!%p945_p1)
}
  0x89   : > { %p1482_p13 = scmp.ne.s32.totalorder %s1474_s30, 0  ;;  %s1483_s16 = smov 4  }
  0x8a   : > { %s1484_s14 = smov 64   ;;  %s1485_s10 = sshll.u32 %s1065_s22, 4 }
  0x8b   : > { %754 = dma.hbm_to_vmem [thread:$0]  (!%p1482_p13), %s1294_s7, 128, %s1296_s15, %s253_s6, %s1484_s14, %s1484_s14, %s1483_s16  }
  0x8c   : > { %s1330_s20 = scalar_lea.hbm %s1443_s2, %s1485_s10  ;;  %s295_s13 = scalar_lea.vmem [#allocation7], %s1218_s11 }
  0x8d   : > { %s302_s3 = sshll.u32 %s295_s13, 4  ;;  %s949_s25 = scalar_lea.hbm %s1330_s20, 16  ;;  %s303_s3 = int_to_ptr.vmem [resolvable:$true] %s302_s3 }
  0x8e   : > { %p950_p6 = scmp.ne.s32.totalorder %s1330_s20, %s949_s25  ;;  %s954_s7 = scalar_lea.hbm %s1443_s2, 32 }
  0x8f   : > { %p955_p0 = scmp.lt.u32.totalorder %s1330_s20, %s1443_s2  ;;  %p956_p5 = scmp.lt.u32.totalorder %s954_s7, %s949_s25 }
  0x90   : > { %p952_p8 = pnand %p950_p6, %p1481_p7  ;;  %p958_p2 = scmp.lt.u32.totalorder %s949_s25, %s1330_s20 }
  0x91   : > { %p957_p9 = por %p956_p5, %p955_p0 }
  0x92   : > { %p953_p12 = pneg %p952_p8 }
  0x93   : > { %p959_p4 = por %p958_p2, %p957_p9 }
  0x95   : > { %p960_p10 = pnand %p959_p4, %p953_p12 }
  0x97   : > { %963 = shalt.err (!%p960_p10)
}
  0x98   : > { %s964_s11 = scalar_lea.vmem %s303_s3, 16  ;;  %s1077_s14 = smov [#allocation7]  }
  0x99   : > { %p965_p3 = scmp.ne.s32.totalorder %s303_s3, %s964_s11  ;;  %s969_s10 = sshll.u32 %s1077_s14, 4  ;;  %s970_s10 = int_to_ptr.vmem [resolvable:$false] %s969_s10 }
  0x9a   : > { %s971_s1 = scalar_lea.vmem %s970_s10, 32  ;;  %p972_p6 = scmp.lt.s32.totalorder %s303_s3, %s970_s10 }
  0x9b   : > { %p967_p11 = pnand %p965_p3, %p1481_p7  ;;  %p973_p8 = scmp.lt.s32.totalorder %s971_s1, %s964_s11 }
  0x9d   : > { %p968_p1 = pneg %p967_p11  ;;  %p974_p13 = por %p973_p8, %p972_p6 }
  0x9f   : > { %p975_p0 = pnand %p974_p13, %p968_p1 }
  0xa1   : > { %978 = shalt.err (!%p975_p0)
}
  0xa2   : > { %p1486_p5 = scmp.ne.s32.totalorder %s1474_s30, 0  ;;  %p1487_p12 = scmp.ne.s32.totalorder %s1468_s28, 0 }
  0xa3   : > { %s1354_s8 = sand.u32 (!%p1487_p12), 1, %s1053_s19   ;;  %p1488_p7 = scmp.ne.s32.totalorder (!%p1487_p12), %s1466_s26, 0 }
  0xa4   : > { %760 = dma.hbm_to_vmem [thread:$0]  (!%p1486_p5), %s1330_s20, 16, %s303_s3, %s1239_s17  }
  0xa5   : > { %311 = sbr.rel (%p1487_p12) target bundleno = 734 (0x2de), region = 40  ;;  %s687_s29 = sshll.u32 (!%p1487_p12), %s1354_s8, 3 }
  0xa6   : > { %s314_s13 = scalar_lea.sflag (!%p1487_p12), [#allocation3], %s1354_s8  ;;  %s317_s25 = scalar_lea.vmem (!%p1487_p12), [#allocation2], %s687_s29 }
  0xac   : > { %1032 = dma.done.wait (%p1488_p7), %s314_s13, 128  }
  0xad   : > { %1034 = vsyncadd (%p1488_p7), %s314_s13, 4294967168  ;;  %s322_s28 = sand.u32 1, %s1144_s24   ;;  %s325_s30 = scalar_lea.vmem [#allocation5], %s1354_s8 }
  0xae   : > { %s323_s17 = scalar_lea.sflag [#allocation6], %s322_s28 }
  0xaf   : > { %1036 = dma.done.wait (%p1488_p7), %s323_s17, 32  }
  0xb0   : > { %1038 = vsyncadd (%p1488_p7), %s323_s17, 4294967264  ;;  %s333_s20 = scalar_lea.vmem [#allocation7], %s1354_s8  ;;  %p1489_p13 = scmp.eq.s32.totalorder %s1144_s24, 0 }
  0xb2   : > { %1040 = dma.done.wait (%p1489_p13), [#allocation9], 272   ;;  %p1490_p9 = pmov %p1489_p13 }
  0xb3   : > { %v709_v0 = vld [vmem:[%s317_s25] sm:$0xff]   ;;  %vm383_vm0 = vcmask 261120   ;;  %v827_v15 = vld [vmem:[#allocation8] sm:$0xff]   ;;  %v1078_v16 = vmov 0.0   ;;  %vm1079_vm1 = vmmov 0   ;;  %s375_s24 = scalar_lea.vmem [#allocation11], %s687_s29 }
  0xb4   : > { %1042 = vsyncadd (%p1490_p9), [#allocation9], 4294967024  ;;  %v710_v1 = vunpack.c.l.bf16 %v709_v0  ;;  %v711_v2 = vunpack.c.h.bf16 %v709_v0  ;;  %720 = vmatprep.subr.bf16.mxu0 %v1078_v16  ;;  %v828_v17 = vld [vmem:[#allocation8 + $0x8] sm:$0xff]   ;;  %724 = vmatprep.mubr.msk.bf16.mxu0 %vm1079_vm1, %v1078_v16  ;;  %v693_v35 = vld [vmem:[#allocation10] ss:$0 sm:$0xff]  ;;  %s524_s26 = sshll.u32 %s375_s24, 4  ;;  %s1387_s26 = int_to_ptr.vmem [resolvable:$true] %s524_s26 }
  0xb5   : > { %721 = vmatpush3.bf16.msra.mxu0 %v827_v15  ;;  %v691_v26 = vld [vmem:[%s325_s30] ss:$0 sm:$0xff]  ;;  %s707_s3 = sshll.u32 %s1061_s21, 7  ;;  %s508_s6 = scalar_lea.sflag [#allocation4], %s1354_s8 }
  0xb6   : > { %v384_v3 = vsel %vm383_vm0, %v710_v1, 0.0  ;;  %v387_v4 = vsel %vm383_vm0, %v711_v2, 0.0  ;;  %722 = vmatprep.subr.bf16.mxu0 %v1078_v16  ;;  %v692_v30 = vld [vmem:[%s333_s20] ss:$0 sm:$0xff]  ;;  %s1392_s7 = scalar_lea.hbm %s1446_s5, %s707_s3  ;;  %s979_s16 = scalar_lea.vmem %s1387_s26, 128 }
  0xb7   : > { %385 = vadd.xlane.f32.xlu0 %v384_v3  ;;  %p980_p2 = scmp.ne.s32.totalorder %s1387_s26, %s979_s16  ;;  %p1491_p4 = scmp.ne.s32.totalorder %s1473_s9, 0 }
  0xb8   : > { %s1080_s21 = smov [#allocation11]  }
  0xb9   : > { %723 = vmatpush3.bf16.msra.mxu0 %v828_v17  ;;  %p981_p10 = pnand %p980_p2, %p1491_p4  ;;  %s983_s11 = sshll.u32 %s1080_s21, 4  ;;  %s984_s11 = int_to_ptr.vmem [resolvable:$false] %s983_s11 }
  0xba   : > { %s985_s14 = scalar_lea.vmem %s984_s11, 256  ;;  %p986_p11 = scmp.lt.s32.totalorder %s1387_s26, %s984_s11 }
  0xbb   : > { %388 = vadd.xlane.f32.xlu0 %v387_v4  ;;  %p982_p3 = pneg %p981_p10  ;;  %p987_p1 = scmp.lt.s32.totalorder %s985_s14, %s979_s16 }
  0xbd   : > { %p988_p6 = por %p987_p1, %p986_p11 }
  0xbf   : > { %p989_p8 = pnand %p988_p6, %p982_p3 }
 0x144   : > { %v386_v5 = vpop.xlane.xlu0 %385 }
 0x145   : > { %v391_v6 = vmul.f32 0.03125, %v386_v5 }
 0x147   : > { %v393_v7 = vsub.f32 %v710_v1, %v391_v6 }
 0x148   : > { %v389_v8 = vpop.xlane.xlu0 %388 }
 0x149   : > { %v392_v9 = vmul.f32 0.03125, %v389_v8  ;;  %v395_v10 = vmul.f32 %v393_v7, %v393_v7 }
 0x14b   : > { %v394_v11 = vsub.f32 %v711_v2, %v392_v9  ;;  %v397_v12 = vsel %vm383_vm0, %v395_v10, 0.0 }
 0x14c   : > { %398 = vadd.xlane.f32.xlu1 %v397_v12 }
 0x14d   : > { %v396_v13 = vmul.f32 %v394_v11, %v394_v11 }
 0x14f   : > { %v400_v14 = vsel %vm383_vm0, %v396_v13, 0.0 }
 0x150   : > { %401 = vadd.xlane.f32.xlu1 %v400_v14 }
 0x1d9   : > { %v399_v18 = vpop.xlane.xlu1 %398 }
 0x1da   : > { %v403_v19 = vmul.f32 0.03125, %v399_v18 }
 0x1dc   : > { %v405_v20 = vadd.f32 1e-05, %v403_v19 }
 0x1dd   : > { %v402_v21 = vpop.xlane.xlu1 %401 }
 0x1de   : > { %829 = vrsqrt.f32 %v405_v20  ;;  %v404_v22 = vmul.f32 0.03125, %v402_v21 }
 0x1e0   : > { %v406_v23 = vadd.f32 1e-05, %v404_v22 }
 0x1e2   : > { %831 = vrsqrt.f32 %v406_v23 }
 0x1e8   : > { %v830_v24 = vpop.eup %829 }
 0x1e9   : > { %v409_v25 = vmul.f32 %v830_v24, %v393_v7 }
 0x1eb   : > { %v418_v29 = vmul.f32 %v691_v26, %v409_v25 }
 0x1ec   : > { %v832_v27 = vpop.eup %831 }
 0x1ed   : > { %v410_v28 = vmul.f32 %v832_v27, %v394_v11  ;;  %v427_v32 = vadd.f32 %v692_v30, %v418_v29 }
 0x1ef   : > { %v419_v31 = vmul.f32 %v691_v26, %v410_v28 }
 0x1f1   : > { %v428_v33 = vadd.f32 %v692_v30, %v419_v31 }
 0x1f3   : > { %v429_v34 = vpack.c.bf16 %v428_v33, %v427_v32 }
 0x1f5   : > { %725 = vmatmul.mubr.msk.bf16.vlgmr.msra.gmra.mrb[0].mxu0 %vm383_vm0, %v429_v34 }
 0x2c8   : > { %v490_v36 = vpop.f32.mrb[0].mxu0 }
 0x2c9   : > { %v726_v37 = vpop.f32.mrb[1].mxu0  ;;  %v491_v39 = vadd.f32 %v693_v35, %v490_v36 }
 0x2ca   : > { %v493_v38 = vpop.f32.mrb[2].mxu0 }
 0x2cb   : > { %v494_v40 = vadd.f32 %v693_v35, %v493_v38  ;;  %v727_v41 = vpop.f32.mrb[3].mxu0 }
 0x2cd   : > { %v715_v42 = vpack.c.bf16 %v494_v40, %v491_v39 }
 0x2cf   : > { %716 = vst [vmem:[%s375_s24] sm:$0xff] %v715_v42  }
 0x2d0   : > { %992 = shalt.err (!%p989_p8)
}
 0x2d1   : > { %s993_s10 = scalar_lea.hbm %s1392_s7, 128  ;;  %s997_s13 = scalar_lea.hbm %s1446_s5, 256 }
 0x2d2   : > { %p994_p0 = scmp.ne.s32.totalorder %s1392_s7, %s993_s10  ;;  %p998_p7 = scmp.lt.u32.totalorder %s1392_s7, %s1446_s5 }
 0x2d3   : > { %p999_p13 = scmp.lt.u32.totalorder %s997_s13, %s993_s10  ;;  %p1001_p2 = scmp.lt.u32.totalorder %s993_s10, %s1392_s7 }
 0x2d4   : > { %p995_p5 = pnand %p994_p0, %p1491_p4 }
 0x2d5   : > { %p1000_p9 = por %p999_p13, %p998_p7 }
 0x2d6   : > { %p996_p12 = pneg %p995_p5 }
 0x2d7   : > { %p1002_p10 = por %p1001_p2, %p1000_p9 }
 0x2d9   : > { %p1003_p3 = pnand %p1002_p10, %p996_p12 }
 0x2db   : > { %1006 = shalt.err (!%p1003_p3)
}
 0x2dc   : > { %s1081_s17 = smov 64   ;;  %s1082_s30 = smov 4  }
 0x2dd   : > { %742 = dma.vmem_to_hbm [thread:$0]  (%p1491_p4), %s1387_s26, 128, %s1392_s7, %s508_s6, %s1081_s17, %s1081_s17, %s1082_s30  }
 0x2de PF: > { %s539_s20 = sand.u32 1, %s1049_s18   ;;  %p1492_p11 = scmp.ne.s32.totalorder %s1467_s27, 0 }
 0x2df   : > { %p1493_p1 = scmp.ge.s32.totalorder %s1069_s23, 2  ;;  %s540_s24 = scalar_lea.sflag [#allocation4], %s539_s20 }
 0x2e1   : > { %p762_p6 = pnand %p1493_p1, %p1492_p11 }
 0x2e3   : > { %1044 = dma.done.wait (!%p762_p6), %s540_s24, 128  }
 0x2e4   : > { %1046 = vsyncadd (!%p762_p6), %s540_s24, 4294967168  ;;  %s25_s23 = sadd.s32 1, %s1069_s23   ;;  %s1494_s3 = sld [smem:[#allocation16_spill]] }
 0x2e5   : > { %p22_p8 = scmp.ge.s32.totalorder %s25_s23, 4   ;;  %s1495_s20 = sld [smem:[#allocation18_spill]] }
 0x2e6   : > { %s1496_s9 = sld [smem:[#allocation17_spill]]  ;;  %s1497_s18 = smov %s1053_s19 }
 0x2e7   : > { %s1499_s21 = smov %s1065_s22  ;;  %24 = sbr.rel (!%p22_p8) target bundleno = 12 (0xc), region = 119 }
 0x2ea   : > { %s1498_s19 = smov %s1494_s3 }
 0x2ec   : > { %s1500_s22 = smov %s1496_s9 }
 0x2ee   :  { %545 = vsyncpa [#allocation3], 1 }
 0x2ef   :  { %547 = vsyncpa [#allocation3 + $0x1], 1 }
 0x2f0   :  { %548 = vsyncpa [#allocation6], 1 }
 0x2f1   :  { %550 = vsyncpa [#allocation6 + $0x1], 1 }
 0x2f2   :  { %551 = vsyncpa [#allocation9], 1 }
 0x2f3   :  { %552 = vsyncpa [#allocation4], 1 }
 0x2f4   :  { %554 = vsyncpa [#allocation4 + $0x1], 1 }

// kernel: transformer_wrapper_forward.23
= control target key start
LH: loop header
LB: loop body
LE: loop exit
PB: predicated region body
PF: predicated region fallthrough
CT: control target
= control target key end

     0   :  { %9 = vsyncpa [#allocation4], 0  ;;  %s612_s0 = inlined_call_operand.hbm [shape: bf16[32,128], index: 0, kind: input, shape index: {}]   ;;  %s613_s1 = inlined_call_operand.hbm [shape: bf16[128,128], index: 1, kind: input, shape index: {}]   ;;  %s614_s2 = inlined_call_operand.hbm [shape: f32[1,128], index: 2, kind: input, shape index: {}]   ;;  %s615_s3 = inlined_call_operand.hbm [shape: bf16[32,128], index: 3, kind: input, shape index: {}]   ;;  %s616_s4 = inlined_call_operand.hbm [shape: bf16[32,128], index: 4, kind: output, shape index: {}]  }
   0x1   :  { %10 = vsyncpa [#allocation7], 0 }
   0x2   :  { %11 = vsyncpa [#allocation10], 0 }
   0x3   :  { %12 = vsyncpa [#allocation5], 0  ;;  %s494_s15 = smov [#allocation6]   ;;  %s495_s17 = smov [#allocation3]  }
   0x4   :  { %s30_s16 = sshll.u32 %s494_s15, 4  ;;  %s18_s18 = sshll.u32 %s495_s17, 4  ;;  %s31_s16 = int_to_ptr.vmem [resolvable:$true] %s30_s16  ;;  %s526_s18 = int_to_ptr.vmem [resolvable:$true] %s18_s18 }
   0x5   :  { %s376_s21 = scalar_lea.hbm %s613_s1, 1024 }
   0x6   :  { %p377_p0 = scmp.ne.s32.totalorder %s613_s1, %s376_s21  ;;  %p380_p1 = scmp.lt.u32.totalorder %s376_s21, %s613_s1 }
   0x8   :  { %p382_p2 = pnand %p380_p1, %p377_p0 }
   0xa   :  { %385 = shalt.err (!%p382_p2)
}
   0xb   :  { %s386_s26 = scalar_lea.vmem %s31_s16, 1024  ;;  %p391_p4 = scmp.lt.s32.totalorder %s31_s16, %s31_s16 }
   0xc   :  { %p387_p3 = scmp.ne.s32.totalorder %s31_s16, %s386_s26  ;;  %p392_p5 = scmp.lt.s32.totalorder %s386_s26, %s386_s26 }
   0xe   :  { %p393_p6 = por %p392_p5, %p391_p4 }
  0x10   :  { %p394_p7 = pnand %p393_p6, %p387_p3 }
  0x12   :  { %397 = shalt.err (!%p394_p7)
}
  0x13   :  { %s496_s27 = smov 64   ;;  %s497_s28 = smov 4  }
  0x14   :  { %36 = dma.hbm_to_vmem [thread:$0]  %s613_s1, 1024, %s31_s16, [#allocation7], %s496_s27, %s496_s27, %s497_s28  }
  0x15   :  { %s398_s7 = scalar_lea.hbm %s612_s0, 256 }
  0x16   :  { %p399_p8 = scmp.ne.s32.totalorder %s612_s0, %s398_s7  ;;  %p402_p9 = scmp.lt.u32.totalorder %s398_s7, %s612_s0 }
  0x18   :  { %p404_p10 = pnand %p402_p9, %p399_p8 }
  0x1a   :  { %407 = shalt.err (!%p404_p10)
}
  0x1b   :  { %s408_s12 = scalar_lea.vmem %s526_s18, 256  ;;  %p413_p12 = scmp.lt.s32.totalorder %s526_s18, %s526_s18 }
  0x1c   :  { %p409_p11 = scmp.ne.s32.totalorder %s526_s18, %s408_s12  ;;  %p414_p13 = scmp.lt.s32.totalorder %s408_s12, %s408_s12 }
  0x1e   :  { %p415_p0 = por %p414_p13, %p413_p12 }
  0x20   :  { %p416_p1 = pnand %p415_p0, %p409_p11 }
  0x22   :  { %419 = shalt.err (!%p416_p1)
}
  0x23   :  { %24 = dma.hbm_to_vmem [thread:$0]  %s612_s0, 256, %s526_s18, [#allocation4], %s496_s27, %s496_s27, %s497_s28  }
  0x24   :  { %s498_s14 = smov [#allocation8]   ;;  %s499_s16 = smov [#allocation9]  }
  0x25   :  { %s43_s15 = sshll.u32 %s498_s14, 4  ;;  %s52_s17 = sshll.u32 %s499_s16, 4  ;;  %s44_s15 = int_to_ptr.vmem [resolvable:$true] %s43_s15  ;;  %s563_s17 = int_to_ptr.vmem [resolvable:$true] %s52_s17 }
  0x26   :  { %s420_s21 = scalar_lea.hbm %s614_s2, 16 }
  0x27   :  { %p421_p2 = scmp.ne.s32.totalorder %s614_s2, %s420_s21  ;;  %p424_p3 = scmp.lt.u32.totalorder %s420_s21, %s614_s2 }
  0x29   :  { %p426_p4 = pnand %p424_p3, %p421_p2 }
  0x2b   :  { %429 = shalt.err (!%p426_p4)
}
  0x2c   :  { %s430_s0 = scalar_lea.vmem %s44_s15, 16  ;;  %s434_s18 = scalar_lea.vmem %s44_s15, 32 }
  0x2d   :  { %p431_p5 = scmp.ne.s32.totalorder %s44_s15, %s430_s0  ;;  %p435_p6 = scmp.lt.s32.totalorder %s44_s15, %s44_s15 }
  0x2e   :  { %p436_p7 = scmp.lt.s32.totalorder %s434_s18, %s430_s0 }
  0x30   :  { %p437_p8 = por %p436_p7, %p435_p6 }
  0x32   :  { %p438_p9 = pnand %p437_p8, %p431_p5 }
  0x34   :  { %441 = shalt.err (!%p438_p9)
}
  0x35   :  { %46 = dma.hbm_to_vmem [thread:$0]  %s614_s2, 16, %s44_s15, [#allocation7]  }
  0x36   :  { %s442_s6 = scalar_lea.hbm %s615_s3, 256 }
  0x37   :  { %p443_p10 = scmp.ne.s32.totalorder %s615_s3, %s442_s6  ;;  %p446_p11 = scmp.lt.u32.totalorder %s442_s6, %s615_s3 }
  0x39   :  { %p448_p12 = pnand %p446_p11, %p443_p10 }
  0x3b   :  { %451 = shalt.err (!%p448_p12)
}
  0x3c   :  { %s452_s11 = scalar_lea.vmem %s563_s17, 256  ;;  %p457_p0 = scmp.lt.s32.totalorder %s563_s17, %s563_s17 }
  0x3d   :  { %p453_p13 = scmp.ne.s32.totalorder %s563_s17, %s452_s11  ;;  %p458_p1 = scmp.lt.s32.totalorder %s452_s11, %s452_s11 }
  0x3f   :  { %p459_p2 = por %p458_p1, %p457_p0 }
  0x41   :  { %p460_p3 = pnand %p459_p2, %p453_p13 }
  0x43   :  { %463 = shalt.err (!%p460_p3)
}
  0x44   :  { %58 = dma.hbm_to_vmem [thread:$0]  %s615_s3, 256, %s563_s17, [#allocation10], %s496_s27, %s496_s27, %s497_s28  }
  0x45   :  { %486 = dma.done.wait [#allocation4], 256  }
  0x46   :  { %487 = vsyncadd [#allocation4], 4294967040 }
  0x47   :  { %488 = dma.done.wait [#allocation7], 1040  }
  0x48   :  { %489 = vsyncadd [#allocation7], 4294966256 }
  0x49   :  { %490 = dma.done.wait [#allocation10], 256  }
  0x4a   :  { %491 = vsyncadd [#allocation10], 4294967040  ;;  %v366_v0 = vld [vmem:[#allocation6] sm:$0xff]   ;;  %v367_v1 = vld [vmem:[#allocation6 + $0x8] sm:$0xff]   ;;  %s500_s3 = smov [#allocation11]  }
  0x4b   :  { %339 = vmatprep.subr.bf16.mxu0 %v366_v0  ;;  %v368_v2 = vld [vmem:[#allocation6 + $0x10] sm:$0xff]   ;;  %v369_v3 = vld [vmem:[#allocation6 + $0x18] sm:$0xff]   ;;  %v370_v5 = vld [vmem:[#allocation6 + $0x20] sm:$0xff]   ;;  %s276_s1 = sshll.u32 %s500_s3, 4  ;;  %s277_s1 = int_to_ptr.vmem [resolvable:$true] %s276_s1 }
  0x4c   :  { %340 = vmatpush3.bf16.msra.mxu0 %v366_v0  ;;  %v374_v4 = vld [vmem:[#allocation3] sm:$0xff]   ;;  %v371_v6 = vld [vmem:[#allocation6 + $0x28] sm:$0xff]   ;;  %v373_v8 = vld [vmem:[#allocation6 + $0x38] sm:$0xff]   ;;  %s464_s13 = scalar_lea.vmem %s277_s1, 256  ;;  %p469_p5 = scmp.lt.s32.totalorder %s277_s1, %s277_s1 }
  0x4d   :  { %341 = vmatprep.subr.bf16.mxu0 %v367_v1  ;;  %355 = vmatprep.mubr.bf16.mxu0 %v374_v4  ;;  %v372_v7 = vld [vmem:[#allocation6 + $0x30] sm:$0xff]   ;;  %v375_v9 = vld [vmem:[#allocation3 + $0x8] sm:$0xff]   ;;  %v300_v10 = vld [vmem:[#allocation8] ss:$0 sm:$0xff]  ;;  %p465_p4 = scmp.ne.s32.totalorder %s277_s1, %s464_s13  ;;  %p470_p6 = scmp.lt.s32.totalorder %s464_s13, %s464_s13 }
  0x4e   :  { %v327_v11 = vld [vmem:[#allocation9 + $0x8] sm:$0xff]   ;;  %v310_v12 = vld [vmem:[#allocation9] sm:$0xff]  }
  0x4f   :  { %v315_v15 = vunpack.c.l.bf16 %v327_v11  ;;  %v316_v17 = vunpack.c.h.bf16 %v327_v11  ;;  %v311_v19 = vunpack.c.l.bf16 %v310_v12  ;;  %v312_v21 = vunpack.c.h.bf16 %v310_v12  ;;  %p471_p7 = por %p470_p6, %p469_p5 }
  0x50   :  { %342 = vmatpush3.bf16.msra.mxu0 %v367_v1 }
  0x51   :  { %343 = vmatprep.subr.bf16.mxu0 %v368_v2  ;;  %p472_p8 = pnand %p471_p7, %p465_p4 }
  0x54   :  { %344 = vmatpush3.bf16.msra.mxu0 %v368_v2 }
  0x55   :  { %345 = vmatprep.subr.bf16.mxu0 %v369_v3 }
  0x58   :  { %346 = vmatpush3.bf16.msra.mxu0 %v369_v3 }
  0x59   :  { %347 = vmatprep.subr.bf16.mxu0 %v370_v5 }
  0x5c   :  { %348 = vmatpush3.bf16.msra.mxu0 %v370_v5 }
  0x5d   :  { %349 = vmatprep.subr.bf16.mxu0 %v371_v6 }
  0x60   :  { %350 = vmatpush3.bf16.msra.mxu0 %v371_v6 }
  0x61   :  { %351 = vmatprep.subr.bf16.mxu0 %v372_v7 }
  0x64   :  { %352 = vmatpush3.bf16.msra.mxu0 %v372_v7 }
  0x65   :  { %353 = vmatprep.subr.bf16.mxu0 %v373_v8 }
  0x68   :  { %354 = vmatpush3.bf16.msra.mxu0 %v373_v8 }
  0x6b   :  { %356 = vmatmul.mubr.bf16.vlgmr.msra.gmra.mrb[0].mxu0 %v375_v9 }
 0x13e   :  { %v357_v13 = vpop.f32.mrb[0].mxu0 }
 0x13f   :  { %v237_v14 = vadd.f32 %v357_v13, %v300_v10  ;;  %v198_v16 = vpop.f32.mrb[1].mxu0 }
 0x140   :  { %v235_v18 = vadd.f32 %v300_v10, %v198_v16  ;;  %v358_v20 = vpop.f32.mrb[2].mxu0 }
 0x141   :  { %v238_v22 = vadd.f32 %v358_v20, %v300_v10  ;;  %v201_v23 = vpop.f32.mrb[3].mxu0  ;;  %v249_v25 = vadd.f32 %v315_v15, %v237_v14 }
 0x142   :  { %v236_v24 = vadd.f32 %v300_v10, %v201_v23  ;;  %v247_v27 = vadd.f32 %v311_v19, %v235_v18 }
 0x143   :  { %v250_v26 = vadd.f32 %v316_v17, %v238_v22 }
 0x144   :  { %v248_v28 = vadd.f32 %v312_v21, %v236_v24 }
 0x145   :  { %v325_v29 = vpack.c.bf16 %v250_v26, %v249_v25 }
 0x146   :  { %v320_v30 = vpack.c.bf16 %v248_v28, %v247_v27 }
 0x147   :  { %328 = vst [vmem:[#allocation11 + $0x8] sm:$0xff] %v325_v29  }
 0x148   :  { %321 = vst [vmem:[#allocation11] sm:$0xff] %v320_v30  }
 0x149   :  { %475 = shalt.err (!%p472_p8)
}
 0x14a   :  { %s476_s16 = scalar_lea.hbm %s616_s4, 256 }
 0x14b   :  { %p477_p9 = scmp.ne.s32.totalorder %s616_s4, %s476_s16  ;;  %p480_p10 = scmp.lt.u32.totalorder %s476_s16, %s616_s4 }
 0x14d   :  { %p482_p11 = pnand %p480_p10, %p477_p9 }
 0x14f   :  { %485 = shalt.err (!%p482_p11)
}
 0x150   :  { %282 = dma.vmem_to_hbm [thread:$0]  %s277_s1, 256, %s616_s4, [#allocation5], %s496_s27, %s496_s27, %s497_s28  }
 0x151   :  { %492 = dma.done.wait [#allocation5], 256  }
 0x152   :  { %493 = vsyncadd [#allocation5], 4294967040 }
 0x153   :  { %286 = vsyncpa [#allocation4], 1 }
 0x154   :  { %287 = vsyncpa [#allocation7], 1 }
 0x155   :  { %288 = vsyncpa [#allocation10], 1 }
 0x156   :  { %289 = vsyncpa [#allocation5], 1 }

// kernel: transformer_wrapper_forward.25
= control target key start
LH: loop header
LB: loop body
LE: loop exit
PB: predicated region body
PF: predicated region fallthrough
CT: control target
= control target key end

     0   :  { %8 = vsyncpa [#allocation4], 0  ;;  %s473_s0 = inlined_call_operand.hbm [shape: bf16[16,128], index: 0, kind: input, shape index: {}]   ;;  %s474_s1 = inlined_call_operand.hbm [shape: bf16[128,128], index: 1, kind: input, shape index: {}]   ;;  %s475_s2 = inlined_call_operand.hbm [shape: f32[1,128], index: 2, kind: input, shape index: {}]   ;;  %s476_s3 = inlined_call_operand.hbm [shape: bf16[16,128], index: 3, kind: output, shape index: {}]  }
   0x1   :  { %9 = vsyncpa [#allocation7], 0 }
   0x2   :  { %10 = vsyncpa [#allocation5], 0  ;;  %s381_s12 = smov [#allocation6]   ;;  %s382_s14 = smov [#allocation3]  }
   0x3   :  { %s28_s13 = sshll.u32 %s381_s12, 4  ;;  %s16_s15 = sshll.u32 %s382_s14, 4  ;;  %s29_s13 = int_to_ptr.vmem [resolvable:$true] %s28_s13  ;;  %s409_s15 = int_to_ptr.vmem [resolvable:$true] %s16_s15 }
   0x4   :  { %s287_s18 = scalar_lea.hbm %s474_s1, 1024 }
   0x5   :  { %p288_p0 = scmp.ne.s32.totalorder %s474_s1, %s287_s18  ;;  %p291_p1 = scmp.lt.u32.totalorder %s287_s18, %s474_s1 }
   0x7   :  { %p293_p2 = pnand %p291_p1, %p288_p0 }
   0x9   :  { %296 = shalt.err (!%p293_p2)
}
   0xa   :  { %s297_s23 = scalar_lea.vmem %s29_s13, 1024  ;;  %p302_p4 = scmp.lt.s32.totalorder %s29_s13, %s29_s13 }
   0xb   :  { %p298_p3 = scmp.ne.s32.totalorder %s29_s13, %s297_s23  ;;  %p303_p5 = scmp.lt.s32.totalorder %s297_s23, %s297_s23 }
   0xd   :  { %p304_p6 = por %p303_p5, %p302_p4 }
   0xf   :  { %p305_p7 = pnand %p304_p6, %p298_p3 }
  0x11   :  { %308 = shalt.err (!%p305_p7)
}
  0x12   :  { %s383_s24 = smov 64   ;;  %s384_s25 = smov 4  }
  0x13   :  { %34 = dma.hbm_to_vmem [thread:$0]  %s474_s1, 1024, %s29_s13, [#allocation7], %s383_s24, %s383_s24, %s384_s25  }
  0x14   :  { %s309_s30 = scalar_lea.hbm %s473_s0, 128 }
  0x15   :  { %p310_p8 = scmp.ne.s32.totalorder %s473_s0, %s309_s30  ;;  %p313_p9 = scmp.lt.u32.totalorder %s309_s30, %s473_s0 }
  0x17   :  { %p315_p10 = pnand %p313_p9, %p310_p8 }
  0x19   :  { %318 = shalt.err (!%p315_p10)
}
  0x1a   :  { %s319_s8 = scalar_lea.vmem %s409_s15, 128  ;;  %p324_p12 = scmp.lt.s32.totalorder %s409_s15, %s409_s15 }
  0x1b   :  { %p320_p11 = scmp.ne.s32.totalorder %s409_s15, %s319_s8  ;;  %p325_p13 = scmp.lt.s32.totalorder %s319_s8, %s319_s8 }
  0x1d   :  { %p326_p0 = por %p325_p13, %p324_p12 }
  0x1f   :  { %p327_p1 = pnand %p326_p0, %p320_p11 }
  0x21   :  { %330 = shalt.err (!%p327_p1)
}
  0x22   :  { %22 = dma.hbm_to_vmem [thread:$0]  %s473_s0, 128, %s409_s15, [#allocation4], %s383_s24, %s383_s24, %s384_s25  }
  0x23   :  { %s385_s10 = smov [#allocation8]   ;;  %s331_s14 = scalar_lea.hbm %s475_s2, 16 }
  0x24   :  { %s41_s11 = sshll.u32 %s385_s10, 4  ;;  %p332_p2 = scmp.ne.s32.totalorder %s475_s2, %s331_s14  ;;  %s42_s11 = int_to_ptr.vmem [resolvable:$true] %s41_s11 }
  0x25   :  { %p335_p3 = scmp.lt.u32.totalorder %s331_s14, %s475_s2 }
  0x27   :  { %p337_p4 = pnand %p335_p3, %p332_p2 }
  0x29   :  { %340 = shalt.err (!%p337_p4)
}
  0x2a   :  { %s341_s20 = scalar_lea.vmem %s42_s11, 16  ;;  %s345_s0 = scalar_lea.vmem %s42_s11, 32 }
  0x2b   :  { %p342_p5 = scmp.ne.s32.totalorder %s42_s11, %s341_s20  ;;  %p346_p6 = scmp.lt.s32.totalorder %s42_s11, %s42_s11 }
  0x2c   :  { %p347_p7 = scmp.lt.s32.totalorder %s345_s0, %s341_s20 }
  0x2e   :  { %p348_p8 = por %p347_p7, %p346_p6 }
  0x30   :  { %p349_p9 = pnand %p348_p8, %p342_p5 }
  0x32   :  { %352 = shalt.err (!%p349_p9)
}
  0x33   :  { %44 = dma.hbm_to_vmem [thread:$0]  %s475_s2, 16, %s42_s11, [#allocation7]  }
  0x34   :  { %375 = dma.done.wait [#allocation4], 128  }
  0x35   :  { %376 = vsyncadd [#allocation4], 4294967168 }
  0x36   :  { %377 = dma.done.wait [#allocation7], 1040  }
  0x37   :  { %378 = vsyncadd [#allocation7], 4294966256  ;;  %v386_v0 = vmov 0.0   ;;  %vm387_vm0 = vmmov 0   ;;  %v278_v1 = vld [vmem:[#allocation6] sm:$0xff]   ;;  %v279_v2 = vld [vmem:[#allocation6 + $0x8] sm:$0xff]  }
  0x38   :  { %250 = vmatprep.subr.bf16.mxu0 %v386_v0  ;;  %266 = vmatprep.mubr.msk.bf16.mxu0 %vm387_vm0, %v386_v0  ;;  %v280_v3 = vld [vmem:[#allocation6 + $0x10] sm:$0xff]   ;;  %v281_v4 = vld [vmem:[#allocation6 + $0x18] sm:$0xff]   ;;  %v282_v5 = vld [vmem:[#allocation6 + $0x20] sm:$0xff]   ;;  %s388_s2 = smov [#allocation9]  }
  0x39   :  { %251 = vmatpush3.bf16.msra.mxu0 %v278_v1  ;;  %v283_v6 = vld [vmem:[#allocation6 + $0x28] sm:$0xff]   ;;  %v284_v7 = vld [vmem:[#allocation6 + $0x30] sm:$0xff]   ;;  %v285_v8 = vld [vmem:[#allocation6 + $0x38] sm:$0xff]   ;;  %s209_s22 = sshll.u32 %s388_s2, 4  ;;  %s210_s22 = int_to_ptr.vmem [resolvable:$true] %s209_s22 }
  0x3a   :  { %252 = vmatprep.subr.bf16.mxu0 %v386_v0  ;;  %v286_v9 = vld [vmem:[#allocation3] sm:$0xff]   ;;  %v231_v11 = vld [vmem:[#allocation8] ss:$0 sm:$0xff]  ;;  %s353_s23 = scalar_lea.vmem %s210_s22, 128  ;;  %p358_p11 = scmp.lt.s32.totalorder %s210_s22, %s210_s22 }
  0x3b   :  { %p354_p10 = scmp.ne.s32.totalorder %s210_s22, %s353_s23  ;;  %p359_p12 = scmp.lt.s32.totalorder %s353_s23, %s353_s23 }
  0x3d   :  { %253 = vmatpush3.bf16.msra.mxu0 %v279_v2  ;;  %p360_p13 = por %p359_p12, %p358_p11 }
  0x3e   :  { %254 = vmatprep.subr.bf16.mxu0 %v386_v0 }
  0x3f   :  { %p361_p0 = pnand %p360_p13, %p354_p10 }
  0x41   :  { %255 = vmatpush3.bf16.msra.mxu0 %v280_v3 }
  0x42   :  { %256 = vmatprep.subr.bf16.mxu0 %v386_v0 }
  0x45   :  { %257 = vmatpush3.bf16.msra.mxu0 %v281_v4 }
  0x46   :  { %258 = vmatprep.subr.bf16.mxu0 %v386_v0 }
  0x49   :  { %259 = vmatpush3.bf16.msra.mxu0 %v282_v5 }
  0x4a   :  { %260 = vmatprep.subr.bf16.mxu0 %v386_v0 }
  0x4d   :  { %261 = vmatpush3.bf16.msra.mxu0 %v283_v6 }
  0x4e   :  { %262 = vmatprep.subr.bf16.mxu0 %v386_v0 }
  0x51   :  { %263 = vmatpush3.bf16.msra.mxu0 %v284_v7 }
  0x52   :  { %264 = vmatprep.subr.bf16.mxu0 %v386_v0 }
  0x55   :  { %265 = vmatpush3.bf16.msra.mxu0 %v285_v8 }
  0x58   :  { %267 = vmatmul.mubr.bf16.vlgmr.msra.gmra.mrb[0].mxu0 %v286_v9 }
 0x12b   :  { %v169_v10 = vpop.f32.mrb[0].mxu0 }
 0x12c   :  { %v268_v12 = vpop.f32.mrb[1].mxu0  ;;  %v192_v14 = vadd.f32 %v231_v11, %v169_v10 }
 0x12d   :  { %v172_v13 = vpop.f32.mrb[2].mxu0 }
 0x12e   :  { %v193_v15 = vadd.f32 %v231_v11, %v172_v13  ;;  %v269_v16 = vpop.f32.mrb[3].mxu0 }
 0x130   :  { %v239_v17 = vpack.c.bf16 %v193_v15, %v192_v14 }
 0x132   :  { %240 = vst [vmem:[#allocation9] sm:$0xff] %v239_v17  }
 0x133   :  { %364 = shalt.err (!%p361_p0)
}
 0x134   :  { %s365_s28 = scalar_lea.hbm %s476_s3, 128 }
 0x135   :  { %p366_p1 = scmp.ne.s32.totalorder %s476_s3, %s365_s28  ;;  %p369_p2 = scmp.lt.u32.totalorder %s365_s28, %s476_s3 }
 0x137   :  { %p371_p3 = pnand %p369_p2, %p366_p1 }
 0x139   :  { %374 = shalt.err (!%p371_p3)
}
 0x13a   :  { %215 = dma.vmem_to_hbm [thread:$0]  %s210_s22, 128, %s476_s3, [#allocation5], %s383_s24, %s383_s24, %s384_s25  }
 0x13b   :  { %379 = dma.done.wait [#allocation5], 128  }
 0x13c   :  { %380 = vsyncadd [#allocation5], 4294967168 }
 0x13d   :  { %219 = vsyncpa [#allocation4], 1 }
 0x13e   :  { %220 = vsyncpa [#allocation7], 1 }
 0x13f   :  { %221 = vsyncpa [#allocation5], 1 }

// kernel: transformer_wrapper_forward.22
= control target key start
LH: loop header
LB: loop body
LE: loop exit
PB: predicated region body
PF: predicated region fallthrough
CT: control target
= control target key end

     0   :  { %s3261_s0 = inlined_call_operand.hbm [shape: bf16[2,16,96], index: 0, kind: input, shape index: {}]   ;;  %s3262_s1 = inlined_call_operand.hbm [shape: bf16[2,128,96], index: 1, kind: input, shape index: {}]   ;;  %s3263_s2 = inlined_call_operand.hbm [shape: f32[2,1,128], index: 2, kind: input, shape index: {}]   ;;  %s3264_s3 = inlined_call_operand.hbm [shape: bf16[2,16,32], index: 3, kind: output, shape index: {}]  }
   0x1   :  { %3271 = sst [smem:[#allocation16_spill]] %s3261_s0 }
   0x2   :  { %3272 = sst [smem:[#allocation17_spill]] %s3262_s1 }
   0x3   :  { %8 = vsyncpa [#allocation6], 0 }
   0x4   :  { %10 = vsyncpa [#allocation6 + $0x1], 0 }
   0x5   :  { %11 = vsyncpa [#allocation9], 0 }
   0x6   :  { %13 = vsyncpa [#allocation9 + $0x1], 0 }
   0x7   :  { %14 = vsyncpa [#allocation7], 0 }
   0x8   :  { %16 = vsyncpa [#allocation7 + $0x1], 0  ;;  %s2450_s12 = smov 0   ;;  %s2452_s13 = smov 0  }
   0x9   :  { %s2454_s14 = smov 0   ;;  %s2456_s15 = smov 0  }
   0xa   :  { %s2458_s16 = smov 0   ;;  %s2460_s17 = smov 0  }
   0xb LB: > { %s2481_s18 = sadd.s32 4294967295, %s2403_s17   ;;  %s1741_s19 = sadd.s32 4294967294, %s2403_s17   ;;  %s2403_s17 = sphi %s2460_s17, %s22_s17   ;;  %s2399_s16 = sphi %s2458_s16, %s3296_s16   ;;  %s2395_s15 = sphi %s2456_s15, %s3295_s15   ;;  %s2391_s14 = sphi %s2454_s14, %s3294_s14   ;;  %s2387_s13 = sphi %s2452_s13, %s3293_s13   ;;  %s2383_s12 = sphi %s2450_s12, %s3292_s12  }
   0xc   : > { %s37_s20 = sadd.s32 1, %s2399_s16  ;;  %s50_s21 = sadd.s32 1, %s2391_s14 }
   0xd   : > { %p39_p0 = scmp.ge.s32.totalorder %s37_s20, 2  ;;  %p57_p1 = scmp.ne.s32.totalorder %s2391_s14, %s2387_s13 }
   0xe   : > { %p58_p2 = scmp.eq.s32.totalorder %s2403_s17, 0  ;;  %p63_p3 = scmp.ne.s32.totalorder %s2387_s13, %s2383_s12 }
   0xf   : > { %s3298_s20 = smov (%p39_p0, %s37_s20), 0  ;;  %p64_p5 = scmp.eq.s32.totalorder %s2481_s18, 0 }
  0x10   : > { %3273 = sst [smem:[#allocation15_spill]] %s3298_s20  ;;  %p2493_p4 = por %p58_p2, %p57_p1 }
  0x11   : > { %s45_s23 = ssub.s32 %s2399_s16, %s3298_s20  ;;  %p145_p6 = scmp.eq.s32.totalorder %s2481_s18, 1 }
  0x12   : > { %p48_p7 = scmp.eq.s32.totalorder %s45_s23, 0  ;;  %p2501_p8 = por %p64_p5, %p63_p3 }
  0x13   : > { %p2505_p9 = por %p145_p6, %p57_p1  ;;  %p151_p10 = scmp.eq.s32.totalorder %s1741_s19, 1 }
  0x14   : > { %s3275_s24 = scalar_select %p2501_p8, 1, 0 }
  0x15   : > { %s3276_s25 = scalar_select %p2505_p9, 1, 0 }
  0x16   : > { %s2510_s26 = scalar_select %p48_p7, %s2391_s14, %s50_s21  }
  0x17   : > { %p2512_p11 = por %p151_p10, %p63_p3  ;;  %p2074_p13 = scmp.lt.s32.totalorder %s2403_s17, 2 }
  0x18   : > { %s2519_s28 = sand.u32 1, %s2391_s14   ;;  %s194_s30 = sand.u32 1, %s2403_s17  }
  0x19   : > { %s3277_s27 = scalar_select %p2512_p11, 1, 0 }
  0x1a   : > { %p2523_p0 = pnand %p2074_p13, %p2493_p4  ;;  %s1747_s4 = sshll.u32 %s2519_s28, 6 }
  0x1b   : > { %s1810_s5 = sshll.u32 %s2399_s16, 10  ;;  %s198_s6 = scalar_lea.vmem [#allocation8], %s1747_s4 }
  0x1c   : > { %s3278_s29 = scalar_select %p2523_p0, 1, 0 }
  0x1d   : > { %s207_s7 = sshll.u32 %s198_s6, 4  ;;  %s3279_s1 = sld [smem:[#allocation17_spill]]  ;;  %s2535_s7 = int_to_ptr.vmem [resolvable:$true] %s207_s7 }
  0x1e   : > { %s2537_s11 = scalar_lea.sflag [#allocation9], %s194_s30  ;;  %p2543_p2 = pneg %p2523_p0 }
  0x23   : > { %s2533_s10 = scalar_lea.hbm %s3279_s1, %s1810_s5  ;;  %s2232_s4 = scalar_lea.hbm %s3279_s1, 2048 }
  0x24   : > { %s2227_s19 = scalar_lea.hbm %s2533_s10, 1024  ;;  %p2233_p5 = scmp.lt.u32.totalorder %s2533_s10, %s3279_s1 }
  0x25   : > { %p2228_p1 = scmp.ne.s32.totalorder %s2533_s10, %s2227_s19  ;;  %p2234_p6 = scmp.lt.u32.totalorder %s2232_s4, %s2227_s19 }
  0x26   : > { %p2236_p10 = scmp.lt.u32.totalorder %s2227_s19, %s2533_s10 }
  0x27   : > { %p2230_p3 = pnand %p2543_p2, %p2228_p1  ;;  %p2235_p7 = por %p2234_p6, %p2233_p5 }
  0x29   : > { %p2231_p4 = pneg %p2230_p3  ;;  %p2237_p13 = por %p2236_p10, %p2235_p7 }
  0x2b   : > { %p2238_p12 = pnand %p2237_p13, %p2231_p4 }
  0x2d   : > { %2241 = shalt.err (!%p2238_p12)
}
  0x2e   : > { %s2242_s30 = scalar_lea.vmem %s2535_s7, 1024  ;;  %s2405_s8 = smov [#allocation8]  }
  0x2f   : > { %p2243_p1 = scmp.ne.s32.totalorder %s2535_s7, %s2242_s30  ;;  %s2247_s9 = sshll.u32 %s2405_s8, 4  ;;  %s2248_s9 = int_to_ptr.vmem [resolvable:$false] %s2247_s9 }
  0x30   : > { %s2249_s22 = scalar_lea.vmem %s2248_s9, 2048  ;;  %p2250_p9 = scmp.lt.s32.totalorder %s2535_s7, %s2248_s9 }
  0x31   : > { %p2245_p3 = pnand %p2243_p1, %p2543_p2  ;;  %p2251_p8 = scmp.lt.s32.totalorder %s2249_s22, %s2242_s30 }
  0x33   : > { %p2246_p11 = pneg %p2245_p3  ;;  %p2252_p5 = por %p2251_p8, %p2250_p9 }
  0x35   : > { %p2253_p6 = pnand %p2252_p5, %p2246_p11 }
  0x37   : > { %2256 = shalt.err (!%p2253_p6)
}
  0x38   : > { %s3267_s19 = smov 64   ;;  %s3268_s23 = smov 4  }
  0x39   : > { %2066 = dma.hbm_to_vmem [thread:$0]  (!%p2523_p0), %s2533_s10, 1024, %s2535_s7, %s2537_s11, %s3267_s19, %s3267_s19, %s3268_s23  }
  0x3a   : > { %p1751_p8 = scmp.ge.s32.totalorder %s2403_s17, 1  ;;  %p233_p9 = scmp.lt.s32.totalorder %s2403_s17, 3 }
  0x3b   : > { %s1744_s5 = sshll.u32 %s2519_s28, 3  ;;  %s1809_s6 = sshll.u32 %s2399_s16, 7 }
  0x3c   : > { %p2572_p11 = pnand %p1751_p8, %p233_p9  ;;  %s3282_s0 = sld [smem:[#allocation16_spill]] }
  0x3d   : > { %s175_s22 = scalar_lea.vmem [#allocation5], %s1744_s5  ;;  %s1750_s7 = sshll.u32 %s2399_s16, 4 }
  0x3e   : > { %s3281_s4 = scalar_select %p2572_p11, 1, 0 }
  0x3f   : > { %s184_s1 = sshll.u32 %s175_s22, 4  ;;  %s172_s10 = scalar_lea.sflag [#allocation6], %s2519_s28  ;;  %s2583_s1 = int_to_ptr.vmem [resolvable:$true] %s184_s1 }
  0x42   : > { %s2581_s9 = scalar_lea.hbm %s3282_s0, %s1809_s6  ;;  %s2262_s6 = scalar_lea.hbm %s3282_s0, 256 }
  0x43   : > { %s2257_s19 = scalar_lea.hbm %s2581_s9, 128  ;;  %p2263_p10 = scmp.lt.u32.totalorder %s2581_s9, %s3282_s0 }
  0x44   : > { %p2258_p12 = scmp.ne.s32.totalorder %s2581_s9, %s2257_s19  ;;  %p2264_p13 = scmp.lt.u32.totalorder %s2262_s6, %s2257_s19 }
  0x45   : > { %p2266_p3 = scmp.lt.u32.totalorder %s2257_s19, %s2581_s9 }
  0x46   : > { %p2260_p4 = pnand %p2258_p12, %p2543_p2  ;;  %p2265_p1 = por %p2264_p13, %p2263_p10 }
  0x48   : > { %p2261_p7 = pneg %p2260_p4  ;;  %p2267_p5 = por %p2266_p3, %p2265_p1 }
  0x4a   : > { %p2268_p6 = pnand %p2267_p5, %p2261_p7 }
  0x4c   : > { %2271 = shalt.err (!%p2268_p6)
}
  0x4d   : > { %s2272_s5 = scalar_lea.vmem %s2583_s1, 128  ;;  %s2408_s20 = smov [#allocation5]  }
  0x4e   : > { %p2273_p8 = scmp.ne.s32.totalorder %s2583_s1, %s2272_s5  ;;  %s2277_s23 = sshll.u32 %s2408_s20, 4  ;;  %s2278_s23 = int_to_ptr.vmem [resolvable:$false] %s2277_s23 }
  0x4f   : > { %s2279_s22 = scalar_lea.vmem %s2278_s23, 256  ;;  %p2280_p4 = scmp.lt.s32.totalorder %s2583_s1, %s2278_s23 }
  0x50   : > { %p2275_p9 = pnand %p2273_p8, %p2543_p2  ;;  %p2281_p11 = scmp.lt.s32.totalorder %s2279_s22, %s2272_s5 }
  0x52   : > { %p2276_p12 = pneg %p2275_p9  ;;  %p2282_p10 = por %p2281_p11, %p2280_p4 }
  0x54   : > { %p2283_p13 = pnand %p2282_p10, %p2276_p12 }
  0x56   : > { %2286 = shalt.err (!%p2283_p13)
}
  0x57   : > { %s3283_s19 = smov 4   ;;  %s3284_s6 = smov 64  }
  0x58   : > { %2063 = dma.hbm_to_vmem [thread:$0]  (!%p2523_p0), %s2581_s9, 128, %s2583_s1, %s172_s10, %s3284_s6, %s3284_s6, %s3283_s19  }
  0x59   : > { %s2618_s5 = scalar_lea.hbm %s3263_s2, %s1750_s7  ;;  %s220_s20 = scalar_lea.vmem [#allocation10], %s2519_s28 }
  0x5a   : > { %s228_s23 = sshll.u32 %s220_s20, 4  ;;  %s2287_s22 = scalar_lea.hbm %s2618_s5, 16  ;;  %s229_s23 = int_to_ptr.vmem [resolvable:$true] %s228_s23 }
  0x5b   : > { %p2288_p11 = scmp.ne.s32.totalorder %s2618_s5, %s2287_s22  ;;  %s2292_s9 = scalar_lea.hbm %s3263_s2, 32 }
  0x5c   : > { %p2293_p3 = scmp.lt.u32.totalorder %s2618_s5, %s3263_s2  ;;  %p2294_p5 = scmp.lt.u32.totalorder %s2292_s9, %s2287_s22 }
  0x5d   : > { %p2290_p7 = pnand %p2288_p11, %p2543_p2  ;;  %p2296_p8 = scmp.lt.u32.totalorder %s2287_s22, %s2618_s5 }
  0x5e   : > { %p2295_p6 = por %p2294_p5, %p2293_p3 }
  0x5f   : > { %p2291_p1 = pneg %p2290_p7 }
  0x60   : > { %p2297_p9 = por %p2296_p8, %p2295_p6 }
  0x62   : > { %p2298_p12 = pnand %p2297_p9, %p2291_p1 }
  0x64   : > { %2301 = shalt.err (!%p2298_p12)
}
  0x65   : > { %s2302_s28 = scalar_lea.vmem %s229_s23, 16  ;;  %s2409_s7 = smov [#allocation10]  }
  0x66   : > { %p2303_p4 = scmp.ne.s32.totalorder %s229_s23, %s2302_s28  ;;  %s2307_s6 = sshll.u32 %s2409_s7, 4  ;;  %s2308_s6 = int_to_ptr.vmem [resolvable:$false] %s2307_s6 }
  0x67   : > { %s2309_s0 = scalar_lea.vmem %s2308_s6, 32  ;;  %p2310_p11 = scmp.lt.s32.totalorder %s229_s23, %s2308_s6 }
  0x68   : > { %p2305_p10 = pnand %p2303_p4, %p2543_p2  ;;  %p2311_p7 = scmp.lt.s32.totalorder %s2309_s0, %s2302_s28 }
  0x6a   : > { %p2306_p13 = pneg %p2305_p10  ;;  %p2312_p0 = por %p2311_p7, %p2310_p11 }
  0x6c   : > { %p2313_p3 = pnand %p2312_p0, %p2306_p13 }
  0x6e   : > { %2316 = shalt.err (!%p2313_p3)
}
  0x6f   : > { %p3285_p5 = scmp.ne.s32.totalorder %s3278_s29, 0  ;;  %p3286_p1 = scmp.ne.s32.totalorder %s3281_s4, 0 }
  0x70   : > { %s2642_s21 = sand.u32 (!%p3286_p1), 1, %s2387_s13   ;;  %p3287_p0 = scmp.ne.s32.totalorder (!%p3286_p1), %s3275_s24, 0 }
  0x71   : > { %2069 = dma.hbm_to_vmem [thread:$0]  (!%p3285_p5), %s2618_s5, 16, %s229_s23, %s2537_s11  }
  0x72   : > { %237 = sbr.rel (%p3286_p1) target bundleno = 2974 (0xb9e), region = 32  ;;  %s1752_s30 = sshll.u32 (!%p3286_p1), %s2642_s21, 3 }
  0x73   : > { %s240_s8 = scalar_lea.sflag (!%p3286_p1), [#allocation6], %s2642_s21  ;;  %s2648_s20 = scalar_lea.vmem (!%p3286_p1), [#allocation5], %s1752_s30 }
  0x79   : > { %2370 = dma.done.wait (%p3287_p0), %s240_s8, 128  }
  0x7a   : > { %2372 = vsyncadd (%p3287_p0), %s240_s8, 4294967168  ;;  %s248_s29 = sand.u32 1, %s2481_s18   ;;  %s1753_s11 = sshll.u32 %s2642_s21, 6 }
  0x7b   : > { %s249_s4 = scalar_lea.sflag [#allocation9], %s248_s29  ;;  %s2656_s5 = scalar_lea.vmem [#allocation8], %s1753_s11 }
  0x7c   : > { %2374 = dma.done.wait (%p3287_p0), %s249_s4, 1040  }
  0x7d   : > { %2376 = vsyncadd (%p3287_p0), %s249_s4, 4294966256  ;;  %vm318_vm0 = vcmask 64512   ;;  %v2410_v0 = vmov 0.0   ;;  %v2681_v1 = vld [vmem:[%s2656_s5] sm:$0xff]   ;;  %v2684_v2 = vld [vmem:[%s2656_s5 + $0x8] sm:$0xff]   ;;  %s2411_s18 = smov 96  }
  0x7e   : > { %1892 = vmatprep.subr.bf16.mxu0 %v2410_v0  ;;  %319 = vst.msk [vmem:[#allocation4] sm:$0xff] %vm318_vm0, %v2410_v0  ;;  %320 = vst.msk [vmem:[#allocation4 + $0x8] sm:$0xff] %vm318_vm0, %v2410_v0  ;;  %1912 = vmatprep.subr.bf16.mxu1 %v2410_v0  ;;  %v2688_v3 = vld [vmem:[%s2656_s5 + $0x10] sm:$0xff]   ;;  %v2692_v4 = vld [vmem:[%s2656_s5 + $0x18] sm:$0xff]   ;;  %vm2412_vm1 = vmmov 0   ;;  %vm301_vm2 = vcmask 7168  }
  0x7f   : > { %321 = vst.msk [vmem:[#allocation4 + $0x10] sm:$0xff] %vm318_vm0, %v2410_v0  ;;  %322 = vst.msk [vmem:[#allocation4 + $0x18] sm:$0xff] %vm318_vm0, %v2410_v0  ;;  %399 = vrot.lane.b32.xlu0 %v2681_v1, %s2411_s18  ;;  %403 = vrot.lane.b32.xlu1 %v2688_v3, %s2411_s18  ;;  %v2696_v5 = vld [vmem:[%s2656_s5 + $0x20] sm:$0xff]   ;;  %v2699_v6 = vld [vmem:[%s2656_s5 + $0x28] sm:$0xff]   ;;  %v2413_v30 = vmov -1e+30  }
  0x80   : > { %323 = vst.msk [vmem:[#allocation4 + $0x20] sm:$0xff] %vm318_vm0, %v2410_v0  ;;  %324 = vst.msk [vmem:[#allocation4 + $0x28] sm:$0xff] %vm318_vm0, %v2410_v0  ;;  %v2703_v7 = vld [vmem:[%s2656_s5 + $0x30] sm:$0xff]   ;;  %v2707_v8 = vld [vmem:[%s2656_s5 + $0x38] sm:$0xff]   ;;  %1908 = vmatprep.mubr.msk.bf16.mxu0 %vm2412_vm1, %v2410_v0  ;;  %1928 = vmatprep.mubr.msk.bf16.mxu1 %vm2412_vm1, %v2410_v0  ;;  %s260_s24 = scalar_lea.vmem [#allocation10], %s2642_s21  ;;  %v2414_v38 = vmov 0  }
  0x81   : > { %325 = vst.msk [vmem:[#allocation4 + $0x30] sm:$0xff] %vm318_vm0, %v2410_v0  ;;  %326 = vst.msk [vmem:[#allocation4 + $0x38] sm:$0xff] %vm318_vm0, %v2410_v0  ;;  %v328_v24 = vld [vmem:[%s2648_s20] sm:$0xf]  ;;  %v329_v25 = vld [vmem:[%s2648_s20 + $0x4] sm:$0xf]  ;;  %2145 = vset.pattern.permute.xlu0 %v2414_v38  ;;  %2146 = vset.pattern.permute.xlu1 %v2414_v38 }
  0x82   : > { %v330_v27 = vmul.bf16 1052065461, %v328_v24  ;;  %v331_v28 = vmul.bf16 1052065461, %v329_v25  ;;  %302 = vst.msk [vmem:[#allocation2] sm:$0xff] %vm301_vm2, %v2413_v30  ;;  %303 = vst.msk [vmem:[#allocation2 + $0x8] sm:$0xff] %vm301_vm2, %v2413_v30 }
  0x83   : > { %401 = vrot.lane.b32.xlu0 %v2684_v2, %s2411_s18  ;;  %405 = vrot.lane.b32.xlu1 %v2692_v4, %s2411_s18  ;;  %304 = vst.msk [vmem:[#allocation2 + $0x10] sm:$0xff] %vm301_vm2, %v2413_v30  ;;  %305 = vst.msk [vmem:[#allocation2 + $0x18] sm:$0xff] %vm301_vm2, %v2413_v30  ;;  %v2762_v31 = vld [vmem:[%s260_s24] ss:$0 sm:$0xff]  ;;  %s2415_s23 = smov 64   ;;  %v2809_v50 = vld [vmem:[%s2656_s5 + $0x8] sm:$0xff]  }
  0x84   : > { %v1756_v29 = vcombine.low %v330_v27, %v331_v28  ;;  %306 = vst.msk [vmem:[#allocation2 + $0x20] sm:$0xff] %vm301_vm2, %v2413_v30  ;;  %307 = vst.msk [vmem:[#allocation2 + $0x28] sm:$0xff] %vm301_vm2, %v2413_v30  ;;  %v2814_v51 = vld [vmem:[%s2656_s5] sm:$0xff]   ;;  %s2416_s22 = smov 88   ;;  %v2819_v53 = vld [vmem:[%s2656_s5 + $0x18] sm:$0xff]   ;;  %s2417_s1 = smov 120  }
  0x85   : > { %308 = vst.msk [vmem:[#allocation2 + $0x30] sm:$0xff] %vm301_vm2, %v2413_v30  ;;  %309 = vst.msk [vmem:[#allocation2 + $0x38] sm:$0xff] %vm301_vm2, %v2413_v30  ;;  %v2823_v54 = vld [vmem:[%s2656_s5 + $0x10] sm:$0xff]   ;;  %v2828_v55 = vld [vmem:[%s2656_s5 + $0x28] sm:$0xff]   ;;  %s2418_s9 = smov 56   ;;  %s2419_s10 = smov 80  }
  0x86   : > { %310 = vst.msk [vmem:[#allocation3] sm:$0xff] %vm301_vm2, %v2410_v0  ;;  %311 = vst.msk [vmem:[#allocation3 + $0x8] sm:$0xff] %vm301_vm2, %v2410_v0  ;;  %v2832_v56 = vld [vmem:[%s2656_s5 + $0x20] sm:$0xff]   ;;  %v613_v57 = vld [vmem:[%s2648_s20] sm:$0xf]  ;;  %s2420_s19 = smov 112  }
  0x87   : > { %407 = vrot.lane.b32.xlu0 %v2696_v5, %s2411_s18  ;;  %409 = vrot.lane.b32.xlu1 %v2699_v6, %s2411_s18  ;;  %312 = vst.msk [vmem:[#allocation3 + $0x10] sm:$0xff] %vm301_vm2, %v2410_v0  ;;  %313 = vst.msk [vmem:[#allocation3 + $0x18] sm:$0xff] %vm301_vm2, %v2410_v0  ;;  %v614_v58 = vld [vmem:[%s2648_s20 + $0x4] sm:$0xf]  ;;  %v615_v61 = vmul.bf16 1052065461, %v613_v57 }
  0x88   : > { %314 = vst.msk [vmem:[#allocation3 + $0x20] sm:$0xff] %vm301_vm2, %v2410_v0  ;;  %315 = vst.msk [vmem:[#allocation3 + $0x28] sm:$0xff] %vm301_vm2, %v2410_v0  ;;  %v2838_v59 = vld [vmem:[%s2656_s5 + $0x38] sm:$0xff]   ;;  %v2842_v60 = vld [vmem:[%s2656_s5 + $0x30] sm:$0xff]   ;;  %v616_v62 = vmul.bf16 1052065461, %v614_v58 }
  0x89   : > { %316 = vst.msk [vmem:[#allocation3 + $0x30] sm:$0xff] %vm301_vm2, %v2410_v0  ;;  %317 = vst.msk [vmem:[#allocation3 + $0x38] sm:$0xff] %vm301_vm2, %v2410_v0  ;;  %v2780_v39 = vld [vmem:[#allocation2] sm:$0xff]  ;;  %v2782_v41 = vld [vmem:[#allocation2 + $0x8] sm:$0xff]  ;;  %s2421_s28 = smov 48   ;;  %s2422_s7 = smov 72  }
  0x8a   : > { %v1766_v63 = vcombine.low %v615_v61, %v616_v62  ;;  %s2423_s6 = smov 104   ;;  %s2424_s0 = smov 40   ;;  %vm1488_vm3 = vcmask 60416   ;;  %vm1521_vm4 = vcmask 126016   ;;  %vm1554_vm5 = vcmask 191616  }
  0x8b   : > { %411 = vrot.lane.b32.xlu0 %v2703_v7, %s2411_s18  ;;  %413 = vrot.lane.b32.xlu1 %v2707_v8, %s2411_s18  ;;  %s3193_s8 = scalar_lea.vmem [#allocation11], %s1752_s30  ;;  %s2426_s30 = smov 16   ;;  %vm1587_vm6 = vcmask 257216  }
  0x8c   : > { %s2427_s29 = smov 24   ;;  %s1819_s11 = sshll.u32 %s2395_s15, 7 }
  0x8d   : > { %s1606_s4 = sshll.u32 %s3193_s8, 4  ;;  %s3206_s24 = scalar_lea.hbm %s3264_s3, %s1819_s11  ;;  %s3209_s4 = int_to_ptr.vmem [resolvable:$true] %s1606_s4 }
  0x8e   : > { %s2317_s15 = scalar_lea.vmem %s3209_s4, 128  ;;  %p3288_p6 = scmp.ne.s32.totalorder %s3276_s25, 0 }
  0x8f   : > { %p2318_p2 = scmp.ne.s32.totalorder %s3209_s4, %s2317_s15 }
  0x91   : > { %p2319_p8 = pnand %p2318_p2, %p3288_p6 }
  0x93   : > { %p2320_p9 = pneg %p2319_p8 }
  0xf1   : > { %v400_v9 = vpop.permute.xlu0 %399  ;;  %v404_v13 = vpop.permute.xlu1 %403 }
  0xf2   : > { %v420_v10 = vsel %vm318_vm0, %v400_v9, 0  ;;  %v426_v14 = vsel %vm318_vm0, %v404_v13, 0 }
  0xf3   : > { %1893 = vmatpush3.bf16.xpose.msra.mxu0 %v420_v10 }
  0xf4   : > { %1894 = vmatprep.subr.bf16.mxu0 %v2410_v0 }
  0xf5   : > { %v402_v11 = vpop.permute.xlu0 %401  ;;  %v406_v15 = vpop.permute.xlu1 %405 }
  0xf6   : > { %v423_v12 = vsel %vm318_vm0, %v402_v11, 0  ;;  %v429_v16 = vsel %vm318_vm0, %v406_v15, 0 }
  0xf9   : > { %v408_v17 = vpop.permute.xlu0 %407  ;;  %v410_v19 = vpop.permute.xlu1 %409 }
  0xfa   : > { %v432_v18 = vsel %vm318_vm0, %v408_v17, 0  ;;  %v435_v20 = vsel %vm318_vm0, %v410_v19, 0 }
  0xfb   : > { %1895 = vmatpush3.bf16.xpose.msra.mxu0 %v423_v12 }
  0xfc   : > { %1896 = vmatprep.subr.bf16.mxu0 %v2410_v0 }
  0xfd   : > { %v412_v21 = vpop.permute.xlu0 %411  ;;  %v414_v23 = vpop.permute.xlu1 %413 }
  0xfe   : > { %v438_v22 = vsel %vm318_vm0, %v412_v21, 0  ;;  %v441_v26 = vsel %vm318_vm0, %v414_v23, 0 }
 0x103   : > { %1897 = vmatpush3.bf16.xpose.msra.mxu0 %v426_v14 }
 0x104   : > { %1898 = vmatprep.subr.bf16.mxu0 %v2410_v0 }
 0x10b   : > { %1899 = vmatpush3.bf16.xpose.msra.mxu0 %v429_v16 }
 0x10c   : > { %1900 = vmatprep.subr.bf16.mxu0 %v2410_v0 }
 0x113   : > { %1901 = vmatpush3.bf16.xpose.msra.mxu0 %v432_v18 }
 0x114   : > { %1902 = vmatprep.subr.bf16.mxu0 %v2410_v0 }
 0x11b   : > { %1903 = vmatpush3.bf16.xpose.msra.mxu0 %v435_v20 }
 0x11c   : > { %1904 = vmatprep.subr.bf16.mxu0 %v2410_v0 }
 0x123   : > { %1905 = vmatpush3.bf16.xpose.msra.mxu0 %v438_v22 }
 0x124   : > { %1906 = vmatprep.subr.bf16.mxu0 %v2410_v0 }
 0x12b   : > { %1907 = vmatpush3.bf16.xpose.msra.mxu0 %v441_v26 }
 0x12c   : > { %1952 = vmatprep.subr.bf16.mxu0 %v2410_v0 }
 0x132   : > { %1909 = vmatmul.mubr.msk.bf16.vlgmr.msra.gmra.mrb[0].mxu0 %vm318_vm0, %v1756_v29 }
 0x133   : > { %1968 = vmatprep.mubr.msk.bf16.mxu0 %vm2412_vm1, %v2410_v0 }
 0x205   : > { %v477_v32 = vpop.f32.mrb[0].mxu0 }
 0x206   : > { %v2765_v33 = vadd.f32 %v2762_v31, %v477_v32  ;;  %v1910_v34 = vpop.f32.mrb[1].mxu0 }
 0x207   : > { %v480_v35 = vpop.f32.mrb[2].mxu0 }
 0x208   : > { %v2768_v36 = vadd.f32 %v2762_v31, %v480_v35  ;;  %v1911_v37 = vpop.f32.mrb[3].mxu0  ;;  %486 = vmax.xlane.f32.xlu0 %v2765_v33 }
 0x20a   : > { %488 = vmax.xlane.f32.xlu1 %v2768_v36 }
 0x21b   : > { %530 = vrot.lane.b32.xlu1 %v2684_v2, %s2415_s23 }
 0x21e   : > { %528 = vrot.lane.b32.xlu0 %v2681_v1, %s2415_s23 }
 0x21f   : > { %534 = vrot.lane.b32.xlu1 %v2692_v4, %s2415_s23 }
 0x222   : > { %532 = vrot.lane.b32.xlu0 %v2688_v3, %s2415_s23 }
 0x295   : > { %v487_v40 = vpop.xlane.xlu0 %486 }
 0x296   : > { %v2785_v42 = vmax.f32 %v2780_v39, %v487_v40 }
 0x297   : > { %v489_v43 = vpop.xlane.xlu1 %488 }
 0x298   : > { %v492_v44 = vsub.f32 %v2780_v39, %v2785_v42  ;;  %611 = vst.msk [vmem:[#allocation2] sm:$0xff] %vm301_vm2, %v2785_v42  ;;  %v2792_v45 = vmax.f32 %v2782_v41, %v489_v43  ;;  %500 = vperm.xlu0 %2145, %v2785_v42  }
 0x299   : > { %v529_v46 = vpop.permute.xlu0 %528 }
 0x29a   : > { %v493_v47 = vsub.f32 %v2782_v41, %v2792_v45  ;;  %612 = vst.msk [vmem:[#allocation2 + $0x8] sm:$0xff] %vm301_vm2, %v2792_v45  ;;  %505 = vperm.xlu1 %2146, %v2792_v45   ;;  %1913 = vmatpush3.bf16.msra.mxu1 %v529_v46 }
 0x29b   : > { %v531_v48 = vpop.permute.xlu1 %530  ;;  %1914 = vmatprep.subr.bf16.mxu1 %v2410_v0 }
 0x29c   : > { %538 = vrot.lane.b32.xlu0 %v2699_v6, %s2415_s23 }
 0x29d   : > { %v533_v49 = vpop.permute.xlu0 %532 }
 0x29e   : > { %536 = vrot.lane.b32.xlu1 %v2696_v5, %s2415_s23  ;;  %1915 = vmatpush3.bf16.msra.mxu1 %v531_v48  ;;  %v2895_v48 = vld [vmem:[#allocation2 + $0x10] sm:$0xff] }
 0x29f   : > { %1916 = vmatprep.subr.bf16.mxu1 %v2410_v0  ;;  %v535_v52 = vpop.permute.xlu1 %534 }
 0x2a0   : > { %542 = vrot.lane.b32.xlu0 %v2707_v8, %s2415_s23 }
 0x2a2   : > { %540 = vrot.lane.b32.xlu1 %v2703_v7, %s2415_s23  ;;  %1917 = vmatpush3.bf16.msra.mxu1 %v533_v49 }
 0x2a3   : > { %1918 = vmatprep.subr.bf16.mxu1 %v2410_v0 }
 0x2a4   : > { %682 = vrot.lane.b32.xlu0 %v2809_v50, %s2416_s22 }
 0x2a6   : > { %680 = vrot.lane.b32.xlu1 %v2814_v51, %s2416_s22  ;;  %1919 = vmatpush3.bf16.msra.mxu1 %v535_v52  ;;  %v2897_v52 = vld [vmem:[#allocation2 + $0x18] sm:$0xff] }
 0x2a7   : > { %1920 = vmatprep.subr.bf16.mxu1 %v2410_v0 }
 0x2a8   : > { %686 = vrot.lane.b32.xlu0 %v2819_v53, %s2416_s22 }
 0x2aa   : > { %684 = vrot.lane.b32.xlu1 %v2823_v54, %s2416_s22 }
 0x2ac   : > { %690 = vrot.lane.b32.xlu0 %v2828_v55, %s2416_s22 }
 0x2ae   : > { %688 = vrot.lane.b32.xlu1 %v2832_v56, %s2416_s22 }
 0x2b0   : > { %694 = vrot.lane.b32.xlu0 %v2838_v59, %s2416_s22 }
 0x2b2   : > { %692 = vrot.lane.b32.xlu1 %v2842_v60, %s2416_s22  ;;  %s1591_s22 = scalar_lea.sflag [#allocation7], %s2642_s21 }
 0x2b6   : > { %638 = vrot.lane.b32.xlu1 %v1766_v63, %s2417_s1  ;;  %v2921_v63 = vld [vmem:[%s2656_s5] sm:$0xff]   ;;  %s2428_s1 = smov [#allocation11]  }
 0x317   : > { %v501_v1 = vpop.permute.xlu0 %500 }
 0x318   : > { %v508_v2 = vsub.f32 %v2765_v33, %v501_v1  ;;  %v2925_v1 = vld [vmem:[%s2656_s5 + $0x8] sm:$0xff]  }
 0x319   : > { %v506_v3 = vpop.permute.xlu1 %505 }
 0x31a   : > { %v509_v4 = vsub.f32 %v2768_v36, %v506_v3  ;;  %v510_v5 = vmul.f32 1.442695, %v508_v2  ;;  %v895_v2 = vld [vmem:[%s2648_s20] sm:$0xf]  ;;  %v896_v3 = vld [vmem:[%s2648_s20 + $0x4] sm:$0xf] }
 0x31b   : > { %v539_v8 = vpop.permute.xlu0 %538 }
 0x31c   : > { %v512_v6 = vmul.f32 1.442695, %v509_v4  ;;  %v2945_v4 = vld [vmem:[%s2656_s5 + $0x28] sm:$0xff]  }
 0x31d   : > { %v537_v7 = vpop.permute.xlu1 %536 }
 0x31e   : > { %2179 = vpow2.f32 %v512_v6  ;;  %1921 = vmatpush3.bf16.msra.mxu1 %v537_v7  ;;  %v897_v6 = vmul.bf16 1052065461, %v895_v2  ;;  %v898_v7 = vmul.bf16 1052065461, %v896_v3 }
 0x31f   : > { %1922 = vmatprep.subr.bf16.mxu1 %v2410_v0  ;;  %2181 = vpow2.f32 %v510_v5  ;;  %v543_v10 = vpop.permute.xlu0 %542  ;;  %v2949_v5 = vld [vmem:[%s2656_s5 + $0x30] sm:$0xff]  }
 0x321   : > { %v541_v9 = vpop.permute.xlu1 %540 }
 0x322   : > { %1923 = vmatpush3.bf16.msra.mxu1 %v539_v8  ;;  %v2953_v8 = vld [vmem:[%s2656_s5 + $0x38] sm:$0xff]  }
 0x323   : > { %1924 = vmatprep.subr.bf16.mxu1 %v2410_v0  ;;  %v683_v16 = vpop.permute.xlu0 %682 }
 0x324   : > { %v703_v17 = vsel %vm318_vm0, %v683_v16, 0 }
 0x325   : > { %v681_v14 = vpop.permute.xlu1 %680 }
 0x326   : > { %1925 = vmatpush3.bf16.msra.mxu1 %v541_v9  ;;  %v700_v15 = vsel %vm318_vm0, %v681_v14, 0  ;;  %v1776_v9 = vcombine.low %v897_v6, %v898_v7 }
 0x327   : > { %1926 = vmatprep.subr.bf16.mxu1 %v2410_v0  ;;  %v687_v20 = vpop.permute.xlu0 %686 }
 0x328   : > { %v2851_v11 = vpop.eup %2179  ;;  %v709_v21 = vsel %vm318_vm0, %v687_v20, 0 }
 0x329   : > { %v2853_v12 = vpop.eup %2181  ;;  %v685_v18 = vpop.permute.xlu1 %684 }
 0x32a   : > { %1927 = vmatpush3.bf16.msra.mxu1 %v543_v10  ;;  %v527_v13 = vpack.c.bf16 %v2851_v11, %v2853_v12  ;;  %v706_v19 = vsel %vm318_vm0, %v685_v18, 0 }
 0x32b   : > { %1932 = vmatprep.subr.bf16.mxu1 %v2410_v0  ;;  %v691_v24 = vpop.permute.xlu0 %690 }
 0x32c   : > { %v715_v25 = vsel %vm318_vm0, %v691_v24, 0 }
 0x32d   : > { %1929 = vmatmul.mubr.bf16.vlgmr.msra.gmra.mrb[0].mxu1 %v527_v13  ;;  %v689_v22 = vpop.permute.xlu1 %688 }
 0x32e   : > { %1948 = vmatprep.mubr.msk.bf16.mxu1 %vm2412_vm1, %v2410_v0  ;;  %v712_v23 = vsel %vm318_vm0, %v689_v22, 0 }
 0x32f   : > { %v695_v28 = vpop.permute.xlu0 %694 }
 0x330   : > { %v721_v29 = vsel %vm318_vm0, %v695_v28, 0 }
 0x331   : > { %v693_v26 = vpop.permute.xlu1 %692 }
 0x332   : > { %v718_v27 = vsel %vm318_vm0, %v693_v26, 0 }
 0x333   : > { %1933 = vmatpush3.bf16.xpose.msra.mxu1 %v700_v15 }
 0x334   : > { %1934 = vmatprep.subr.bf16.mxu1 %v2410_v0 }
 0x335   : > { %v639_v30 = vpop.permute.xlu1 %638 }
 0x33b   : > { %1935 = vmatpush3.bf16.xpose.msra.mxu1 %v703_v17 }
 0x33c   : > { %1936 = vmatprep.subr.bf16.mxu1 %v2410_v0 }
 0x343   : > { %1937 = vmatpush3.bf16.xpose.msra.mxu1 %v706_v19 }
 0x344   : > { %1938 = vmatprep.subr.bf16.mxu1 %v2410_v0 }
 0x34b   : > { %1939 = vmatpush3.bf16.xpose.msra.mxu1 %v709_v21 }
 0x34c   : > { %1940 = vmatprep.subr.bf16.mxu1 %v2410_v0 }
 0x353   : > { %1941 = vmatpush3.bf16.xpose.msra.mxu1 %v712_v23 }
 0x354   : > { %1942 = vmatprep.subr.bf16.mxu1 %v2410_v0 }
 0x35b   : > { %1943 = vmatpush3.bf16.xpose.msra.mxu1 %v715_v25 }
 0x35c   : > { %1944 = vmatprep.subr.bf16.mxu1 %v2410_v0 }
 0x363   : > { %1945 = vmatpush3.bf16.xpose.msra.mxu1 %v718_v27 }
 0x364   : > { %1946 = vmatprep.subr.bf16.mxu1 %v2410_v0 }
 0x36b   : > { %1947 = vmatpush3.bf16.xpose.msra.mxu1 %v721_v29 }
 0x36c   : > { %1992 = vmatprep.subr.bf16.mxu1 %v2410_v0 }
 0x372   : > { %1949 = vmatmul.mubr.msk.bf16.vlgmr.msra.gmra.mrb[4].mxu1 %vm318_vm0, %v639_v30 }
 0x373   : > { %2008 = vmatprep.mubr.msk.bf16.mxu1 %vm2412_vm1, %v2410_v0 }
 0x400   : > { %v2879_v32 = vpop.f32.mrb[0].mxu1 }
 0x401   : > { %v1930_v33 = vpop.f32.mrb[1].mxu1 }
 0x402   : > { %v2881_v34 = vpop.f32.mrb[2].mxu1 }
 0x403   : > { %v1931_v35 = vpop.f32.mrb[3].mxu1 }
 0x445   : > { %v757_v36 = vpop.f32.mrb[4].mxu1 }
 0x446   : > { %v2884_v37 = vadd.f32 %v2762_v31, %v757_v36  ;;  %v1950_v38 = vpop.f32.mrb[5].mxu1 }
 0x447   : > { %v760_v40 = vpop.f32.mrb[6].mxu1 }
 0x448   : > { %v2887_v43 = vadd.f32 %v2762_v31, %v760_v40  ;;  %767 = vmax.xlane.f32.xlu0 %v2884_v37  ;;  %v1951_v46 = vpop.f32.mrb[7].mxu1 }
 0x44a   : > { %769 = vmax.xlane.f32.xlu1 %v2887_v43 }
 0x45b   : > { %811 = vrot.lane.b32.xlu1 %v2809_v50, %s2418_s9 }
 0x45e   : > { %809 = vrot.lane.b32.xlu0 %v2814_v51, %s2418_s9 }
 0x45f   : > { %815 = vrot.lane.b32.xlu1 %v2819_v53, %s2418_s9 }
 0x462   : > { %813 = vrot.lane.b32.xlu0 %v2823_v54, %s2418_s9 }
 0x4d5   : > { %v768_v49 = vpop.xlane.xlu0 %767 }
 0x4d6   : > { %v2900_v57 = vmax.f32 %v2895_v48, %v768_v49 }
 0x4d7   : > { %v770_v58 = vpop.xlane.xlu1 %769 }
 0x4d8   : > { %v773_v61 = vsub.f32 %v2895_v48, %v2900_v57  ;;  %893 = vst.msk [vmem:[#allocation2 + $0x10] sm:$0xff] %vm301_vm2, %v2900_v57  ;;  %v2907_v50 = vmax.f32 %v2897_v52, %v770_v58  ;;  %781 = vperm.xlu0 %2145, %v2900_v57  }
 0x4d9   : > { %v810_v51 = vpop.permute.xlu0 %809 }
 0x4da   : > { %v774_v53 = vsub.f32 %v2897_v52, %v2907_v50  ;;  %894 = vst.msk [vmem:[#allocation2 + $0x18] sm:$0xff] %vm301_vm2, %v2907_v50  ;;  %786 = vperm.xlu1 %2146, %v2907_v50   ;;  %1953 = vmatpush3.bf16.msra.mxu0 %v810_v51 }
 0x4db   : > { %1954 = vmatprep.subr.bf16.mxu0 %v2410_v0  ;;  %v812_v54 = vpop.permute.xlu1 %811 }
 0x4dc   : > { %817 = vrot.lane.b32.xlu0 %v2832_v56, %s2418_s9  ;;  %v2930_v56 = vld [vmem:[%s2656_s5 + $0x10] sm:$0xff]   ;;  %v777_v39 = vmul.f32 1.442695, %v774_v53  ;;  %v796_v53 = vld [vmem:[#allocation3 + $0x10] sm:$0xff] }
 0x4dd   : > { %v814_v62 = vpop.permute.xlu0 %813 }
 0x4de   : > { %819 = vrot.lane.b32.xlu1 %v2828_v55, %s2418_s9  ;;  %1955 = vmatpush3.bf16.msra.mxu0 %v812_v54 }
 0x4df   : > { %1956 = vmatprep.subr.bf16.mxu0 %v2410_v0  ;;  %v816_v55 = vpop.permute.xlu1 %815 }
 0x4e0   : > { %821 = vrot.lane.b32.xlu0 %v2842_v60, %s2418_s9  ;;  %v2934_v60 = vld [vmem:[%s2656_s5 + $0x18] sm:$0xff]  }
 0x4e2   : > { %823 = vrot.lane.b32.xlu1 %v2838_v59, %s2418_s9  ;;  %1957 = vmatpush3.bf16.msra.mxu0 %v814_v62  ;;  %v2939_v59 = vld [vmem:[%s2656_s5 + $0x20] sm:$0xff]   ;;  %s2321_s9 = sshll.u32 %s2428_s1, 4  ;;  %s2322_s9 = int_to_ptr.vmem [resolvable:$false] %s2321_s9 }
 0x4e3   : > { %1958 = vmatprep.subr.bf16.mxu0 %v2410_v0  ;;  %p2324_p12 = scmp.lt.s32.totalorder %s3209_s4, %s2322_s9 }
 0x4e4   : > { %962 = vrot.lane.b32.xlu0 %v2921_v63, %s2419_s10 }
 0x4e6   : > { %964 = vrot.lane.b32.xlu1 %v2925_v1, %s2419_s10  ;;  %1959 = vmatpush3.bf16.msra.mxu0 %v816_v55 }
 0x4e7   : > { %1960 = vmatprep.subr.bf16.mxu0 %v2410_v0 }
 0x4e8   : > { %966 = vrot.lane.b32.xlu0 %v2930_v56, %s2419_s10 }
 0x4ea   : > { %968 = vrot.lane.b32.xlu1 %v2934_v60, %s2419_s10 }
 0x4ec   : > { %970 = vrot.lane.b32.xlu0 %v2939_v59, %s2419_s10 }
 0x4ee   : > { %972 = vrot.lane.b32.xlu1 %v2945_v4, %s2419_s10 }
 0x4f0   : > { %974 = vrot.lane.b32.xlu0 %v2949_v5, %s2419_s10 }
 0x4f2   : > { %976 = vrot.lane.b32.xlu1 %v2953_v8, %s2419_s10  ;;  %s2323_s10 = scalar_lea.vmem %s2322_s9, 256 }
 0x4f3   : > { %p2325_p4 = scmp.lt.s32.totalorder %s2323_s10, %s2317_s15 }
 0x4f4   : > { %920 = vrot.lane.b32.xlu0 %v1776_v9, %s2420_s19 }
 0x4f5   : > { %p2326_p10 = por %p2325_p4, %p2324_p12 }
 0x4f7   : > { %p2327_p13 = pnand %p2326_p10, %p2320_p9 }
 0x557   : > { %v782_v10 = vpop.permute.xlu0 %781 }
 0x558   : > { %v789_v13 = vsub.f32 %v2884_v37, %v782_v10 }
 0x559   : > { %v787_v14 = vpop.permute.xlu1 %786 }
 0x55a   : > { %v791_v15 = vmul.f32 1.442695, %v789_v13  ;;  %v790_v16 = vsub.f32 %v2887_v43, %v787_v14  ;;  %v3006_v14 = vld [vmem:[#allocation2 + $0x20] sm:$0xff] }
 0x55b   : > { %v818_v17 = vpop.permute.xlu0 %817 }
 0x55c   : > { %v793_v18 = vmul.f32 1.442695, %v790_v16  ;;  %1961 = vmatpush3.bf16.msra.mxu0 %v818_v17  ;;  %2183 = vpow2.f32 %v791_v15  ;;  %v3008_v16 = vld [vmem:[#allocation2 + $0x28] sm:$0xff] }
 0x55d   : > { %1962 = vmatprep.subr.bf16.mxu0 %v2410_v0  ;;  %v820_v19 = vpop.permute.xlu1 %819 }
 0x55e   : > { %2185 = vpow2.f32 %v793_v18 }
 0x55f   : > { %v822_v20 = vpop.permute.xlu0 %821 }
 0x560   : > { %1963 = vmatpush3.bf16.msra.mxu0 %v820_v19 }
 0x561   : > { %1964 = vmatprep.subr.bf16.mxu0 %v2410_v0  ;;  %v824_v21 = vpop.permute.xlu1 %823 }
 0x563   : > { %v963_v25 = vpop.permute.xlu0 %962 }
 0x564   : > { %1965 = vmatpush3.bf16.msra.mxu0 %v822_v20  ;;  %v982_v26 = vsel %vm318_vm0, %v963_v25, 0  ;;  %v3031_v20 = vld [vmem:[%s2656_s5] sm:$0xff]   ;;  %v1177_v25 = vld [vmem:[%s2648_s20] sm:$0xf] }
 0x565   : > { %1966 = vmatprep.subr.bf16.mxu0 %v2410_v0  ;;  %v965_v27 = vpop.permute.xlu1 %964 }
 0x566   : > { %v2962_v22 = vpop.eup %2183  ;;  %v985_v28 = vsel %vm318_vm0, %v965_v27, 0  ;;  %v3056_v27 = vld [vmem:[%s2656_s5 + $0x28] sm:$0xff]  }
 0x567   : > { %v967_v29 = vpop.permute.xlu0 %966 }
 0x568   : > { %v2964_v23 = vpop.eup %2185  ;;  %1967 = vmatpush3.bf16.msra.mxu0 %v824_v21  ;;  %v988_v30 = vsel %vm318_vm0, %v967_v29, 0  ;;  %v1179_v29 = vmul.bf16 1052065461, %v1177_v25 }
 0x569   : > { %v808_v24 = vpack.c.bf16 %v2964_v23, %v2962_v22  ;;  %1972 = vmatprep.subr.bf16.mxu0 %v2410_v0  ;;  %v969_v33 = vpop.permute.xlu1 %968 }
 0x56a   : > { %v991_v35 = vsel %vm318_vm0, %v969_v33, 0  ;;  %v3064_v33 = vld [vmem:[%s2656_s5 + $0x38] sm:$0xff]  }
 0x56b   : > { %1969 = vmatmul.mubr.bf16.vlgmr.msra.gmra.mrb[4].mxu0 %v808_v24  ;;  %v971_v36 = vpop.permute.xlu0 %970  ;;  %v3045_v24 = vld [vmem:[%s2656_s5 + $0x18] sm:$0xff]  }
 0x56c   : > { %1988 = vmatprep.mubr.msk.bf16.mxu0 %vm2412_vm1, %v2410_v0  ;;  %v994_v37 = vsel %vm318_vm0, %v971_v36, 0 }
 0x56d   : > { %v973_v38 = vpop.permute.xlu1 %972 }
 0x56e   : > { %v997_v40 = vsel %vm318_vm0, %v973_v38, 0 }
 0x56f   : > { %v975_v43 = vpop.permute.xlu0 %974 }
 0x570   : > { %v1000_v46 = vsel %vm318_vm0, %v975_v43, 0 }
 0x571   : > { %1973 = vmatpush3.bf16.xpose.msra.mxu0 %v982_v26  ;;  %v977_v49 = vpop.permute.xlu1 %976  ;;  %v1178_v26 = vld [vmem:[%s2648_s20 + $0x4] sm:$0xf]  ;;  %s2425_s20 = smov 8  }
 0x572   : > { %1974 = vmatprep.subr.bf16.mxu0 %v2410_v0  ;;  %v1003_v58 = vsel %vm318_vm0, %v977_v49, 0 }
 0x573   : > { %v921_v51 = vpop.permute.xlu0 %920 }
 0x579   : > { %1975 = vmatpush3.bf16.xpose.msra.mxu0 %v985_v28  ;;  %v3060_v28 = vld [vmem:[%s2656_s5 + $0x30] sm:$0xff]  }
 0x57a   : > { %1976 = vmatprep.subr.bf16.mxu0 %v2410_v0 }
 0x581   : > { %1977 = vmatpush3.bf16.xpose.msra.mxu0 %v988_v30  ;;  %v1180_v30 = vmul.bf16 1052065461, %v1178_v26 }
 0x582   : > { %1978 = vmatprep.subr.bf16.mxu0 %v2410_v0 }
 0x589   : > { %1979 = vmatpush3.bf16.xpose.msra.mxu0 %v991_v35  ;;  %v1786_v35 = vcombine.low %v1179_v29, %v1180_v30 }
 0x58a   : > { %1980 = vmatprep.subr.bf16.mxu0 %v2410_v0 }
 0x591   : > { %1981 = vmatpush3.bf16.xpose.msra.mxu0 %v994_v37 }
 0x592   : > { %1982 = vmatprep.subr.bf16.mxu0 %v2410_v0 }
 0x599   : > { %1983 = vmatpush3.bf16.xpose.msra.mxu0 %v997_v40 }
 0x59a   : > { %1984 = vmatprep.subr.bf16.mxu0 %v2410_v0 }
 0x5a1   : > { %1985 = vmatpush3.bf16.xpose.msra.mxu0 %v1000_v46 }
 0x5a2   : > { %1986 = vmatprep.subr.bf16.mxu0 %v2410_v0 }
 0x5a9   : > { %1987 = vmatpush3.bf16.xpose.msra.mxu0 %v1003_v58 }
 0x5aa   : > { %2032 = vmatprep.subr.bf16.mxu0 %v2410_v0 }
 0x5b0   : > { %1989 = vmatmul.mubr.msk.bf16.vlgmr.msra.gmra.mrb[8].mxu0 %vm318_vm0, %v921_v51 }
 0x5b1   : > { %2048 = vmatprep.mubr.msk.bf16.mxu0 %vm2412_vm1, %v2410_v0 }
 0x63e   : > { %v2990_v54 = vpop.f32.mrb[4].mxu0 }
 0x63f   : > { %v1970_v62 = vpop.f32.mrb[5].mxu0 }
 0x640   : > { %v2992_v55 = vpop.f32.mrb[6].mxu0 }
 0x641   : > { %v1971_v2 = vpop.f32.mrb[7].mxu0 }
 0x683   : > { %v1039_v3 = vpop.f32.mrb[8].mxu0 }
 0x684   : > { %v2995_v6 = vadd.f32 %v2762_v31, %v1039_v3  ;;  %v1990_v7 = vpop.f32.mrb[9].mxu0 }
 0x685   : > { %v1042_v9 = vpop.f32.mrb[10].mxu0 }
 0x686   : > { %v2998_v10 = vadd.f32 %v2762_v31, %v1042_v9  ;;  %1049 = vmax.xlane.f32.xlu1 %v2995_v6  ;;  %v1991_v13 = vpop.f32.mrb[11].mxu0 }
 0x688   : > { %1051 = vmax.xlane.f32.xlu0 %v2998_v10 }
 0x697   : > { %1093 = vrot.lane.b32.xlu1 %v2925_v1, %s2421_s28 }
 0x69b   : > { %1095 = vrot.lane.b32.xlu1 %v2930_v56, %s2421_s28 }
 0x69e   : > { %1091 = vrot.lane.b32.xlu0 %v2921_v63, %s2421_s28 }
 0x6a2   : > { %1097 = vrot.lane.b32.xlu0 %v2934_v60, %s2421_s28 }
 0x713   : > { %v1050_v15 = vpop.xlane.xlu1 %1049 }
 0x714   : > { %v3011_v17 = vmax.f32 %v3006_v14, %v1050_v15 }
 0x715   : > { %v1052_v18 = vpop.xlane.xlu0 %1051 }
 0x716   : > { %v1055_v19 = vsub.f32 %v3006_v14, %v3011_v17  ;;  %1175 = vst.msk [vmem:[#allocation2 + $0x20] sm:$0xff] %vm301_vm2, %v3011_v17  ;;  %v3018_v63 = vmax.f32 %v3008_v16, %v1052_v18  ;;  %1063 = vperm.xlu1 %2146, %v3011_v17   ;;  %v1078_v17 = vld [vmem:[#allocation3 + $0x20] sm:$0xff] }
 0x717   : > { %v1094_v60 = vpop.permute.xlu1 %1093 }
 0x718   : > { %v1056_v1 = vsub.f32 %v3008_v16, %v3018_v63  ;;  %1176 = vst.msk [vmem:[#allocation2 + $0x28] sm:$0xff] %vm301_vm2, %v3018_v63  ;;  %1068 = vperm.xlu0 %2145, %v3018_v63  }
 0x719   : > { %v1092_v56 = vpop.permute.xlu0 %1091 }
 0x71a   : > { %1099 = vrot.lane.b32.xlu1 %v2939_v59, %s2421_s28  ;;  %1993 = vmatpush3.bf16.msra.mxu1 %v1092_v56  ;;  %v3036_v59 = vld [vmem:[%s2656_s5 + $0x8] sm:$0xff]   ;;  %v1059_v42 = vmul.f32 1.442695, %v1056_v1 }
 0x71b   : > { %1994 = vmatprep.subr.bf16.mxu1 %v2410_v0  ;;  %v1096_v21 = vpop.permute.xlu1 %1095  ;;  %v797_v1 = vld [vmem:[#allocation3 + $0x18] sm:$0xff] }
 0x71c   : > { %1101 = vrot.lane.b32.xlu0 %v2945_v4, %s2421_s28  ;;  %v3040_v4 = vld [vmem:[%s2656_s5 + $0x10] sm:$0xff]  }
 0x71e   : > { %1103 = vrot.lane.b32.xlu1 %v2949_v5, %s2421_s28  ;;  %1995 = vmatpush3.bf16.msra.mxu1 %v1094_v60  ;;  %v1098_v5 = vpop.permute.xlu0 %1097 }
 0x71f   : > { %1996 = vmatprep.subr.bf16.mxu1 %v2410_v0 }
 0x720   : > { %1105 = vrot.lane.b32.xlu0 %v2953_v8, %s2421_s28  ;;  %v3049_v8 = vld [vmem:[%s2656_s5 + $0x20] sm:$0xff]  }
 0x722   : > { %1244 = vrot.lane.b32.xlu1 %v3031_v20, %s2422_s7  ;;  %1997 = vmatpush3.bf16.msra.mxu1 %v1096_v21 }
 0x723   : > { %1998 = vmatprep.subr.bf16.mxu1 %v2410_v0 }
 0x724   : > { %1246 = vrot.lane.b32.xlu0 %v3036_v59, %s2422_s7 }
 0x726   : > { %1248 = vrot.lane.b32.xlu1 %v3040_v4, %s2422_s7  ;;  %1999 = vmatpush3.bf16.msra.mxu1 %v1098_v5 }
 0x727   : > { %2000 = vmatprep.subr.bf16.mxu1 %v2410_v0 }
 0x728   : > { %1250 = vrot.lane.b32.xlu0 %v3045_v24, %s2422_s7 }
 0x72a   : > { %1252 = vrot.lane.b32.xlu1 %v3049_v8, %s2422_s7 }
 0x72c   : > { %1254 = vrot.lane.b32.xlu0 %v3056_v27, %s2422_s7 }
 0x72e   : > { %1256 = vrot.lane.b32.xlu1 %v3060_v28, %s2422_s7 }
 0x730   : > { %1258 = vrot.lane.b32.xlu0 %v3064_v33, %s2422_s7 }
 0x732   : > { %1202 = vrot.lane.b32.xlu1 %v1786_v35, %s2423_s6 }
 0x795   : > { %v1064_v36 = vpop.permute.xlu1 %1063 }
 0x796   : > { %v1071_v37 = vsub.f32 %v2995_v6, %v1064_v36 }
 0x797   : > { %v1069_v38 = vpop.permute.xlu0 %1068 }
 0x798   : > { %v1073_v40 = vmul.f32 1.442695, %v1071_v37  ;;  %v1072_v43 = vsub.f32 %v2998_v10, %v1069_v38 }
 0x799   : > { %v1100_v46 = vpop.permute.xlu1 %1099 }
 0x79a   : > { %v1075_v49 = vmul.f32 1.442695, %v1072_v43  ;;  %2001 = vmatpush3.bf16.msra.mxu1 %v1100_v46  ;;  %2187 = vpow2.f32 %v1073_v40 }
 0x79b   : > { %2002 = vmatprep.subr.bf16.mxu1 %v2410_v0  ;;  %v1102_v58 = vpop.permute.xlu0 %1101 }
 0x79c   : > { %2189 = vpow2.f32 %v1075_v49 }
 0x79d   : > { %v1104_v51 = vpop.permute.xlu1 %1103 }
 0x79e   : > { %2003 = vmatpush3.bf16.msra.mxu1 %v1102_v58 }
 0x79f   : > { %2004 = vmatprep.subr.bf16.mxu1 %v2410_v0  ;;  %v1106_v62 = vpop.permute.xlu0 %1105 }
 0x7a1   : > { %v1245_v7 = vpop.permute.xlu1 %1244 }
 0x7a2   : > { %2005 = vmatpush3.bf16.msra.mxu1 %v1104_v51  ;;  %v1264_v9 = vsel %vm318_vm0, %v1245_v7, 0 }
 0x7a3   : > { %2006 = vmatprep.subr.bf16.mxu1 %v2410_v0  ;;  %v1247_v10 = vpop.permute.xlu0 %1246 }
 0x7a4   : > { %v3073_v2 = vpop.eup %2187  ;;  %v1267_v13 = vsel %vm318_vm0, %v1247_v10, 0 }
 0x7a5   : > { %v1249_v15 = vpop.permute.xlu1 %1248 }
 0x7a6   : > { %v3075_v3 = vpop.eup %2189  ;;  %2007 = vmatpush3.bf16.msra.mxu1 %v1106_v62  ;;  %v1270_v18 = vsel %vm318_vm0, %v1249_v15, 0 }
 0x7a7   : > { %v1090_v6 = vpack.c.bf16 %v3075_v3, %v3073_v2  ;;  %2012 = vmatprep.subr.bf16.mxu1 %v2410_v0  ;;  %v1251_v56 = vpop.permute.xlu0 %1250 }
 0x7a8   : > { %v1273_v60 = vsel %vm318_vm0, %v1251_v56, 0 }
 0x7a9   : > { %2009 = vmatmul.mubr.bf16.vlgmr.msra.gmra.mrb[8].mxu1 %v1090_v6  ;;  %v1253_v21 = vpop.permute.xlu1 %1252 }
 0x7aa   : > { %2028 = vmatprep.mubr.msk.bf16.mxu1 %vm2412_vm1, %v2410_v0  ;;  %v1276_v5 = vsel %vm318_vm0, %v1253_v21, 0 }
 0x7ab   : > { %v1255_v25 = vpop.permute.xlu0 %1254 }
 0x7ac   : > { %v1279_v26 = vsel %vm318_vm0, %v1255_v25, 0 }
 0x7ad   : > { %v1257_v29 = vpop.permute.xlu1 %1256 }
 0x7ae   : > { %v1282_v30 = vsel %vm318_vm0, %v1257_v29, 0 }
 0x7af   : > { %2013 = vmatpush3.bf16.xpose.msra.mxu1 %v1264_v9  ;;  %v1259_v35 = vpop.permute.xlu0 %1258  ;;  %v3106_v9 = vld [vmem:[#allocation2 + $0x30] sm:$0xff] }
 0x7b0   : > { %2014 = vmatprep.subr.bf16.mxu1 %v2410_v0  ;;  %v1285_v36 = vsel %vm318_vm0, %v1259_v35, 0 }
 0x7b1   : > { %v1203_v37 = vpop.permute.xlu1 %1202 }
 0x7b7   : > { %2015 = vmatpush3.bf16.xpose.msra.mxu1 %v1267_v13  ;;  %v3108_v13 = vld [vmem:[#allocation2 + $0x38] sm:$0xff] }
 0x7b8   : > { %2016 = vmatprep.subr.bf16.mxu1 %v2410_v0 }
 0x7bf   : > { %2017 = vmatpush3.bf16.xpose.msra.mxu1 %v1270_v18 }
 0x7c0   : > { %2018 = vmatprep.subr.bf16.mxu1 %v2410_v0 }
 0x7c7   : > { %2019 = vmatpush3.bf16.xpose.msra.mxu1 %v1273_v60 }
 0x7c8   : > { %2020 = vmatprep.subr.bf16.mxu1 %v2410_v0 }
 0x7cf   : > { %2021 = vmatpush3.bf16.xpose.msra.mxu1 %v1276_v5 }
 0x7d0   : > { %2022 = vmatprep.subr.bf16.mxu1 %v2410_v0 }
 0x7d7   : > { %2023 = vmatpush3.bf16.xpose.msra.mxu1 %v1279_v26  ;;  %v494_v26 = vmul.f32 1.442695, %v492_v44 }
 0x7d8   : > { %2024 = vmatprep.subr.bf16.mxu1 %v2410_v0 }
 0x7df   : > { %2025 = vmatpush3.bf16.xpose.msra.mxu1 %v1282_v30  ;;  %v775_v30 = vmul.f32 1.442695, %v773_v61 }
 0x7e0   : > { %2026 = vmatprep.subr.bf16.mxu1 %v2410_v0 }
 0x7e7   : > { %2027 = vmatpush3.bf16.xpose.msra.mxu1 %v1285_v36 }
 0x7ee   : > { %2029 = vmatmul.mubr.msk.bf16.vlgmr.msra.gmra.mrb[12].mxu1 %vm318_vm0, %v1203_v37  ;;  %v1079_v37 = vld [vmem:[#allocation3 + $0x28] sm:$0xff] }
 0x87c   : > { %v3098_v38 = vpop.f32.mrb[8].mxu1 }
 0x87d   : > { %v2010_v40 = vpop.f32.mrb[9].mxu1 }
 0x87e   : > { %v3100_v43 = vpop.f32.mrb[10].mxu1 }
 0x87f   : > { %v2011_v46 = vpop.f32.mrb[11].mxu1 }
 0x8c1   : > { %v1321_v49 = vpop.f32.mrb[12].mxu1 }
 0x8c2   : > { %v1322_v58 = vadd.f32 %v2762_v31, %v1321_v49  ;;  %v2030_v51 = vpop.f32.mrb[13].mxu1 }
 0x8c3   : > { %v1324_v62 = vpop.f32.mrb[14].mxu1 }
 0x8c4   : > { %v1325_v6 = vadd.f32 %v2762_v31, %v1324_v62  ;;  %1331 = vmax.xlane.f32.xlu0 %v1322_v58  ;;  %v2031_v7 = vpop.f32.mrb[15].mxu1 }
 0x8c5   : > { %v1360_v7 = vld [vmem:[#allocation3 + $0x30] sm:$0xff] }
 0x8c6   : > { %1333 = vmax.xlane.f32.xlu1 %v1325_v6 }
 0x8d7   : > { %1375 = vrot.lane.b32.xlu1 %v3036_v59, %s2424_s0 }
 0x8da   : > { %1373 = vrot.lane.b32.xlu0 %v3031_v20, %s2424_s0 }
 0x951   : > { %v1332_v10 = vpop.xlane.xlu0 %1331 }
 0x952   : > { %v3111_v15 = vmax.f32 %v3106_v9, %v1332_v10 }
 0x953   : > { %v1334_v18 = vpop.xlane.xlu1 %1333 }
 0x954   : > { %v1337_v31 = vsub.f32 %v3106_v9, %v3111_v15  ;;  %1457 = vst.msk [vmem:[#allocation2 + $0x30] sm:$0xff] %vm301_vm2, %v3111_v15  ;;  %v3118_v56 = vmax.f32 %v3108_v13, %v1334_v18  ;;  %1345 = vperm.xlu0 %2145, %v3111_v15   ;;  %v1361_v9 = vld [vmem:[#allocation3 + $0x38] sm:$0xff]  ;;  %v514_v15 = vld [vmem:[#allocation3] sm:$0xff] }
 0x955   : > { %v1374_v20 = vpop.permute.xlu0 %1373 }
 0x956   : > { %v1338_v59 = vsub.f32 %v3108_v13, %v3118_v56  ;;  %1458 = vst.msk [vmem:[#allocation2 + $0x38] sm:$0xff] %vm301_vm2, %v3118_v56  ;;  %1350 = vperm.xlu1 %2146, %v3118_v56   ;;  %2033 = vmatpush3.bf16.msra.mxu0 %v1374_v20  ;;  %v1339_v41 = vmul.f32 1.442695, %v1337_v31  ;;  %v515_v20 = vld [vmem:[#allocation3 + $0x8] sm:$0xff] }
 0x957   : > { %2034 = vmatprep.subr.bf16.mxu0 %v2410_v0  ;;  %v1376_v60 = vpop.permute.xlu1 %1375 }
 0x958   : > { %1377 = vrot.lane.b32.xlu0 %v3040_v4, %s2424_s0  ;;  %v1341_v45 = vmul.f32 1.442695, %v1338_v59 }
 0x95a   : > { %1379 = vrot.lane.b32.xlu1 %v3045_v24, %s2424_s0  ;;  %2035 = vmatpush3.bf16.msra.mxu0 %v1376_v60 }
 0x95b   : > { %2036 = vmatprep.subr.bf16.mxu0 %v2410_v0 }
 0x95c   : > { %1381 = vrot.lane.b32.xlu0 %v3049_v8, %s2424_s0 }
 0x95e   : > { %1383 = vrot.lane.b32.xlu1 %v3056_v27, %s2424_s0 }
 0x960   : > { %1385 = vrot.lane.b32.xlu0 %v3060_v28, %s2424_s0 }
 0x962   : > { %1387 = vrot.lane.b32.xlu1 %v3064_v33, %s2424_s0 }
 0x97f   : > { %800 = vadd.xlane.f32.xlu0 %v2962_v22 }
 0x983   : > { %1082 = vadd.xlane.f32.xlu0 %v3073_v2 }
 0x986   : > { %802 = vadd.xlane.f32.xlu1 %v2964_v23 }
 0x987   : > { %1084 = vadd.xlane.f32.xlu0 %v3075_v3 }
 0x9d3   : > { %v1346_v4 = vpop.permute.xlu0 %1345 }
 0x9d4   : > { %v1353_v24 = vsub.f32 %v1322_v58, %v1346_v4 }
 0x9d5   : > { %v1351_v21 = vpop.permute.xlu1 %1350 }
 0x9d6   : > { %v1355_v5 = vmul.f32 1.442695, %v1353_v24  ;;  %v1354_v25 = vsub.f32 %v1325_v6, %v1351_v21 }
 0x9d7   : > { %v1378_v8 = vpop.permute.xlu0 %1377 }
 0x9d8   : > { %2191 = vpow2.f32 %v1355_v5  ;;  %v1357_v27 = vmul.f32 1.442695, %v1354_v25  ;;  %2037 = vmatpush3.bf16.msra.mxu0 %v1378_v8  ;;  %v593_v25 = vld [vmem:[#allocation4] sm:$0xff] }
 0x9d9   : > { %2038 = vmatprep.subr.bf16.mxu0 %v2410_v0  ;;  %v1380_v28 = vpop.permute.xlu1 %1379 }
 0x9da   : > { %2193 = vpow2.f32 %v1357_v27 }
 0x9db   : > { %v1382_v22 = vpop.permute.xlu0 %1381  ;;  %2195 = vpow2.f32 %v494_v26 }
 0x9dc   : > { %2039 = vmatpush3.bf16.msra.mxu0 %v1380_v28  ;;  %2197 = vpow2.f32 %v775_v30  ;;  %v876_v30 = vld [vmem:[#allocation4 + $0x18] sm:$0xff] }
 0x9dd   : > { %2040 = vmatprep.subr.bf16.mxu0 %v2410_v0  ;;  %v1384_v23 = vpop.permute.xlu1 %1383 }
 0x9df   : > { %v1386_v3 = vpop.permute.xlu0 %1385 }
 0x9e0   : > { %2041 = vmatpush3.bf16.msra.mxu0 %v1382_v22  ;;  %v875_v22 = vld [vmem:[#allocation4 + $0x10] sm:$0xff] }
 0x9e1   : > { %2042 = vmatprep.subr.bf16.mxu0 %v2410_v0  ;;  %v1388_v29 = vpop.permute.xlu1 %1387 }
 0x9e2   : > { %v2192_v33 = vpop.eup %2191 }
 0x9e3   : > { %1364 = vadd.xlane.f32.xlu1 %v2192_v33 }
 0x9e4   : > { %v2194_v2 = vpop.eup %2193  ;;  %2043 = vmatpush3.bf16.msra.mxu0 %v1384_v23 }
 0x9e5   : > { %1366 = vadd.xlane.f32.xlu0 %v2194_v2  ;;  %2044 = vmatprep.subr.bf16.mxu0 %v2410_v0  ;;  %v1372_v35 = vpack.c.bf16 %v2194_v2, %v2192_v33  ;;  %v2196_v44 = vpop.eup %2195  ;;  %v594_v2 = vld [vmem:[#allocation4 + $0x8] sm:$0xff] }
 0x9e6   : > { %v516_v60 = vmul.f32 %v2196_v44, %v514_v15 }
 0x9e7   : > { %518 = vadd.xlane.f32.xlu1 %v2853_v12  ;;  %v496_v12 = vmul.f32 1.442695, %v493_v47  ;;  %v2198_v47 = vpop.eup %2197 }
 0x9e8   : > { %2045 = vmatpush3.bf16.msra.mxu0 %v1386_v3  ;;  %v798_v14 = vmul.f32 %v2198_v47, %v796_v53 }
 0x9e9   : > { %520 = vadd.xlane.f32.xlu0 %v2851_v11  ;;  %2046 = vmatprep.subr.bf16.mxu0 %v2410_v0  ;;  %2199 = vpow2.f32 %v496_v12  ;;  %v1057_v0 = vmul.f32 1.442695, %v1055_v19 }
 0x9ea   : > { %2201 = vpow2.f32 %v777_v39 }
 0x9eb   : > { %2203 = vpow2.f32 %v1057_v0 }
 0x9ec   : > { %2047 = vmatpush3.bf16.msra.mxu0 %v1388_v29  ;;  %2205 = vpow2.f32 %v1059_v42 }
 0x9ed   : > { %2207 = vpow2.f32 %v1339_v41 }
 0x9ee   : > { %2209 = vpow2.f32 %v1341_v45 }
 0x9ef   : > { %2049 = vmatmul.mubr.bf16.vlgmr.msra.gmra.mrb[12].mxu0 %v1372_v35 }
 0x9f3   : > { %v2200_v11 = vpop.eup %2199 }
 0x9f4   : > { %v2202_v48 = vpop.eup %2201  ;;  %v517_v21 = vmul.f32 %v2200_v11, %v515_v20 }
 0x9f5   : > { %v2204_v52 = vpop.eup %2203  ;;  %v799_v46 = vmul.f32 %v2202_v48, %v797_v1 }
 0x9f6   : > { %v2206_v57 = vpop.eup %2205  ;;  %v1080_v63 = vmul.f32 %v2204_v52, %v1078_v17 }
 0x9f7   : > { %v2208_v61 = vpop.eup %2207  ;;  %v1081_v58 = vmul.f32 %v2206_v57, %v1079_v37  ;;  %v1439_v37 = vld [vmem:[#allocation4 + $0x30] sm:$0xff] }
 0x9f8   : > { %597 = vperm.xlu1 %2146, %v2196_v44   ;;  %v2210_v50 = vpop.eup %2209  ;;  %v1362_v10 = vmul.f32 %v2208_v61, %v1360_v7  ;;  %v1157_v44 = vld [vmem:[#allocation4 + $0x20] sm:$0xff] }
 0x9f9   : > { %v1363_v31 = vmul.f32 %v2210_v50, %v1361_v9 }
 0x9fc   : > { %879 = vperm.xlu1 %2146, %v2198_v47  }
 0x9ff   : > { %602 = vperm.xlu0 %2145, %v2200_v11   ;;  %v1158_v11 = vld [vmem:[#allocation4 + $0x28] sm:$0xff] }
 0xa00   : > { %884 = vperm.xlu1 %2146, %v2202_v48  }
 0xa03   : > { %1161 = vperm.xlu0 %2145, %v2204_v52  }
 0xa04   : > { %1166 = vperm.xlu1 %2146, %v2206_v57  }
 0xa07   : > { %1443 = vperm.xlu0 %2145, %v2208_v61  }
 0xa08   : > { %1448 = vperm.xlu1 %2146, %v2210_v50  }
 0xa0c   : > { %v801_v16 = vpop.xlane.xlu0 %800 }
 0xa0d   : > { %v804_v19 = vadd.f32 %v801_v16, %v798_v14 }
 0xa0f   : > { %806 = vst.msk [vmem:[#allocation3 + $0x10] sm:$0xff] %vm301_vm2, %v804_v19 }
 0xa10   : > { %v1083_v36 = vpop.xlane.xlu0 %1082 }
 0xa11   : > { %v1086_v40 = vadd.f32 %v1083_v36, %v1080_v63 }
 0xa13   : > { %1088 = vst.msk [vmem:[#allocation3 + $0x20] sm:$0xff] %vm301_vm2, %v1086_v40  ;;  %v803_v49 = vpop.xlane.xlu1 %802 }
 0xa14   : > { %v805_v51 = vadd.f32 %v803_v49, %v799_v46  ;;  %v1085_v62 = vpop.xlane.xlu0 %1084  ;;  %v1440_v46 = vld [vmem:[#allocation4 + $0x38] sm:$0xff] }
 0xa15   : > { %v1087_v6 = vadd.f32 %v1085_v62, %v1081_v58 }
 0xa16   : > { %807 = vst.msk [vmem:[#allocation3 + $0x18] sm:$0xff] %vm301_vm2, %v805_v51  ;;  %v1491_v39 = vld [vmem:[#allocation3 + $0x10] sm:$0xff] }
 0xa17   : > { %1089 = vst.msk [vmem:[#allocation3 + $0x28] sm:$0xff] %vm301_vm2, %v1087_v6 }
 0xa1a   : > { %v1524_v52 = vld [vmem:[#allocation3 + $0x20] sm:$0xff] }
 0xa1d   : > { %v1492_v45 = vld [vmem:[#allocation3 + $0x18] sm:$0xff] }
 0xa1e   : > { %v1525_v53 = vld [vmem:[#allocation3 + $0x28] sm:$0xff] }
 0xa70   : > { %v1365_v13 = vpop.xlane.xlu1 %1364 }
 0xa71   : > { %v1368_v18 = vadd.f32 %v1365_v13, %v1362_v10 }
 0xa72   : > { %v1367_v56 = vpop.xlane.xlu0 %1366 }
 0xa73   : > { %1370 = vst.msk [vmem:[#allocation3 + $0x30] sm:$0xff] %vm301_vm2, %v1368_v18  ;;  %v1369_v59 = vadd.f32 %v1367_v56, %v1363_v31 }
 0xa74   : > { %v519_v4 = vpop.xlane.xlu1 %518 }
 0xa75   : > { %1371 = vst.msk [vmem:[#allocation3 + $0x38] sm:$0xff] %vm301_vm2, %v1369_v59  ;;  %v522_v24 = vadd.f32 %v519_v4, %v516_v60 }
 0xa76   : > { %v521_v5 = vpop.xlane.xlu0 %520 }
 0xa77   : > { %525 = vst.msk [vmem:[#allocation3] sm:$0xff] %vm301_vm2, %v522_v24  ;;  %v523_v8 = vadd.f32 %v521_v5, %v517_v21 }
 0xa78   : > { %v598_v27 = vpop.permute.xlu1 %597 }
 0xa79   : > { %526 = vst.msk [vmem:[#allocation3 + $0x8] sm:$0xff] %vm301_vm2, %v523_v8  ;;  %v605_v28 = vmul.f32 %v598_v27, %v593_v25 }
 0xa7a   : > { %v1557_v14 = vld [vmem:[#allocation3 + $0x30] sm:$0xff] }
 0xa7b   : > { %v607_v23 = vadd.f32 %v605_v28, %v2879_v32 }
 0xa7c   : > { %v880_v33 = vpop.permute.xlu1 %879 }
 0xa7d   : > { %609 = vst.msk [vmem:[#allocation4] sm:$0xff] %vm318_vm0, %v607_v23  ;;  %v887_v3 = vmul.f32 %v880_v33, %v875_v22 }
 0xa7e   : > { %v1462_v26 = vld [vmem:[#allocation3] sm:$0xff]  ;;  %v603_v29 = vpop.permute.xlu0 %602 }
 0xa7f   : > { %2211 = vrcp.f32 %v1462_v26  ;;  %v889_v35 = vadd.f32 %v887_v3, %v2990_v54  ;;  %v606_v12 = vmul.f32 %v603_v29, %v594_v2 }
 0xa80   : > { %v1463_v0 = vld [vmem:[#allocation3 + $0x8] sm:$0xff]  ;;  %v885_v42 = vpop.permute.xlu1 %884 }
 0xa81   : > { %2213 = vrcp.f32 %v1463_v0  ;;  %891 = vst.msk [vmem:[#allocation4 + $0x10] sm:$0xff] %vm318_vm0, %v889_v35  ;;  %v608_v32 = vadd.f32 %v606_v12, %v2881_v34  ;;  %v888_v41 = vmul.f32 %v885_v42, %v876_v30 }
 0xa82   : > { %v1162_v47 = vpop.permute.xlu0 %1161  ;;  %2215 = vrcp.f32 %v1491_v39 }
 0xa83   : > { %610 = vst.msk [vmem:[#allocation4 + $0x8] sm:$0xff] %vm318_vm0, %v608_v32  ;;  %v890_v48 = vadd.f32 %v888_v41, %v2992_v55  ;;  %v1169_v54 = vmul.f32 %v1162_v47, %v1157_v44  ;;  %2217 = vrcp.f32 %v1492_v45  ;;  %v1558_v55 = vld [vmem:[#allocation3 + $0x38] sm:$0xff] }
 0xa84   : > { %v1167_v57 = vpop.permute.xlu1 %1166  ;;  %2219 = vrcp.f32 %v1524_v52  ;;  %v1466_v15 = vld [vmem:[#allocation4] sm:$0xff] }
 0xa85   : > { %892 = vst.msk [vmem:[#allocation4 + $0x18] sm:$0xff] %vm318_vm0, %v890_v48  ;;  %v1171_v61 = vadd.f32 %v1169_v54, %v3098_v38  ;;  %v1170_v50 = vmul.f32 %v1167_v57, %v1158_v11  ;;  %2221 = vrcp.f32 %v1525_v53 }
 0xa86   : > { %2223 = vrcp.f32 %v1557_v14  ;;  %v1444_v40 = vpop.permute.xlu0 %1443 }
 0xa87   : > { %1173 = vst.msk [vmem:[#allocation4 + $0x20] sm:$0xff] %vm318_vm0, %v1171_v61  ;;  %v1172_v34 = vadd.f32 %v1170_v50, %v3100_v43  ;;  %2225 = vrcp.f32 %v1558_v55  ;;  %v1451_v58 = vmul.f32 %v1444_v40, %v1439_v37 }
 0xa88   : > { %v1449_v49 = vpop.permute.xlu1 %1448  ;;  %v1495_v4 = vld [vmem:[#allocation4 + $0x10] sm:$0xff] }
 0xa89   : > { %v2212_v16 = vpop.eup %2211  ;;  %1174 = vst.msk [vmem:[#allocation4 + $0x28] sm:$0xff] %vm318_vm0, %v1172_v34  ;;  %v1452_v62 = vmul.f32 %v1449_v49, %v1440_v46 }
 0xa8a   : > { %1470 = vperm.xlu0 %2145, %v2212_v16   ;;  %v1467_v56 = vld [vmem:[#allocation4 + $0x8] sm:$0xff] }
 0xa8b   : > { %v2214_v17 = vpop.eup %2213 }
 0xa8c   : > { %1475 = vperm.xlu1 %2146, %v2214_v17   ;;  %v2216_v19 = vpop.eup %2215  ;;  %v1496_v25 = vld [vmem:[#allocation4 + $0x18] sm:$0xff] }
 0xa8d   : > { %v2218_v38 = vpop.eup %2217 }
 0xa8e   : > { %1499 = vperm.xlu0 %2145, %v2216_v19   ;;  %v2220_v63 = vpop.eup %2219  ;;  %v1528_v22 = vld [vmem:[#allocation4 + $0x20] sm:$0xff] }
 0xa8f   : > { %v2222_v1 = vpop.eup %2221 }
 0xa90   : > { %1504 = vperm.xlu1 %2146, %v2218_v38   ;;  %v2224_v43 = vpop.eup %2223  ;;  %v1529_v3 = vld [vmem:[#allocation4 + $0x28] sm:$0xff] }
 0xa91   : > { %v2226_v36 = vpop.eup %2225 }
 0xa92   : > { %1532 = vperm.xlu0 %2145, %v2220_v63  }
 0xa94   : > { %1537 = vperm.xlu1 %2146, %v2222_v1  }
 0xa96   : > { %1565 = vperm.xlu0 %2145, %v2224_v43  }
 0xa98   : > { %1570 = vperm.xlu1 %2146, %v2226_v36  }
 0xac2   : > { %v1431_v51 = vpop.f32.mrb[12].mxu0 }
 0xac3   : > { %v1453_v6 = vadd.f32 %v1451_v58, %v1431_v51  ;;  %v2050_v7 = vpop.f32.mrb[13].mxu0 }
 0xac4   : > { %v1434_v9 = vpop.f32.mrb[14].mxu0 }
 0xac5   : > { %1455 = vst.msk [vmem:[#allocation4 + $0x30] sm:$0xff] %vm318_vm0, %v1453_v6  ;;  %v1454_v10 = vadd.f32 %v1452_v62, %v1434_v9  ;;  %v2051_v13 = vpop.f32.mrb[15].mxu0 }
 0xac7   : > { %1456 = vst.msk [vmem:[#allocation4 + $0x38] sm:$0xff] %vm318_vm0, %v1454_v10 }
 0xacc   : > { %v1561_v35 = vld [vmem:[#allocation4 + $0x30] sm:$0xff] }
 0xace   : > { %v1562_v42 = vld [vmem:[#allocation4 + $0x38] sm:$0xff] }
 0xb09   : > { %v1471_v18 = vpop.permute.xlu0 %1470 }
 0xb0a   : > { %v1478_v31 = vmul.f32 %v1471_v18, %v1466_v15 }
 0xb0b   : > { %v1476_v20 = vpop.permute.xlu1 %1475 }
 0xb0c   : > { %v1811_v59 = vpack.c.bf16 %v1478_v31, %v1478_v31  ;;  %v1479_v60 = vmul.f32 %v1476_v20, %v1467_v56 }
 0xb0d   : > { %v1500_v24 = vpop.permute.xlu0 %1499 }
 0xb0e   : > { %1489 = vst.msk [vmem:[%s3193_s8] sm:$0xf] %vm1488_vm3, %v1811_v59  ;;  %v1812_v21 = vpack.c.bf16 %v1479_v60, %v1479_v60  ;;  %v1507_v5 = vmul.f32 %v1500_v24, %v1495_v4 }
 0xb0f   : > { %v1505_v8 = vpop.permute.xlu1 %1504 }
 0xb10   : > { %1490 = vst.msk [vmem:[%s3193_s8 + $0x4] sm:$0xf] %vm1488_vm3, %v1812_v21  ;;  %v1813_v27 = vpack.c.bf16 %v1507_v5, %v1507_v5  ;;  %v1508_v28 = vmul.f32 %v1505_v8, %v1496_v25 }
 0xb11   : > { %v1533_v23 = vpop.permute.xlu0 %1532 }
 0xb12   : > { %v1814_v33 = vpack.c.bf16 %v1508_v28, %v1508_v28  ;;  %v1540_v2 = vmul.f32 %v1533_v23, %v1528_v22  ;;  %1515 = vrot.lane.b32.xlu0 %v1813_v27, %s2425_s20 }
 0xb13   : > { %v1538_v26 = vpop.permute.xlu1 %1537 }
 0xb14   : > { %v1815_v29 = vpack.c.bf16 %v1540_v2, %v1540_v2  ;;  %v1541_v30 = vmul.f32 %v1538_v26, %v1529_v3  ;;  %1517 = vrot.lane.b32.xlu1 %v1814_v33, %s2425_s20 }
 0xb15   : > { %v1566_v12 = vpop.permute.xlu0 %1565 }
 0xb16   : > { %v1816_v39 = vpack.c.bf16 %v1541_v30, %v1541_v30  ;;  %v1573_v0 = vmul.f32 %v1566_v12, %v1561_v35  ;;  %1548 = vrot.lane.b32.xlu0 %v1815_v29, %s2426_s30 }
 0xb17   : > { %v1571_v44 = vpop.permute.xlu1 %1570 }
 0xb18   : > { %v1817_v32 = vpack.c.bf16 %v1573_v0, %v1573_v0  ;;  %v1574_v41 = vmul.f32 %v1571_v44, %v1562_v42  ;;  %1550 = vrot.lane.b32.xlu1 %v1816_v39, %s2426_s30 }
 0xb1a   : > { %v1818_v45 = vpack.c.bf16 %v1574_v41, %v1574_v41  ;;  %1581 = vrot.lane.b32.xlu0 %v1817_v32, %s2427_s29 }
 0xb1c   : > { %1583 = vrot.lane.b32.xlu1 %v1818_v45, %s2427_s29 }
 0xb84   : > { %v1516_v47 = vpop.permute.xlu0 %1515 }
 0xb85   : > { %1522 = vst.msk [vmem:[%s3193_s8] sm:$0xf] %vm1521_vm4, %v1516_v47 }
 0xb86   : > { %v1518_v11 = vpop.permute.xlu1 %1517 }
 0xb87   : > { %1523 = vst.msk [vmem:[%s3193_s8 + $0x4] sm:$0xf] %vm1521_vm4, %v1518_v11 }
 0xb88   : > { %v1549_v48 = vpop.permute.xlu0 %1548 }
 0xb89   : > { %1555 = vst.msk [vmem:[%s3193_s8] sm:$0xf] %vm1554_vm5, %v1549_v48 }
 0xb8a   : > { %v1551_v54 = vpop.permute.xlu1 %1550 }
 0xb8b   : > { %1556 = vst.msk [vmem:[%s3193_s8 + $0x4] sm:$0xf] %vm1554_vm5, %v1551_v54 }
 0xb8c   : > { %v1582_v52 = vpop.permute.xlu0 %1581 }
 0xb8d   : > { %1588 = vst.msk [vmem:[%s3193_s8] sm:$0xf] %vm1587_vm6, %v1582_v52 }
 0xb8e   : > { %v1584_v57 = vpop.permute.xlu1 %1583 }
 0xb8f   : > { %1589 = vst.msk [vmem:[%s3193_s8 + $0x4] sm:$0xf] %vm1587_vm6, %v1584_v57 }
 0xb90   : > { %2330 = shalt.err (!%p2327_p13)
}
 0xb91   : > { %s2331_s19 = scalar_lea.hbm %s3206_s24, 128  ;;  %s2335_s6 = scalar_lea.hbm %s3264_s3, 256 }
 0xb92   : > { %p2332_p11 = scmp.ne.s32.totalorder %s3206_s24, %s2331_s19  ;;  %p2336_p5 = scmp.lt.u32.totalorder %s3206_s24, %s3264_s3 }
 0xb93   : > { %p2337_p1 = scmp.lt.u32.totalorder %s2335_s6, %s2331_s19  ;;  %p2339_p2 = scmp.lt.u32.totalorder %s2331_s19, %s3206_s24 }
 0xb94   : > { %p2333_p7 = pnand %p2332_p11, %p3288_p6 }
 0xb95   : > { %p2338_p0 = por %p2337_p1, %p2336_p5 }
 0xb96   : > { %p2334_p3 = pneg %p2333_p7 }
 0xb97   : > { %p2340_p8 = por %p2339_p2, %p2338_p0 }
 0xb99   : > { %p2341_p9 = pnand %p2340_p8, %p2334_p3 }
 0xb9b   : > { %2344 = shalt.err (!%p2341_p9)
}
 0xb9c   : > { %s2429_s20 = smov 4  }
 0xb9d   : > { %2058 = dma.vmem_to_hbm [thread:$0]  (%p3288_p6), %s3209_s4, 128, %s3206_s24, %s1591_s22, %s2415_s23, %s2415_s23, %s2429_s20  }
 0xb9e PF: > { %s1621_s30 = sand.u32 1, %s2383_s12   ;;  %p3289_p12 = scmp.ne.s32.totalorder %s3277_s27, 0 }
 0xb9f   : > { %p3290_p4 = scmp.ge.s32.totalorder %s2403_s17, 2  ;;  %s1622_s29 = scalar_lea.sflag [#allocation7], %s1621_s30 }
 0xba1   : > { %p2071_p10 = pnand %p3290_p4, %p3289_p12 }
 0xba3   : > { %2378 = dma.done.wait (!%p2071_p10), %s1622_s29, 128  }
 0xba4   : > { %2380 = vsyncadd (!%p2071_p10), %s1622_s29, 4294967168  ;;  %s22_s17 = sadd.s32 1, %s2403_s17   ;;  %s3291_s25 = sld [smem:[#allocation15_spill]] }
 0xba5   : > { %p19_p13 = scmp.ge.s32.totalorder %s22_s17, 4   ;;  %s3292_s12 = smov %s2387_s13 }
 0xba6   : > { %s3293_s13 = smov %s2391_s14  ;;  %s3294_s14 = smov %s2510_s26 }
 0xba7   : > { %s3295_s15 = smov %s2399_s16  ;;  %21 = sbr.rel (!%p19_p13) target bundleno = 11 (0xb), region = 118 }
 0xbaa   : > { %s3296_s16 = smov %s3291_s25 }
 0xbae   :  { %1627 = vsyncpa [#allocation6], 1 }
 0xbaf   :  { %1629 = vsyncpa [#allocation6 + $0x1], 1 }
 0xbb0   :  { %1630 = vsyncpa [#allocation9], 1 }
 0xbb1   :  { %1632 = vsyncpa [#allocation9 + $0x1], 1 }
 0xbb2   :  { %1633 = vsyncpa [#allocation7], 1 }
 0xbb3   :  { %1635 = vsyncpa [#allocation7 + $0x1], 1 }

// kernel: transformer_wrapper_forward.28
= control target key start
LH: loop header
LB: loop body
LE: loop exit
PB: predicated region body
PF: predicated region fallthrough
CT: control target
= control target key end

     0   :  { %s1463_s0 = inlined_call_operand.hbm [shape: bf16[2,16,32], index: 0, kind: input, shape index: {}]   ;;  %s1464_s1 = inlined_call_operand.hbm [shape: f32[2,1,32], index: 1, kind: input, shape index: {}]   ;;  %s1465_s2 = inlined_call_operand.hbm [shape: f32[2,1,32], index: 2, kind: input, shape index: {}]   ;;  %s1466_s3 = inlined_call_operand.hbm [shape: bf16[32,128], index: 3, kind: input, shape index: {}]   ;;  %s1467_s4 = inlined_call_operand.hbm [shape: f32[1,128], index: 4, kind: input, shape index: {}]   ;;  %s1468_s5 = inlined_call_operand.hbm [shape: bf16[2,16,128], index: 5, kind: output, shape index: {}]  }
   0x1   :  { %1485 = sst [smem:[#allocation19_spill]] %s1464_s1 }
   0x2   :  { %1486 = sst [smem:[#allocation20_spill]] %s1466_s3 }
   0x3   :  { %10 = vsyncpa [#allocation3], 0 }
   0x4   :  { %12 = vsyncpa [#allocation3 + $0x1], 0 }
   0x5   :  { %13 = vsyncpa [#allocation6], 0 }
   0x6   :  { %15 = vsyncpa [#allocation6 + $0x1], 0 }
   0x7   :  { %16 = vsyncpa [#allocation9], 0 }
   0x8   :  { %17 = vsyncpa [#allocation4], 0 }
   0x9   :  { %19 = vsyncpa [#allocation4 + $0x1], 0  ;;  %s1135_s18 = smov 0   ;;  %s1137_s19 = smov 0  }
   0xa   :  { %s1139_s20 = smov 0   ;;  %s1141_s21 = smov 0  }
   0xb   :  { %s1143_s22 = smov 0   ;;  %s1145_s23 = smov 0  }
   0xc LB: > { %1487 = sst [smem:[#allocation16_spill]] %s1079_s20  ;;  %s1166_s24 = sadd.s32 4294967295, %s1091_s23   ;;  %s1091_s23 = sphi %s1145_s23, %s25_s23   ;;  %s1087_s22 = sphi %s1143_s22, %s1522_s22   ;;  %s1083_s21 = sphi %s1141_s21, %s1521_s21   ;;  %s1079_s20 = sphi %s1139_s20, %s1517_s20   ;;  %s1075_s19 = sphi %s1137_s19, %s1520_s19   ;;  %s1071_s18 = sphi %s1135_s18, %s1519_s18  }
   0xd   : > { %s694_s25 = sadd.s32 4294967294, %s1091_s23   ;;  %p66_p0 = scmp.ne.s32.totalorder %s1075_s19, %s1071_s18 }
   0xe   : > { %p1469_p1 = scmp.eq.s32.totalorder %s1166_s24, 0  ;;  %p204_p3 = scmp.eq.s32.totalorder %s694_s25, 1 }
   0xf   : > { %p695_p5 = scmp.ge.s32.totalorder %s1091_s23, 1  ;;  %p211_p7 = scmp.lt.s32.totalorder %s1091_s23, 3 }
  0x10   : > { %p1175_p4 = por %p1469_p1, %p66_p0  ;;  %p1180_p6 = por %p204_p3, %p66_p0 }
  0x11   : > { %p1185_p8 = pnand %p695_p5, %p211_p7  ;;  %s1093_s29 = smov [#allocation8]  }
  0x12   : > { %s1488_s26 = scalar_select %p1175_p4, 1, 0 }
  0x13   : > { %s1489_s27 = scalar_select %p1180_p6, 1, 0 }
  0x14   : > { %s1490_s28 = scalar_select %p1185_p8, 1, 0 }
  0x15   : > { %s225_s30 = sshll.u32 %s1093_s29, 4  ;;  %p762_p9 = pneg %p1185_p8  ;;  %s226_s30 = int_to_ptr.vmem [resolvable:$true] %s225_s30 }
  0x16   : > { %s44_s7 = sadd.s32 1, %s1087_s22  ;;  %s1492_s3 = sld [smem:[#allocation20_spill]] }
  0x17   : > { %p1194_p11 = pnand %p762_p9, %p1469_p1 }
  0x19   : > { %s1491_s6 = scalar_select %p1194_p11, 1, 0 }
  0x1a   : > { %p1476_p13 = pneg %p1194_p11 }
  0x1c   : > { %s855_s10 = scalar_lea.hbm %s1492_s3, 256 }
  0x1d   : > { %p856_p12 = scmp.ne.s32.totalorder %s1492_s3, %s855_s10  ;;  %p862_p5 = scmp.lt.u32.totalorder %s855_s10, %s1492_s3 }
  0x1f   : > { %p858_p0 = pnand %p1476_p13, %p856_p12 }
  0x21   : > { %p859_p3 = pneg %p858_p0 }
  0x23   : > { %p864_p7 = pnand %p862_p5, %p859_p3 }
  0x25   : > { %867 = shalt.err (!%p864_p7)
}
  0x26   : > { %s868_s15 = scalar_lea.vmem %s226_s30, 256  ;;  %p876_p2 = scmp.lt.s32.totalorder %s226_s30, %s226_s30 }
  0x27   : > { %p869_p9 = scmp.ne.s32.totalorder %s226_s30, %s868_s15  ;;  %p877_p6 = scmp.lt.s32.totalorder %s868_s15, %s868_s15 }
  0x29   : > { %p871_p10 = pnand %p869_p9, %p1476_p13  ;;  %p878_p4 = por %p877_p6, %p876_p2 }
  0x2b   : > { %p872_p1 = pneg %p871_p10 }
  0x2d   : > { %p879_p8 = pnand %p878_p4, %p872_p1 }
  0x2f   : > { %882 = shalt.err (!%p879_p8)
}
  0x30   : > { %s1472_s16 = smov 64   ;;  %s1473_s17 = smov 4  }
  0x31   : > { %765 = dma.hbm_to_vmem [thread:$0]  (!%p1194_p11), %s1492_s3, 256, %s226_s30, [#allocation9], %s1472_s16, %s1472_s16, %s1473_s17  }
  0x32   : > { %p46_p1 = scmp.ge.s32.totalorder %s44_s7, 2  ;;  %s53_s8 = sadd.s32 1, %s1079_s20 }
  0x33   : > { %p60_p2 = scmp.ne.s32.totalorder %s1079_s20, %s1075_s19  ;;  %p61_p4 = scmp.eq.s32.totalorder %s1091_s23, 0 }
  0x34   : > { %s1524_s7 = smov (%p46_p1, %s44_s7), 0  ;;  %p1494_p8 = scmp.eq.s32.totalorder %s1166_s24, 1 }
  0x35   : > { %1493 = sst [smem:[#allocation17_spill]] %s1524_s7  ;;  %p62_p6 = por %p61_p4, %p60_p2 }
  0x36   : > { %p1232_p10 = por %p1494_p8, %p60_p2  ;;  %s48_s10 = ssub.s32 %s1087_s22, %s1524_s7 }
  0x37   : > { %p785_p12 = scmp.lt.s32.totalorder %s1091_s23, 2  ;;  %p51_p0 = scmp.eq.s32.totalorder %s48_s10, 0 }
  0x38   : > { %s1495_s9 = scalar_select %p1232_p10, 1, 0 }
  0x39   : > { %s1240_s11 = sand.u32 1, %s1079_s20   ;;  %p1242_p3 = pnand %p785_p12, %p62_p6 }
  0x3a   : > { %s275_s12 = sand.u32 1, %s1091_s23   ;;  %s1474_s14 = sshll.u32 %s1087_s22, 4 }
  0x3b   : > { %s1496_s30 = scalar_select %p1242_p3, 1, 0 }
  0x3c   : > { %s1248_s13 = scalar_select %p51_p0, %s1079_s20, %s53_s8  }
  0x3d   : > { %s1498_s1 = sld [smem:[#allocation19_spill]]  ;;  %s278_s10 = scalar_lea.vmem [#allocation5], %s1240_s11 }
  0x3e   : > { %1497 = sst [smem:[#allocation18_spill]] %s1248_s13  ;;  %s285_s16 = sshll.u32 %s278_s10, 4  ;;  %s1259_s16 = int_to_ptr.vmem [resolvable:$true] %s285_s16 }
  0x3f   : > { %s1261_s17 = scalar_lea.sflag [#allocation6], %s275_s12  ;;  %p1267_p7 = pneg %p1242_p3 }
  0x41   : > { %s1499_s8 = scalar_select %p1267_p7, 1, 0 }
  0x43   : > { %s1256_s29 = scalar_lea.hbm %s1498_s1, %s1474_s14  ;;  %s888_s14 = scalar_lea.hbm %s1498_s1, 32 }
  0x44   : > { %s883_s3 = scalar_lea.hbm %s1256_s29, 16  ;;  %p889_p2 = scmp.lt.u32.totalorder %s1256_s29, %s1498_s1 }
  0x45   : > { %p884_p5 = scmp.ne.s32.totalorder %s1256_s29, %s883_s3  ;;  %p890_p4 = scmp.lt.u32.totalorder %s888_s14, %s883_s3 }
  0x46   : > { %p892_p8 = scmp.lt.u32.totalorder %s883_s3, %s1256_s29 }
  0x47   : > { %p886_p9 = pnand %p1267_p7, %p884_p5  ;;  %p891_p6 = por %p890_p4, %p889_p2 }
  0x49   : > { %p887_p1 = pneg %p886_p9  ;;  %p893_p12 = por %p892_p8, %p891_p6 }
  0x4b   : > { %p894_p0 = pnand %p893_p12, %p887_p1 }
  0x4d   : > { %897 = shalt.err (!%p894_p0)
}
  0x4e   : > { %s898_s12 = scalar_lea.vmem %s1259_s16, 16  ;;  %s1096_s15 = smov [#allocation5]  }
  0x4f   : > { %p899_p5 = scmp.ne.s32.totalorder %s1259_s16, %s898_s12  ;;  %s903_s25 = sshll.u32 %s1096_s15, 4  ;;  %s904_s25 = int_to_ptr.vmem [resolvable:$false] %s903_s25 }
  0x50   : > { %s905_s7 = scalar_lea.vmem %s904_s25, 32  ;;  %p906_p10 = scmp.lt.s32.totalorder %s1259_s16, %s904_s25 }
  0x51   : > { %p901_p9 = pnand %p899_p5, %p1267_p7  ;;  %p907_p11 = scmp.lt.s32.totalorder %s905_s7, %s898_s12 }
  0x53   : > { %p902_p13 = pneg %p901_p9  ;;  %p908_p2 = por %p907_p11, %p906_p10 }
  0x55   : > { %p909_p4 = pnand %p908_p2, %p902_p13 }
  0x57   : > { %912 = shalt.err (!%p909_p4)
}
  0x58   : > { %775 = dma.hbm_to_vmem [thread:$0]  (!%p1242_p3), %s1256_s29, 16, %s1259_s16, %s1261_s17  }
  0x59   : > { %s1097_s3 = smov [#allocation10]   ;;  %s699_s10 = sshll.u32 %s1240_s11, 3 }
  0x5a   : > { %s241_s14 = sshll.u32 %s1097_s3, 4  ;;  %s913_s25 = scalar_lea.hbm %s1467_s4, 16  ;;  %s242_s14 = int_to_ptr.vmem [resolvable:$true] %s241_s14 }
  0x5b   : > { %p914_p11 = scmp.ne.s32.totalorder %s1467_s4, %s913_s25  ;;  %p1500_p13 = scmp.ne.s32.totalorder %s1491_s6, 0 }
  0x5c   : > { %p920_p8 = scmp.lt.u32.totalorder %s913_s25, %s1467_s4 }
  0x5d   : > { %p1501_p10 = pneg %p1500_p13 }
  0x5f   : > { %p916_p1 = pnand %p914_p11, %p1501_p10 }
  0x61   : > { %p917_p6 = pneg %p916_p1 }
  0x63   : > { %p922_p12 = pnand %p920_p8, %p917_p6 }
  0x65   : > { %925 = shalt.err (!%p922_p12)
}
  0x66   : > { %s926_s16 = scalar_lea.vmem %s242_s14, 16  ;;  %p1502_p5 = pmov %p1501_p10 }
  0x67   : > { %p927_p0 = scmp.ne.s32.totalorder %s242_s14, %s926_s16  ;;  %s933_s1 = scalar_lea.vmem %s242_s14, 32 }
  0x68   : > { %p934_p4 = scmp.lt.s32.totalorder %s242_s14, %s242_s14  ;;  %p935_p3 = scmp.lt.s32.totalorder %s933_s1, %s926_s16 }
  0x69   : > { %p929_p9 = pnand %p927_p0, %p1502_p5 }
  0x6a   : > { %p936_p7 = por %p935_p3, %p934_p4 }
  0x6b   : > { %p930_p2 = pneg %p929_p9 }
  0x6d   : > { %p937_p10 = pnand %p936_p7, %p930_p2 }
  0x6f   : > { %940 = shalt.err (!%p937_p10)
}
  0x70   : > { %768 = dma.hbm_to_vmem [thread:$0]  (!%p1500_p13), %s1467_s4, 16, %s242_s14, [#allocation9]  }
  0x71   : > { %s722_s13 = sshll.u32 %s1087_s22, 7  ;;  %s256_s3 = scalar_lea.vmem [#allocation2], %s699_s10 }
  0x72   : > { %s265_s15 = sshll.u32 %s256_s3, 4  ;;  %s1316_s7 = scalar_lea.hbm %s1463_s0, %s722_s13  ;;  %s1318_s15 = int_to_ptr.vmem [resolvable:$true] %s265_s15 }
  0x73   : > { %s253_s6 = scalar_lea.sflag [#allocation3], %s1240_s11  ;;  %s941_s16 = scalar_lea.hbm %s1316_s7, 128 }
  0x74   : > { %p942_p3 = scmp.ne.s32.totalorder %s1316_s7, %s941_s16  ;;  %p1503_p7 = scmp.ne.s32.totalorder %s1499_s8, 0 }
  0x75   : > { %s946_s1 = scalar_lea.hbm %s1463_s0, 256  ;;  %p947_p1 = scmp.lt.u32.totalorder %s1316_s7, %s1463_s0 }
  0x76   : > { %p944_p11 = pnand %p942_p3, %p1503_p7  ;;  %p948_p6 = scmp.lt.u32.totalorder %s946_s1, %s941_s16 }
  0x77   : > { %p950_p12 = scmp.lt.u32.totalorder %s941_s16, %s1316_s7 }
  0x78   : > { %p945_p13 = pneg %p944_p11  ;;  %p949_p8 = por %p948_p6, %p947_p1 }
  0x7a   : > { %p951_p0 = por %p950_p12, %p949_p8 }
  0x7c   : > { %p952_p5 = pnand %p951_p0, %p945_p13 }
  0x7e   : > { %955 = shalt.err (!%p952_p5)
}
  0x7f   : > { %s956_s13 = scalar_lea.vmem %s1318_s15, 128  ;;  %s1098_s3 = smov [#allocation2]  }
  0x80   : > { %p957_p9 = scmp.ne.s32.totalorder %s1318_s15, %s956_s13  ;;  %s961_s25 = sshll.u32 %s1098_s3, 4  ;;  %s962_s25 = int_to_ptr.vmem [resolvable:$false] %s961_s25 }
  0x81   : > { %s963_s12 = scalar_lea.vmem %s962_s25, 256  ;;  %p964_p10 = scmp.lt.s32.totalorder %s1318_s15, %s962_s25 }
  0x82   : > { %p959_p2 = pnand %p957_p9, %p1503_p7  ;;  %p965_p3 = scmp.lt.s32.totalorder %s963_s12, %s956_s13 }
  0x84   : > { %p960_p4 = pneg %p959_p2  ;;  %p966_p11 = por %p965_p3, %p964_p10 }
  0x86   : > { %p967_p1 = pnand %p966_p11, %p960_p4 }
  0x88   : > { %970 = shalt.err (!%p967_p1)
}
  0x89   : > { %p1504_p13 = scmp.ne.s32.totalorder %s1496_s30, 0  ;;  %s1505_s16 = smov 4  }
  0x8a   : > { %s1506_s14 = smov 64   ;;  %s1507_s10 = sshll.u32 %s1087_s22, 4 }
  0x8b   : > { %772 = dma.hbm_to_vmem [thread:$0]  (!%p1504_p13), %s1316_s7, 128, %s1318_s15, %s253_s6, %s1506_s14, %s1506_s14, %s1505_s16  }
  0x8c   : > { %s1352_s20 = scalar_lea.hbm %s1465_s2, %s1507_s10  ;;  %s295_s13 = scalar_lea.vmem [#allocation7], %s1240_s11 }
  0x8d   : > { %s302_s3 = sshll.u32 %s295_s13, 4  ;;  %s971_s25 = scalar_lea.hbm %s1352_s20, 16  ;;  %s303_s3 = int_to_ptr.vmem [resolvable:$true] %s302_s3 }
  0x8e   : > { %p972_p6 = scmp.ne.s32.totalorder %s1352_s20, %s971_s25  ;;  %s976_s7 = scalar_lea.hbm %s1465_s2, 32 }
  0x8f   : > { %p977_p0 = scmp.lt.u32.totalorder %s1352_s20, %s1465_s2  ;;  %p978_p5 = scmp.lt.u32.totalorder %s976_s7, %s971_s25 }
  0x90   : > { %p974_p8 = pnand %p972_p6, %p1503_p7  ;;  %p980_p2 = scmp.lt.u32.totalorder %s971_s25, %s1352_s20 }
  0x91   : > { %p979_p9 = por %p978_p5, %p977_p0 }
  0x92   : > { %p975_p12 = pneg %p974_p8 }
  0x93   : > { %p981_p4 = por %p980_p2, %p979_p9 }
  0x95   : > { %p982_p10 = pnand %p981_p4, %p975_p12 }
  0x97   : > { %985 = shalt.err (!%p982_p10)
}
  0x98   : > { %s986_s11 = scalar_lea.vmem %s303_s3, 16  ;;  %s1099_s14 = smov [#allocation7]  }
  0x99   : > { %p987_p3 = scmp.ne.s32.totalorder %s303_s3, %s986_s11  ;;  %s991_s10 = sshll.u32 %s1099_s14, 4  ;;  %s992_s10 = int_to_ptr.vmem [resolvable:$false] %s991_s10 }
  0x9a   : > { %s993_s1 = scalar_lea.vmem %s992_s10, 32  ;;  %p994_p6 = scmp.lt.s32.totalorder %s303_s3, %s992_s10 }
  0x9b   : > { %p989_p11 = pnand %p987_p3, %p1503_p7  ;;  %p995_p8 = scmp.lt.s32.totalorder %s993_s1, %s986_s11 }
  0x9d   : > { %p990_p1 = pneg %p989_p11  ;;  %p996_p13 = por %p995_p8, %p994_p6 }
  0x9f   : > { %p997_p0 = pnand %p996_p13, %p990_p1 }
  0xa1   : > { %1000 = shalt.err (!%p997_p0)
}
  0xa2   : > { %p1508_p5 = scmp.ne.s32.totalorder %s1496_s30, 0  ;;  %p1509_p12 = scmp.ne.s32.totalorder %s1490_s28, 0 }
  0xa3   : > { %s1376_s8 = sand.u32 (!%p1509_p12), 1, %s1075_s19   ;;  %p1510_p7 = scmp.ne.s32.totalorder (!%p1509_p12), %s1488_s26, 0 }
  0xa4   : > { %778 = dma.hbm_to_vmem [thread:$0]  (!%p1508_p5), %s1352_s20, 16, %s303_s3, %s1261_s17  }
  0xa5   : > { %311 = sbr.rel (%p1509_p12) target bundleno = 761 (0x2f9), region = 40  ;;  %s705_s29 = sshll.u32 (!%p1509_p12), %s1376_s8, 3 }
  0xa6   : > { %s314_s13 = scalar_lea.sflag (!%p1509_p12), [#allocation3], %s1376_s8  ;;  %s317_s25 = scalar_lea.vmem (!%p1509_p12), [#allocation2], %s705_s29 }
  0xac   : > { %1054 = dma.done.wait (%p1510_p7), %s314_s13, 128  }
  0xad   : > { %1056 = vsyncadd (%p1510_p7), %s314_s13, 4294967168  ;;  %s322_s28 = sand.u32 1, %s1166_s24   ;;  %s325_s30 = scalar_lea.vmem [#allocation5], %s1376_s8 }
  0xae   : > { %s323_s17 = scalar_lea.sflag [#allocation6], %s322_s28 }
  0xaf   : > { %1058 = dma.done.wait (%p1510_p7), %s323_s17, 32  }
  0xb0   : > { %1060 = vsyncadd (%p1510_p7), %s323_s17, 4294967264  ;;  %s333_s20 = scalar_lea.vmem [#allocation7], %s1376_s8  ;;  %p1511_p13 = scmp.eq.s32.totalorder %s1166_s24, 0 }
  0xb2   : > { %1062 = dma.done.wait (%p1511_p13), [#allocation9], 272   ;;  %p1512_p9 = pmov %p1511_p13 }
  0xb3   : > { %v727_v0 = vld [vmem:[%s317_s25] sm:$0xff]   ;;  %vm383_vm0 = vcmask 261120   ;;  %v845_v15 = vld [vmem:[#allocation8] sm:$0xff]   ;;  %v1100_v16 = vmov 0.0   ;;  %vm1101_vm1 = vmmov 0   ;;  %s725_s24 = sshll.u32 %s1083_s21, 7 }
  0xb4   : > { %1064 = vsyncadd (%p1512_p9), [#allocation9], 4294967024  ;;  %v728_v1 = vunpack.c.l.bf16 %v727_v0  ;;  %v729_v2 = vunpack.c.h.bf16 %v727_v0  ;;  %738 = vmatprep.subr.bf16.mxu0 %v1100_v16  ;;  %v846_v17 = vld [vmem:[#allocation8 + $0x8] sm:$0xff]   ;;  %742 = vmatprep.mubr.msk.bf16.mxu0 %vm1101_vm1, %v1100_v16  ;;  %v711_v35 = vld [vmem:[#allocation10] ss:$0 sm:$0xff]  ;;  %s375_s26 = scalar_lea.vmem [#allocation11], %s705_s29  ;;  %s1412_s7 = scalar_lea.hbm %s1468_s5, %s725_s24 }
  0xb5   : > { %739 = vmatpush3.bf16.msra.mxu0 %v845_v15  ;;  %v709_v26 = vld [vmem:[%s325_s30] ss:$0 sm:$0xff]  ;;  %s542_s3 = sshll.u32 %s375_s26, 4  ;;  %s526_s6 = scalar_lea.sflag [#allocation4], %s1376_s8  ;;  %s1414_s3 = int_to_ptr.vmem [resolvable:$true] %s542_s3 }
  0xb6   : > { %v384_v3 = vsel %vm383_vm0, %v728_v1, 0.0  ;;  %v387_v4 = vsel %vm383_vm0, %v729_v2, 0.0  ;;  %740 = vmatprep.subr.bf16.mxu0 %v1100_v16  ;;  %v710_v30 = vld [vmem:[%s333_s20] ss:$0 sm:$0xff]  ;;  %s1001_s16 = scalar_lea.vmem %s1414_s3, 128  ;;  %p1513_p4 = scmp.ne.s32.totalorder %s1495_s9, 0 }
  0xb7   : > { %385 = vadd.xlane.f32.xlu0 %v384_v3  ;;  %p1002_p2 = scmp.ne.s32.totalorder %s1414_s3, %s1001_s16  ;;  %s1102_s21 = smov [#allocation11]  }
  0xb8   : > { %s1005_s11 = sshll.u32 %s1102_s21, 4  ;;  %s1006_s11 = int_to_ptr.vmem [resolvable:$false] %s1005_s11 }
  0xb9   : > { %741 = vmatpush3.bf16.msra.mxu0 %v846_v17  ;;  %p1003_p10 = pnand %p1002_p2, %p1513_p4  ;;  %s1007_s14 = scalar_lea.vmem %s1006_s11, 256 }
  0xba   : > { %p1008_p11 = scmp.lt.s32.totalorder %s1414_s3, %s1006_s11  ;;  %p1009_p1 = scmp.lt.s32.totalorder %s1007_s14, %s1001_s16 }
  0xbb   : > { %388 = vadd.xlane.f32.xlu0 %v387_v4  ;;  %p1004_p3 = pneg %p1003_p10 }
  0xbc   : > { %p1010_p6 = por %p1009_p1, %p1008_p11 }
  0xbe   : > { %p1011_p8 = pnand %p1010_p6, %p1004_p3 }
 0x144   : > { %v386_v5 = vpop.xlane.xlu0 %385 }
 0x145   : > { %v391_v6 = vmul.f32 0.03125, %v386_v5 }
 0x147   : > { %v393_v7 = vsub.f32 %v728_v1, %v391_v6 }
 0x148   : > { %v389_v8 = vpop.xlane.xlu0 %388 }
 0x149   : > { %v392_v9 = vmul.f32 0.03125, %v389_v8  ;;  %v395_v10 = vmul.f32 %v393_v7, %v393_v7 }
 0x14b   : > { %v394_v11 = vsub.f32 %v729_v2, %v392_v9  ;;  %v397_v12 = vsel %vm383_vm0, %v395_v10, 0.0 }
 0x14c   : > { %398 = vadd.xlane.f32.xlu1 %v397_v12 }
 0x14d   : > { %v396_v13 = vmul.f32 %v394_v11, %v394_v11 }
 0x14f   : > { %v400_v14 = vsel %vm383_vm0, %v396_v13, 0.0 }
 0x150   : > { %401 = vadd.xlane.f32.xlu1 %v400_v14 }
 0x1d9   : > { %v399_v18 = vpop.xlane.xlu1 %398 }
 0x1da   : > { %v403_v19 = vmul.f32 0.03125, %v399_v18 }
 0x1dc   : > { %v405_v20 = vadd.f32 1e-05, %v403_v19 }
 0x1dd   : > { %v402_v21 = vpop.xlane.xlu1 %401 }
 0x1de   : > { %847 = vrsqrt.f32 %v405_v20  ;;  %v404_v22 = vmul.f32 0.03125, %v402_v21 }
 0x1e0   : > { %v406_v23 = vadd.f32 1e-05, %v404_v22 }
 0x1e2   : > { %849 = vrsqrt.f32 %v406_v23 }
 0x1e8   : > { %v848_v24 = vpop.eup %847 }
 0x1e9   : > { %v409_v25 = vmul.f32 %v848_v24, %v393_v7 }
 0x1eb   : > { %v418_v29 = vmul.f32 %v709_v26, %v409_v25 }
 0x1ec   : > { %v850_v27 = vpop.eup %849 }
 0x1ed   : > { %v410_v28 = vmul.f32 %v850_v27, %v394_v11  ;;  %v427_v32 = vadd.f32 %v710_v30, %v418_v29 }
 0x1ef   : > { %v419_v31 = vmul.f32 %v709_v26, %v410_v28 }
 0x1f1   : > { %v428_v33 = vadd.f32 %v710_v30, %v419_v31 }
 0x1f3   : > { %v429_v34 = vpack.c.bf16 %v428_v33, %v427_v32 }
 0x1f5   : > { %743 = vmatmul.mubr.msk.bf16.vlgmr.msra.gmra.mrb[0].mxu0 %vm383_vm0, %v429_v34 }
 0x2c8   : > { %v490_v36 = vpop.f32.mrb[0].mxu0 }
 0x2c9   : > { %v491_v37 = vadd.f32 %v711_v35, %v490_v36  ;;  %v744_v38 = vpop.f32.mrb[1].mxu0 }
 0x2ca   : > { %v493_v39 = vpop.f32.mrb[2].mxu0 }
 0x2cb   : > { %v497_v40 = vmul.f32 %v491_v37, %v491_v37  ;;  %v494_v41 = vadd.f32 %v711_v35, %v493_v39  ;;  %v745_v42 = vpop.f32.mrb[3].mxu0 }
 0x2cd   : > { %v499_v43 = vmul.f32 %v497_v40, %v491_v37  ;;  %v498_v44 = vmul.f32 %v494_v41, %v494_v41 }
 0x2cf   : > { %v501_v45 = vmul.f32 0.044715, %v499_v43  ;;  %v500_v46 = vmul.f32 %v498_v44, %v494_v41 }
 0x2d1   : > { %v503_v47 = vadd.f32 %v501_v45, %v491_v37  ;;  %v502_v48 = vmul.f32 0.044715, %v500_v46 }
 0x2d3   : > { %v505_v49 = vmul.f32 0.7978846, %v503_v47  ;;  %v504_v50 = vadd.f32 %v502_v48, %v494_v41 }
 0x2d5   : > { %851 = vtanh.f32 %v505_v49  ;;  %v506_v51 = vmul.f32 0.7978846, %v504_v50 }
 0x2d7   : > { %853 = vtanh.f32 %v506_v51 }
 0x2df   : > { %v852_v52 = vpop.eup %851 }
 0x2e0   : > { %v509_v53 = vadd.f32 1.0, %v852_v52 }
 0x2e1   : > { %v854_v54 = vpop.eup %853 }
 0x2e2   : > { %v511_v55 = vmul.f32 0.5, %v509_v53  ;;  %v510_v56 = vadd.f32 1.0, %v854_v54 }
 0x2e4   : > { %v512_v57 = vmul.f32 0.5, %v510_v56  ;;  %v513_v58 = vmul.f32 %v511_v55, %v491_v37 }
 0x2e6   : > { %v514_v59 = vmul.f32 %v512_v57, %v494_v41 }
 0x2e8   : > { %v733_v60 = vpack.c.bf16 %v514_v59, %v513_v58 }
 0x2ea   : > { %734 = vst [vmem:[%s375_s26] sm:$0xff] %v733_v60  }
 0x2eb   : > { %1014 = shalt.err (!%p1011_p8)
}
 0x2ec   : > { %s1015_s10 = scalar_lea.hbm %s1412_s7, 128  ;;  %s1019_s13 = scalar_lea.hbm %s1468_s5, 256 }
 0x2ed   : > { %p1016_p0 = scmp.ne.s32.totalorder %s1412_s7, %s1015_s10  ;;  %p1020_p7 = scmp.lt.u32.totalorder %s1412_s7, %s1468_s5 }
 0x2ee   : > { %p1021_p13 = scmp.lt.u32.totalorder %s1019_s13, %s1015_s10  ;;  %p1023_p2 = scmp.lt.u32.totalorder %s1015_s10, %s1412_s7 }
 0x2ef   : > { %p1017_p5 = pnand %p1016_p0, %p1513_p4 }
 0x2f0   : > { %p1022_p9 = por %p1021_p13, %p1020_p7 }
 0x2f1   : > { %p1018_p12 = pneg %p1017_p5 }
 0x2f2   : > { %p1024_p10 = por %p1023_p2, %p1022_p9 }
 0x2f4   : > { %p1025_p3 = pnand %p1024_p10, %p1018_p12 }
 0x2f6   : > { %1028 = shalt.err (!%p1025_p3)
}
 0x2f7   : > { %s1103_s17 = smov 64   ;;  %s1104_s30 = smov 4  }
 0x2f8   : > { %760 = dma.vmem_to_hbm [thread:$0]  (%p1513_p4), %s1414_s3, 128, %s1412_s7, %s526_s6, %s1103_s17, %s1103_s17, %s1104_s30  }
 0x2f9 PF: > { %s557_s20 = sand.u32 1, %s1071_s18   ;;  %p1514_p11 = scmp.ne.s32.totalorder %s1489_s27, 0 }
 0x2fa   : > { %p1515_p1 = scmp.ge.s32.totalorder %s1091_s23, 2  ;;  %s558_s24 = scalar_lea.sflag [#allocation4], %s557_s20 }
 0x2fc   : > { %p780_p6 = pnand %p1515_p1, %p1514_p11 }
 0x2fe   : > { %1066 = dma.done.wait (!%p780_p6), %s558_s24, 128  }
 0x2ff   : > { %1068 = vsyncadd (!%p780_p6), %s558_s24, 4294967168  ;;  %s25_s23 = sadd.s32 1, %s1091_s23   ;;  %s1516_s26 = sld [smem:[#allocation16_spill]] }
 0x300   : > { %p22_p8 = scmp.ge.s32.totalorder %s25_s23, 4   ;;  %s1517_s20 = sld [smem:[#allocation18_spill]] }
 0x301   : > { %s1518_s9 = sld [smem:[#allocation17_spill]]  ;;  %s1519_s18 = smov %s1075_s19 }
 0x302   : > { %s1521_s21 = smov %s1087_s22  ;;  %24 = sbr.rel (!%p22_p8) target bundleno = 12 (0xc), region = 119 }
 0x305   : > { %s1520_s19 = smov %s1516_s26 }
 0x307   : > { %s1522_s22 = smov %s1518_s9 }
 0x309   :  { %563 = vsyncpa [#allocation3], 1 }
 0x30a   :  { %565 = vsyncpa [#allocation3 + $0x1], 1 }
 0x30b   :  { %566 = vsyncpa [#allocation6], 1 }
 0x30c   :  { %568 = vsyncpa [#allocation6 + $0x1], 1 }
 0x30d   :  { %569 = vsyncpa [#allocation9], 1 }
 0x30e   :  { %570 = vsyncpa [#allocation4], 1 }
 0x30f   :  { %572 = vsyncpa [#allocation4 + $0x1], 1 }

// kernel: transformer_wrapper_forward.26
= control target key start
LH: loop header
LB: loop body
LE: loop exit
PB: predicated region body
PF: predicated region fallthrough
CT: control target
= control target key end

     0   :  { %s3226_s0 = inlined_call_operand.hbm [shape: bf16[2,16,32], index: 0, kind: input, shape index: {}]   ;;  %s3227_s1 = inlined_call_operand.hbm [shape: bf16[2,128,64], index: 1, kind: input, shape index: {}]   ;;  %s3228_s2 = inlined_call_operand.hbm [shape: f32[2,1,128], index: 2, kind: input, shape index: {}]   ;;  %s3229_s3 = inlined_call_operand.hbm [shape: bf16[2,16,32], index: 3, kind: output, shape index: {}]  }
   0x1   :  { %3236 = sst [smem:[#allocation16_spill]] %s3226_s0 }
   0x2   :  { %3237 = sst [smem:[#allocation17_spill]] %s3227_s1 }
   0x3   :  { %8 = vsyncpa [#allocation6], 0 }
   0x4   :  { %10 = vsyncpa [#allocation6 + $0x1], 0 }
   0x5   :  { %11 = vsyncpa [#allocation9], 0 }
   0x6   :  { %13 = vsyncpa [#allocation9 + $0x1], 0 }
   0x7   :  { %14 = vsyncpa [#allocation7], 0 }
   0x8   :  { %16 = vsyncpa [#allocation7 + $0x1], 0  ;;  %s2428_s12 = smov 0   ;;  %s2430_s13 = smov 0  }
   0x9   :  { %s2432_s14 = smov 0   ;;  %s2434_s15 = smov 0  }
   0xa   :  { %s2436_s16 = smov 0   ;;  %s2438_s17 = smov 0  }
   0xb LB: > { %s2459_s18 = sadd.s32 4294967295, %s2384_s17   ;;  %s1725_s19 = sadd.s32 4294967294, %s2384_s17   ;;  %s2384_s17 = sphi %s2438_s17, %s22_s17   ;;  %s2380_s16 = sphi %s2436_s16, %s3261_s16   ;;  %s2376_s15 = sphi %s2434_s15, %s3260_s15   ;;  %s2372_s14 = sphi %s2432_s14, %s3259_s14   ;;  %s2368_s13 = sphi %s2430_s13, %s3258_s13   ;;  %s2364_s12 = sphi %s2428_s12, %s3257_s12  }
   0xc   : > { %s37_s20 = sadd.s32 1, %s2380_s16  ;;  %s50_s21 = sadd.s32 1, %s2372_s14 }
   0xd   : > { %p39_p0 = scmp.ge.s32.totalorder %s37_s20, 2  ;;  %p57_p1 = scmp.ne.s32.totalorder %s2372_s14, %s2368_s13 }
   0xe   : > { %p58_p2 = scmp.eq.s32.totalorder %s2384_s17, 0  ;;  %p63_p3 = scmp.ne.s32.totalorder %s2368_s13, %s2364_s12 }
   0xf   : > { %s3263_s20 = smov (%p39_p0, %s37_s20), 0  ;;  %p64_p5 = scmp.eq.s32.totalorder %s2459_s18, 0 }
  0x10   : > { %3238 = sst [smem:[#allocation15_spill]] %s3263_s20  ;;  %p2471_p4 = por %p58_p2, %p57_p1 }
  0x11   : > { %s45_s23 = ssub.s32 %s2380_s16, %s3263_s20  ;;  %p145_p6 = scmp.eq.s32.totalorder %s2459_s18, 1 }
  0x12   : > { %p48_p7 = scmp.eq.s32.totalorder %s45_s23, 0  ;;  %p2479_p8 = por %p64_p5, %p63_p3 }
  0x13   : > { %p2483_p9 = por %p145_p6, %p57_p1  ;;  %p151_p10 = scmp.eq.s32.totalorder %s1725_s19, 1 }
  0x14   : > { %s3240_s24 = scalar_select %p2479_p8, 1, 0 }
  0x15   : > { %s3241_s25 = scalar_select %p2483_p9, 1, 0 }
  0x16   : > { %s2488_s26 = scalar_select %p48_p7, %s2372_s14, %s50_s21  }
  0x17   : > { %p2490_p11 = por %p151_p10, %p63_p3  ;;  %p2058_p13 = scmp.lt.s32.totalorder %s2384_s17, 2 }
  0x18   : > { %s2497_s28 = sand.u32 1, %s2372_s14   ;;  %s194_s30 = sand.u32 1, %s2384_s17  }
  0x19   : > { %s3242_s27 = scalar_select %p2490_p11, 1, 0 }
  0x1a   : > { %p2501_p0 = pnand %p2058_p13, %p2471_p4  ;;  %s1731_s4 = sshll.u32 %s2497_s28, 6 }
  0x1b   : > { %s1794_s5 = sshll.u32 %s2380_s16, 10  ;;  %s198_s6 = scalar_lea.vmem [#allocation8], %s1731_s4 }
  0x1c   : > { %s3243_s29 = scalar_select %p2501_p0, 1, 0 }
  0x1d   : > { %s207_s7 = sshll.u32 %s198_s6, 4  ;;  %s3244_s1 = sld [smem:[#allocation17_spill]]  ;;  %s2513_s7 = int_to_ptr.vmem [resolvable:$true] %s207_s7 }
  0x1e   : > { %s2515_s11 = scalar_lea.sflag [#allocation9], %s194_s30  ;;  %p2521_p2 = pneg %p2501_p0 }
  0x23   : > { %s2511_s10 = scalar_lea.hbm %s3244_s1, %s1794_s5  ;;  %s2213_s4 = scalar_lea.hbm %s3244_s1, 2048 }
  0x24   : > { %s2208_s19 = scalar_lea.hbm %s2511_s10, 1024  ;;  %p2214_p5 = scmp.lt.u32.totalorder %s2511_s10, %s3244_s1 }
  0x25   : > { %p2209_p1 = scmp.ne.s32.totalorder %s2511_s10, %s2208_s19  ;;  %p2215_p6 = scmp.lt.u32.totalorder %s2213_s4, %s2208_s19 }
  0x26   : > { %p2217_p10 = scmp.lt.u32.totalorder %s2208_s19, %s2511_s10 }
  0x27   : > { %p2211_p3 = pnand %p2521_p2, %p2209_p1  ;;  %p2216_p7 = por %p2215_p6, %p2214_p5 }
  0x29   : > { %p2212_p4 = pneg %p2211_p3  ;;  %p2218_p13 = por %p2217_p10, %p2216_p7 }
  0x2b   : > { %p2219_p12 = pnand %p2218_p13, %p2212_p4 }
  0x2d   : > { %2222 = shalt.err (!%p2219_p12)
}
  0x2e   : > { %s2223_s30 = scalar_lea.vmem %s2513_s7, 1024  ;;  %s2386_s8 = smov [#allocation8]  }
  0x2f   : > { %p2224_p1 = scmp.ne.s32.totalorder %s2513_s7, %s2223_s30  ;;  %s2228_s9 = sshll.u32 %s2386_s8, 4  ;;  %s2229_s9 = int_to_ptr.vmem [resolvable:$false] %s2228_s9 }
  0x30   : > { %s2230_s22 = scalar_lea.vmem %s2229_s9, 2048  ;;  %p2231_p9 = scmp.lt.s32.totalorder %s2513_s7, %s2229_s9 }
  0x31   : > { %p2226_p3 = pnand %p2224_p1, %p2521_p2  ;;  %p2232_p8 = scmp.lt.s32.totalorder %s2230_s22, %s2223_s30 }
  0x33   : > { %p2227_p11 = pneg %p2226_p3  ;;  %p2233_p5 = por %p2232_p8, %p2231_p9 }
  0x35   : > { %p2234_p6 = pnand %p2233_p5, %p2227_p11 }
  0x37   : > { %2237 = shalt.err (!%p2234_p6)
}
  0x38   : > { %s3232_s19 = smov 64   ;;  %s3233_s23 = smov 4  }
  0x39   : > { %2050 = dma.hbm_to_vmem [thread:$0]  (!%p2501_p0), %s2511_s10, 1024, %s2513_s7, %s2515_s11, %s3232_s19, %s3232_s19, %s3233_s23  }
  0x3a   : > { %p1735_p8 = scmp.ge.s32.totalorder %s2384_s17, 1  ;;  %p233_p9 = scmp.lt.s32.totalorder %s2384_s17, 3 }
  0x3b   : > { %s1728_s5 = sshll.u32 %s2497_s28, 3  ;;  %s1793_s6 = sshll.u32 %s2380_s16, 7 }
  0x3c   : > { %p2550_p11 = pnand %p1735_p8, %p233_p9  ;;  %s3247_s0 = sld [smem:[#allocation16_spill]] }
  0x3d   : > { %s175_s22 = scalar_lea.vmem [#allocation5], %s1728_s5  ;;  %s1734_s7 = sshll.u32 %s2380_s16, 4 }
  0x3e   : > { %s3246_s4 = scalar_select %p2550_p11, 1, 0 }
  0x3f   : > { %s184_s1 = sshll.u32 %s175_s22, 4  ;;  %s172_s10 = scalar_lea.sflag [#allocation6], %s2497_s28  ;;  %s2561_s1 = int_to_ptr.vmem [resolvable:$true] %s184_s1 }
  0x42   : > { %s2559_s9 = scalar_lea.hbm %s3247_s0, %s1793_s6  ;;  %s2243_s6 = scalar_lea.hbm %s3247_s0, 256 }
  0x43   : > { %s2238_s19 = scalar_lea.hbm %s2559_s9, 128  ;;  %p2244_p10 = scmp.lt.u32.totalorder %s2559_s9, %s3247_s0 }
  0x44   : > { %p2239_p12 = scmp.ne.s32.totalorder %s2559_s9, %s2238_s19  ;;  %p2245_p13 = scmp.lt.u32.totalorder %s2243_s6, %s2238_s19 }
  0x45   : > { %p2247_p3 = scmp.lt.u32.totalorder %s2238_s19, %s2559_s9 }
  0x46   : > { %p2241_p4 = pnand %p2239_p12, %p2521_p2  ;;  %p2246_p1 = por %p2245_p13, %p2244_p10 }
  0x48   : > { %p2242_p7 = pneg %p2241_p4  ;;  %p2248_p5 = por %p2247_p3, %p2246_p1 }
  0x4a   : > { %p2249_p6 = pnand %p2248_p5, %p2242_p7 }
  0x4c   : > { %2252 = shalt.err (!%p2249_p6)
}
  0x4d   : > { %s2253_s5 = scalar_lea.vmem %s2561_s1, 128  ;;  %s2389_s20 = smov [#allocation5]  }
  0x4e   : > { %p2254_p8 = scmp.ne.s32.totalorder %s2561_s1, %s2253_s5  ;;  %s2258_s23 = sshll.u32 %s2389_s20, 4  ;;  %s2259_s23 = int_to_ptr.vmem [resolvable:$false] %s2258_s23 }
  0x4f   : > { %s2260_s22 = scalar_lea.vmem %s2259_s23, 256  ;;  %p2261_p4 = scmp.lt.s32.totalorder %s2561_s1, %s2259_s23 }
  0x50   : > { %p2256_p9 = pnand %p2254_p8, %p2521_p2  ;;  %p2262_p11 = scmp.lt.s32.totalorder %s2260_s22, %s2253_s5 }
  0x52   : > { %p2257_p12 = pneg %p2256_p9  ;;  %p2263_p10 = por %p2262_p11, %p2261_p4 }
  0x54   : > { %p2264_p13 = pnand %p2263_p10, %p2257_p12 }
  0x56   : > { %2267 = shalt.err (!%p2264_p13)
}
  0x57   : > { %s3248_s19 = smov 4   ;;  %s3249_s6 = smov 64  }
  0x58   : > { %2047 = dma.hbm_to_vmem [thread:$0]  (!%p2501_p0), %s2559_s9, 128, %s2561_s1, %s172_s10, %s3249_s6, %s3249_s6, %s3248_s19  }
  0x59   : > { %s2596_s5 = scalar_lea.hbm %s3228_s2, %s1734_s7  ;;  %s220_s20 = scalar_lea.vmem [#allocation10], %s2497_s28 }
  0x5a   : > { %s228_s23 = sshll.u32 %s220_s20, 4  ;;  %s2268_s22 = scalar_lea.hbm %s2596_s5, 16  ;;  %s229_s23 = int_to_ptr.vmem [resolvable:$true] %s228_s23 }
  0x5b   : > { %p2269_p11 = scmp.ne.s32.totalorder %s2596_s5, %s2268_s22  ;;  %s2273_s9 = scalar_lea.hbm %s3228_s2, 32 }
  0x5c   : > { %p2274_p3 = scmp.lt.u32.totalorder %s2596_s5, %s3228_s2  ;;  %p2275_p5 = scmp.lt.u32.totalorder %s2273_s9, %s2268_s22 }
  0x5d   : > { %p2271_p7 = pnand %p2269_p11, %p2521_p2  ;;  %p2277_p8 = scmp.lt.u32.totalorder %s2268_s22, %s2596_s5 }
  0x5e   : > { %p2276_p6 = por %p2275_p5, %p2274_p3 }
  0x5f   : > { %p2272_p1 = pneg %p2271_p7 }
  0x60   : > { %p2278_p9 = por %p2277_p8, %p2276_p6 }
  0x62   : > { %p2279_p12 = pnand %p2278_p9, %p2272_p1 }
  0x64   : > { %2282 = shalt.err (!%p2279_p12)
}
  0x65   : > { %s2283_s28 = scalar_lea.vmem %s229_s23, 16  ;;  %s2390_s7 = smov [#allocation10]  }
  0x66   : > { %p2284_p4 = scmp.ne.s32.totalorder %s229_s23, %s2283_s28  ;;  %s2288_s6 = sshll.u32 %s2390_s7, 4  ;;  %s2289_s6 = int_to_ptr.vmem [resolvable:$false] %s2288_s6 }
  0x67   : > { %s2290_s0 = scalar_lea.vmem %s2289_s6, 32  ;;  %p2291_p11 = scmp.lt.s32.totalorder %s229_s23, %s2289_s6 }
  0x68   : > { %p2286_p10 = pnand %p2284_p4, %p2521_p2  ;;  %p2292_p7 = scmp.lt.s32.totalorder %s2290_s0, %s2283_s28 }
  0x6a   : > { %p2287_p13 = pneg %p2286_p10  ;;  %p2293_p0 = por %p2292_p7, %p2291_p11 }
  0x6c   : > { %p2294_p3 = pnand %p2293_p0, %p2287_p13 }
  0x6e   : > { %2297 = shalt.err (!%p2294_p3)
}
  0x6f   : > { %p3250_p5 = scmp.ne.s32.totalorder %s3243_s29, 0  ;;  %p3251_p1 = scmp.ne.s32.totalorder %s3246_s4, 0 }
  0x70   : > { %s2620_s21 = sand.u32 (!%p3251_p1), 1, %s2368_s13   ;;  %p3252_p0 = scmp.ne.s32.totalorder (!%p3251_p1), %s3240_s24, 0 }
  0x71   : > { %2053 = dma.hbm_to_vmem [thread:$0]  (!%p3250_p5), %s2596_s5, 16, %s229_s23, %s2515_s11  }
  0x72   : > { %237 = sbr.rel (%p3251_p1) target bundleno = 2863 (0xb2f), region = 32  ;;  %s1736_s30 = sshll.u32 (!%p3251_p1), %s2620_s21, 3 }
  0x73   : > { %s240_s8 = scalar_lea.sflag (!%p3251_p1), [#allocation6], %s2620_s21  ;;  %s2626_s20 = scalar_lea.vmem (!%p3251_p1), [#allocation5], %s1736_s30 }
  0x79   : > { %2351 = dma.done.wait (%p3252_p0), %s240_s8, 128  }
  0x7a   : > { %2353 = vsyncadd (%p3252_p0), %s240_s8, 4294967168  ;;  %s248_s29 = sand.u32 1, %s2459_s18   ;;  %s1737_s11 = sshll.u32 %s2620_s21, 6 }
  0x7b   : > { %s249_s4 = scalar_lea.sflag [#allocation9], %s248_s29  ;;  %s2634_s5 = scalar_lea.vmem [#allocation8], %s1737_s11 }
  0x7c   : > { %2355 = dma.done.wait (%p3252_p0), %s249_s4, 1040  }
  0x7d   : > { %2357 = vsyncadd (%p3252_p0), %s249_s4, 4294966256  ;;  %vm318_vm0 = vcmask 64512   ;;  %v2391_v0 = vmov 0.0   ;;  %vm2392_vm1 = vmmov 0   ;;  %v2128_v1 = vld [vmem:[%s2634_s5] sm:$0xff]   ;;  %v2129_v3 = vld [vmem:[%s2634_s5 + $0x8] sm:$0xff]  }
  0x7e   : > { %1876 = vmatprep.subr.bf16.mxu0 %v2391_v0  ;;  %319 = vst.msk [vmem:[#allocation4] sm:$0xff] %vm318_vm0, %v2391_v0  ;;  %320 = vst.msk [vmem:[#allocation4 + $0x8] sm:$0xff] %vm318_vm0, %v2391_v0  ;;  %1892 = vmatprep.mubr.msk.bf16.mxu0 %vm2392_vm1, %v2391_v0  ;;  %v404_v2 = vsel %vm318_vm0, %v2128_v1, 0  ;;  %v2667_v4 = vld [vmem:[%s2634_s5 + $0x10] sm:$0xff]   ;;  %v2131_v5 = vld [vmem:[%s2634_s5 + $0x18] sm:$0xff]   ;;  %v407_v6 = vsel %vm318_vm0, %v2129_v3, 0 }
  0x7f   : > { %321 = vst.msk [vmem:[#allocation4 + $0x10] sm:$0xff] %vm318_vm0, %v2391_v0  ;;  %322 = vst.msk [vmem:[#allocation4 + $0x18] sm:$0xff] %vm318_vm0, %v2391_v0  ;;  %1896 = vmatprep.subr.bf16.mxu1 %v2391_v0  ;;  %1912 = vmatprep.mubr.msk.bf16.mxu1 %vm2392_vm1, %v2391_v0  ;;  %v410_v7 = vsel %vm318_vm0, %v2667_v4, 0  ;;  %v413_v8 = vsel %vm318_vm0, %v2131_v5, 0  ;;  %v2678_v9 = vld [vmem:[%s2634_s5 + $0x20] sm:$0xff]   ;;  %v2684_v11 = vld [vmem:[%s2634_s5 + $0x28] sm:$0xff]  }
  0x80   : > { %323 = vst.msk [vmem:[#allocation4 + $0x20] sm:$0xff] %vm318_vm0, %v2391_v0  ;;  %324 = vst.msk [vmem:[#allocation4 + $0x28] sm:$0xff] %vm318_vm0, %v2391_v0  ;;  %1877 = vmatpush3.bf16.xpose.msra.mxu0 %v404_v2  ;;  %v416_v10 = vsel %vm318_vm0, %v2678_v9, 0  ;;  %v419_v12 = vsel %vm318_vm0, %v2684_v11, 0  ;;  %v2690_v13 = vld [vmem:[%s2634_s5 + $0x30] sm:$0xff]   ;;  %v2135_v15 = vld [vmem:[%s2634_s5 + $0x38] sm:$0xff]  }
  0x81   : > { %325 = vst.msk [vmem:[#allocation4 + $0x30] sm:$0xff] %vm318_vm0, %v2391_v0  ;;  %326 = vst.msk [vmem:[#allocation4 + $0x38] sm:$0xff] %vm318_vm0, %v2391_v0  ;;  %1878 = vmatprep.subr.bf16.mxu0 %v2391_v0  ;;  %v422_v14 = vsel %vm318_vm0, %v2690_v13, 0  ;;  %v328_v16 = vld [vmem:[%s2626_s20] sm:$0xf]  ;;  %v425_v18 = vsel %vm318_vm0, %v2135_v15, 0 }
  0x82   : > { %v329_v17 = vld [vmem:[%s2626_s20 + $0x4] sm:$0xf]  ;;  %v330_v19 = vmul.bf16 1052065461, %v328_v16  ;;  %s2393_s18 = smov 96   ;;  %vm301_vm2 = vcmask 7168  }
  0x83   : > { %v331_v20 = vmul.bf16 1052065461, %v329_v17  ;;  %512 = vrot.lane.b32.xlu1 %v2128_v1, %s2393_s18  ;;  %v2394_v22 = vmov -1e+30   ;;  %310 = vst.msk [vmem:[#allocation3] sm:$0xff] %vm301_vm2, %v2391_v0  ;;  %311 = vst.msk [vmem:[#allocation3 + $0x8] sm:$0xff] %vm301_vm2, %v2391_v0 }
  0x84   : > { %302 = vst.msk [vmem:[#allocation2] sm:$0xff] %vm301_vm2, %v2394_v22  ;;  %303 = vst.msk [vmem:[#allocation2 + $0x8] sm:$0xff] %vm301_vm2, %v2394_v22  ;;  %s260_s24 = scalar_lea.vmem [#allocation10], %s2620_s21  ;;  %v2395_v30 = vmov 0   ;;  %v2742_v31 = vld [vmem:[%s2634_s5 + $0x8] sm:$0xff]   ;;  %s2396_s23 = smov 120  }
  0x85   : > { %v1740_v21 = vcombine.low %v330_v19, %v331_v20  ;;  %304 = vst.msk [vmem:[#allocation2 + $0x10] sm:$0xff] %vm301_vm2, %v2394_v22  ;;  %305 = vst.msk [vmem:[#allocation2 + $0x18] sm:$0xff] %vm301_vm2, %v2394_v22  ;;  %v2731_v23 = vld [vmem:[%s260_s24] ss:$0 sm:$0xff]  ;;  %2126 = vset.pattern.permute.xlu1 %v2395_v30  ;;  %2127 = vset.pattern.permute.xlu0 %v2395_v30  ;;  %v2747_v32 = vld [vmem:[%s2634_s5 + $0x18] sm:$0xff]   ;;  %s2397_s22 = smov 88  }
  0x86   : > { %306 = vst.msk [vmem:[#allocation2 + $0x20] sm:$0xff] %vm301_vm2, %v2394_v22  ;;  %307 = vst.msk [vmem:[#allocation2 + $0x28] sm:$0xff] %vm301_vm2, %v2394_v22  ;;  %v2752_v33 = vld [vmem:[%s2634_s5 + $0x28] sm:$0xff]   ;;  %v2757_v34 = vld [vmem:[%s2634_s5 + $0x38] sm:$0xff]   ;;  %s2398_s1 = smov 112   ;;  %s2399_s9 = smov 80  }
  0x87   : > { %514 = vrot.lane.b32.xlu1 %v2129_v3, %s2393_s18  ;;  %308 = vst.msk [vmem:[#allocation2 + $0x30] sm:$0xff] %vm301_vm2, %v2394_v22  ;;  %309 = vst.msk [vmem:[#allocation2 + $0x38] sm:$0xff] %vm301_vm2, %v2394_v22  ;;  %v2792_v47 = vld [vmem:[%s2634_s5] sm:$0xff]   ;;  %v2797_v48 = vld [vmem:[%s2634_s5 + $0x10] sm:$0xff]   ;;  %s2400_s10 = smov 104   ;;  %s2401_s19 = smov 72  }
  0x88   : > { %1879 = vmatpush3.bf16.xpose.msra.mxu0 %v407_v6  ;;  %312 = vst.msk [vmem:[#allocation3 + $0x10] sm:$0xff] %vm301_vm2, %v2391_v0  ;;  %313 = vst.msk [vmem:[#allocation3 + $0x18] sm:$0xff] %vm301_vm2, %v2391_v0  ;;  %v2802_v49 = vld [vmem:[%s2634_s5 + $0x20] sm:$0xff]   ;;  %v597_v50 = vld [vmem:[%s2626_s20] sm:$0xf]  ;;  %vm1472_vm3 = vcmask 60416  }
  0x89   : > { %1880 = vmatprep.subr.bf16.mxu0 %v2391_v0  ;;  %314 = vst.msk [vmem:[#allocation3 + $0x20] sm:$0xff] %vm301_vm2, %v2391_v0  ;;  %315 = vst.msk [vmem:[#allocation3 + $0x28] sm:$0xff] %vm301_vm2, %v2391_v0  ;;  %v598_v51 = vld [vmem:[%s2626_s20 + $0x4] sm:$0xf]  ;;  %v599_v53 = vmul.bf16 1052065461, %v597_v50 }
  0x8a   : > { %316 = vst.msk [vmem:[#allocation3 + $0x30] sm:$0xff] %vm301_vm2, %v2391_v0  ;;  %317 = vst.msk [vmem:[#allocation3 + $0x38] sm:$0xff] %vm301_vm2, %v2391_v0  ;;  %v2809_v52 = vld [vmem:[%s2634_s5 + $0x30] sm:$0xff]   ;;  %v600_v54 = vmul.bf16 1052065461, %v598_v51  ;;  %s3160_s28 = scalar_lea.vmem [#allocation11], %s1736_s30 }
  0x8b   : > { %518 = vrot.lane.b32.xlu1 %v2131_v5, %s2393_s18  ;;  %v2763_v37 = vld [vmem:[#allocation2] sm:$0xff]  ;;  %v2768_v40 = vld [vmem:[#allocation2 + $0x8] sm:$0xff]  ;;  %s2402_s7 = smov 8   ;;  %s2403_s6 = smov 16   ;;  %vm1505_vm4 = vcmask 126016   ;;  %vm1538_vm5 = vcmask 191616  }
  0x8c   : > { %v1750_v55 = vcombine.low %v599_v53, %v600_v54  ;;  %s2404_s0 = smov 24   ;;  %s1803_s30 = sshll.u32 %s2376_s15, 7  ;;  %vm1571_vm6 = vcmask 257216  }
  0x8d   : > { %s1590_s8 = sshll.u32 %s3160_s28, 4  ;;  %s3173_s11 = scalar_lea.hbm %s3229_s3, %s1803_s30  ;;  %s3175_s8 = int_to_ptr.vmem [resolvable:$true] %s1590_s8 }
  0x8e   : > { %s1575_s4 = scalar_lea.sflag [#allocation7], %s2620_s21  ;;  %s2298_s15 = scalar_lea.vmem %s3175_s8, 128 }
  0x8f   : > { %p2299_p2 = scmp.ne.s32.totalorder %s3175_s8, %s2298_s15  ;;  %p3253_p6 = scmp.ne.s32.totalorder %s3241_s25, 0 }
  0x90   : > { %1881 = vmatpush3.bf16.xpose.msra.mxu0 %v410_v7 }
  0x91   : > { %1882 = vmatprep.subr.bf16.mxu0 %v2391_v0  ;;  %p2300_p8 = pnand %p2299_p2, %p3253_p6 }
  0x93   : > { %p2301_p9 = pneg %p2300_p8 }
  0x98   : > { %1883 = vmatpush3.bf16.xpose.msra.mxu0 %v413_v8 }
  0x99   : > { %1884 = vmatprep.subr.bf16.mxu0 %v2391_v0 }
  0xa0   : > { %1885 = vmatpush3.bf16.xpose.msra.mxu0 %v416_v10 }
  0xa1   : > { %1886 = vmatprep.subr.bf16.mxu0 %v2391_v0 }
  0xa8   : > { %1887 = vmatpush3.bf16.xpose.msra.mxu0 %v419_v12 }
  0xa9   : > { %1888 = vmatprep.subr.bf16.mxu0 %v2391_v0 }
  0xb0   : > { %1889 = vmatpush3.bf16.xpose.msra.mxu0 %v422_v14 }
  0xb1   : > { %1890 = vmatprep.subr.bf16.mxu0 %v2391_v0 }
  0xb8   : > { %1891 = vmatpush3.bf16.xpose.msra.mxu0 %v425_v18 }
  0xb9   : > { %1936 = vmatprep.subr.bf16.mxu0 %v2391_v0 }
  0xbf   : > { %1893 = vmatmul.mubr.msk.bf16.vlgmr.msra.gmra.mrb[0].mxu0 %vm318_vm0, %v1740_v21 }
  0xc0   : > { %1952 = vmatprep.mubr.msk.bf16.mxu0 %vm2392_vm1, %v2391_v0 }
  0xf5   : > { %v513_v35 = vpop.permute.xlu1 %512 }
  0xf6   : > { %1897 = vmatpush3.bf16.msra.mxu1 %v513_v35 }
  0xf7   : > { %1898 = vmatprep.subr.bf16.mxu1 %v2391_v0 }
  0xf9   : > { %v515_v36 = vpop.permute.xlu1 %514 }
  0xfa   : > { %1899 = vmatpush3.bf16.msra.mxu1 %v515_v36 }
  0xfb   : > { %1900 = vmatprep.subr.bf16.mxu1 %v2391_v0 }
  0xfd   : > { %v519_v46 = vpop.permute.xlu1 %518 }
 0x192   : > { %v461_v24 = vpop.f32.mrb[0].mxu0 }
 0x193   : > { %v2734_v25 = vadd.f32 %v2731_v23, %v461_v24  ;;  %v1894_v26 = vpop.f32.mrb[1].mxu0 }
 0x194   : > { %v464_v27 = vpop.f32.mrb[2].mxu0 }
 0x195   : > { %v1895_v28 = vpop.f32.mrb[3].mxu0  ;;  %470 = vmax.xlane.f32.xlu0 %v2734_v25  ;;  %v465_v29 = vadd.f32 %v2731_v23, %v464_v27 }
 0x199   : > { %472 = vmax.xlane.f32.xlu0 %v465_v29 }
 0x1af   : > { %516 = vrot.lane.b32.xlu0 %v2667_v4, %s2393_s18 }
 0x1b3   : > { %526 = vrot.lane.b32.xlu0 %v2135_v15, %s2393_s18 }
 0x1b7   : > { %666 = vrot.lane.b32.xlu0 %v2742_v31, %s2396_s23 }
 0x1bb   : > { %670 = vrot.lane.b32.xlu0 %v2747_v32, %s2396_s23 }
 0x1bf   : > { %674 = vrot.lane.b32.xlu0 %v2752_v33, %s2396_s23 }
 0x1c3   : > { %678 = vrot.lane.b32.xlu0 %v2757_v34, %s2396_s23 }
 0x222   : > { %v471_v38 = vpop.xlane.xlu0 %470 }
 0x223   : > { %v2766_v39 = vmax.f32 %v2763_v37, %v471_v38 }
 0x225   : > { %v476_v41 = vsub.f32 %v2763_v37, %v2766_v39  ;;  %595 = vst.msk [vmem:[#allocation2] sm:$0xff] %vm301_vm2, %v2766_v39  ;;  %484 = vperm.xlu1 %2126, %v2766_v39  }
 0x226   : > { %v473_v42 = vpop.xlane.xlu0 %472 }
 0x227   : > { %v2776_v43 = vmax.f32 %v2768_v40, %v473_v42  ;;  %v2862_v42 = vld [vmem:[#allocation2 + $0x10] sm:$0xff] }
 0x229   : > { %v477_v44 = vsub.f32 %v2768_v40, %v2776_v43  ;;  %596 = vst.msk [vmem:[#allocation2 + $0x8] sm:$0xff] %vm301_vm2, %v2776_v43  ;;  %489 = vperm.xlu1 %2126, %v2776_v43  }
 0x22a   : > { %v517_v45 = vpop.permute.xlu0 %516 }
 0x22b   : > { %1901 = vmatpush3.bf16.msra.mxu1 %v517_v45 }
 0x22c   : > { %1902 = vmatprep.subr.bf16.mxu1 %v2391_v0 }
 0x22d   : > { %520 = vrot.lane.b32.xlu1 %v2678_v9, %s2393_s18 }
 0x22e   : > { %v527_v2 = vpop.permute.xlu0 %526 }
 0x22f   : > { %1903 = vmatpush3.bf16.msra.mxu1 %v519_v46  ;;  %v2864_v46 = vld [vmem:[#allocation2 + $0x18] sm:$0xff] }
 0x230   : > { %1904 = vmatprep.subr.bf16.mxu1 %v2391_v0 }
 0x231   : > { %522 = vrot.lane.b32.xlu1 %v2684_v11, %s2393_s18 }
 0x232   : > { %v667_v8 = vpop.permute.xlu0 %666 }
 0x233   : > { %v687_v9 = vsel %vm318_vm0, %v667_v8, 0 }
 0x235   : > { %524 = vrot.lane.b32.xlu1 %v2690_v13, %s2393_s18 }
 0x236   : > { %v671_v12 = vpop.permute.xlu0 %670 }
 0x237   : > { %v693_v13 = vsel %vm318_vm0, %v671_v12, 0 }
 0x239   : > { %664 = vrot.lane.b32.xlu1 %v2792_v47, %s2396_s23 }
 0x23a   : > { %v675_v16 = vpop.permute.xlu0 %674 }
 0x23b   : > { %v699_v17 = vsel %vm318_vm0, %v675_v16, 0 }
 0x23d   : > { %668 = vrot.lane.b32.xlu1 %v2797_v48, %s2396_s23 }
 0x23e   : > { %v679_v20 = vpop.permute.xlu0 %678 }
 0x23f   : > { %v705_v21 = vsel %vm318_vm0, %v679_v20, 0 }
 0x241   : > { %672 = vrot.lane.b32.xlu1 %v2802_v49, %s2396_s23 }
 0x245   : > { %676 = vrot.lane.b32.xlu1 %v2809_v52, %s2396_s23 }
 0x249   : > { %622 = vrot.lane.b32.xlu1 %v1750_v55, %s2396_s23  ;;  %v2888_v55 = vld [vmem:[%s2634_s5 + $0x8] sm:$0xff]  }
 0x2a4   : > { %v485_v56 = vpop.permute.xlu1 %484 }
 0x2a5   : > { %v492_v57 = vsub.f32 %v2734_v25, %v485_v56  ;;  %v2892_v56 = vld [vmem:[%s2634_s5] sm:$0xff]  }
 0x2a7   : > { %v494_v60 = vmul.f32 1.442695, %v492_v57  ;;  %v2910_v57 = vld [vmem:[%s2634_s5 + $0x20] sm:$0xff]  }
 0x2a8   : > { %v490_v58 = vpop.permute.xlu1 %489 }
 0x2a9   : > { %v493_v59 = vsub.f32 %v465_v29, %v490_v58  ;;  %v879_v58 = vld [vmem:[%s2626_s20] sm:$0xf] }
 0x2ab   : > { %v496_v61 = vmul.f32 1.442695, %v493_v59  ;;  %v880_v59 = vld [vmem:[%s2626_s20 + $0x4] sm:$0xf] }
 0x2ac   : > { %v521_v62 = vpop.permute.xlu1 %520 }
 0x2ad   : > { %2160 = vpow2.f32 %v496_v61  ;;  %1905 = vmatpush3.bf16.msra.mxu1 %v521_v62  ;;  %v2920_v61 = vld [vmem:[%s2634_s5 + $0x30] sm:$0xff]   ;;  %v881_v62 = vmul.bf16 1052065461, %v879_v58 }
 0x2ae   : > { %1906 = vmatprep.subr.bf16.mxu1 %v2391_v0  ;;  %2162 = vpow2.f32 %v494_v60  ;;  %v2916_v60 = vld [vmem:[%s2634_s5 + $0x38] sm:$0xff]  }
 0x2b0   : > { %v523_v63 = vpop.permute.xlu1 %522 }
 0x2b1   : > { %1907 = vmatpush3.bf16.msra.mxu1 %v523_v63  ;;  %v882_v63 = vmul.bf16 1052065461, %v880_v59 }
 0x2b2   : > { %1908 = vmatprep.subr.bf16.mxu1 %v2391_v0 }
 0x2b4   : > { %v525_v1 = vpop.permute.xlu1 %524 }
 0x2b5   : > { %1909 = vmatpush3.bf16.msra.mxu1 %v525_v1  ;;  %v1760_v1 = vcombine.low %v881_v62, %v882_v63 }
 0x2b6   : > { %1910 = vmatprep.subr.bf16.mxu1 %v2391_v0 }
 0x2b7   : > { %v2818_v3 = vpop.eup %2160 }
 0x2b8   : > { %v2820_v4 = vpop.eup %2162  ;;  %v665_v6 = vpop.permute.xlu1 %664 }
 0x2b9   : > { %1911 = vmatpush3.bf16.msra.mxu1 %v527_v2  ;;  %v511_v5 = vpack.c.bf16 %v2818_v3, %v2820_v4  ;;  %v684_v7 = vsel %vm318_vm0, %v665_v6, 0 }
 0x2ba   : > { %1916 = vmatprep.subr.bf16.mxu1 %v2391_v0 }
 0x2bc   : > { %1913 = vmatmul.mubr.bf16.vlgmr.msra.gmra.mrb[0].mxu1 %v511_v5  ;;  %v669_v10 = vpop.permute.xlu1 %668 }
 0x2bd   : > { %1932 = vmatprep.mubr.msk.bf16.mxu1 %vm2392_vm1, %v2391_v0  ;;  %v690_v11 = vsel %vm318_vm0, %v669_v10, 0 }
 0x2c0   : > { %v673_v14 = vpop.permute.xlu1 %672 }
 0x2c1   : > { %v696_v15 = vsel %vm318_vm0, %v673_v14, 0 }
 0x2c2   : > { %1917 = vmatpush3.bf16.xpose.msra.mxu1 %v684_v7 }
 0x2c3   : > { %1918 = vmatprep.subr.bf16.mxu1 %v2391_v0 }
 0x2c4   : > { %v677_v18 = vpop.permute.xlu1 %676 }
 0x2c5   : > { %v702_v19 = vsel %vm318_vm0, %v677_v18, 0 }
 0x2c8   : > { %v623_v22 = vpop.permute.xlu1 %622 }
 0x2ca   : > { %1919 = vmatpush3.bf16.xpose.msra.mxu1 %v687_v9 }
 0x2cb   : > { %1920 = vmatprep.subr.bf16.mxu1 %v2391_v0 }
 0x2d2   : > { %1921 = vmatpush3.bf16.xpose.msra.mxu1 %v690_v11 }
 0x2d3   : > { %1922 = vmatprep.subr.bf16.mxu1 %v2391_v0 }
 0x2da   : > { %1923 = vmatpush3.bf16.xpose.msra.mxu1 %v693_v13 }
 0x2db   : > { %1924 = vmatprep.subr.bf16.mxu1 %v2391_v0 }
 0x2e2   : > { %1925 = vmatpush3.bf16.xpose.msra.mxu1 %v696_v15 }
 0x2e3   : > { %1926 = vmatprep.subr.bf16.mxu1 %v2391_v0 }
 0x2ea   : > { %1927 = vmatpush3.bf16.xpose.msra.mxu1 %v699_v17 }
 0x2eb   : > { %1928 = vmatprep.subr.bf16.mxu1 %v2391_v0 }
 0x2f2   : > { %1929 = vmatpush3.bf16.xpose.msra.mxu1 %v702_v19 }
 0x2f3   : > { %1930 = vmatprep.subr.bf16.mxu1 %v2391_v0 }
 0x2fa   : > { %1931 = vmatpush3.bf16.xpose.msra.mxu1 %v705_v21 }
 0x2fb   : > { %1976 = vmatprep.subr.bf16.mxu1 %v2391_v0 }
 0x301   : > { %1933 = vmatmul.mubr.msk.bf16.vlgmr.msra.gmra.mrb[4].mxu1 %vm318_vm0, %v623_v22 }
 0x302   : > { %1992 = vmatprep.mubr.msk.bf16.mxu1 %vm2392_vm1, %v2391_v0 }
 0x38f   : > { %v2846_v24 = vpop.f32.mrb[0].mxu1 }
 0x390   : > { %v1914_v25 = vpop.f32.mrb[1].mxu1 }
 0x391   : > { %v2848_v26 = vpop.f32.mrb[2].mxu1 }
 0x392   : > { %v1915_v27 = vpop.f32.mrb[3].mxu1 }
 0x3d4   : > { %v741_v28 = vpop.f32.mrb[4].mxu1 }
 0x3d5   : > { %v2851_v29 = vadd.f32 %v2731_v23, %v741_v28  ;;  %v1934_v30 = vpop.f32.mrb[5].mxu1 }
 0x3d6   : > { %v744_v35 = vpop.f32.mrb[6].mxu1 }
 0x3d7   : > { %v2854_v36 = vadd.f32 %v2731_v23, %v744_v35  ;;  %751 = vmax.xlane.f32.xlu0 %v2851_v29  ;;  %v1935_v38 = vpop.f32.mrb[7].mxu1 }
 0x3d9   : > { %753 = vmax.xlane.f32.xlu1 %v2854_v36 }
 0x3ea   : > { %795 = vrot.lane.b32.xlu1 %v2742_v31, %s2397_s22 }
 0x3ed   : > { %793 = vrot.lane.b32.xlu0 %v2792_v47, %s2397_s22 }
 0x3ee   : > { %799 = vrot.lane.b32.xlu1 %v2747_v32, %s2397_s22 }
 0x3f1   : > { %797 = vrot.lane.b32.xlu0 %v2797_v48, %s2397_s22 }
 0x464   : > { %v752_v45 = vpop.xlane.xlu0 %751 }
 0x465   : > { %v2867_v50 = vmax.f32 %v2862_v42, %v752_v45 }
 0x466   : > { %v754_v51 = vpop.xlane.xlu1 %753 }
 0x467   : > { %v757_v53 = vsub.f32 %v2862_v42, %v2867_v50  ;;  %877 = vst.msk [vmem:[#allocation2 + $0x10] sm:$0xff] %vm301_vm2, %v2867_v50  ;;  %v2874_v31 = vmax.f32 %v2864_v46, %v754_v51  ;;  %765 = vperm.xlu0 %2127, %v2867_v50  }
 0x468   : > { %v794_v32 = vpop.permute.xlu0 %793 }
 0x469   : > { %v758_v47 = vsub.f32 %v2864_v46, %v2874_v31  ;;  %878 = vst.msk [vmem:[#allocation2 + $0x18] sm:$0xff] %vm301_vm2, %v2874_v31  ;;  %770 = vperm.xlu1 %2126, %v2874_v31   ;;  %1937 = vmatpush3.bf16.msra.mxu0 %v794_v32 }
 0x46a   : > { %1938 = vmatprep.subr.bf16.mxu0 %v2391_v0  ;;  %v796_v48 = vpop.permute.xlu1 %795 }
 0x46b   : > { %803 = vrot.lane.b32.xlu0 %v2752_v33, %s2397_s22 }
 0x46c   : > { %v798_v54 = vpop.permute.xlu0 %797 }
 0x46d   : > { %801 = vrot.lane.b32.xlu1 %v2802_v49, %s2397_s22  ;;  %1939 = vmatpush3.bf16.msra.mxu0 %v796_v48  ;;  %v2897_v49 = vld [vmem:[%s2634_s5 + $0x18] sm:$0xff]  }
 0x46e   : > { %1940 = vmatprep.subr.bf16.mxu0 %v2391_v0  ;;  %v800_v33 = vpop.permute.xlu1 %799 }
 0x46f   : > { %807 = vrot.lane.b32.xlu0 %v2757_v34, %s2397_s22  ;;  %v2901_v34 = vld [vmem:[%s2634_s5 + $0x10] sm:$0xff]  }
 0x471   : > { %805 = vrot.lane.b32.xlu1 %v2809_v52, %s2397_s22  ;;  %1941 = vmatpush3.bf16.msra.mxu0 %v798_v54  ;;  %v2906_v52 = vld [vmem:[%s2634_s5 + $0x28] sm:$0xff]  }
 0x472   : > { %1942 = vmatprep.subr.bf16.mxu0 %v2391_v0 }
 0x473   : > { %948 = vrot.lane.b32.xlu0 %v2888_v55, %s2398_s1 }
 0x475   : > { %946 = vrot.lane.b32.xlu1 %v2892_v56, %s2398_s1  ;;  %1943 = vmatpush3.bf16.msra.mxu0 %v800_v33 }
 0x476   : > { %1944 = vmatprep.subr.bf16.mxu0 %v2391_v0 }
 0x477   : > { %952 = vrot.lane.b32.xlu0 %v2897_v49, %s2398_s1 }
 0x479   : > { %950 = vrot.lane.b32.xlu1 %v2901_v34, %s2398_s1 }
 0x47b   : > { %956 = vrot.lane.b32.xlu0 %v2906_v52, %s2398_s1 }
 0x47d   : > { %954 = vrot.lane.b32.xlu1 %v2910_v57, %s2398_s1 }
 0x47f   : > { %960 = vrot.lane.b32.xlu0 %v2916_v60, %s2398_s1 }
 0x481   : > { %958 = vrot.lane.b32.xlu1 %v2920_v61, %s2398_s1 }
 0x485   : > { %904 = vrot.lane.b32.xlu1 %v1760_v1, %s2398_s1 }
 0x4e6   : > { %v766_v2 = vpop.permute.xlu0 %765 }
 0x4e7   : > { %v773_v5 = vsub.f32 %v2851_v29, %v766_v2 }
 0x4e8   : > { %v771_v6 = vpop.permute.xlu1 %770 }
 0x4e9   : > { %v774_v7 = vsub.f32 %v2854_v36, %v771_v6  ;;  %v775_v8 = vmul.f32 1.442695, %v773_v5  ;;  %v2973_v6 = vld [vmem:[#allocation2 + $0x20] sm:$0xff] }
 0x4ea   : > { %v804_v11 = vpop.permute.xlu0 %803 }
 0x4eb   : > { %v777_v9 = vmul.f32 1.442695, %v774_v7 }
 0x4ec   : > { %v802_v10 = vpop.permute.xlu1 %801 }
 0x4ed   : > { %2164 = vpow2.f32 %v777_v9  ;;  %1945 = vmatpush3.bf16.msra.mxu0 %v802_v10 }
 0x4ee   : > { %1946 = vmatprep.subr.bf16.mxu0 %v2391_v0  ;;  %2166 = vpow2.f32 %v775_v8  ;;  %v808_v13 = vpop.permute.xlu0 %807  ;;  %v2975_v8 = vld [vmem:[#allocation2 + $0x28] sm:$0xff] }
 0x4f0   : > { %v806_v12 = vpop.permute.xlu1 %805 }
 0x4f1   : > { %1947 = vmatpush3.bf16.msra.mxu0 %v804_v11 }
 0x4f2   : > { %1948 = vmatprep.subr.bf16.mxu0 %v2391_v0  ;;  %v949_v19 = vpop.permute.xlu0 %948 }
 0x4f3   : > { %v969_v20 = vsel %vm318_vm0, %v949_v19, 0  ;;  %v3023_v19 = vld [vmem:[%s2634_s5 + $0x28] sm:$0xff]  }
 0x4f4   : > { %v947_v17 = vpop.permute.xlu1 %946 }
 0x4f5   : > { %1949 = vmatpush3.bf16.msra.mxu0 %v806_v12  ;;  %v966_v18 = vsel %vm318_vm0, %v947_v17, 0  ;;  %v1161_v17 = vld [vmem:[%s2626_s20] sm:$0xf] }
 0x4f6   : > { %1950 = vmatprep.subr.bf16.mxu0 %v2391_v0  ;;  %v953_v25 = vpop.permute.xlu0 %952 }
 0x4f7   : > { %v2929_v14 = vpop.eup %2164  ;;  %v975_v27 = vsel %vm318_vm0, %v953_v25, 0  ;;  %v3031_v25 = vld [vmem:[%s2634_s5 + $0x38] sm:$0xff]  }
 0x4f8   : > { %v2931_v15 = vpop.eup %2166  ;;  %v951_v21 = vpop.permute.xlu1 %950 }
 0x4f9   : > { %1951 = vmatpush3.bf16.msra.mxu0 %v808_v13  ;;  %v792_v16 = vpack.c.bf16 %v2929_v14, %v2931_v15  ;;  %v972_v22 = vsel %vm318_vm0, %v951_v21, 0  ;;  %v2999_v13 = vld [vmem:[%s2634_s5] sm:$0xff]   ;;  %v1163_v21 = vmul.bf16 1052065461, %v1161_v17 }
 0x4fa   : > { %1956 = vmatprep.subr.bf16.mxu0 %v2391_v0  ;;  %v957_v30 = vpop.permute.xlu0 %956 }
 0x4fb   : > { %v981_v35 = vsel %vm318_vm0, %v957_v30, 0 }
 0x4fc   : > { %1953 = vmatmul.mubr.bf16.vlgmr.msra.gmra.mrb[4].mxu0 %v792_v16  ;;  %v955_v28 = vpop.permute.xlu1 %954  ;;  %v3003_v16 = vld [vmem:[%s2634_s5 + $0x8] sm:$0xff]  }
 0x4fd   : > { %1972 = vmatprep.mubr.msk.bf16.mxu0 %vm2392_vm1, %v2391_v0  ;;  %v978_v29 = vsel %vm318_vm0, %v955_v28, 0 }
 0x4fe   : > { %v961_v45 = vpop.permute.xlu0 %960 }
 0x4ff   : > { %v987_v51 = vsel %vm318_vm0, %v961_v45, 0 }
 0x500   : > { %v959_v36 = vpop.permute.xlu1 %958 }
 0x501   : > { %v984_v38 = vsel %vm318_vm0, %v959_v36, 0 }
 0x502   : > { %1957 = vmatpush3.bf16.xpose.msra.mxu0 %v966_v18  ;;  %v1162_v18 = vld [vmem:[%s2626_s20 + $0x4] sm:$0xf] }
 0x503   : > { %1958 = vmatprep.subr.bf16.mxu0 %v2391_v0 }
 0x504   : > { %v905_v32 = vpop.permute.xlu1 %904 }
 0x50a   : > { %1959 = vmatpush3.bf16.xpose.msra.mxu0 %v969_v20  ;;  %v3027_v20 = vld [vmem:[%s2634_s5 + $0x30] sm:$0xff]  }
 0x50b   : > { %1960 = vmatprep.subr.bf16.mxu0 %v2391_v0 }
 0x512   : > { %1961 = vmatpush3.bf16.xpose.msra.mxu0 %v972_v22  ;;  %v1164_v22 = vmul.bf16 1052065461, %v1162_v18 }
 0x513   : > { %1962 = vmatprep.subr.bf16.mxu0 %v2391_v0 }
 0x51a   : > { %1963 = vmatpush3.bf16.xpose.msra.mxu0 %v975_v27  ;;  %v1770_v27 = vcombine.low %v1163_v21, %v1164_v22 }
 0x51b   : > { %1964 = vmatprep.subr.bf16.mxu0 %v2391_v0 }
 0x522   : > { %1965 = vmatpush3.bf16.xpose.msra.mxu0 %v978_v29 }
 0x523   : > { %1966 = vmatprep.subr.bf16.mxu0 %v2391_v0 }
 0x52a   : > { %1967 = vmatpush3.bf16.xpose.msra.mxu0 %v981_v35 }
 0x52b   : > { %1968 = vmatprep.subr.bf16.mxu0 %v2391_v0 }
 0x532   : > { %1969 = vmatpush3.bf16.xpose.msra.mxu0 %v984_v38 }
 0x533   : > { %1970 = vmatprep.subr.bf16.mxu0 %v2391_v0 }
 0x53a   : > { %1971 = vmatpush3.bf16.xpose.msra.mxu0 %v987_v51 }
 0x53b   : > { %2016 = vmatprep.subr.bf16.mxu0 %v2391_v0 }
 0x541   : > { %1973 = vmatmul.mubr.msk.bf16.vlgmr.msra.gmra.mrb[8].mxu0 %vm318_vm0, %v905_v32 }
 0x542   : > { %2032 = vmatprep.mubr.msk.bf16.mxu0 %vm2392_vm1, %v2391_v0 }
 0x5cf   : > { %v2957_v48 = vpop.f32.mrb[4].mxu0 }
 0x5d0   : > { %v1954_v54 = vpop.f32.mrb[5].mxu0 }
 0x5d1   : > { %v2959_v33 = vpop.f32.mrb[6].mxu0 }
 0x5d2   : > { %v1955_v58 = vpop.f32.mrb[7].mxu0 }
 0x614   : > { %v1023_v59 = vpop.f32.mrb[8].mxu0 }
 0x615   : > { %v2962_v62 = vadd.f32 %v2731_v23, %v1023_v59  ;;  %v1974_v63 = vpop.f32.mrb[9].mxu0 }
 0x616   : > { %v1026_v1 = vpop.f32.mrb[10].mxu0 }
 0x617   : > { %v2965_v2 = vadd.f32 %v2731_v23, %v1026_v1  ;;  %1033 = vmax.xlane.f32.xlu0 %v2962_v62  ;;  %v1975_v5 = vpop.f32.mrb[11].mxu0 }
 0x619   : > { %1035 = vmax.xlane.f32.xlu1 %v2965_v2 }
 0x62a   : > { %1077 = vrot.lane.b32.xlu1 %v2888_v55, %s2399_s9 }
 0x62d   : > { %1075 = vrot.lane.b32.xlu0 %v2892_v56, %s2399_s9 }
 0x62e   : > { %1081 = vrot.lane.b32.xlu1 %v2897_v49, %s2399_s9 }
 0x631   : > { %1079 = vrot.lane.b32.xlu0 %v2901_v34, %s2399_s9 }
 0x6a4   : > { %v1034_v7 = vpop.xlane.xlu0 %1033 }
 0x6a5   : > { %v2978_v9 = vmax.f32 %v2973_v6, %v1034_v7 }
 0x6a6   : > { %v1036_v10 = vpop.xlane.xlu1 %1035 }
 0x6a7   : > { %v1039_v11 = vsub.f32 %v2973_v6, %v2978_v9  ;;  %1159 = vst.msk [vmem:[#allocation2 + $0x20] sm:$0xff] %vm301_vm2, %v2978_v9  ;;  %v2985_v55 = vmax.f32 %v2975_v8, %v1036_v10  ;;  %1047 = vperm.xlu0 %2127, %v2978_v9  }
 0x6a8   : > { %v1076_v56 = vpop.permute.xlu0 %1075 }
 0x6a9   : > { %v1040_v49 = vsub.f32 %v2975_v8, %v2985_v55  ;;  %1160 = vst.msk [vmem:[#allocation2 + $0x28] sm:$0xff] %vm301_vm2, %v2985_v55  ;;  %1052 = vperm.xlu1 %2126, %v2985_v55   ;;  %1977 = vmatpush3.bf16.msra.mxu1 %v1076_v56  ;;  %v1041_v40 = vmul.f32 1.442695, %v1039_v11  ;;  %v780_v8 = vld [vmem:[#allocation3 + $0x10] sm:$0xff]  ;;  %v1062_v11 = vld [vmem:[#allocation3 + $0x20] sm:$0xff] }
 0x6aa   : > { %1978 = vmatprep.subr.bf16.mxu1 %v2391_v0  ;;  %v1078_v34 = vpop.permute.xlu1 %1077 }
 0x6ab   : > { %1083 = vrot.lane.b32.xlu0 %v2910_v57, %s2399_s9  ;;  %v3008_v57 = vld [vmem:[%s2634_s5 + $0x10] sm:$0xff]   ;;  %v1043_v37 = vmul.f32 1.442695, %v1040_v49 }
 0x6ac   : > { %v1080_v12 = vpop.permute.xlu0 %1079 }
 0x6ad   : > { %1085 = vrot.lane.b32.xlu1 %v2906_v52, %s2399_s9  ;;  %1979 = vmatpush3.bf16.msra.mxu1 %v1078_v34 }
 0x6ae   : > { %1980 = vmatprep.subr.bf16.mxu1 %v2391_v0  ;;  %v1082_v52 = vpop.permute.xlu1 %1081 }
 0x6af   : > { %1087 = vrot.lane.b32.xlu0 %v2920_v61, %s2399_s9  ;;  %v3012_v61 = vld [vmem:[%s2634_s5 + $0x18] sm:$0xff]  }
 0x6b1   : > { %1089 = vrot.lane.b32.xlu1 %v2916_v60, %s2399_s9  ;;  %1981 = vmatpush3.bf16.msra.mxu1 %v1080_v12  ;;  %v3017_v60 = vld [vmem:[%s2634_s5 + $0x20] sm:$0xff]   ;;  %s2405_s5 = smov [#allocation11]  }
 0x6b2   : > { %1982 = vmatprep.subr.bf16.mxu1 %v2391_v0  ;;  %s2302_s18 = sshll.u32 %s2405_s5, 4  ;;  %s2303_s18 = int_to_ptr.vmem [resolvable:$false] %s2302_s18 }
 0x6b3   : > { %1228 = vrot.lane.b32.xlu0 %v2999_v13, %s2400_s10  ;;  %s2304_s24 = scalar_lea.vmem %s2303_s18, 256  ;;  %p2305_p12 = scmp.lt.s32.totalorder %s3175_s8, %s2303_s18 }
 0x6b4   : > { %p2306_p4 = scmp.lt.s32.totalorder %s2304_s24, %s2298_s15 }
 0x6b5   : > { %1230 = vrot.lane.b32.xlu1 %v3003_v16, %s2400_s10  ;;  %1983 = vmatpush3.bf16.msra.mxu1 %v1082_v52 }
 0x6b6   : > { %1984 = vmatprep.subr.bf16.mxu1 %v2391_v0  ;;  %p2307_p10 = por %p2306_p4, %p2305_p12 }
 0x6b7   : > { %1232 = vrot.lane.b32.xlu0 %v3008_v57, %s2400_s10 }
 0x6b8   : > { %p2308_p13 = pnand %p2307_p10, %p2301_p9 }
 0x6b9   : > { %1234 = vrot.lane.b32.xlu1 %v3012_v61, %s2400_s10 }
 0x6bb   : > { %1236 = vrot.lane.b32.xlu0 %v3017_v60, %s2400_s10 }
 0x6bd   : > { %1238 = vrot.lane.b32.xlu1 %v3023_v19, %s2400_s10 }
 0x6bf   : > { %1240 = vrot.lane.b32.xlu0 %v3027_v20, %s2400_s10 }
 0x6c1   : > { %1242 = vrot.lane.b32.xlu1 %v3031_v25, %s2400_s10 }
 0x6c3   : > { %1186 = vrot.lane.b32.xlu0 %v1770_v27, %s2400_s10 }
 0x726   : > { %v1048_v28 = vpop.permute.xlu0 %1047 }
 0x727   : > { %v1055_v29 = vsub.f32 %v2962_v62, %v1048_v28 }
 0x728   : > { %v1053_v30 = vpop.permute.xlu1 %1052 }
 0x729   : > { %v1057_v35 = vmul.f32 1.442695, %v1055_v29  ;;  %v1056_v36 = vsub.f32 %v2965_v2, %v1053_v30 }
 0x72a   : > { %v1084_v38 = vpop.permute.xlu0 %1083 }
 0x72b   : > { %v1059_v45 = vmul.f32 1.442695, %v1056_v36  ;;  %1985 = vmatpush3.bf16.msra.mxu1 %v1084_v38  ;;  %2168 = vpow2.f32 %v1057_v35 }
 0x72c   : > { %1986 = vmatprep.subr.bf16.mxu1 %v2391_v0  ;;  %v1086_v51 = vpop.permute.xlu1 %1085 }
 0x72d   : > { %2170 = vpow2.f32 %v1059_v45 }
 0x72e   : > { %v1088_v32 = vpop.permute.xlu0 %1087 }
 0x72f   : > { %1987 = vmatpush3.bf16.msra.mxu1 %v1086_v51 }
 0x730   : > { %1988 = vmatprep.subr.bf16.mxu1 %v2391_v0  ;;  %v1090_v54 = vpop.permute.xlu1 %1089 }
 0x732   : > { %v1229_v63 = vpop.permute.xlu0 %1228 }
 0x733   : > { %1989 = vmatpush3.bf16.msra.mxu1 %v1088_v32  ;;  %v1248_v1 = vsel %vm318_vm0, %v1229_v63, 0 }
 0x734   : > { %1990 = vmatprep.subr.bf16.mxu1 %v2391_v0  ;;  %v1231_v2 = vpop.permute.xlu1 %1230 }
 0x735   : > { %v3040_v58 = vpop.eup %2168  ;;  %v1251_v5 = vsel %vm318_vm0, %v1231_v2, 0 }
 0x736   : > { %v1233_v7 = vpop.permute.xlu0 %1232 }
 0x737   : > { %v3042_v59 = vpop.eup %2170  ;;  %1991 = vmatpush3.bf16.msra.mxu1 %v1090_v54  ;;  %v1254_v10 = vsel %vm318_vm0, %v1233_v7, 0 }
 0x738   : > { %v1074_v62 = vpack.c.bf16 %v3042_v59, %v3040_v58  ;;  %1996 = vmatprep.subr.bf16.mxu1 %v2391_v0  ;;  %v1235_v56 = vpop.permute.xlu1 %1234 }
 0x739   : > { %v1257_v34 = vsel %vm318_vm0, %v1235_v56, 0 }
 0x73a   : > { %1993 = vmatmul.mubr.bf16.vlgmr.msra.gmra.mrb[8].mxu1 %v1074_v62  ;;  %v1237_v12 = vpop.permute.xlu0 %1236 }
 0x73b   : > { %2012 = vmatprep.mubr.msk.bf16.mxu1 %vm2392_vm1, %v2391_v0  ;;  %v1260_v52 = vsel %vm318_vm0, %v1237_v12, 0 }
 0x73c   : > { %v1239_v17 = vpop.permute.xlu1 %1238 }
 0x73d   : > { %v1263_v18 = vsel %vm318_vm0, %v1239_v17, 0 }
 0x73e   : > { %v1241_v21 = vpop.permute.xlu0 %1240 }
 0x73f   : > { %v1266_v22 = vsel %vm318_vm0, %v1241_v21, 0  ;;  %v480_v21 = vmul.f32 1.442695, %v477_v44 }
 0x740   : > { %1997 = vmatpush3.bf16.xpose.msra.mxu1 %v1248_v1  ;;  %v1243_v27 = vpop.permute.xlu1 %1242  ;;  %v3073_v1 = vld [vmem:[#allocation2 + $0x30] sm:$0xff] }
 0x741   : > { %1998 = vmatprep.subr.bf16.mxu1 %v2391_v0  ;;  %v1269_v28 = vsel %vm318_vm0, %v1243_v27, 0  ;;  %v478_v27 = vmul.f32 1.442695, %v476_v41 }
 0x742   : > { %v1187_v29 = vpop.permute.xlu0 %1186 }
 0x748   : > { %1999 = vmatpush3.bf16.xpose.msra.mxu1 %v1251_v5  ;;  %v3075_v5 = vld [vmem:[#allocation2 + $0x38] sm:$0xff] }
 0x749   : > { %2000 = vmatprep.subr.bf16.mxu1 %v2391_v0 }
 0x750   : > { %2001 = vmatpush3.bf16.xpose.msra.mxu1 %v1254_v10 }
 0x751   : > { %2002 = vmatprep.subr.bf16.mxu1 %v2391_v0 }
 0x758   : > { %2003 = vmatpush3.bf16.xpose.msra.mxu1 %v1257_v34 }
 0x759   : > { %2004 = vmatprep.subr.bf16.mxu1 %v2391_v0 }
 0x760   : > { %2005 = vmatpush3.bf16.xpose.msra.mxu1 %v1260_v52 }
 0x761   : > { %2006 = vmatprep.subr.bf16.mxu1 %v2391_v0 }
 0x768   : > { %2007 = vmatpush3.bf16.xpose.msra.mxu1 %v1263_v18 }
 0x769   : > { %2008 = vmatprep.subr.bf16.mxu1 %v2391_v0 }
 0x770   : > { %2009 = vmatpush3.bf16.xpose.msra.mxu1 %v1266_v22 }
 0x771   : > { %2010 = vmatprep.subr.bf16.mxu1 %v2391_v0 }
 0x778   : > { %2011 = vmatpush3.bf16.xpose.msra.mxu1 %v1269_v28 }
 0x77f   : > { %2013 = vmatmul.mubr.msk.bf16.vlgmr.msra.gmra.mrb[12].mxu1 %vm318_vm0, %v1187_v29 }
 0x80d   : > { %v3065_v30 = vpop.f32.mrb[8].mxu1 }
 0x80e   : > { %v1994_v35 = vpop.f32.mrb[9].mxu1 }
 0x80f   : > { %v3067_v36 = vpop.f32.mrb[10].mxu1  ;;  %v1063_v35 = vld [vmem:[#allocation3 + $0x28] sm:$0xff] }
 0x810   : > { %v1995_v38 = vpop.f32.mrb[11].mxu1 }
 0x852   : > { %v1305_v45 = vpop.f32.mrb[12].mxu1 }
 0x853   : > { %v1306_v51 = vadd.f32 %v2731_v23, %v1305_v45  ;;  %v2014_v32 = vpop.f32.mrb[13].mxu1 }
 0x854   : > { %v1308_v54 = vpop.f32.mrb[14].mxu1 }
 0x855   : > { %v1309_v62 = vadd.f32 %v2731_v23, %v1308_v54  ;;  %1315 = vmax.xlane.f32.xlu1 %v1306_v51  ;;  %v2015_v63 = vpop.f32.mrb[15].mxu1 }
 0x856   : > { %v1344_v63 = vld [vmem:[#allocation3 + $0x30] sm:$0xff] }
 0x857   : > { %1317 = vmax.xlane.f32.xlu0 %v1309_v62 }
 0x866   : > { %1359 = vrot.lane.b32.xlu1 %v3003_v16, %s2401_s19 }
 0x86d   : > { %1357 = vrot.lane.b32.xlu0 %v2999_v13, %s2401_s19 }
 0x8e2   : > { %v1316_v2 = vpop.xlane.xlu1 %1315 }
 0x8e3   : > { %v3078_v7 = vmax.f32 %v3073_v1, %v1316_v2 }
 0x8e4   : > { %v1318_v10 = vpop.xlane.xlu0 %1317 }
 0x8e5   : > { %v1321_v23 = vsub.f32 %v3073_v1, %v3078_v7  ;;  %1441 = vst.msk [vmem:[#allocation2 + $0x30] sm:$0xff] %vm301_vm2, %v3078_v7  ;;  %v3085_v56 = vmax.f32 %v3075_v5, %v1318_v10  ;;  %1329 = vperm.xlu1 %2126, %v3078_v7   ;;  %v1345_v1 = vld [vmem:[#allocation3 + $0x38] sm:$0xff]  ;;  %v498_v7 = vld [vmem:[#allocation3] sm:$0xff] }
 0x8e6   : > { %v1360_v34 = vpop.permute.xlu1 %1359 }
 0x8e7   : > { %v1322_v13 = vsub.f32 %v3075_v5, %v3085_v56  ;;  %1442 = vst.msk [vmem:[#allocation2 + $0x38] sm:$0xff] %vm301_vm2, %v3085_v56  ;;  %1334 = vperm.xlu0 %2127, %v3085_v56   ;;  %v1323_v39 = vmul.f32 1.442695, %v1321_v23 }
 0x8e8   : > { %v1358_v16 = vpop.permute.xlu0 %1357 }
 0x8e9   : > { %1361 = vrot.lane.b32.xlu1 %v3008_v57, %s2401_s19  ;;  %2017 = vmatpush3.bf16.msra.mxu0 %v1358_v16  ;;  %v1325_v43 = vmul.f32 1.442695, %v1322_v13  ;;  %v499_v13 = vld [vmem:[#allocation3 + $0x8] sm:$0xff] }
 0x8ea   : > { %2018 = vmatprep.subr.bf16.mxu0 %v2391_v0 }
 0x8eb   : > { %1363 = vrot.lane.b32.xlu0 %v3012_v61, %s2401_s19 }
 0x8ed   : > { %1365 = vrot.lane.b32.xlu1 %v3017_v60, %s2401_s19  ;;  %2019 = vmatpush3.bf16.msra.mxu0 %v1360_v34 }
 0x8ee   : > { %2020 = vmatprep.subr.bf16.mxu0 %v2391_v0 }
 0x8ef   : > { %1367 = vrot.lane.b32.xlu0 %v3023_v19, %s2401_s19 }
 0x8f1   : > { %1369 = vrot.lane.b32.xlu1 %v3027_v20, %s2401_s19 }
 0x8f3   : > { %1371 = vrot.lane.b32.xlu0 %v3031_v25, %s2401_s19 }
 0x912   : > { %786 = vadd.xlane.f32.xlu0 %v2929_v14 }
 0x915   : > { %784 = vadd.xlane.f32.xlu1 %v2931_v15 }
 0x916   : > { %1066 = vadd.xlane.f32.xlu0 %v3040_v58 }
 0x919   : > { %1068 = vadd.xlane.f32.xlu1 %v3042_v59 }
 0x964   : > { %v1330_v57 = vpop.permute.xlu1 %1329 }
 0x965   : > { %v1337_v61 = vsub.f32 %v1306_v51, %v1330_v57 }
 0x966   : > { %v1335_v60 = vpop.permute.xlu0 %1334 }
 0x967   : > { %v1339_v12 = vmul.f32 1.442695, %v1337_v61  ;;  %v1338_v52 = vsub.f32 %v1309_v62, %v1335_v60 }
 0x968   : > { %v1362_v17 = vpop.permute.xlu1 %1361 }
 0x969   : > { %2172 = vpow2.f32 %v1339_v12  ;;  %v1341_v19 = vmul.f32 1.442695, %v1338_v52  ;;  %2021 = vmatpush3.bf16.msra.mxu0 %v1362_v17  ;;  %v578_v17 = vld [vmem:[#allocation4 + $0x8] sm:$0xff] }
 0x96a   : > { %2022 = vmatprep.subr.bf16.mxu0 %v2391_v0  ;;  %v1364_v20 = vpop.permute.xlu0 %1363 }
 0x96b   : > { %2174 = vpow2.f32 %v1341_v19 }
 0x96c   : > { %v1366_v14 = vpop.permute.xlu1 %1365  ;;  %2176 = vpow2.f32 %v480_v21  ;;  %v860_v21 = vld [vmem:[#allocation4 + $0x18] sm:$0xff] }
 0x96d   : > { %2023 = vmatpush3.bf16.msra.mxu0 %v1364_v20  ;;  %2178 = vpow2.f32 %v478_v27  ;;  %v577_v20 = vld [vmem:[#allocation4] sm:$0xff] }
 0x96e   : > { %2024 = vmatprep.subr.bf16.mxu0 %v2391_v0  ;;  %v1368_v15 = vpop.permute.xlu0 %1367 }
 0x970   : > { %v1370_v59 = vpop.permute.xlu1 %1369 }
 0x971   : > { %2025 = vmatpush3.bf16.msra.mxu0 %v1366_v14 }
 0x972   : > { %2026 = vmatprep.subr.bf16.mxu0 %v2391_v0  ;;  %v1372_v18 = vpop.permute.xlu0 %1371 }
 0x973   : > { %v2173_v25 = vpop.eup %2172 }
 0x974   : > { %1348 = vadd.xlane.f32.xlu0 %v2173_v25 }
 0x975   : > { %v2175_v58 = vpop.eup %2174  ;;  %2027 = vmatpush3.bf16.msra.mxu0 %v1368_v15 }
 0x976   : > { %1350 = vadd.xlane.f32.xlu1 %v2175_v58  ;;  %2028 = vmatprep.subr.bf16.mxu0 %v2391_v0  ;;  %v1356_v22 = vpack.c.bf16 %v2175_v58, %v2173_v25  ;;  %v2177_v41 = vpop.eup %2176  ;;  %v859_v25 = vld [vmem:[#allocation4 + $0x10] sm:$0xff] }
 0x977   : > { %v2179_v44 = vpop.eup %2178  ;;  %v501_v60 = vmul.f32 %v2177_v41, %v499_v13 }
 0x978   : > { %502 = vadd.xlane.f32.xlu0 %v2820_v4  ;;  %v759_v4 = vmul.f32 1.442695, %v757_v53  ;;  %v500_v34 = vmul.f32 %v2179_v44, %v498_v7 }
 0x979   : > { %2029 = vmatpush3.bf16.msra.mxu0 %v1370_v59 }
 0x97a   : > { %504 = vadd.xlane.f32.xlu1 %v2818_v3  ;;  %2030 = vmatprep.subr.bf16.mxu0 %v2391_v0  ;;  %v761_v0 = vmul.f32 1.442695, %v758_v47  ;;  %2180 = vpow2.f32 %v759_v4  ;;  %v781_v47 = vld [vmem:[#allocation3 + $0x18] sm:$0xff] }
 0x97c   : > { %2182 = vpow2.f32 %v761_v0 }
 0x97d   : > { %2031 = vmatpush3.bf16.msra.mxu0 %v1372_v18  ;;  %2184 = vpow2.f32 %v1041_v40 }
 0x97e   : > { %2186 = vpow2.f32 %v1043_v37  ;;  %v1141_v37 = vld [vmem:[#allocation4 + $0x20] sm:$0xff] }
 0x97f   : > { %2188 = vpow2.f32 %v1323_v39 }
 0x980   : > { %2033 = vmatmul.mubr.bf16.vlgmr.msra.gmra.mrb[12].mxu0 %v1356_v22  ;;  %2190 = vpow2.f32 %v1325_v43 }
 0x984   : > { %v2181_v3 = vpop.eup %2180 }
 0x985   : > { %v782_v49 = vmul.f32 %v2181_v3, %v780_v8 }
 0x986   : > { %v2183_v42 = vpop.eup %2182 }
 0x987   : > { %v2185_v46 = vpop.eup %2184  ;;  %v783_v6 = vmul.f32 %v2183_v42, %v781_v47 }
 0x988   : > { %v2187_v50 = vpop.eup %2186  ;;  %v1064_v29 = vmul.f32 %v2185_v46, %v1062_v11 }
 0x989   : > { %v2189_v53 = vpop.eup %2188  ;;  %v1065_v32 = vmul.f32 %v2187_v50, %v1063_v35 }
 0x98a   : > { %v2191_v31 = vpop.eup %2190  ;;  %v1346_v2 = vmul.f32 %v2189_v53, %v1344_v63 }
 0x98b   : > { %586 = vperm.xlu1 %2126, %v2177_v41   ;;  %v1347_v23 = vmul.f32 %v2191_v31, %v1345_v1 }
 0x98e   : > { %581 = vperm.xlu0 %2127, %v2179_v44   ;;  %v1142_v44 = vld [vmem:[#allocation4 + $0x28] sm:$0xff] }
 0x98f   : > { %863 = vperm.xlu1 %2126, %v2181_v3  }
 0x992   : > { %868 = vperm.xlu0 %2127, %v2183_v42  }
 0x993   : > { %1145 = vperm.xlu1 %2126, %v2185_v46  }
 0x996   : > { %1150 = vperm.xlu0 %2127, %v2187_v50  }
 0x997   : > { %1427 = vperm.xlu1 %2126, %v2189_v53  }
 0x99a   : > { %1432 = vperm.xlu0 %2127, %v2191_v31  }
 0x99f   : > { %v787_v9 = vpop.xlane.xlu0 %786 }
 0x9a0   : > { %v789_v55 = vadd.f32 %v787_v9, %v783_v6 }
 0x9a2   : > { %791 = vst.msk [vmem:[#allocation3 + $0x18] sm:$0xff] %vm301_vm2, %v789_v55  ;;  %v785_v28 = vpop.xlane.xlu1 %784 }
 0x9a3   : > { %v788_v38 = vadd.f32 %v785_v28, %v782_v49  ;;  %v1067_v45 = vpop.xlane.xlu0 %1066 }
 0x9a4   : > { %v1070_v51 = vadd.f32 %v1067_v45, %v1064_v29  ;;  %v1423_v29 = vld [vmem:[#allocation4 + $0x30] sm:$0xff] }
 0x9a5   : > { %790 = vst.msk [vmem:[#allocation3 + $0x10] sm:$0xff] %vm301_vm2, %v788_v38  ;;  %v1424_v38 = vld [vmem:[#allocation4 + $0x38] sm:$0xff] }
 0x9a6   : > { %1072 = vst.msk [vmem:[#allocation3 + $0x20] sm:$0xff] %vm301_vm2, %v1070_v51  ;;  %v1069_v54 = vpop.xlane.xlu1 %1068 }
 0x9a7   : > { %v1071_v62 = vadd.f32 %v1069_v54, %v1065_v32 }
 0x9a9   : > { %1073 = vst.msk [vmem:[#allocation3 + $0x28] sm:$0xff] %vm301_vm2, %v1071_v62  ;;  %v1476_v3 = vld [vmem:[#allocation3 + $0x18] sm:$0xff] }
 0x9ac   : > { %v1475_v0 = vld [vmem:[#allocation3 + $0x10] sm:$0xff] }
 0x9ad   : > { %v1508_v46 = vld [vmem:[#allocation3 + $0x20] sm:$0xff] }
 0xa01   : > { %v1349_v5 = vpop.xlane.xlu0 %1348 }
 0xa02   : > { %v1352_v10 = vadd.f32 %v1349_v5, %v1346_v2 }
 0xa03   : > { %v1351_v56 = vpop.xlane.xlu1 %1350 }
 0xa04   : > { %1354 = vst.msk [vmem:[#allocation3 + $0x30] sm:$0xff] %vm301_vm2, %v1352_v10  ;;  %v1353_v16 = vadd.f32 %v1351_v56, %v1347_v23 }
 0xa05   : > { %v503_v57 = vpop.xlane.xlu0 %502 }
 0xa06   : > { %1355 = vst.msk [vmem:[#allocation3 + $0x38] sm:$0xff] %vm301_vm2, %v1353_v16  ;;  %v506_v61 = vadd.f32 %v503_v57, %v500_v34 }
 0xa07   : > { %v505_v12 = vpop.xlane.xlu1 %504 }
 0xa08   : > { %509 = vst.msk [vmem:[#allocation3] sm:$0xff] %vm301_vm2, %v506_v61  ;;  %v507_v52 = vadd.f32 %v505_v12, %v501_v60 }
 0xa0a   : > { %510 = vst.msk [vmem:[#allocation3 + $0x8] sm:$0xff] %vm301_vm2, %v507_v52 }
 0xa0b   : > { %v587_v19 = vpop.permute.xlu1 %586  ;;  %v1541_v6 = vld [vmem:[#allocation3 + $0x30] sm:$0xff] }
 0xa0c   : > { %v590_v14 = vmul.f32 %v587_v19, %v578_v17 }
 0xa0d   : > { %v582_v15 = vpop.permute.xlu0 %581 }
 0xa0e   : > { %v592_v58 = vadd.f32 %v590_v14, %v2848_v26  ;;  %v589_v59 = vmul.f32 %v582_v15, %v577_v20 }
 0xa0f   : > { %v864_v18 = vpop.permute.xlu1 %863  ;;  %v1446_v22 = vld [vmem:[#allocation3] sm:$0xff] }
 0xa10   : > { %594 = vst.msk [vmem:[#allocation4 + $0x8] sm:$0xff] %vm318_vm0, %v592_v58  ;;  %v591_v27 = vadd.f32 %v589_v59, %v2846_v24  ;;  %v871_v4 = vmul.f32 %v864_v18, %v859_v25  ;;  %2192 = vrcp.f32 %v1446_v22 }
 0xa11   : > { %v869_v40 = vpop.permute.xlu0 %868  ;;  %v1447_v39 = vld [vmem:[#allocation3 + $0x8] sm:$0xff] }
 0xa12   : > { %593 = vst.msk [vmem:[#allocation4] sm:$0xff] %vm318_vm0, %v591_v27  ;;  %v873_v41 = vadd.f32 %v871_v4, %v2957_v48  ;;  %v872_v43 = vmul.f32 %v869_v40, %v860_v21  ;;  %2194 = vrcp.f32 %v1447_v39  ;;  %v1509_v48 = vld [vmem:[#allocation3 + $0x28] sm:$0xff] }
 0xa13   : > { %v1146_v26 = vpop.permute.xlu1 %1145  ;;  %2196 = vrcp.f32 %v1475_v0 }
 0xa14   : > { %875 = vst.msk [vmem:[#allocation4 + $0x10] sm:$0xff] %vm318_vm0, %v873_v41  ;;  %v874_v24 = vadd.f32 %v872_v43, %v2959_v33  ;;  %v1153_v42 = vmul.f32 %v1146_v26, %v1141_v37  ;;  %2198 = vrcp.f32 %v1476_v3  ;;  %v1542_v33 = vld [vmem:[#allocation3 + $0x38] sm:$0xff] }
 0xa15   : > { %v1151_v50 = vpop.permute.xlu0 %1150  ;;  %2200 = vrcp.f32 %v1508_v46 }
 0xa16   : > { %876 = vst.msk [vmem:[#allocation4 + $0x18] sm:$0xff] %vm318_vm0, %v874_v24  ;;  %v1155_v53 = vadd.f32 %v1153_v42, %v3065_v30  ;;  %v1154_v31 = vmul.f32 %v1151_v50, %v1142_v44  ;;  %2202 = vrcp.f32 %v1509_v48 }
 0xa17   : > { %2204 = vrcp.f32 %v1541_v6  ;;  %v1428_v35 = vpop.permute.xlu1 %1427  ;;  %v1451_v56 = vld [vmem:[#allocation4 + $0x8] sm:$0xff] }
 0xa18   : > { %1157 = vst.msk [vmem:[#allocation4 + $0x20] sm:$0xff] %vm318_vm0, %v1155_v53  ;;  %v1156_v47 = vadd.f32 %v1154_v31, %v3067_v36  ;;  %2206 = vrcp.f32 %v1542_v33  ;;  %v1435_v51 = vmul.f32 %v1428_v35, %v1423_v29 }
 0xa19   : > { %v1433_v45 = vpop.permute.xlu0 %1432  ;;  %v1450_v7 = vld [vmem:[#allocation4] sm:$0xff] }
 0xa1a   : > { %v2193_v8 = vpop.eup %2192  ;;  %1158 = vst.msk [vmem:[#allocation4 + $0x28] sm:$0xff] %vm318_vm0, %v1156_v47  ;;  %v1436_v54 = vmul.f32 %v1433_v45, %v1424_v38 }
 0xa1b   : > { %1454 = vperm.xlu1 %2126, %v2193_v8   ;;  %v1479_v57 = vld [vmem:[#allocation4 + $0x10] sm:$0xff] }
 0xa1c   : > { %v2195_v9 = vpop.eup %2194 }
 0xa1d   : > { %1459 = vperm.xlu0 %2127, %v2195_v9   ;;  %v2197_v11 = vpop.eup %2196  ;;  %v1480_v52 = vld [vmem:[#allocation4 + $0x18] sm:$0xff] }
 0xa1e   : > { %v2199_v30 = vpop.eup %2198 }
 0xa1f   : > { %1483 = vperm.xlu1 %2126, %v2197_v11   ;;  %v2201_v55 = vpop.eup %2200  ;;  %v1512_v14 = vld [vmem:[#allocation4 + $0x20] sm:$0xff] }
 0xa20   : > { %v2203_v49 = vpop.eup %2202 }
 0xa21   : > { %1488 = vperm.xlu0 %2127, %v2199_v30   ;;  %v2205_v36 = vpop.eup %2204  ;;  %v1513_v59 = vld [vmem:[#allocation4 + $0x28] sm:$0xff] }
 0xa22   : > { %v2207_v28 = vpop.eup %2206 }
 0xa23   : > { %1516 = vperm.xlu1 %2126, %v2201_v55  }
 0xa25   : > { %1521 = vperm.xlu0 %2127, %v2203_v49  }
 0xa27   : > { %1549 = vperm.xlu1 %2126, %v2205_v36  }
 0xa29   : > { %1554 = vperm.xlu0 %2127, %v2207_v28  }
 0xa53   : > { %v1415_v32 = vpop.f32.mrb[12].mxu0 }
 0xa54   : > { %v1437_v62 = vadd.f32 %v1435_v51, %v1415_v32  ;;  %v2034_v63 = vpop.f32.mrb[13].mxu0 }
 0xa55   : > { %v1418_v1 = vpop.f32.mrb[14].mxu0 }
 0xa56   : > { %1439 = vst.msk [vmem:[#allocation4 + $0x30] sm:$0xff] %vm318_vm0, %v1437_v62  ;;  %v1438_v2 = vadd.f32 %v1436_v54, %v1418_v1  ;;  %v2035_v5 = vpop.f32.mrb[15].mxu0 }
 0xa58   : > { %1440 = vst.msk [vmem:[#allocation4 + $0x38] sm:$0xff] %vm318_vm0, %v1438_v2 }
 0xa5d   : > { %v1545_v27 = vld [vmem:[#allocation4 + $0x30] sm:$0xff] }
 0xa5f   : > { %v1546_v37 = vld [vmem:[#allocation4 + $0x38] sm:$0xff] }
 0xa9a   : > { %v1455_v10 = vpop.permute.xlu1 %1454 }
 0xa9b   : > { %v1462_v23 = vmul.f32 %v1455_v10, %v1450_v7 }
 0xa9c   : > { %v1460_v13 = vpop.permute.xlu0 %1459 }
 0xa9d   : > { %v1795_v16 = vpack.c.bf16 %v1462_v23, %v1462_v23  ;;  %v1463_v34 = vmul.f32 %v1460_v13, %v1451_v56 }
 0xa9e   : > { %v1484_v61 = vpop.permute.xlu1 %1483 }
 0xa9f   : > { %1473 = vst.msk [vmem:[%s3160_s28] sm:$0xf] %vm1472_vm3, %v1795_v16  ;;  %v1796_v60 = vpack.c.bf16 %v1463_v34, %v1463_v34  ;;  %v1491_v12 = vmul.f32 %v1484_v61, %v1479_v57 }
 0xaa0   : > { %v1489_v17 = vpop.permute.xlu0 %1488 }
 0xaa1   : > { %1474 = vst.msk [vmem:[%s3160_s28 + $0x4] sm:$0xf] %vm1472_vm3, %v1796_v60  ;;  %v1797_v19 = vpack.c.bf16 %v1491_v12, %v1491_v12  ;;  %v1492_v20 = vmul.f32 %v1489_v17, %v1480_v52 }
 0xaa2   : > { %v1517_v15 = vpop.permute.xlu1 %1516 }
 0xaa3   : > { %v1798_v25 = vpack.c.bf16 %v1492_v20, %v1492_v20  ;;  %v1524_v58 = vmul.f32 %v1517_v15, %v1512_v14  ;;  %1499 = vrot.lane.b32.xlu1 %v1797_v19, %s2402_s7 }
 0xaa4   : > { %v1522_v18 = vpop.permute.xlu0 %1521 }
 0xaa5   : > { %v1799_v21 = vpack.c.bf16 %v1524_v58, %v1524_v58  ;;  %v1525_v22 = vmul.f32 %v1522_v18, %v1513_v59  ;;  %1501 = vrot.lane.b32.xlu0 %v1798_v25, %s2402_s7 }
 0xaa6   : > { %v1550_v4 = vpop.permute.xlu1 %1549 }
 0xaa7   : > { %v1800_v0 = vpack.c.bf16 %v1525_v22, %v1525_v22  ;;  %v1557_v40 = vmul.f32 %v1550_v4, %v1545_v27  ;;  %1532 = vrot.lane.b32.xlu1 %v1799_v21, %s2403_s6 }
 0xaa8   : > { %v1555_v39 = vpop.permute.xlu0 %1554 }
 0xaa9   : > { %v1801_v41 = vpack.c.bf16 %v1557_v40, %v1557_v40  ;;  %v1558_v43 = vmul.f32 %v1555_v39, %v1546_v37  ;;  %1534 = vrot.lane.b32.xlu0 %v1800_v0, %s2403_s6 }
 0xaab   : > { %v1802_v26 = vpack.c.bf16 %v1558_v43, %v1558_v43  ;;  %1565 = vrot.lane.b32.xlu1 %v1801_v41, %s2404_s0 }
 0xaad   : > { %1567 = vrot.lane.b32.xlu0 %v1802_v26, %s2404_s0 }
 0xb15   : > { %v1500_v44 = vpop.permute.xlu1 %1499 }
 0xb16   : > { %1506 = vst.msk [vmem:[%s3160_s28] sm:$0xf] %vm1505_vm4, %v1500_v44 }
 0xb17   : > { %v1502_v3 = vpop.permute.xlu0 %1501 }
 0xb18   : > { %1507 = vst.msk [vmem:[%s3160_s28 + $0x4] sm:$0xf] %vm1505_vm4, %v1502_v3 }
 0xb19   : > { %v1533_v24 = vpop.permute.xlu1 %1532 }
 0xb1a   : > { %1539 = vst.msk [vmem:[%s3160_s28] sm:$0xf] %vm1538_vm5, %v1533_v24 }
 0xb1b   : > { %v1535_v42 = vpop.permute.xlu0 %1534 }
 0xb1c   : > { %1540 = vst.msk [vmem:[%s3160_s28 + $0x4] sm:$0xf] %vm1538_vm5, %v1535_v42 }
 0xb1d   : > { %v1566_v46 = vpop.permute.xlu1 %1565 }
 0xb1e   : > { %1572 = vst.msk [vmem:[%s3160_s28] sm:$0xf] %vm1571_vm6, %v1566_v46 }
 0xb1f   : > { %v1568_v50 = vpop.permute.xlu0 %1567 }
 0xb20   : > { %1573 = vst.msk [vmem:[%s3160_s28 + $0x4] sm:$0xf] %vm1571_vm6, %v1568_v50 }
 0xb21   : > { %2311 = shalt.err (!%p2308_p13)
}
 0xb22   : > { %s2312_s23 = scalar_lea.hbm %s3173_s11, 128  ;;  %s2316_s9 = scalar_lea.hbm %s3229_s3, 256 }
 0xb23   : > { %p2313_p11 = scmp.ne.s32.totalorder %s3173_s11, %s2312_s23  ;;  %p2317_p5 = scmp.lt.u32.totalorder %s3173_s11, %s3229_s3 }
 0xb24   : > { %p2318_p1 = scmp.lt.u32.totalorder %s2316_s9, %s2312_s23  ;;  %p2320_p2 = scmp.lt.u32.totalorder %s2312_s23, %s3173_s11 }
 0xb25   : > { %p2314_p7 = pnand %p2313_p11, %p3253_p6 }
 0xb26   : > { %p2319_p0 = por %p2318_p1, %p2317_p5 }
 0xb27   : > { %p2315_p3 = pneg %p2314_p7 }
 0xb28   : > { %p2321_p8 = por %p2320_p2, %p2319_p0 }
 0xb2a   : > { %p2322_p9 = pnand %p2321_p8, %p2315_p3 }
 0xb2c   : > { %2325 = shalt.err (!%p2322_p9)
}
 0xb2d   : > { %s2406_s28 = smov 64   ;;  %s2407_s7 = smov 4  }
 0xb2e   : > { %2042 = dma.vmem_to_hbm [thread:$0]  (%p3253_p6), %s3175_s8, 128, %s3173_s11, %s1575_s4, %s2406_s28, %s2406_s28, %s2407_s7  }
 0xb2f PF: > { %s1605_s6 = sand.u32 1, %s2364_s12   ;;  %p3254_p12 = scmp.ne.s32.totalorder %s3242_s27, 0 }
 0xb30   : > { %p3255_p4 = scmp.ge.s32.totalorder %s2384_s17, 2  ;;  %s1606_s0 = scalar_lea.sflag [#allocation7], %s1605_s6 }
 0xb32   : > { %p2055_p10 = pnand %p3255_p4, %p3254_p12 }
 0xb34   : > { %2359 = dma.done.wait (!%p2055_p10), %s1606_s0, 128  }
 0xb35   : > { %2361 = vsyncadd (!%p2055_p10), %s1606_s0, 4294967168  ;;  %s22_s17 = sadd.s32 1, %s2384_s17   ;;  %s3256_s25 = sld [smem:[#allocation15_spill]] }
 0xb36   : > { %p19_p13 = scmp.ge.s32.totalorder %s22_s17, 4   ;;  %s3257_s12 = smov %s2368_s13 }
 0xb37   : > { %s3258_s13 = smov %s2372_s14  ;;  %s3259_s14 = smov %s2488_s26 }
 0xb38   : > { %s3260_s15 = smov %s2380_s16  ;;  %21 = sbr.rel (!%p19_p13) target bundleno = 11 (0xb), region = 118 }
 0xb3b   : > { %s3261_s16 = smov %s3256_s25 }
 0xb3f   :  { %1611 = vsyncpa [#allocation6], 1 }
 0xb40   :  { %1613 = vsyncpa [#allocation6 + $0x1], 1 }
 0xb41   :  { %1614 = vsyncpa [#allocation9], 1 }
 0xb42   :  { %1616 = vsyncpa [#allocation9 + $0x1], 1 }
 0xb43   :  { %1617 = vsyncpa [#allocation7], 1 }
 0xb44   :  { %1619 = vsyncpa [#allocation7 + $0x1], 1 }

// kernel: transformer_wrapper_forward.39
= control target key start
LH: loop header
LB: loop body
LE: loop exit
PB: predicated region body
PF: predicated region fallthrough
CT: control target
= control target key end

     0   :  { %11 = vsyncpa [#allocation3], 0  ;;  %s806_s0 = inlined_call_operand.hbm [shape: bf16[32,32], index: 0, kind: input, shape index: {}]   ;;  %s807_s1 = inlined_call_operand.hbm [shape: f32[1,32], index: 1, kind: input, shape index: {}]   ;;  %s808_s2 = inlined_call_operand.hbm [shape: f32[1,32], index: 2, kind: input, shape index: {}]   ;;  %s809_s3 = inlined_call_operand.hbm [shape: f32[1,32], index: 3, kind: input, shape index: {}]   ;;  %s810_s4 = inlined_call_operand.hbm [shape: bf16[32,128], index: 4, kind: input, shape index: {}]   ;;  %s811_s5 = inlined_call_operand.hbm [shape: f32[1,128], index: 5, kind: input, shape index: {}]   ;;  %s812_s6 = inlined_call_operand.hbm [shape: f32[32,128], index: 6, kind: output, shape index: {}]  }
   0x1   :  { %12 = vsyncpa [#allocation6], 0 }
   0x2   :  { %13 = vsyncpa [#allocation9], 0 }
   0x3   :  { %14 = vsyncpa [#allocation12], 0 }
   0x4   :  { %15 = vsyncpa [#allocation4], 0  ;;  %s636_s21 = smov [#allocation5]   ;;  %s637_s23 = smov [#allocation8]  }
   0x5   :  { %s34_s22 = sshll.u32 %s636_s21, 4  ;;  %s54_s24 = sshll.u32 %s637_s23, 4  ;;  %s35_s22 = int_to_ptr.vmem [resolvable:$true] %s34_s22  ;;  %s55_s24 = int_to_ptr.vmem [resolvable:$true] %s54_s24 }
   0x6   :  { %s472_s27 = scalar_lea.hbm %s807_s1, 16 }
   0x7   :  { %p473_p0 = scmp.ne.s32.totalorder %s807_s1, %s472_s27  ;;  %p476_p1 = scmp.lt.u32.totalorder %s472_s27, %s807_s1 }
   0x9   :  { %p478_p2 = pnand %p476_p1, %p473_p0 }
   0xb   :  { %481 = shalt.err (!%p478_p2)
}
   0xc   :  { %s482_s8 = scalar_lea.vmem %s35_s22, 16  ;;  %s486_s9 = scalar_lea.vmem %s35_s22, 32 }
   0xd   :  { %p483_p3 = scmp.ne.s32.totalorder %s35_s22, %s482_s8  ;;  %p487_p4 = scmp.lt.s32.totalorder %s35_s22, %s35_s22 }
   0xe   :  { %p488_p5 = scmp.lt.s32.totalorder %s486_s9, %s482_s8 }
  0x10   :  { %p489_p6 = por %p488_p5, %p487_p4 }
  0x12   :  { %p490_p7 = pnand %p489_p6, %p483_p3 }
  0x14   :  { %493 = shalt.err (!%p490_p7)
}
  0x15   :  { %37 = dma.hbm_to_vmem [thread:$0]  %s807_s1, 16, %s35_s22, [#allocation6]  }
  0x16   :  { %s494_s14 = scalar_lea.hbm %s809_s3, 16 }
  0x17   :  { %p495_p8 = scmp.ne.s32.totalorder %s809_s3, %s494_s14  ;;  %p498_p9 = scmp.lt.u32.totalorder %s494_s14, %s809_s3 }
  0x19   :  { %p500_p10 = pnand %p498_p9, %p495_p8 }
  0x1b   :  { %503 = shalt.err (!%p500_p10)
}
  0x1c   :  { %s504_s19 = scalar_lea.vmem %s55_s24, 16  ;;  %s508_s20 = scalar_lea.vmem %s55_s24, 32 }
  0x1d   :  { %p505_p11 = scmp.ne.s32.totalorder %s55_s24, %s504_s19  ;;  %p509_p12 = scmp.lt.s32.totalorder %s55_s24, %s55_s24 }
  0x1e   :  { %p510_p13 = scmp.lt.s32.totalorder %s508_s20, %s504_s19 }
  0x20   :  { %p511_p0 = por %p510_p13, %p509_p12 }
  0x22   :  { %p512_p1 = pnand %p511_p0, %p505_p11 }
  0x24   :  { %515 = shalt.err (!%p512_p1)
}
  0x25   :  { %57 = dma.hbm_to_vmem [thread:$0]  %s809_s3, 16, %s55_s24, [#allocation9]  }
  0x26   :  { %s638_s22 = smov [#allocation2]   ;;  %s516_s27 = scalar_lea.hbm %s806_s0, 256 }
  0x27   :  { %s21_s23 = sshll.u32 %s638_s22, 4  ;;  %p517_p2 = scmp.ne.s32.totalorder %s806_s0, %s516_s27  ;;  %s22_s23 = int_to_ptr.vmem [resolvable:$true] %s21_s23 }
  0x28   :  { %p520_p3 = scmp.lt.u32.totalorder %s516_s27, %s806_s0 }
  0x2a   :  { %p522_p4 = pnand %p520_p3, %p517_p2 }
  0x2c   :  { %525 = shalt.err (!%p522_p4)
}
  0x2d   :  { %s526_s8 = scalar_lea.vmem %s22_s23, 256  ;;  %p531_p6 = scmp.lt.s32.totalorder %s22_s23, %s22_s23 }
  0x2e   :  { %p527_p5 = scmp.ne.s32.totalorder %s22_s23, %s526_s8  ;;  %p532_p7 = scmp.lt.s32.totalorder %s526_s8, %s526_s8 }
  0x30   :  { %p533_p8 = por %p532_p7, %p531_p6 }
  0x32   :  { %p534_p9 = pnand %p533_p8, %p527_p5 }
  0x34   :  { %537 = shalt.err (!%p534_p9)
}
  0x35   :  { %s639_s3 = smov 64   ;;  %s640_s24 = smov 4  }
  0x36   :  { %27 = dma.hbm_to_vmem [thread:$0]  %s806_s0, 256, %s22_s23, [#allocation3], %s639_s3, %s639_s3, %s640_s24  }
  0x37   :  { %s641_s11 = smov [#allocation7]   ;;  %s642_s13 = smov [#allocation10]  }
  0x38   :  { %s44_s12 = sshll.u32 %s641_s11, 4  ;;  %s63_s14 = sshll.u32 %s642_s13, 4  ;;  %s45_s12 = int_to_ptr.vmem [resolvable:$true] %s44_s12  ;;  %s64_s14 = int_to_ptr.vmem [resolvable:$true] %s63_s14 }
  0x39   :  { %s538_s17 = scalar_lea.hbm %s808_s2, 16 }
  0x3a   :  { %p539_p10 = scmp.ne.s32.totalorder %s808_s2, %s538_s17  ;;  %p542_p11 = scmp.lt.u32.totalorder %s538_s17, %s808_s2 }
  0x3c   :  { %p544_p12 = pnand %p542_p11, %p539_p10 }
  0x3e   :  { %547 = shalt.err (!%p544_p12)
}
  0x3f   :  { %s548_s0 = scalar_lea.vmem %s45_s12, 16  ;;  %s552_s21 = scalar_lea.vmem %s45_s12, 32 }
  0x40   :  { %p549_p13 = scmp.ne.s32.totalorder %s45_s12, %s548_s0  ;;  %p553_p0 = scmp.lt.s32.totalorder %s45_s12, %s45_s12 }
  0x41   :  { %p554_p1 = scmp.lt.s32.totalorder %s552_s21, %s548_s0 }
  0x43   :  { %p555_p2 = por %p554_p1, %p553_p0 }
  0x45   :  { %p556_p3 = pnand %p555_p2, %p549_p13 }
  0x47   :  { %559 = shalt.err (!%p556_p3)
}
  0x48   :  { %47 = dma.hbm_to_vmem [thread:$0]  %s808_s2, 16, %s45_s12, [#allocation6]  }
  0x49   :  { %s560_s27 = scalar_lea.hbm %s810_s4, 256 }
  0x4a   :  { %p561_p4 = scmp.ne.s32.totalorder %s810_s4, %s560_s27  ;;  %p564_p5 = scmp.lt.u32.totalorder %s560_s27, %s810_s4 }
  0x4c   :  { %p566_p6 = pnand %p564_p5, %p561_p4 }
  0x4e   :  { %569 = shalt.err (!%p566_p6)
}
  0x4f   :  { %s570_s8 = scalar_lea.vmem %s64_s14, 256  ;;  %p575_p8 = scmp.lt.s32.totalorder %s64_s14, %s64_s14 }
  0x50   :  { %p571_p7 = scmp.ne.s32.totalorder %s64_s14, %s570_s8  ;;  %p576_p9 = scmp.lt.s32.totalorder %s570_s8, %s570_s8 }
  0x52   :  { %p577_p10 = por %p576_p9, %p575_p8 }
  0x54   :  { %p578_p11 = pnand %p577_p10, %p571_p7 }
  0x56   :  { %581 = shalt.err (!%p578_p11)
}
  0x57   :  { %69 = dma.hbm_to_vmem [thread:$0]  %s810_s4, 256, %s64_s14, [#allocation9], %s639_s3, %s639_s3, %s640_s24  }
  0x58   :  { %s643_s10 = smov [#allocation11]   ;;  %s582_s15 = scalar_lea.hbm %s811_s5, 16 }
  0x59   :  { %s76_s11 = sshll.u32 %s643_s10, 4  ;;  %p583_p12 = scmp.ne.s32.totalorder %s811_s5, %s582_s15  ;;  %s77_s11 = int_to_ptr.vmem [resolvable:$true] %s76_s11 }
  0x5a   :  { %p586_p13 = scmp.lt.u32.totalorder %s582_s15, %s811_s5 }
  0x5c   :  { %p588_p0 = pnand %p586_p13, %p583_p12 }
  0x5e   :  { %591 = shalt.err (!%p588_p0)
}
  0x5f   :  { %s592_s20 = scalar_lea.vmem %s77_s11, 16  ;;  %s596_s4 = scalar_lea.vmem %s77_s11, 32 }
  0x60   :  { %p593_p1 = scmp.ne.s32.totalorder %s77_s11, %s592_s20  ;;  %p597_p2 = scmp.lt.s32.totalorder %s77_s11, %s77_s11 }
  0x61   :  { %p598_p3 = scmp.lt.s32.totalorder %s596_s4, %s592_s20 }
  0x63   :  { %p599_p4 = por %p598_p3, %p597_p2 }
  0x65   :  { %p600_p5 = pnand %p599_p4, %p593_p1 }
  0x67   :  { %603 = shalt.err (!%p600_p5)
}
  0x68   :  { %79 = dma.hbm_to_vmem [thread:$0]  %s811_s5, 16, %s77_s11, [#allocation12]  }
  0x69   :  { %626 = dma.done.wait [#allocation3], 256  }
  0x6a   :  { %627 = vsyncadd [#allocation3], 4294967040 }
  0x6b   :  { %628 = dma.done.wait [#allocation6], 32  }
  0x6c   :  { %629 = vsyncadd [#allocation6], 4294967264 }
  0x6d   :  { %630 = dma.done.wait [#allocation9], 272  }
  0x6e   :  { %631 = vsyncadd [#allocation9], 4294967024 }
  0x6f   :  { %632 = dma.done.wait [#allocation12], 16  }
  0x70   :  { %633 = vsyncadd [#allocation12], 4294967280  ;;  %v399_v0 = vld [vmem:[#allocation2] sm:$0xff]   ;;  %vm107_vm0 = vcmask 261120   ;;  %v406_v1 = vld [vmem:[#allocation2 + $0x8] sm:$0xff]   ;;  %s644_s5 = smov [#allocation13]  }
  0x71   :  { %v400_v2 = vunpack.c.l.bf16 %v399_v0  ;;  %v404_v3 = vunpack.c.l.bf16 %v406_v1  ;;  %v401_v4 = vunpack.c.h.bf16 %v399_v0  ;;  %v405_v5 = vunpack.c.h.bf16 %v406_v1  ;;  %v386_v43 = vld [vmem:[#allocation5] ss:$0 sm:$0xff]  ;;  %v387_v45 = vld [vmem:[#allocation7] ss:$0 sm:$0xff]  ;;  %s371_s14 = sshll.u32 %s644_s5, 4  ;;  %s372_s14 = int_to_ptr.vmem [resolvable:$true] %s371_s14 }
  0x72   :  { %s604_s1 = scalar_lea.vmem %s372_s14, 512  ;;  %p609_p7 = scmp.lt.s32.totalorder %s372_s14, %s372_s14 }
  0x73   :  { %v108_v6 = vsel %vm107_vm0, %v400_v2, 0.0  ;;  %v114_v7 = vsel %vm107_vm0, %v404_v3, 0.0  ;;  %v111_v8 = vsel %vm107_vm0, %v401_v4, 0.0  ;;  %v117_v9 = vsel %vm107_vm0, %v405_v5, 0.0  ;;  %p605_p6 = scmp.ne.s32.totalorder %s372_s14, %s604_s1  ;;  %p610_p8 = scmp.lt.s32.totalorder %s604_s1, %s604_s1 }
  0x74   :  { %109 = vadd.xlane.f32.xlu0 %v108_v6  ;;  %115 = vadd.xlane.f32.xlu1 %v114_v7 }
  0x75   :  { %p611_p9 = por %p610_p8, %p609_p7 }
  0x77   :  { %p612_p10 = pnand %p611_p9, %p605_p6 }
  0x78   :  { %112 = vadd.xlane.f32.xlu0 %v111_v8  ;;  %118 = vadd.xlane.f32.xlu1 %v117_v9 }
 0x101   :  { %v110_v10 = vpop.xlane.xlu0 %109  ;;  %v116_v11 = vpop.xlane.xlu1 %115 }
 0x102   :  { %v121_v12 = vmul.f32 0.03125, %v110_v10  ;;  %v123_v13 = vmul.f32 0.03125, %v116_v11 }
 0x104   :  { %v125_v14 = vsub.f32 %v400_v2, %v121_v12  ;;  %v127_v15 = vsub.f32 %v404_v3, %v123_v13 }
 0x105   :  { %v113_v16 = vpop.xlane.xlu0 %112  ;;  %v119_v17 = vpop.xlane.xlu1 %118 }
 0x106   :  { %v122_v18 = vmul.f32 0.03125, %v113_v16  ;;  %v124_v19 = vmul.f32 0.03125, %v119_v17  ;;  %v129_v20 = vmul.f32 %v125_v14, %v125_v14  ;;  %v131_v21 = vmul.f32 %v127_v15, %v127_v15 }
 0x108   :  { %v126_v22 = vsub.f32 %v401_v4, %v122_v18  ;;  %v128_v23 = vsub.f32 %v405_v5, %v124_v19  ;;  %v133_v24 = vsel %vm107_vm0, %v129_v20, 0.0  ;;  %v139_v25 = vsel %vm107_vm0, %v131_v21, 0.0  ;;  %v430_v4 = vld [vmem:[#allocation10] sm:$0xff]   ;;  %v431_v5 = vld [vmem:[#allocation10 + $0x8] sm:$0xff]  }
 0x109   :  { %134 = vadd.xlane.f32.xlu0 %v133_v24  ;;  %411 = vmatprep.subr.bf16.mxu0 %v430_v4 }
 0x10a   :  { %v130_v26 = vmul.f32 %v126_v22, %v126_v22  ;;  %v132_v27 = vmul.f32 %v128_v23, %v128_v23  ;;  %412 = vmatpush3.bf16.msra.mxu0 %v430_v4 }
 0x10b   :  { %413 = vmatprep.subr.bf16.mxu0 %v431_v5 }
 0x10c   :  { %v136_v28 = vsel %vm107_vm0, %v130_v26, 0.0  ;;  %v142_v29 = vsel %vm107_vm0, %v132_v27, 0.0 }
 0x10d   :  { %140 = vadd.xlane.f32.xlu0 %v139_v25  ;;  %137 = vadd.xlane.f32.xlu1 %v136_v28 }
 0x10e   :  { %414 = vmatpush3.bf16.msra.mxu0 %v431_v5 }
 0x111   :  { %143 = vadd.xlane.f32.xlu1 %v142_v29 }
 0x196   :  { %v135_v30 = vpop.xlane.xlu0 %134 }
 0x197   :  { %v145_v31 = vmul.f32 0.03125, %v135_v30 }
 0x199   :  { %v149_v32 = vadd.f32 1e-05, %v145_v31 }
 0x19a   :  { %v138_v33 = vpop.xlane.xlu1 %137  ;;  %v141_v34 = vpop.xlane.xlu0 %140 }
 0x19b   :  { %432 = vrsqrt.f32 %v149_v32  ;;  %v146_v35 = vmul.f32 0.03125, %v138_v33  ;;  %v147_v36 = vmul.f32 0.03125, %v141_v34 }
 0x19d   :  { %v150_v37 = vadd.f32 1e-05, %v146_v35  ;;  %v151_v38 = vadd.f32 1e-05, %v147_v36  ;;  %v388_v35 = vld [vmem:[#allocation8] ss:$0 sm:$0xff] }
 0x19e   :  { %v144_v39 = vpop.xlane.xlu1 %143 }
 0x19f   :  { %434 = vrsqrt.f32 %v150_v37  ;;  %v148_v40 = vmul.f32 0.03125, %v144_v39 }
 0x1a0   :  { %436 = vrsqrt.f32 %v151_v38 }
 0x1a1   :  { %v152_v41 = vadd.f32 1e-05, %v148_v40 }
 0x1a3   :  { %438 = vrsqrt.f32 %v152_v41 }
 0x1a5   :  { %v433_v42 = vpop.eup %432 }
 0x1a6   :  { %v157_v44 = vmul.f32 %v433_v42, %v125_v14 }
 0x1a8   :  { %v168_v46 = vmul.f32 %v386_v43, %v157_v44 }
 0x1a9   :  { %v435_v47 = vpop.eup %434 }
 0x1aa   :  { %v437_v48 = vpop.eup %436  ;;  %v768_v49 = vadd.f32 %v387_v45, %v168_v46  ;;  %v158_v50 = vmul.f32 %v435_v47, %v126_v22 }
 0x1ab   :  { %v159_v51 = vmul.f32 %v437_v48, %v127_v15 }
 0x1ac   :  { %v183_v52 = vmul.f32 %v768_v49, %v768_v49  ;;  %v169_v53 = vmul.f32 %v386_v43, %v158_v50 }
 0x1ad   :  { %v439_v54 = vpop.eup %438  ;;  %v170_v55 = vmul.f32 %v386_v43, %v159_v51 }
 0x1ae   :  { %v187_v56 = vsel %vm107_vm0, %v183_v52, 0.0  ;;  %v773_v57 = vadd.f32 %v387_v45, %v169_v53  ;;  %v160_v58 = vmul.f32 %v439_v54, %v128_v23 }
 0x1af   :  { %188 = vadd.xlane.f32.xlu0 %v187_v56  ;;  %v775_v59 = vadd.f32 %v387_v45, %v170_v55 }
 0x1b0   :  { %v184_v60 = vmul.f32 %v773_v57, %v773_v57  ;;  %v171_v61 = vmul.f32 %v386_v43, %v160_v58 }
 0x1b1   :  { %v185_v62 = vmul.f32 %v775_v59, %v775_v59 }
 0x1b2   :  { %v190_v63 = vsel %vm107_vm0, %v184_v60, 0.0  ;;  %v782_v0 = vadd.f32 %v387_v45, %v171_v61 }
 0x1b3   :  { %191 = vadd.xlane.f32.xlu1 %v190_v63  ;;  %v193_v1 = vsel %vm107_vm0, %v185_v62, 0.0 }
 0x1b4   :  { %194 = vadd.xlane.f32.xlu0 %v193_v1  ;;  %v186_v2 = vmul.f32 %v782_v0, %v782_v0 }
 0x1b6   :  { %v196_v3 = vsel %vm107_vm0, %v186_v2, 0.0 }
 0x1b7   :  { %197 = vadd.xlane.f32.xlu1 %v196_v3 }
 0x23c   :  { %v189_v6 = vpop.xlane.xlu0 %188 }
 0x23d   :  { %440 = vrsqrt.f32 %v189_v6  ;;  %vm201_vm1 = vcmp.eq.f32.partialorder %v189_v6, inf  ;;  %v204_v12 = vand.u32 2147483648, %v189_v6  ;;  %vm203_vm2 = vcmp.eq.f32.partialorder %v189_v6, 0.0 }
 0x240   :  { %v192_v7 = vpop.xlane.xlu1 %191 }
 0x241   :  { %442 = vrsqrt.f32 %v192_v7  ;;  %v195_v8 = vpop.xlane.xlu0 %194  ;;  %vm208_vm3 = vcmp.eq.f32.partialorder %v192_v7, inf  ;;  %vm210_vm4 = vcmp.eq.f32.partialorder %v192_v7, 0.0  ;;  %v211_v19 = vand.u32 2147483648, %v192_v7 }
 0x242   :  { %444 = vrsqrt.f32 %v195_v8  ;;  %vm215_vm5 = vcmp.eq.f32.partialorder %v195_v8, inf  ;;  %v218_v22 = vand.u32 2147483648, %v195_v8  ;;  %vm217_vm6 = vcmp.eq.f32.partialorder %v195_v8, 0.0 }
 0x244   :  { %v198_v9 = vpop.xlane.xlu1 %197 }
 0x245   :  { %446 = vrsqrt.f32 %v198_v9  ;;  %vm222_vm7 = vcmp.eq.f32.partialorder %v198_v9, inf  ;;  %v225_v30 = vand.u32 2147483648, %v198_v9  ;;  %vm224_vm8 = vcmp.eq.f32.partialorder %v198_v9, 0.0 }
 0x247   :  { %v441_v10 = vpop.eup %440 }
 0x248   :  { %v200_v11 = vmul.f32 %v441_v10, %v189_v6 }
 0x24a   :  { %v202_v13 = vsel %vm201_vm1, %v189_v6, %v200_v11 }
 0x24b   :  { %v443_v14 = vpop.eup %442  ;;  %v205_v15 = vsel %vm203_vm2, %v204_v12, %v202_v13  ;;  %v393_v13 = vld [vmem:[#allocation11] ss:$0 sm:$0xff] }
 0x24c   :  { %v445_v16 = vpop.eup %444  ;;  %v227_v17 = vmax.f32 %v205_v15, 1e-12  ;;  %v207_v18 = vmul.f32 %v443_v14, %v192_v7 }
 0x24d   :  { %v214_v20 = vmul.f32 %v445_v16, %v195_v8 }
 0x24e   :  { %448 = vrcp.f32 %v227_v17  ;;  %v209_v21 = vsel %vm208_vm3, %v192_v7, %v207_v18 }
 0x24f   :  { %v447_v23 = vpop.eup %446  ;;  %v212_v24 = vsel %vm210_vm4, %v211_v19, %v209_v21  ;;  %v216_v25 = vsel %vm215_vm5, %v195_v8, %v214_v20 }
 0x250   :  { %v228_v26 = vmax.f32 %v212_v24, 1e-12  ;;  %v219_v27 = vsel %vm217_vm6, %v218_v22, %v216_v25  ;;  %v221_v28 = vmul.f32 %v447_v23, %v198_v9 }
 0x251   :  { %v229_v29 = vmax.f32 %v219_v27, 1e-12 }
 0x252   :  { %450 = vrcp.f32 %v228_v26  ;;  %v223_v31 = vsel %vm222_vm7, %v198_v9, %v221_v28 }
 0x253   :  { %452 = vrcp.f32 %v229_v29  ;;  %v226_v32 = vsel %vm224_vm8, %v225_v30, %v223_v31 }
 0x254   :  { %v230_v33 = vmax.f32 %v226_v32, 1e-12 }
 0x256   :  { %454 = vrcp.f32 %v230_v33 }
 0x258   :  { %v449_v34 = vpop.eup %448 }
 0x259   :  { %v232_v36 = vmul.f32 %v449_v34, %v768_v49 }
 0x25b   :  { %v246_v37 = vmul.f32 %v388_v35, %v232_v36 }
 0x25c   :  { %v451_v38 = vpop.eup %450 }
 0x25d   :  { %v453_v39 = vpop.eup %452  ;;  %v234_v40 = vmul.f32 %v451_v38, %v773_v57  ;;  %v389_v41 = vmul.f32 -5.656854, %v246_v37 }
 0x25e   :  { %v236_v42 = vmul.f32 %v453_v39, %v775_v59 }
 0x25f   :  { %v247_v43 = vmul.f32 %v388_v35, %v234_v40  ;;  %v258_v44 = vmul.f32 1.442695, %v389_v41 }
 0x260   :  { %v455_v45 = vpop.eup %454  ;;  %v248_v46 = vmul.f32 %v388_v35, %v236_v42 }
 0x261   :  { %v390_v47 = vmul.f32 -5.656854, %v247_v43  ;;  %456 = vpow2.f32 %v258_v44  ;;  %v238_v48 = vmul.f32 %v455_v45, %v782_v0  ;;  %v250_v0 = vmul.f32 5.656854, %v246_v37 }
 0x262   :  { %v391_v50 = vmul.f32 -5.656854, %v248_v46  ;;  %v251_v1 = vmul.f32 5.656854, %v247_v43  ;;  %v252_v7 = vmul.f32 5.656854, %v248_v46 }
 0x263   :  { %v260_v51 = vmul.f32 1.442695, %v390_v47  ;;  %v249_v52 = vmul.f32 %v388_v35, %v238_v48 }
 0x264   :  { %v262_v49 = vmul.f32 1.442695, %v391_v50 }
 0x265   :  { %458 = vpow2.f32 %v260_v51  ;;  %v392_v53 = vmul.f32 -5.656854, %v249_v52  ;;  %v253_v8 = vmul.f32 5.656854, %v249_v52 }
 0x266   :  { %460 = vpow2.f32 %v262_v49 }
 0x267   :  { %v264_v54 = vmul.f32 1.442695, %v392_v53 }
 0x269   :  { %462 = vpow2.f32 %v264_v54 }
 0x26b   :  { %v457_v55 = vpop.eup %456 }
 0x26c   :  { %v266_v56 = vadd.f32 1.0, %v457_v55 }
 0x26e   :  { %464 = vrcp.f32 %v266_v56 }
 0x26f   :  { %v459_v57 = vpop.eup %458 }
 0x270   :  { %v461_v58 = vpop.eup %460  ;;  %v267_v59 = vadd.f32 1.0, %v459_v57 }
 0x271   :  { %v268_v60 = vadd.f32 1.0, %v461_v58 }
 0x272   :  { %466 = vrcp.f32 %v267_v59 }
 0x273   :  { %v463_v61 = vpop.eup %462  ;;  %468 = vrcp.f32 %v268_v60 }
 0x274   :  { %v269_v62 = vadd.f32 1.0, %v463_v61 }
 0x276   :  { %470 = vrcp.f32 %v269_v62 }
 0x278   :  { %v465_v63 = vpop.eup %464 }
 0x279   :  { %v278_v3 = vmul.f32 %v465_v63, %v250_v0 }
 0x27c   :  { %v467_v2 = vpop.eup %466 }
 0x27d   :  { %v279_v4 = vmul.f32 %v467_v2, %v251_v1  ;;  %v469_v5 = vpop.eup %468 }
 0x27e   :  { %v280_v10 = vmul.f32 %v469_v5, %v252_v7 }
 0x27f   :  { %v282_v6 = vpack.c.bf16 %v279_v4, %v278_v3 }
 0x280   :  { %v471_v9 = vpop.eup %470 }
 0x281   :  { %415 = vmatprep.mubr.msk.bf16.mxu0 %vm107_vm0, %v282_v6  ;;  %v281_v11 = vmul.f32 %v471_v9, %v253_v8 }
 0x283   :  { %v283_v12 = vpack.c.bf16 %v281_v11, %v280_v10 }
 0x285   :  { %416 = vmatmul.mubr.msk.bf16.vlgmr.msra.gmra.mrb[0].mxu0 %vm107_vm0, %v283_v12 }
 0x358   :  { %v417_v14 = vpop.f32.mrb[0].mxu0 }
 0x359   :  { %v356_v15 = vadd.f32 %v417_v14, %v393_v13  ;;  %v347_v16 = vpop.f32.mrb[1].mxu0 }
 0x35a   :  { %v348_v17 = vadd.f32 %v393_v13, %v347_v16  ;;  %v418_v18 = vpop.f32.mrb[2].mxu0 }
 0x35b   :  { %364 = vst [vmem:[#allocation13 + $0x10] sm:$0xff] %v356_v15  ;;  %v359_v19 = vadd.f32 %v418_v18, %v393_v13  ;;  %v350_v20 = vpop.f32.mrb[3].mxu0 }
 0x35c   :  { %362 = vst [vmem:[#allocation13] sm:$0xff] %v348_v17  ;;  %v351_v21 = vadd.f32 %v393_v13, %v350_v20 }
 0x35d   :  { %365 = vst [vmem:[#allocation13 + $0x18] sm:$0xff] %v359_v19 }
 0x35e   :  { %363 = vst [vmem:[#allocation13 + $0x8] sm:$0xff] %v351_v21 }
 0x35f   :  { %615 = shalt.err (!%p612_p10)
}
 0x360   :  { %s616_s22 = scalar_lea.hbm %s812_s6, 512 }
 0x361   :  { %p617_p11 = scmp.ne.s32.totalorder %s812_s6, %s616_s22  ;;  %p620_p12 = scmp.lt.u32.totalorder %s616_s22, %s812_s6 }
 0x363   :  { %p622_p13 = pnand %p620_p12, %p617_p11 }
 0x365   :  { %625 = shalt.err (!%p622_p13)
}
 0x366   :  { %s645_s28 = smov 128   ;;  %s646_s29 = smov 8  }
 0x367   :  { %377 = dma.vmem_to_hbm [thread:$0]  %s372_s14, 512, %s812_s6, [#allocation4], %s645_s28, %s645_s28, %s646_s29  }
 0x368   :  { %634 = dma.done.wait [#allocation4], 512  }
 0x369   :  { %635 = vsyncadd [#allocation4], 4294966784 }
 0x36a   :  { %381 = vsyncpa [#allocation3], 1 }
 0x36b   :  { %382 = vsyncpa [#allocation6], 1 }
 0x36c   :  { %383 = vsyncpa [#allocation9], 1 }
 0x36d   :  { %384 = vsyncpa [#allocation12], 1 }
 0x36e   :  { %385 = vsyncpa [#allocation4], 1 }

</bundles_post_ra>
